<compile_context>
chip_gen: v7x
topology: tpu7x:2x2x1
jax: 0.10.0
libtpu: 0.0.40
codegen_flags: <defaults>
</compile_context>

<pallas_src>
import functools
import math

import jax
import jax.numpy as jnp
from jax import lax
from jax.experimental import pallas as pl
from jax.experimental.pallas import tpu as pltpu

NEG_SLOPE = 0.01     # torch.nn.LeakyReLU default
LANES = 128
SUB_MAX = 8          # max sublanes per POE channel -> max batch tile = 1024


# ----------------------------- fused kernel ----------------------------------

def _fused_kernel(x_ref, *rest, n_layers, n_joint):
    # rest = (w0, b0, ..., w_{L-1}, b_{L-1}, twist_ref, tinit_ref, o_ref)
    w_refs = rest[0:2 * n_layers:2]          # bf16, resident in VMEM
    b_refs = rest[1:2 * n_layers:2]          # f32,  resident in VMEM
    twist_ref = rest[2 * n_layers]           # (6*n_joint,) f32 in SMEM
    tinit_ref = rest[2 * n_layers + 1]       # (16,)        f32 in SMEM
    o_ref = rest[2 * n_layers + 2]           # (16, sub, 128) in VMEM

    tb = x_ref.shape[0]
    sub = tb // LANES                        # static

    # ------------- q_layer: bf16 MXU matmuls, f32 bias + LeakyReLU -------------
    h = x_ref[...]                                            # (tb, inputdim) f32
    for k in range(n_layers - 1):
        y = jnp.dot(h.astype(jnp.bfloat16), w_refs[k][...],
                    preferred_element_type=jnp.float32)       # f32 accumulate
        y = y + b_refs[k][...]                                # (1, dout) f32
        h = jnp.maximum(y, NEG_SLOPE * y)                     # LeakyReLU
    # Last layer directly in (joint, batch) orientation:
    #   (J_pad, din) contracted with (tb, din) on din  ->  (J_pad, tb)
    q = lax.dot_general(w_refs[-1][...], h.astype(jnp.bfloat16),
                        (((1,), (1,)), ((), ())),
                        preferred_element_type=jnp.float32)
    q = q + b_refs[-1][...]                                   # (J_pad, 1) f32
    q = jnp.maximum(q, NEG_SLOPE * q)                         # LeakyReLU (last too)

    # ------------------- POE: full-vreg (sub, 128) channels --------------------
    one = jnp.ones((sub, LANES), jnp.float32)
    zero = jnp.zeros((sub, LANES), jnp.float32)

    def to_channel(row):
        # (1, tb) lane-row -> (sub, 128) full-vreg channel via aligned
        # lane-block slices + sublane concatenate (batch b -> (b//128, b%128)).
        parts = [row[:, s * LANES:(s + 1) * LANES] for s in range(sub)]
        return parts[0] if sub == 1 else jnp.concatenate(parts, axis=0)

    T_R = None   # running transform: affine (R 3x3, p 3x1), entries (sub, 128)
    T_p = None

    for jn in range(n_joint):
        w0 = twist_ref[6 * jn + 0]
        w1 = twist_ref[6 * jn + 1]
        w2 = twist_ref[6 * jn + 2]
        v0 = twist_ref[6 * jn + 3]
        v1 = twist_ref[6 * jn + 4]
        v2 = twist_ref[6 * jn + 5]

        qj = to_channel(q[jn:jn + 1, :])                      # (sub, 128)

        wq0 = w0 * qj; wq1 = w1 * qj; wq2 = w2 * qj
        vq0 = v0 * qj; vq1 = v1 * qj; vq2 = v2 * qj

        ww00 = wq0 * wq0; ww11 = wq1 * wq1; ww22 = wq2 * wq2
        ww01 = wq0 * wq1; ww02 = wq0 * wq2; ww12 = wq1 * wq2
        th2 = ww00 + ww11 + ww22
        th = jnp.sqrt(th2)

        small = th < 1e-2                     # raised threshold (f32 cancellation)
        ths = jnp.where(small, 1.0, th)
        sh = jnp.sin(0.5 * ths)
        ch = jnp.cos(0.5 * ths)
        s = 2.0 * sh * ch                     # sin(th)
        omc = 2.0 * sh * sh                   # 1 - cos(th), cancellation-free
        inv = 1.0 / ths
        inv2 = inv * inv
        A = jnp.where(small, 1.0 - th2 * (1.0 / 6.0), s * inv)
        Bc = jnp.where(small, 0.5 - th2 * (1.0 / 24.0), omc * inv2)
        Cc = jnp.where(small, (1.0 / 6.0) - th2 * (1.0 / 120.0),
                       (ths - s) * inv2 * inv)

        # Closed-form K^2 = wq wq^T - th2 I (diagonal terms)
        d0 = ww00 - th2; d1 = ww11 - th2; d2 = ww22 - th2

        # R = I + A*K + Bc*K^2
        R = [[1.0 + Bc * d0,        -A * wq2 + Bc * ww01,  A * wq1 + Bc * ww02],
             [A * wq2 + Bc * ww01,   1.0 + Bc * d1,        -A * wq0 + Bc * ww12],
             [-A * wq1 + Bc * ww02,  A * wq0 + Bc * ww12,   1.0 + Bc * d2]]
        # G = I + Bc*K + Cc*K^2 ;  p = G @ (v*q)
        G = [[1.0 + Cc * d0,         -Bc * wq2 + Cc * ww01,  Bc * wq1 + Cc * ww02],
             [Bc * wq2 + Cc * ww01,   1.0 + Cc * d1,         -Bc * wq0 + Cc * ww12],
             [-Bc * wq1 + Cc * ww02,  Bc * wq0 + Cc * ww12,   1.0 + Cc * d2]]
        p = [G[i][0] * vq0 + G[i][1] * vq1 + G[i][2] * vq2 for i in range(3)]

        if jn == 0:
            T_R, T_p = R, p                   # T starts at identity: T = E_0
        else:
            # affine compose: T <- T * E   (36 mults instead of 64)
            T_R_new = [[T_R[i][0] * R[0][j] + T_R[i][1] * R[1][j]
                        + T_R[i][2] * R[2][j] for j in range(3)] for i in range(3)]
            T_p_new = [T_R[i][0] * p[0] + T_R[i][1] * p[1] + T_R[i][2] * p[2]
                       + T_p[i] for i in range(3)]
            T_R, T_p = T_R_new, T_p_new

    # Right-multiply by pr2t(init_p, init_rpy), scalar entries from SMEM.
    Ri = [[tinit_ref[4 * i + j] for j in range(3)] for i in range(3)]
    pi = [tinit_ref[4 * i + 3] for i in range(3)]
    F_R = [[T_R[i][0] * Ri[0][j] + T_R[i][1] * Ri[1][j] + T_R[i][2] * Ri[2][j]
            for j in range(3)] for i in range(3)]
    F_p = [T_R[i][0] * pi[0] + T_R[i][1] * pi[1] + T_R[i][2] * pi[2] + T_p[i]
           for i in range(3)]

    channels = []
    for i in range(3):
        channels += [F_R[i][0], F_R[i][1], F_R[i][2], F_p[i]]
    channels += [zero, zero, zero, one]       # homogeneous bottom row
    for idx in range(16):
        o_ref[idx] = channels[idx]            # lane-dense full-tile stores

    # TODO(synk): Twistls (= inv_x(t2x(T)) @ twist) from POELayer is not computed
    # here because Model.forward only returns SE3, never Twistls.


# ------------------------------ glue / params --------------------------------

def pr2t(p, rpy):
    """p: (3,), rpy: (3,) -> 4x4 homogeneous transform (R = Rz Ry Rx)."""
    r, pt, y = rpy[0], rpy[1], rpy[2]
    cr, sr = jnp.cos(r), jnp.sin(r)
    cp, sp = jnp.cos(pt), jnp.sin(pt)
    cy, sy = jnp.cos(y), jnp.sin(y)
    R = jnp.stack([
        jnp.stack([cy * cp, cy * sp * sr - sy * cr, cy * sp * cr + sy * sr]),
        jnp.stack([sy * cp, sy * sp * sr + cy * cr, sy * sp * cr - cy * sr]),
        jnp.stack([-sp, cp * sr, cp * cr]),
    ])
    T = jnp.eye(4, dtype=jnp.float32)
    T = T.at[:3, :3].set(R)
    T = T.at[:3, 3].set(p)
    return T


def make_params(n_joint, inputdim, key, n_layers=7):
    """Weights pre-transposed to (din, dout) and cast to bf16 ONCE; the last
    layer is kept row-oriented (J_pad, din) with rows padded to a multiple of 8
    so the kernel can emit q directly as (J_pad, batch).  Biases stay f32."""
    layer_dims = []
    d = inputdim
    for _ in range(n_layers):
        layer_dims.append((d, 2 * d)); d = 2 * d
    for _ in range(n_layers - 3):
        layer_dims.append((d, d // 2)); d = d // 2
    layer_dims.append((d, n_joint))

    j_rows = max(8, ((n_joint + 7) // 8) * 8)   # last layer padded to 8 rows

    wts, bs = [], []
    for li, (din, dout) in enumerate(layer_dims):
        key, kw, kb = jax.random.split(key, 3)
        limit = math.sqrt(6.0 / (din + dout))          # xavier_uniform_
        W = jax.random.uniform(kw, (dout, din), jnp.float32, -limit, limit)
        bound = 1.0 / math.sqrt(din)                   # torch Linear bias default
        b = jax.random.uniform(kb, (dout,), jnp.float32, -bound, bound)
        if li == len(layer_dims) - 1:                  # last layer: row-oriented
            W = jnp.pad(W, ((0, j_rows - dout), (0, 0)))
            wts.append(W.astype(jnp.bfloat16))         # (j_rows, din) bf16
            bs.append(jnp.pad(b, (0, j_rows - dout)).reshape(j_rows, 1))  # f32
        else:
            wts.append(W.T.astype(jnp.bfloat16))       # (din, dout) bf16
            bs.append(b.reshape(1, dout))              # (1, dout) f32
    key, kt, kp, kr = jax.random.split(key, 4)
    twist = jax.random.uniform(kt, (n_joint, 6), jnp.float32, -1.0, 1.0)
    init_p = jax.random.uniform(kp, (1, 3), jnp.float32, -1.0, 1.0)
    init_rpy = jax.random.uniform(kr, (1, 3), jnp.float32, -1.0, 1.0)
    return dict(wts=tuple(wts), bs=tuple(bs), twist=twist,
                init_p=init_p, init_rpy=init_rpy)


def model_forward(motor_control, params):
    wts, bs = params["wts"], params["bs"]
    n_layers = len(wts)
    n_joint = params["twist"].shape[0]

    x = jnp.asarray(motor_control, jnp.float32)
    B, din = x.shape

    t_init = pr2t(params["init_p"][0], params["init_rpy"][0])   # (4, 4)
    tinit_flat = t_init.reshape(16)
    twist_flat = params["twist"].astype(jnp.float32).reshape(6 * n_joint)

    # Batch tile: up to 1024 rows (8 sublanes x 128 lanes per POE channel).
    sub = max(1, min(SUB_MAX, pl.cdiv(B, LANES)))
    tile_b = sub * LANES
    n_tiles = pl.cdiv(B, tile_b)
    B_pad = n_tiles * tile_b
    if B_pad != B:
        x = jnp.pad(x, ((0, B_pad - B), (0, 0)))

    in_specs = [pl.BlockSpec((tile_b, din), lambda i: (i, 0))]
    for wt, b2 in zip(wts, bs):
        # Grid-invariant (resident) weights/biases; the pipeline does not re-DMA
        # blocks whose index does not change across grid steps.
        in_specs.append(pl.BlockSpec(wt.shape, lambda i: (0, 0)))
        in_specs.append(pl.BlockSpec(b2.shape, lambda i: (0, 0)))
    in_specs.append(pl.BlockSpec(memory_space=pltpu.MemorySpace.SMEM))  # twist
    in_specs.append(pl.BlockSpec(memory_space=pltpu.MemorySpace.SMEM))  # t_init

    wb_interleaved = [a for pair in zip(wts, bs) for a in pair]

    out = pl.pallas_call(
        functools.partial(_fused_kernel, n_layers=n_layers, n_joint=n_joint),
        out_shape=jax.ShapeDtypeStruct((16, n_tiles * sub, LANES), jnp.float32),
        grid=(n_tiles,),
        in_specs=in_specs,
        out_specs=pl.BlockSpec((16, sub, LANES), lambda i: (0, i, 0)),
        compiler_params=pltpu.CompilerParams(
            dimension_semantics=("parallel",),       # megacore-shard batch tiles
            vmem_limit_bytes=32 * 1024 * 1024,       # ~16 MB real need + headroom
        ),
    )(x, *wb_interleaved, twist_flat, tinit_flat)

    # (16, n_tiles*sub, 128) -> (16, B_pad) -> (B, 4, 4)
    SE3 = out.reshape(16, B_pad).T[:B].reshape(B, 4, 4)
    return SE3


# ---------------------------------- main --------------------------------------

if __name__ == "__main__":
    n_joint, inputdim, batch = 4, 8, 2
    key = jax.random.PRNGKey(0)
    key, kparams, kx = jax.random.split(key, 3)
    params = make_params(n_joint, inputdim, kparams)
    motor_control = jax.random.normal(kx, (batch, inputdim), jnp.float32)

    fwd = jax.jit(model_forward)
    SE3 = fwd(motor_control, params)
    SE3 = jax.block_until_ready(SE3)

    assert SE3.shape == (batch, 4, 4) and SE3.dtype == jnp.float32
    # homogeneous bottom row must be [0, 0, 0, 1]
    bottom = SE3[:, 3, :]
    expected = jnp.tile(jnp.array([0.0, 0.0, 0.0, 1.0], jnp.float32), (batch, 1))
    assert bool(jnp.allclose(bottom, expected, atol=1e-5))
    print("KERNEL_OK")
</pallas_src>

<mosaic_0001>
module attributes {stable_mosaic.version = 11 : i64} {
  func.func @_fused_kernel(%arg0: i32, %arg1: memref<128x8xf32, #tpu.memory_space<vmem>>, %arg2: memref<8x16xbf16, #tpu.memory_space<vmem>>, %arg3: memref<1x16xf32, #tpu.memory_space<vmem>>, %arg4: memref<16x32xbf16, #tpu.memory_space<vmem>>, %arg5: memref<1x32xf32, #tpu.memory_space<vmem>>, %arg6: memref<32x64xbf16, #tpu.memory_space<vmem>>, %arg7: memref<1x64xf32, #tpu.memory_space<vmem>>, %arg8: memref<64x128xbf16, #tpu.memory_space<vmem>>, %arg9: memref<1x128xf32, #tpu.memory_space<vmem>>, %arg10: memref<128x256xbf16, #tpu.memory_space<vmem>>, %arg11: memref<1x256xf32, #tpu.memory_space<vmem>>, %arg12: memref<256x512xbf16, #tpu.memory_space<vmem>>, %arg13: memref<1x512xf32, #tpu.memory_space<vmem>>, %arg14: memref<512x1024xbf16, #tpu.memory_space<vmem>>, %arg15: memref<1x1024xf32, #tpu.memory_space<vmem>>, %arg16: memref<1024x512xbf16, #tpu.memory_space<vmem>>, %arg17: memref<1x512xf32, #tpu.memory_space<vmem>>, %arg18: memref<512x256xbf16, #tpu.memory_space<vmem>>, %arg19: memref<1x256xf32, #tpu.memory_space<vmem>>, %arg20: memref<256x128xbf16, #tpu.memory_space<vmem>>, %arg21: memref<1x128xf32, #tpu.memory_space<vmem>>, %arg22: memref<128x64xbf16, #tpu.memory_space<vmem>>, %arg23: memref<1x64xf32, #tpu.memory_space<vmem>>, %arg24: memref<8x64xbf16, #tpu.memory_space<vmem>>, %arg25: memref<8x1xf32, #tpu.memory_space<vmem>>, %arg26: memref<24xf32, #tpu.memory_space<smem>>, %arg27: memref<16xf32, #tpu.memory_space<smem>>, %arg28: memref<16x1x128xf32, #tpu.memory_space<vmem>>) attributes {dimension_semantics = [#tpu.dimension_semantics<parallel>], iteration_bounds = array<i64: 1>, scalar_prefetch = 0 : i64, scratch_operands = 0 : i64, tpu.core_type = #tpu.core_type<tc>, window_params = [{transform_indices = @transform_0, window_bounds = array<i64: 128, 8>}, {pipeline_mode = #tpu.pipeline_mode<synchronous>, transform_indices = @transform_1, window_bounds = array<i64: 8, 16>}, {pipeline_mode = #tpu.pipeline_mode<synchronous>, transform_indices = @transform_2, window_bounds = array<i64: 1, 16>}, {pipeline_mode = #tpu.pipeline_mode<synchronous>, transform_indices = @transform_3, window_bounds = array<i64: 16, 32>}, {pipeline_mode = #tpu.pipeline_mode<synchronous>, transform_indices = @transform_4, window_bounds = array<i64: 1, 32>}, {pipeline_mode = #tpu.pipeline_mode<synchronous>, transform_indices = @transform_5, window_bounds = array<i64: 32, 64>}, {pipeline_mode = #tpu.pipeline_mode<synchronous>, transform_indices = @transform_6, window_bounds = array<i64: 1, 64>}, {pipeline_mode = #tpu.pipeline_mode<synchronous>, transform_indices = @transform_7, window_bounds = array<i64: 64, 128>}, {pipeline_mode = #tpu.pipeline_mode<synchronous>, transform_indices = @transform_8, window_bounds = array<i64: 1, 128>}, {pipeline_mode = #tpu.pipeline_mode<synchronous>, transform_indices = @transform_9, window_bounds = array<i64: 128, 256>}, {pipeline_mode = #tpu.pipeline_mode<synchronous>, transform_indices = @transform_10, window_bounds = array<i64: 1, 256>}, {pipeline_mode = #tpu.pipeline_mode<synchronous>, transform_indices = @transform_11, window_bounds = array<i64: 256, 512>}, {pipeline_mode = #tpu.pipeline_mode<synchronous>, transform_indices = @transform_12, window_bounds = array<i64: 1, 512>}, {pipeline_mode = #tpu.pipeline_mode<synchronous>, transform_indices = @transform_13, window_bounds = array<i64: 512, 1024>}, {pipeline_mode = #tpu.pipeline_mode<synchronous>, transform_indices = @transform_14, window_bounds = array<i64: 1, 1024>}, {pipeline_mode = #tpu.pipeline_mode<synchronous>, transform_indices = @transform_15, window_bounds = array<i64: 1024, 512>}, {pipeline_mode = #tpu.pipeline_mode<synchronous>, transform_indices = @transform_16, window_bounds = array<i64: 1, 512>}, {pipeline_mode = #tpu.pipeline_mode<synchronous>, transform_indices = @transform_17, window_bounds = array<i64: 512, 256>}, {pipeline_mode = #tpu.pipeline_mode<synchronous>, transform_indices = @transform_18, window_bounds = array<i64: 1, 256>}, {pipeline_mode = #tpu.pipeline_mode<synchronous>, transform_indices = @transform_19, window_bounds = array<i64: 256, 128>}, {pipeline_mode = #tpu.pipeline_mode<synchronous>, transform_indices = @transform_20, window_bounds = array<i64: 1, 128>}, {pipeline_mode = #tpu.pipeline_mode<synchronous>, transform_indices = @transform_21, window_bounds = array<i64: 128, 64>}, {pipeline_mode = #tpu.pipeline_mode<synchronous>, transform_indices = @transform_22, window_bounds = array<i64: 1, 64>}, {pipeline_mode = #tpu.pipeline_mode<synchronous>, transform_indices = @transform_23, window_bounds = array<i64: 8, 64>}, {pipeline_mode = #tpu.pipeline_mode<synchronous>, transform_indices = @transform_24, window_bounds = array<i64: 8, 1>}, {transform_indices = @transform_25, window_bounds = array<i64: 24>}, {transform_indices = @transform_26, window_bounds = array<i64: 16>}, {transform_indices = @transform_27, window_bounds = array<i64: 16, 1, 128>}]} {
    %c0 = arith.constant 0 : index
    %c0_0 = arith.constant 0 : index
    %0 = vector.load %arg1[%c0, %c0_0] : memref<128x8xf32, #tpu.memory_space<vmem>>, vector<128x8xf32>
    %1 = arith.truncf %0 : vector<128x8xf32> to vector<128x8xbf16>
    %c0_1 = arith.constant 0 : index
    %c0_2 = arith.constant 0 : index
    %2 = vector.load %arg2[%c0_1, %c0_2] : memref<8x16xbf16, #tpu.memory_space<vmem>>, vector<8x16xbf16>
    %cst = arith.constant dense<0.000000e+00> : vector<128x16xf32>
    %3 = tpu.matmul %1, %2, %cst {dimension_numbers = #tpu.dot_dimension_numbers<[1], [0], [0], [1], [0, 0, 1, 1], [], []>} : vector<128x8xbf16>, vector<8x16xbf16>, vector<128x16xf32> -> vector<128x16xf32>
    %c0_3 = arith.constant 0 : index
    %c0_4 = arith.constant 0 : index
    %4 = vector.load %arg3[%c0_3, %c0_4] : memref<1x16xf32, #tpu.memory_space<vmem>>, vector<1x16xf32>
    %5 = vector.broadcast %4 : vector<1x16xf32> to vector<128x16xf32>
    %6 = arith.addf %3, %5 : vector<128x16xf32>
    %cst_5 = arith.constant 0.00999999977 : f32
    %7 = vector.broadcast %cst_5 : f32 to vector<128x16xf32>
    %8 = arith.mulf %7, %6 : vector<128x16xf32>
    %9 = arith.maximumf %6, %8 : vector<128x16xf32>
    %10 = arith.truncf %9 : vector<128x16xf32> to vector<128x16xbf16>
    %c0_6 = arith.constant 0 : index
    %c0_7 = arith.constant 0 : index
    %11 = vector.load %arg4[%c0_6, %c0_7] : memref<16x32xbf16, #tpu.memory_space<vmem>>, vector<16x32xbf16>
    %cst_8 = arith.constant dense<0.000000e+00> : vector<128x32xf32>
    %12 = tpu.matmul %10, %11, %cst_8 {dimension_numbers = #tpu.dot_dimension_numbers<[1], [0], [0], [1], [0, 0, 1, 1], [], []>} : vector<128x16xbf16>, vector<16x32xbf16>, vector<128x32xf32> -> vector<128x32xf32>
    %c0_9 = arith.constant 0 : index
    %c0_10 = arith.constant 0 : index
    %13 = vector.load %arg5[%c0_9, %c0_10] : memref<1x32xf32, #tpu.memory_space<vmem>>, vector<1x32xf32>
    %14 = vector.broadcast %13 : vector<1x32xf32> to vector<128x32xf32>
    %15 = arith.addf %12, %14 : vector<128x32xf32>
    %cst_11 = arith.constant 0.00999999977 : f32
    %16 = vector.broadcast %cst_11 : f32 to vector<128x32xf32>
    %17 = arith.mulf %16, %15 : vector<128x32xf32>
    %18 = arith.maximumf %15, %17 : vector<128x32xf32>
    %19 = arith.truncf %18 : vector<128x32xf32> to vector<128x32xbf16>
    %c0_12 = arith.constant 0 : index
    %c0_13 = arith.constant 0 : index
    %20 = vector.load %arg6[%c0_12, %c0_13] : memref<32x64xbf16, #tpu.memory_space<vmem>>, vector<32x64xbf16>
    %cst_14 = arith.constant dense<0.000000e+00> : vector<128x64xf32>
    %21 = tpu.matmul %19, %20, %cst_14 {dimension_numbers = #tpu.dot_dimension_numbers<[1], [0], [0], [1], [0, 0, 1, 1], [], []>} : vector<128x32xbf16>, vector<32x64xbf16>, vector<128x64xf32> -> vector<128x64xf32>
    %c0_15 = arith.constant 0 : index
    %c0_16 = arith.constant 0 : index
    %22 = vector.load %arg7[%c0_15, %c0_16] : memref<1x64xf32, #tpu.memory_space<vmem>>, vector<1x64xf32>
    %23 = vector.broadcast %22 : vector<1x64xf32> to vector<128x64xf32>
    %24 = arith.addf %21, %23 : vector<128x64xf32>
    %cst_17 = arith.constant 0.00999999977 : f32
    %25 = vector.broadcast %cst_17 : f32 to vector<128x64xf32>
    %26 = arith.mulf %25, %24 : vector<128x64xf32>
    %27 = arith.maximumf %24, %26 : vector<128x64xf32>
    %28 = arith.truncf %27 : vector<128x64xf32> to vector<128x64xbf16>
    %c0_18 = arith.constant 0 : index
    %c0_19 = arith.constant 0 : index
    %29 = vector.load %arg8[%c0_18, %c0_19] : memref<64x128xbf16, #tpu.memory_space<vmem>>, vector<64x128xbf16>
    %cst_20 = arith.constant dense<0.000000e+00> : vector<128x128xf32>
    %30 = tpu.matmul %28, %29, %cst_20 {dimension_numbers = #tpu.dot_dimension_numbers<[1], [0], [0], [1], [0, 0, 1, 1], [], []>} : vector<128x64xbf16>, vector<64x128xbf16>, vector<128x128xf32> -> vector<128x128xf32>
    %c0_21 = arith.constant 0 : index
    %c0_22 = arith.constant 0 : index
    %31 = vector.load %arg9[%c0_21, %c0_22] : memref<1x128xf32, #tpu.memory_space<vmem>>, vector<1x128xf32>
    %32 = vector.broadcast %31 : vector<1x128xf32> to vector<128x128xf32>
    %33 = arith.addf %30, %32 : vector<128x128xf32>
    %cst_23 = arith.constant 0.00999999977 : f32
    %34 = vector.broadcast %cst_23 : f32 to vector<128x128xf32>
    %35 = arith.mulf %34, %33 : vector<128x128xf32>
    %36 = arith.maximumf %33, %35 : vector<128x128xf32>
    %37 = arith.truncf %36 : vector<128x128xf32> to vector<128x128xbf16>
    %c0_24 = arith.constant 0 : index
    %c0_25 = arith.constant 0 : index
    %38 = vector.load %arg10[%c0_24, %c0_25] : memref<128x256xbf16, #tpu.memory_space<vmem>>, vector<128x256xbf16>
    %cst_26 = arith.constant dense<0.000000e+00> : vector<128x256xf32>
    %39 = tpu.matmul %37, %38, %cst_26 {dimension_numbers = #tpu.dot_dimension_numbers<[1], [0], [0], [1], [0, 0, 1, 1], [], []>} : vector<128x128xbf16>, vector<128x256xbf16>, vector<128x256xf32> -> vector<128x256xf32>
    %c0_27 = arith.constant 0 : index
    %c0_28 = arith.constant 0 : index
    %40 = vector.load %arg11[%c0_27, %c0_28] : memref<1x256xf32, #tpu.memory_space<vmem>>, vector<1x256xf32>
    %41 = vector.broadcast %40 : vector<1x256xf32> to vector<128x256xf32>
    %42 = arith.addf %39, %41 : vector<128x256xf32>
    %cst_29 = arith.constant 0.00999999977 : f32
    %43 = vector.broadcast %cst_29 : f32 to vector<128x256xf32>
    %44 = arith.mulf %43, %42 : vector<128x256xf32>
    %45 = arith.maximumf %42, %44 : vector<128x256xf32>
    %46 = arith.truncf %45 : vector<128x256xf32> to vector<128x256xbf16>
    %c0_30 = arith.constant 0 : index
    %c0_31 = arith.constant 0 : index
    %47 = vector.load %arg12[%c0_30, %c0_31] : memref<256x512xbf16, #tpu.memory_space<vmem>>, vector<256x512xbf16>
    %cst_32 = arith.constant dense<0.000000e+00> : vector<128x512xf32>
    %48 = tpu.matmul %46, %47, %cst_32 {dimension_numbers = #tpu.dot_dimension_numbers<[1], [0], [0], [1], [0, 0, 1, 1], [], []>} : vector<128x256xbf16>, vector<256x512xbf16>, vector<128x512xf32> -> vector<128x512xf32>
    %c0_33 = arith.constant 0 : index
    %c0_34 = arith.constant 0 : index
    %49 = vector.load %arg13[%c0_33, %c0_34] : memref<1x512xf32, #tpu.memory_space<vmem>>, vector<1x512xf32>
    %50 = vector.broadcast %49 : vector<1x512xf32> to vector<128x512xf32>
    %51 = arith.addf %48, %50 : vector<128x512xf32>
    %cst_35 = arith.constant 0.00999999977 : f32
    %52 = vector.broadcast %cst_35 : f32 to vector<128x512xf32>
    %53 = arith.mulf %52, %51 : vector<128x512xf32>
    %54 = arith.maximumf %51, %53 : vector<128x512xf32>
    %55 = arith.truncf %54 : vector<128x512xf32> to vector<128x512xbf16>
    %c0_36 = arith.constant 0 : index
    %c0_37 = arith.constant 0 : index
    %56 = vector.load %arg14[%c0_36, %c0_37] : memref<512x1024xbf16, #tpu.memory_space<vmem>>, vector<512x1024xbf16>
    %cst_38 = arith.constant dense<0.000000e+00> : vector<128x1024xf32>
    %57 = tpu.matmul %55, %56, %cst_38 {dimension_numbers = #tpu.dot_dimension_numbers<[1], [0], [0], [1], [0, 0, 1, 1], [], []>} : vector<128x512xbf16>, vector<512x1024xbf16>, vector<128x1024xf32> -> vector<128x1024xf32>
    %c0_39 = arith.constant 0 : index
    %c0_40 = arith.constant 0 : index
    %58 = vector.load %arg15[%c0_39, %c0_40] : memref<1x1024xf32, #tpu.memory_space<vmem>>, vector<1x1024xf32>
    %59 = vector.broadcast %58 : vector<1x1024xf32> to vector<128x1024xf32>
    %60 = arith.addf %57, %59 : vector<128x1024xf32>
    %cst_41 = arith.constant 0.00999999977 : f32
    %61 = vector.broadcast %cst_41 : f32 to vector<128x1024xf32>
    %62 = arith.mulf %61, %60 : vector<128x1024xf32>
    %63 = arith.maximumf %60, %62 : vector<128x1024xf32>
    %64 = arith.truncf %63 : vector<128x1024xf32> to vector<128x1024xbf16>
    %c0_42 = arith.constant 0 : index
    %c0_43 = arith.constant 0 : index
    %65 = vector.load %arg16[%c0_42, %c0_43] : memref<1024x512xbf16, #tpu.memory_space<vmem>>, vector<1024x512xbf16>
    %cst_44 = arith.constant dense<0.000000e+00> : vector<128x512xf32>
    %66 = tpu.matmul %64, %65, %cst_44 {dimension_numbers = #tpu.dot_dimension_numbers<[1], [0], [0], [1], [0, 0, 1, 1], [], []>} : vector<128x1024xbf16>, vector<1024x512xbf16>, vector<128x512xf32> -> vector<128x512xf32>
    %c0_45 = arith.constant 0 : index
    %c0_46 = arith.constant 0 : index
    %67 = vector.load %arg17[%c0_45, %c0_46] : memref<1x512xf32, #tpu.memory_space<vmem>>, vector<1x512xf32>
    %68 = vector.broadcast %67 : vector<1x512xf32> to vector<128x512xf32>
    %69 = arith.addf %66, %68 : vector<128x512xf32>
    %cst_47 = arith.constant 0.00999999977 : f32
    %70 = vector.broadcast %cst_47 : f32 to vector<128x512xf32>
    %71 = arith.mulf %70, %69 : vector<128x512xf32>
    %72 = arith.maximumf %69, %71 : vector<128x512xf32>
    %73 = arith.truncf %72 : vector<128x512xf32> to vector<128x512xbf16>
    %c0_48 = arith.constant 0 : index
    %c0_49 = arith.constant 0 : index
    %74 = vector.load %arg18[%c0_48, %c0_49] : memref<512x256xbf16, #tpu.memory_space<vmem>>, vector<512x256xbf16>
    %cst_50 = arith.constant dense<0.000000e+00> : vector<128x256xf32>
    %75 = tpu.matmul %73, %74, %cst_50 {dimension_numbers = #tpu.dot_dimension_numbers<[1], [0], [0], [1], [0, 0, 1, 1], [], []>} : vector<128x512xbf16>, vector<512x256xbf16>, vector<128x256xf32> -> vector<128x256xf32>
    %c0_51 = arith.constant 0 : index
    %c0_52 = arith.constant 0 : index
    %76 = vector.load %arg19[%c0_51, %c0_52] : memref<1x256xf32, #tpu.memory_space<vmem>>, vector<1x256xf32>
    %77 = vector.broadcast %76 : vector<1x256xf32> to vector<128x256xf32>
    %78 = arith.addf %75, %77 : vector<128x256xf32>
    %cst_53 = arith.constant 0.00999999977 : f32
    %79 = vector.broadcast %cst_53 : f32 to vector<128x256xf32>
    %80 = arith.mulf %79, %78 : vector<128x256xf32>
    %81 = arith.maximumf %78, %80 : vector<128x256xf32>
    %82 = arith.truncf %81 : vector<128x256xf32> to vector<128x256xbf16>
    %c0_54 = arith.constant 0 : index
    %c0_55 = arith.constant 0 : index
    %83 = vector.load %arg20[%c0_54, %c0_55] : memref<256x128xbf16, #tpu.memory_space<vmem>>, vector<256x128xbf16>
    %cst_56 = arith.constant dense<0.000000e+00> : vector<128x128xf32>
    %84 = tpu.matmul %82, %83, %cst_56 {dimension_numbers = #tpu.dot_dimension_numbers<[1], [0], [0], [1], [0, 0, 1, 1], [], []>} : vector<128x256xbf16>, vector<256x128xbf16>, vector<128x128xf32> -> vector<128x128xf32>
    %c0_57 = arith.constant 0 : index
    %c0_58 = arith.constant 0 : index
    %85 = vector.load %arg21[%c0_57, %c0_58] : memref<1x128xf32, #tpu.memory_space<vmem>>, vector<1x128xf32>
    %86 = vector.broadcast %85 : vector<1x128xf32> to vector<128x128xf32>
    %87 = arith.addf %84, %86 : vector<128x128xf32>
    %cst_59 = arith.constant 0.00999999977 : f32
    %88 = vector.broadcast %cst_59 : f32 to vector<128x128xf32>
    %89 = arith.mulf %88, %87 : vector<128x128xf32>
    %90 = arith.maximumf %87, %89 : vector<128x128xf32>
    %91 = arith.truncf %90 : vector<128x128xf32> to vector<128x128xbf16>
    %c0_60 = arith.constant 0 : index
    %c0_61 = arith.constant 0 : index
    %92 = vector.load %arg22[%c0_60, %c0_61] : memref<128x64xbf16, #tpu.memory_space<vmem>>, vector<128x64xbf16>
    %cst_62 = arith.constant dense<0.000000e+00> : vector<128x64xf32>
    %93 = tpu.matmul %91, %92, %cst_62 {dimension_numbers = #tpu.dot_dimension_numbers<[1], [0], [0], [1], [0, 0, 1, 1], [], []>} : vector<128x128xbf16>, vector<128x64xbf16>, vector<128x64xf32> -> vector<128x64xf32>
    %c0_63 = arith.constant 0 : index
    %c0_64 = arith.constant 0 : index
    %94 = vector.load %arg23[%c0_63, %c0_64] : memref<1x64xf32, #tpu.memory_space<vmem>>, vector<1x64xf32>
    %95 = vector.broadcast %94 : vector<1x64xf32> to vector<128x64xf32>
    %96 = arith.addf %93, %95 : vector<128x64xf32>
    %cst_65 = arith.constant 0.00999999977 : f32
    %97 = vector.broadcast %cst_65 : f32 to vector<128x64xf32>
    %98 = arith.mulf %97, %96 : vector<128x64xf32>
    %99 = arith.maximumf %96, %98 : vector<128x64xf32>
    %c0_66 = arith.constant 0 : index
    %c0_67 = arith.constant 0 : index
    %100 = vector.load %arg24[%c0_66, %c0_67] : memref<8x64xbf16, #tpu.memory_space<vmem>>, vector<8x64xbf16>
    %101 = arith.truncf %99 : vector<128x64xf32> to vector<128x64xbf16>
    %cst_68 = arith.constant dense<0.000000e+00> : vector<8x128xf32>
    %102 = tpu.matmul %100, %101, %cst_68 {dimension_numbers = #tpu.dot_dimension_numbers<[1], [1], [0], [0], [0, 0, 1, 0], [], []>} : vector<8x64xbf16>, vector<128x64xbf16>, vector<8x128xf32> -> vector<8x128xf32>
    %c0_69 = arith.constant 0 : index
    %c0_70 = arith.constant 0 : index
    %103 = vector.load %arg25[%c0_69, %c0_70] : memref<8x1xf32, #tpu.memory_space<vmem>>, vector<8x1xf32>
    %104 = vector.broadcast %103 : vector<8x1xf32> to vector<8x128xf32>
    %105 = arith.addf %102, %104 : vector<8x128xf32>
    %cst_71 = arith.constant 0.00999999977 : f32
    %106 = vector.broadcast %cst_71 : f32 to vector<8x128xf32>
    %107 = arith.mulf %106, %105 : vector<8x128xf32>
    %108 = arith.maximumf %105, %107 : vector<8x128xf32>
    %cst_72 = arith.constant 1.000000e+00 : f32
    %109 = vector.broadcast %cst_72 : f32 to vector<1x128xf32>
    %cst_73 = arith.constant 0.000000e+00 : f32
    %110 = vector.broadcast %cst_73 : f32 to vector<1x128xf32>
    %c0_74 = arith.constant 0 : index
    %111 = memref.load %arg26[%c0_74] : memref<24xf32, #tpu.memory_space<smem>>
    %c1 = arith.constant 1 : index
    %112 = memref.load %arg26[%c1] : memref<24xf32, #tpu.memory_space<smem>>
    %c2 = arith.constant 2 : index
    %113 = memref.load %arg26[%c2] : memref<24xf32, #tpu.memory_space<smem>>
    %c3 = arith.constant 3 : index
    %114 = memref.load %arg26[%c3] : memref<24xf32, #tpu.memory_space<smem>>
    %c4 = arith.constant 4 : index
    %115 = memref.load %arg26[%c4] : memref<24xf32, #tpu.memory_space<smem>>
    %c5 = arith.constant 5 : index
    %116 = memref.load %arg26[%c5] : memref<24xf32, #tpu.memory_space<smem>>
    %117 = vector.extract_strided_slice %108 {offsets = [0, 0], sizes = [1, 128], strides = [1, 1]} : vector<8x128xf32> to vector<1x128xf32>
    %118 = vector.broadcast %111 : f32 to vector<1x128xf32>
    %119 = arith.mulf %118, %117 : vector<1x128xf32>
    %120 = vector.broadcast %112 : f32 to vector<1x128xf32>
    %121 = arith.mulf %120, %117 : vector<1x128xf32>
    %122 = vector.broadcast %113 : f32 to vector<1x128xf32>
    %123 = arith.mulf %122, %117 : vector<1x128xf32>
    %124 = vector.broadcast %114 : f32 to vector<1x128xf32>
    %125 = arith.mulf %124, %117 : vector<1x128xf32>
    %126 = vector.broadcast %115 : f32 to vector<1x128xf32>
    %127 = arith.mulf %126, %117 : vector<1x128xf32>
    %128 = vector.broadcast %116 : f32 to vector<1x128xf32>
    %129 = arith.mulf %128, %117 : vector<1x128xf32>
    %130 = arith.mulf %119, %119 : vector<1x128xf32>
    %131 = arith.mulf %121, %121 : vector<1x128xf32>
    %132 = arith.mulf %123, %123 : vector<1x128xf32>
    %133 = arith.mulf %119, %121 : vector<1x128xf32>
    %134 = arith.mulf %119, %123 : vector<1x128xf32>
    %135 = arith.mulf %121, %123 : vector<1x128xf32>
    %136 = arith.addf %130, %131 : vector<1x128xf32>
    %137 = arith.addf %136, %132 : vector<1x128xf32>
    %138 = math.sqrt %137 : vector<1x128xf32>
    %cst_75 = arith.constant 0.00999999977 : f32
    %139 = vector.broadcast %cst_75 : f32 to vector<1x128xf32>
    %140 = arith.cmpf olt, %138, %139 : vector<1x128xf32>
    %cst_76 = arith.constant 1.000000e+00 : f32
    %141 = vector.broadcast %cst_76 : f32 to vector<1x128xf32>
    %142 = arith.select %140, %141, %138 : vector<1x128xi1>, vector<1x128xf32>
    %cst_77 = arith.constant 5.000000e-01 : f32
    %143 = vector.broadcast %cst_77 : f32 to vector<1x128xf32>
    %144 = arith.mulf %143, %142 : vector<1x128xf32>
    %145 = math.sin %144 : vector<1x128xf32>
    %cst_78 = arith.constant 5.000000e-01 : f32
    %146 = vector.broadcast %cst_78 : f32 to vector<1x128xf32>
    %147 = arith.mulf %146, %142 : vector<1x128xf32>
    %148 = math.cos %147 : vector<1x128xf32>
    %cst_79 = arith.constant 2.000000e+00 : f32
    %149 = vector.broadcast %cst_79 : f32 to vector<1x128xf32>
    %150 = arith.mulf %149, %145 : vector<1x128xf32>
    %151 = arith.mulf %150, %148 : vector<1x128xf32>
    %cst_80 = arith.constant 2.000000e+00 : f32
    %152 = vector.broadcast %cst_80 : f32 to vector<1x128xf32>
    %153 = arith.mulf %152, %145 : vector<1x128xf32>
    %154 = arith.mulf %153, %145 : vector<1x128xf32>
    %cst_81 = arith.constant 1.000000e+00 : f32
    %155 = vector.broadcast %cst_81 : f32 to vector<1x128xf32>
    %156 = arith.divf %155, %142 : vector<1x128xf32>
    %157 = arith.mulf %156, %156 : vector<1x128xf32>
    %cst_82 = arith.constant 0.166666672 : f32
    %158 = vector.broadcast %cst_82 : f32 to vector<1x128xf32>
    %159 = arith.mulf %137, %158 : vector<1x128xf32>
    %cst_83 = arith.constant 1.000000e+00 : f32
    %160 = vector.broadcast %cst_83 : f32 to vector<1x128xf32>
    %161 = arith.subf %160, %159 : vector<1x128xf32>
    %162 = arith.mulf %151, %156 : vector<1x128xf32>
    %163 = arith.select %140, %161, %162 : vector<1x128xi1>, vector<1x128xf32>
    %cst_84 = arith.constant 0.0416666679 : f32
    %164 = vector.broadcast %cst_84 : f32 to vector<1x128xf32>
    %165 = arith.mulf %137, %164 : vector<1x128xf32>
    %cst_85 = arith.constant 5.000000e-01 : f32
    %166 = vector.broadcast %cst_85 : f32 to vector<1x128xf32>
    %167 = arith.subf %166, %165 : vector<1x128xf32>
    %168 = arith.mulf %154, %157 : vector<1x128xf32>
    %169 = arith.select %140, %167, %168 : vector<1x128xi1>, vector<1x128xf32>
    %cst_86 = arith.constant 0.00833333377 : f32
    %170 = vector.broadcast %cst_86 : f32 to vector<1x128xf32>
    %171 = arith.mulf %137, %170 : vector<1x128xf32>
    %cst_87 = arith.constant 0.166666672 : f32
    %172 = vector.broadcast %cst_87 : f32 to vector<1x128xf32>
    %173 = arith.subf %172, %171 : vector<1x128xf32>
    %174 = arith.subf %142, %151 : vector<1x128xf32>
    %175 = arith.mulf %174, %157 : vector<1x128xf32>
    %176 = arith.mulf %175, %156 : vector<1x128xf32>
    %177 = arith.select %140, %173, %176 : vector<1x128xi1>, vector<1x128xf32>
    %178 = arith.subf %130, %137 : vector<1x128xf32>
    %179 = arith.subf %131, %137 : vector<1x128xf32>
    %180 = arith.subf %132, %137 : vector<1x128xf32>
    %181 = arith.mulf %169, %178 : vector<1x128xf32>
    %cst_88 = arith.constant 1.000000e+00 : f32
    %182 = vector.broadcast %cst_88 : f32 to vector<1x128xf32>
    %183 = arith.addf %182, %181 : vector<1x128xf32>
    %cst_89 = arith.constant 0.000000e+00 : f32
    %184 = vector.broadcast %cst_89 : f32 to vector<1x128xf32>
    %185 = arith.subf %184, %163 : vector<1x128xf32>
    %186 = arith.mulf %185, %123 : vector<1x128xf32>
    %187 = arith.mulf %169, %133 : vector<1x128xf32>
    %188 = arith.addf %186, %187 : vector<1x128xf32>
    %189 = arith.mulf %163, %121 : vector<1x128xf32>
    %190 = arith.mulf %169, %134 : vector<1x128xf32>
    %191 = arith.addf %189, %190 : vector<1x128xf32>
    %192 = arith.mulf %163, %123 : vector<1x128xf32>
    %193 = arith.mulf %169, %133 : vector<1x128xf32>
    %194 = arith.addf %192, %193 : vector<1x128xf32>
    %195 = arith.mulf %169, %179 : vector<1x128xf32>
    %cst_90 = arith.constant 1.000000e+00 : f32
    %196 = vector.broadcast %cst_90 : f32 to vector<1x128xf32>
    %197 = arith.addf %196, %195 : vector<1x128xf32>
    %cst_91 = arith.constant 0.000000e+00 : f32
    %198 = vector.broadcast %cst_91 : f32 to vector<1x128xf32>
    %199 = arith.subf %198, %163 : vector<1x128xf32>
    %200 = arith.mulf %199, %119 : vector<1x128xf32>
    %201 = arith.mulf %169, %135 : vector<1x128xf32>
    %202 = arith.addf %200, %201 : vector<1x128xf32>
    %cst_92 = arith.constant 0.000000e+00 : f32
    %203 = vector.broadcast %cst_92 : f32 to vector<1x128xf32>
    %204 = arith.subf %203, %163 : vector<1x128xf32>
    %205 = arith.mulf %204, %121 : vector<1x128xf32>
    %206 = arith.mulf %169, %134 : vector<1x128xf32>
    %207 = arith.addf %205, %206 : vector<1x128xf32>
    %208 = arith.mulf %163, %119 : vector<1x128xf32>
    %209 = arith.mulf %169, %135 : vector<1x128xf32>
    %210 = arith.addf %208, %209 : vector<1x128xf32>
    %211 = arith.mulf %169, %180 : vector<1x128xf32>
    %cst_93 = arith.constant 1.000000e+00 : f32
    %212 = vector.broadcast %cst_93 : f32 to vector<1x128xf32>
    %213 = arith.addf %212, %211 : vector<1x128xf32>
    %214 = arith.mulf %177, %178 : vector<1x128xf32>
    %cst_94 = arith.constant 1.000000e+00 : f32
    %215 = vector.broadcast %cst_94 : f32 to vector<1x128xf32>
    %216 = arith.addf %215, %214 : vector<1x128xf32>
    %cst_95 = arith.constant 0.000000e+00 : f32
    %217 = vector.broadcast %cst_95 : f32 to vector<1x128xf32>
    %218 = arith.subf %217, %169 : vector<1x128xf32>
    %219 = arith.mulf %218, %123 : vector<1x128xf32>
    %220 = arith.mulf %177, %133 : vector<1x128xf32>
    %221 = arith.addf %219, %220 : vector<1x128xf32>
    %222 = arith.mulf %169, %121 : vector<1x128xf32>
    %223 = arith.mulf %177, %134 : vector<1x128xf32>
    %224 = arith.addf %222, %223 : vector<1x128xf32>
    %225 = arith.mulf %169, %123 : vector<1x128xf32>
    %226 = arith.mulf %177, %133 : vector<1x128xf32>
    %227 = arith.addf %225, %226 : vector<1x128xf32>
    %228 = arith.mulf %177, %179 : vector<1x128xf32>
    %cst_96 = arith.constant 1.000000e+00 : f32
    %229 = vector.broadcast %cst_96 : f32 to vector<1x128xf32>
    %230 = arith.addf %229, %228 : vector<1x128xf32>
    %cst_97 = arith.constant 0.000000e+00 : f32
    %231 = vector.broadcast %cst_97 : f32 to vector<1x128xf32>
    %232 = arith.subf %231, %169 : vector<1x128xf32>
    %233 = arith.mulf %232, %119 : vector<1x128xf32>
    %234 = arith.mulf %177, %135 : vector<1x128xf32>
    %235 = arith.addf %233, %234 : vector<1x128xf32>
    %cst_98 = arith.constant 0.000000e+00 : f32
    %236 = vector.broadcast %cst_98 : f32 to vector<1x128xf32>
    %237 = arith.subf %236, %169 : vector<1x128xf32>
    %238 = arith.mulf %237, %121 : vector<1x128xf32>
    %239 = arith.mulf %177, %134 : vector<1x128xf32>
    %240 = arith.addf %238, %239 : vector<1x128xf32>
    %241 = arith.mulf %169, %119 : vector<1x128xf32>
    %242 = arith.mulf %177, %135 : vector<1x128xf32>
    %243 = arith.addf %241, %242 : vector<1x128xf32>
    %244 = arith.mulf %177, %180 : vector<1x128xf32>
    %cst_99 = arith.constant 1.000000e+00 : f32
    %245 = vector.broadcast %cst_99 : f32 to vector<1x128xf32>
    %246 = arith.addf %245, %244 : vector<1x128xf32>
    %247 = arith.mulf %216, %125 : vector<1x128xf32>
    %248 = arith.mulf %221, %127 : vector<1x128xf32>
    %249 = arith.addf %247, %248 : vector<1x128xf32>
    %250 = arith.mulf %224, %129 : vector<1x128xf32>
    %251 = arith.addf %249, %250 : vector<1x128xf32>
    %252 = arith.mulf %227, %125 : vector<1x128xf32>
    %253 = arith.mulf %230, %127 : vector<1x128xf32>
    %254 = arith.addf %252, %253 : vector<1x128xf32>
    %255 = arith.mulf %235, %129 : vector<1x128xf32>
    %256 = arith.addf %254, %255 : vector<1x128xf32>
    %257 = arith.mulf %240, %125 : vector<1x128xf32>
    %258 = arith.mulf %243, %127 : vector<1x128xf32>
    %259 = arith.addf %257, %258 : vector<1x128xf32>
    %260 = arith.mulf %246, %129 : vector<1x128xf32>
    %261 = arith.addf %259, %260 : vector<1x128xf32>
    %c6 = arith.constant 6 : index
    %262 = memref.load %arg26[%c6] : memref<24xf32, #tpu.memory_space<smem>>
    %c7 = arith.constant 7 : index
    %263 = memref.load %arg26[%c7] : memref<24xf32, #tpu.memory_space<smem>>
    %c8 = arith.constant 8 : index
    %264 = memref.load %arg26[%c8] : memref<24xf32, #tpu.memory_space<smem>>
    %c9 = arith.constant 9 : index
    %265 = memref.load %arg26[%c9] : memref<24xf32, #tpu.memory_space<smem>>
    %c10 = arith.constant 10 : index
    %266 = memref.load %arg26[%c10] : memref<24xf32, #tpu.memory_space<smem>>
    %c11 = arith.constant 11 : index
    %267 = memref.load %arg26[%c11] : memref<24xf32, #tpu.memory_space<smem>>
    %268 = vector.extract_strided_slice %108 {offsets = [1, 0], sizes = [1, 128], strides = [1, 1]} : vector<8x128xf32> to vector<1x128xf32>
    %269 = vector.broadcast %262 : f32 to vector<1x128xf32>
    %270 = arith.mulf %269, %268 : vector<1x128xf32>
    %271 = vector.broadcast %263 : f32 to vector<1x128xf32>
    %272 = arith.mulf %271, %268 : vector<1x128xf32>
    %273 = vector.broadcast %264 : f32 to vector<1x128xf32>
    %274 = arith.mulf %273, %268 : vector<1x128xf32>
    %275 = vector.broadcast %265 : f32 to vector<1x128xf32>
    %276 = arith.mulf %275, %268 : vector<1x128xf32>
    %277 = vector.broadcast %266 : f32 to vector<1x128xf32>
    %278 = arith.mulf %277, %268 : vector<1x128xf32>
    %279 = vector.broadcast %267 : f32 to vector<1x128xf32>
    %280 = arith.mulf %279, %268 : vector<1x128xf32>
    %281 = arith.mulf %270, %270 : vector<1x128xf32>
    %282 = arith.mulf %272, %272 : vector<1x128xf32>
    %283 = arith.mulf %274, %274 : vector<1x128xf32>
    %284 = arith.mulf %270, %272 : vector<1x128xf32>
    %285 = arith.mulf %270, %274 : vector<1x128xf32>
    %286 = arith.mulf %272, %274 : vector<1x128xf32>
    %287 = arith.addf %281, %282 : vector<1x128xf32>
    %288 = arith.addf %287, %283 : vector<1x128xf32>
    %289 = math.sqrt %288 : vector<1x128xf32>
    %cst_100 = arith.constant 0.00999999977 : f32
    %290 = vector.broadcast %cst_100 : f32 to vector<1x128xf32>
    %291 = arith.cmpf olt, %289, %290 : vector<1x128xf32>
    %cst_101 = arith.constant 1.000000e+00 : f32
    %292 = vector.broadcast %cst_101 : f32 to vector<1x128xf32>
    %293 = arith.select %291, %292, %289 : vector<1x128xi1>, vector<1x128xf32>
    %cst_102 = arith.constant 5.000000e-01 : f32
    %294 = vector.broadcast %cst_102 : f32 to vector<1x128xf32>
    %295 = arith.mulf %294, %293 : vector<1x128xf32>
    %296 = math.sin %295 : vector<1x128xf32>
    %cst_103 = arith.constant 5.000000e-01 : f32
    %297 = vector.broadcast %cst_103 : f32 to vector<1x128xf32>
    %298 = arith.mulf %297, %293 : vector<1x128xf32>
    %299 = math.cos %298 : vector<1x128xf32>
    %cst_104 = arith.constant 2.000000e+00 : f32
    %300 = vector.broadcast %cst_104 : f32 to vector<1x128xf32>
    %301 = arith.mulf %300, %296 : vector<1x128xf32>
    %302 = arith.mulf %301, %299 : vector<1x128xf32>
    %cst_105 = arith.constant 2.000000e+00 : f32
    %303 = vector.broadcast %cst_105 : f32 to vector<1x128xf32>
    %304 = arith.mulf %303, %296 : vector<1x128xf32>
    %305 = arith.mulf %304, %296 : vector<1x128xf32>
    %cst_106 = arith.constant 1.000000e+00 : f32
    %306 = vector.broadcast %cst_106 : f32 to vector<1x128xf32>
    %307 = arith.divf %306, %293 : vector<1x128xf32>
    %308 = arith.mulf %307, %307 : vector<1x128xf32>
    %cst_107 = arith.constant 0.166666672 : f32
    %309 = vector.broadcast %cst_107 : f32 to vector<1x128xf32>
    %310 = arith.mulf %288, %309 : vector<1x128xf32>
    %cst_108 = arith.constant 1.000000e+00 : f32
    %311 = vector.broadcast %cst_108 : f32 to vector<1x128xf32>
    %312 = arith.subf %311, %310 : vector<1x128xf32>
    %313 = arith.mulf %302, %307 : vector<1x128xf32>
    %314 = arith.select %291, %312, %313 : vector<1x128xi1>, vector<1x128xf32>
    %cst_109 = arith.constant 0.0416666679 : f32
    %315 = vector.broadcast %cst_109 : f32 to vector<1x128xf32>
    %316 = arith.mulf %288, %315 : vector<1x128xf32>
    %cst_110 = arith.constant 5.000000e-01 : f32
    %317 = vector.broadcast %cst_110 : f32 to vector<1x128xf32>
    %318 = arith.subf %317, %316 : vector<1x128xf32>
    %319 = arith.mulf %305, %308 : vector<1x128xf32>
    %320 = arith.select %291, %318, %319 : vector<1x128xi1>, vector<1x128xf32>
    %cst_111 = arith.constant 0.00833333377 : f32
    %321 = vector.broadcast %cst_111 : f32 to vector<1x128xf32>
    %322 = arith.mulf %288, %321 : vector<1x128xf32>
    %cst_112 = arith.constant 0.166666672 : f32
    %323 = vector.broadcast %cst_112 : f32 to vector<1x128xf32>
    %324 = arith.subf %323, %322 : vector<1x128xf32>
    %325 = arith.subf %293, %302 : vector<1x128xf32>
    %326 = arith.mulf %325, %308 : vector<1x128xf32>
    %327 = arith.mulf %326, %307 : vector<1x128xf32>
    %328 = arith.select %291, %324, %327 : vector<1x128xi1>, vector<1x128xf32>
    %329 = arith.subf %281, %288 : vector<1x128xf32>
    %330 = arith.subf %282, %288 : vector<1x128xf32>
    %331 = arith.subf %283, %288 : vector<1x128xf32>
    %332 = arith.mulf %320, %329 : vector<1x128xf32>
    %cst_113 = arith.constant 1.000000e+00 : f32
    %333 = vector.broadcast %cst_113 : f32 to vector<1x128xf32>
    %334 = arith.addf %333, %332 : vector<1x128xf32>
    %cst_114 = arith.constant 0.000000e+00 : f32
    %335 = vector.broadcast %cst_114 : f32 to vector<1x128xf32>
    %336 = arith.subf %335, %314 : vector<1x128xf32>
    %337 = arith.mulf %336, %274 : vector<1x128xf32>
    %338 = arith.mulf %320, %284 : vector<1x128xf32>
    %339 = arith.addf %337, %338 : vector<1x128xf32>
    %340 = arith.mulf %314, %272 : vector<1x128xf32>
    %341 = arith.mulf %320, %285 : vector<1x128xf32>
    %342 = arith.addf %340, %341 : vector<1x128xf32>
    %343 = arith.mulf %314, %274 : vector<1x128xf32>
    %344 = arith.mulf %320, %284 : vector<1x128xf32>
    %345 = arith.addf %343, %344 : vector<1x128xf32>
    %346 = arith.mulf %320, %330 : vector<1x128xf32>
    %cst_115 = arith.constant 1.000000e+00 : f32
    %347 = vector.broadcast %cst_115 : f32 to vector<1x128xf32>
    %348 = arith.addf %347, %346 : vector<1x128xf32>
    %cst_116 = arith.constant 0.000000e+00 : f32
    %349 = vector.broadcast %cst_116 : f32 to vector<1x128xf32>
    %350 = arith.subf %349, %314 : vector<1x128xf32>
    %351 = arith.mulf %350, %270 : vector<1x128xf32>
    %352 = arith.mulf %320, %286 : vector<1x128xf32>
    %353 = arith.addf %351, %352 : vector<1x128xf32>
    %cst_117 = arith.constant 0.000000e+00 : f32
    %354 = vector.broadcast %cst_117 : f32 to vector<1x128xf32>
    %355 = arith.subf %354, %314 : vector<1x128xf32>
    %356 = arith.mulf %355, %272 : vector<1x128xf32>
    %357 = arith.mulf %320, %285 : vector<1x128xf32>
    %358 = arith.addf %356, %357 : vector<1x128xf32>
    %359 = arith.mulf %314, %270 : vector<1x128xf32>
    %360 = arith.mulf %320, %286 : vector<1x128xf32>
    %361 = arith.addf %359, %360 : vector<1x128xf32>
    %362 = arith.mulf %320, %331 : vector<1x128xf32>
    %cst_118 = arith.constant 1.000000e+00 : f32
    %363 = vector.broadcast %cst_118 : f32 to vector<1x128xf32>
    %364 = arith.addf %363, %362 : vector<1x128xf32>
    %365 = arith.mulf %328, %329 : vector<1x128xf32>
    %cst_119 = arith.constant 1.000000e+00 : f32
    %366 = vector.broadcast %cst_119 : f32 to vector<1x128xf32>
    %367 = arith.addf %366, %365 : vector<1x128xf32>
    %cst_120 = arith.constant 0.000000e+00 : f32
    %368 = vector.broadcast %cst_120 : f32 to vector<1x128xf32>
    %369 = arith.subf %368, %320 : vector<1x128xf32>
    %370 = arith.mulf %369, %274 : vector<1x128xf32>
    %371 = arith.mulf %328, %284 : vector<1x128xf32>
    %372 = arith.addf %370, %371 : vector<1x128xf32>
    %373 = arith.mulf %320, %272 : vector<1x128xf32>
    %374 = arith.mulf %328, %285 : vector<1x128xf32>
    %375 = arith.addf %373, %374 : vector<1x128xf32>
    %376 = arith.mulf %320, %274 : vector<1x128xf32>
    %377 = arith.mulf %328, %284 : vector<1x128xf32>
    %378 = arith.addf %376, %377 : vector<1x128xf32>
    %379 = arith.mulf %328, %330 : vector<1x128xf32>
    %cst_121 = arith.constant 1.000000e+00 : f32
    %380 = vector.broadcast %cst_121 : f32 to vector<1x128xf32>
    %381 = arith.addf %380, %379 : vector<1x128xf32>
    %cst_122 = arith.constant 0.000000e+00 : f32
    %382 = vector.broadcast %cst_122 : f32 to vector<1x128xf32>
    %383 = arith.subf %382, %320 : vector<1x128xf32>
    %384 = arith.mulf %383, %270 : vector<1x128xf32>
    %385 = arith.mulf %328, %286 : vector<1x128xf32>
    %386 = arith.addf %384, %385 : vector<1x128xf32>
    %cst_123 = arith.constant 0.000000e+00 : f32
    %387 = vector.broadcast %cst_123 : f32 to vector<1x128xf32>
    %388 = arith.subf %387, %320 : vector<1x128xf32>
    %389 = arith.mulf %388, %272 : vector<1x128xf32>
    %390 = arith.mulf %328, %285 : vector<1x128xf32>
    %391 = arith.addf %389, %390 : vector<1x128xf32>
    %392 = arith.mulf %320, %270 : vector<1x128xf32>
    %393 = arith.mulf %328, %286 : vector<1x128xf32>
    %394 = arith.addf %392, %393 : vector<1x128xf32>
    %395 = arith.mulf %328, %331 : vector<1x128xf32>
    %cst_124 = arith.constant 1.000000e+00 : f32
    %396 = vector.broadcast %cst_124 : f32 to vector<1x128xf32>
    %397 = arith.addf %396, %395 : vector<1x128xf32>
    %398 = arith.mulf %367, %276 : vector<1x128xf32>
    %399 = arith.mulf %372, %278 : vector<1x128xf32>
    %400 = arith.addf %398, %399 : vector<1x128xf32>
    %401 = arith.mulf %375, %280 : vector<1x128xf32>
    %402 = arith.addf %400, %401 : vector<1x128xf32>
    %403 = arith.mulf %378, %276 : vector<1x128xf32>
    %404 = arith.mulf %381, %278 : vector<1x128xf32>
    %405 = arith.addf %403, %404 : vector<1x128xf32>
    %406 = arith.mulf %386, %280 : vector<1x128xf32>
    %407 = arith.addf %405, %406 : vector<1x128xf32>
    %408 = arith.mulf %391, %276 : vector<1x128xf32>
    %409 = arith.mulf %394, %278 : vector<1x128xf32>
    %410 = arith.addf %408, %409 : vector<1x128xf32>
    %411 = arith.mulf %397, %280 : vector<1x128xf32>
    %412 = arith.addf %410, %411 : vector<1x128xf32>
    %413 = arith.mulf %183, %334 : vector<1x128xf32>
    %414 = arith.mulf %188, %345 : vector<1x128xf32>
    %415 = arith.addf %413, %414 : vector<1x128xf32>
    %416 = arith.mulf %191, %358 : vector<1x128xf32>
    %417 = arith.addf %415, %416 : vector<1x128xf32>
    %418 = arith.mulf %183, %339 : vector<1x128xf32>
    %419 = arith.mulf %188, %348 : vector<1x128xf32>
    %420 = arith.addf %418, %419 : vector<1x128xf32>
    %421 = arith.mulf %191, %361 : vector<1x128xf32>
    %422 = arith.addf %420, %421 : vector<1x128xf32>
    %423 = arith.mulf %183, %342 : vector<1x128xf32>
    %424 = arith.mulf %188, %353 : vector<1x128xf32>
    %425 = arith.addf %423, %424 : vector<1x128xf32>
    %426 = arith.mulf %191, %364 : vector<1x128xf32>
    %427 = arith.addf %425, %426 : vector<1x128xf32>
    %428 = arith.mulf %194, %334 : vector<1x128xf32>
    %429 = arith.mulf %197, %345 : vector<1x128xf32>
    %430 = arith.addf %428, %429 : vector<1x128xf32>
    %431 = arith.mulf %202, %358 : vector<1x128xf32>
    %432 = arith.addf %430, %431 : vector<1x128xf32>
    %433 = arith.mulf %194, %339 : vector<1x128xf32>
    %434 = arith.mulf %197, %348 : vector<1x128xf32>
    %435 = arith.addf %433, %434 : vector<1x128xf32>
    %436 = arith.mulf %202, %361 : vector<1x128xf32>
    %437 = arith.addf %435, %436 : vector<1x128xf32>
    %438 = arith.mulf %194, %342 : vector<1x128xf32>
    %439 = arith.mulf %197, %353 : vector<1x128xf32>
    %440 = arith.addf %438, %439 : vector<1x128xf32>
    %441 = arith.mulf %202, %364 : vector<1x128xf32>
    %442 = arith.addf %440, %441 : vector<1x128xf32>
    %443 = arith.mulf %207, %334 : vector<1x128xf32>
    %444 = arith.mulf %210, %345 : vector<1x128xf32>
    %445 = arith.addf %443, %444 : vector<1x128xf32>
    %446 = arith.mulf %213, %358 : vector<1x128xf32>
    %447 = arith.addf %445, %446 : vector<1x128xf32>
    %448 = arith.mulf %207, %339 : vector<1x128xf32>
    %449 = arith.mulf %210, %348 : vector<1x128xf32>
    %450 = arith.addf %448, %449 : vector<1x128xf32>
    %451 = arith.mulf %213, %361 : vector<1x128xf32>
    %452 = arith.addf %450, %451 : vector<1x128xf32>
    %453 = arith.mulf %207, %342 : vector<1x128xf32>
    %454 = arith.mulf %210, %353 : vector<1x128xf32>
    %455 = arith.addf %453, %454 : vector<1x128xf32>
    %456 = arith.mulf %213, %364 : vector<1x128xf32>
    %457 = arith.addf %455, %456 : vector<1x128xf32>
    %458 = arith.mulf %183, %402 : vector<1x128xf32>
    %459 = arith.mulf %188, %407 : vector<1x128xf32>
    %460 = arith.addf %458, %459 : vector<1x128xf32>
    %461 = arith.mulf %191, %412 : vector<1x128xf32>
    %462 = arith.addf %460, %461 : vector<1x128xf32>
    %463 = arith.addf %462, %251 : vector<1x128xf32>
    %464 = arith.mulf %194, %402 : vector<1x128xf32>
    %465 = arith.mulf %197, %407 : vector<1x128xf32>
    %466 = arith.addf %464, %465 : vector<1x128xf32>
    %467 = arith.mulf %202, %412 : vector<1x128xf32>
    %468 = arith.addf %466, %467 : vector<1x128xf32>
    %469 = arith.addf %468, %256 : vector<1x128xf32>
    %470 = arith.mulf %207, %402 : vector<1x128xf32>
    %471 = arith.mulf %210, %407 : vector<1x128xf32>
    %472 = arith.addf %470, %471 : vector<1x128xf32>
    %473 = arith.mulf %213, %412 : vector<1x128xf32>
    %474 = arith.addf %472, %473 : vector<1x128xf32>
    %475 = arith.addf %474, %261 : vector<1x128xf32>
    %c12 = arith.constant 12 : index
    %476 = memref.load %arg26[%c12] : memref<24xf32, #tpu.memory_space<smem>>
    %c13 = arith.constant 13 : index
    %477 = memref.load %arg26[%c13] : memref<24xf32, #tpu.memory_space<smem>>
    %c14 = arith.constant 14 : index
    %478 = memref.load %arg26[%c14] : memref<24xf32, #tpu.memory_space<smem>>
    %c15 = arith.constant 15 : index
    %479 = memref.load %arg26[%c15] : memref<24xf32, #tpu.memory_space<smem>>
    %c16 = arith.constant 16 : index
    %480 = memref.load %arg26[%c16] : memref<24xf32, #tpu.memory_space<smem>>
    %c17 = arith.constant 17 : index
    %481 = memref.load %arg26[%c17] : memref<24xf32, #tpu.memory_space<smem>>
    %482 = vector.extract_strided_slice %108 {offsets = [2, 0], sizes = [1, 128], strides = [1, 1]} : vector<8x128xf32> to vector<1x128xf32>
    %483 = vector.broadcast %476 : f32 to vector<1x128xf32>
    %484 = arith.mulf %483, %482 : vector<1x128xf32>
    %485 = vector.broadcast %477 : f32 to vector<1x128xf32>
    %486 = arith.mulf %485, %482 : vector<1x128xf32>
    %487 = vector.broadcast %478 : f32 to vector<1x128xf32>
    %488 = arith.mulf %487, %482 : vector<1x128xf32>
    %489 = vector.broadcast %479 : f32 to vector<1x128xf32>
    %490 = arith.mulf %489, %482 : vector<1x128xf32>
    %491 = vector.broadcast %480 : f32 to vector<1x128xf32>
    %492 = arith.mulf %491, %482 : vector<1x128xf32>
    %493 = vector.broadcast %481 : f32 to vector<1x128xf32>
    %494 = arith.mulf %493, %482 : vector<1x128xf32>
    %495 = arith.mulf %484, %484 : vector<1x128xf32>
    %496 = arith.mulf %486, %486 : vector<1x128xf32>
    %497 = arith.mulf %488, %488 : vector<1x128xf32>
    %498 = arith.mulf %484, %486 : vector<1x128xf32>
    %499 = arith.mulf %484, %488 : vector<1x128xf32>
    %500 = arith.mulf %486, %488 : vector<1x128xf32>
    %501 = arith.addf %495, %496 : vector<1x128xf32>
    %502 = arith.addf %501, %497 : vector<1x128xf32>
    %503 = math.sqrt %502 : vector<1x128xf32>
    %cst_125 = arith.constant 0.00999999977 : f32
    %504 = vector.broadcast %cst_125 : f32 to vector<1x128xf32>
    %505 = arith.cmpf olt, %503, %504 : vector<1x128xf32>
    %cst_126 = arith.constant 1.000000e+00 : f32
    %506 = vector.broadcast %cst_126 : f32 to vector<1x128xf32>
    %507 = arith.select %505, %506, %503 : vector<1x128xi1>, vector<1x128xf32>
    %cst_127 = arith.constant 5.000000e-01 : f32
    %508 = vector.broadcast %cst_127 : f32 to vector<1x128xf32>
    %509 = arith.mulf %508, %507 : vector<1x128xf32>
    %510 = math.sin %509 : vector<1x128xf32>
    %cst_128 = arith.constant 5.000000e-01 : f32
    %511 = vector.broadcast %cst_128 : f32 to vector<1x128xf32>
    %512 = arith.mulf %511, %507 : vector<1x128xf32>
    %513 = math.cos %512 : vector<1x128xf32>
    %cst_129 = arith.constant 2.000000e+00 : f32
    %514 = vector.broadcast %cst_129 : f32 to vector<1x128xf32>
    %515 = arith.mulf %514, %510 : vector<1x128xf32>
    %516 = arith.mulf %515, %513 : vector<1x128xf32>
    %cst_130 = arith.constant 2.000000e+00 : f32
    %517 = vector.broadcast %cst_130 : f32 to vector<1x128xf32>
    %518 = arith.mulf %517, %510 : vector<1x128xf32>
    %519 = arith.mulf %518, %510 : vector<1x128xf32>
    %cst_131 = arith.constant 1.000000e+00 : f32
    %520 = vector.broadcast %cst_131 : f32 to vector<1x128xf32>
    %521 = arith.divf %520, %507 : vector<1x128xf32>
    %522 = arith.mulf %521, %521 : vector<1x128xf32>
    %cst_132 = arith.constant 0.166666672 : f32
    %523 = vector.broadcast %cst_132 : f32 to vector<1x128xf32>
    %524 = arith.mulf %502, %523 : vector<1x128xf32>
    %cst_133 = arith.constant 1.000000e+00 : f32
    %525 = vector.broadcast %cst_133 : f32 to vector<1x128xf32>
    %526 = arith.subf %525, %524 : vector<1x128xf32>
    %527 = arith.mulf %516, %521 : vector<1x128xf32>
    %528 = arith.select %505, %526, %527 : vector<1x128xi1>, vector<1x128xf32>
    %cst_134 = arith.constant 0.0416666679 : f32
    %529 = vector.broadcast %cst_134 : f32 to vector<1x128xf32>
    %530 = arith.mulf %502, %529 : vector<1x128xf32>
    %cst_135 = arith.constant 5.000000e-01 : f32
    %531 = vector.broadcast %cst_135 : f32 to vector<1x128xf32>
    %532 = arith.subf %531, %530 : vector<1x128xf32>
    %533 = arith.mulf %519, %522 : vector<1x128xf32>
    %534 = arith.select %505, %532, %533 : vector<1x128xi1>, vector<1x128xf32>
    %cst_136 = arith.constant 0.00833333377 : f32
    %535 = vector.broadcast %cst_136 : f32 to vector<1x128xf32>
    %536 = arith.mulf %502, %535 : vector<1x128xf32>
    %cst_137 = arith.constant 0.166666672 : f32
    %537 = vector.broadcast %cst_137 : f32 to vector<1x128xf32>
    %538 = arith.subf %537, %536 : vector<1x128xf32>
    %539 = arith.subf %507, %516 : vector<1x128xf32>
    %540 = arith.mulf %539, %522 : vector<1x128xf32>
    %541 = arith.mulf %540, %521 : vector<1x128xf32>
    %542 = arith.select %505, %538, %541 : vector<1x128xi1>, vector<1x128xf32>
    %543 = arith.subf %495, %502 : vector<1x128xf32>
    %544 = arith.subf %496, %502 : vector<1x128xf32>
    %545 = arith.subf %497, %502 : vector<1x128xf32>
    %546 = arith.mulf %534, %543 : vector<1x128xf32>
    %cst_138 = arith.constant 1.000000e+00 : f32
    %547 = vector.broadcast %cst_138 : f32 to vector<1x128xf32>
    %548 = arith.addf %547, %546 : vector<1x128xf32>
    %cst_139 = arith.constant 0.000000e+00 : f32
    %549 = vector.broadcast %cst_139 : f32 to vector<1x128xf32>
    %550 = arith.subf %549, %528 : vector<1x128xf32>
    %551 = arith.mulf %550, %488 : vector<1x128xf32>
    %552 = arith.mulf %534, %498 : vector<1x128xf32>
    %553 = arith.addf %551, %552 : vector<1x128xf32>
    %554 = arith.mulf %528, %486 : vector<1x128xf32>
    %555 = arith.mulf %534, %499 : vector<1x128xf32>
    %556 = arith.addf %554, %555 : vector<1x128xf32>
    %557 = arith.mulf %528, %488 : vector<1x128xf32>
    %558 = arith.mulf %534, %498 : vector<1x128xf32>
    %559 = arith.addf %557, %558 : vector<1x128xf32>
    %560 = arith.mulf %534, %544 : vector<1x128xf32>
    %cst_140 = arith.constant 1.000000e+00 : f32
    %561 = vector.broadcast %cst_140 : f32 to vector<1x128xf32>
    %562 = arith.addf %561, %560 : vector<1x128xf32>
    %cst_141 = arith.constant 0.000000e+00 : f32
    %563 = vector.broadcast %cst_141 : f32 to vector<1x128xf32>
    %564 = arith.subf %563, %528 : vector<1x128xf32>
    %565 = arith.mulf %564, %484 : vector<1x128xf32>
    %566 = arith.mulf %534, %500 : vector<1x128xf32>
    %567 = arith.addf %565, %566 : vector<1x128xf32>
    %cst_142 = arith.constant 0.000000e+00 : f32
    %568 = vector.broadcast %cst_142 : f32 to vector<1x128xf32>
    %569 = arith.subf %568, %528 : vector<1x128xf32>
    %570 = arith.mulf %569, %486 : vector<1x128xf32>
    %571 = arith.mulf %534, %499 : vector<1x128xf32>
    %572 = arith.addf %570, %571 : vector<1x128xf32>
    %573 = arith.mulf %528, %484 : vector<1x128xf32>
    %574 = arith.mulf %534, %500 : vector<1x128xf32>
    %575 = arith.addf %573, %574 : vector<1x128xf32>
    %576 = arith.mulf %534, %545 : vector<1x128xf32>
    %cst_143 = arith.constant 1.000000e+00 : f32
    %577 = vector.broadcast %cst_143 : f32 to vector<1x128xf32>
    %578 = arith.addf %577, %576 : vector<1x128xf32>
    %579 = arith.mulf %542, %543 : vector<1x128xf32>
    %cst_144 = arith.constant 1.000000e+00 : f32
    %580 = vector.broadcast %cst_144 : f32 to vector<1x128xf32>
    %581 = arith.addf %580, %579 : vector<1x128xf32>
    %cst_145 = arith.constant 0.000000e+00 : f32
    %582 = vector.broadcast %cst_145 : f32 to vector<1x128xf32>
    %583 = arith.subf %582, %534 : vector<1x128xf32>
    %584 = arith.mulf %583, %488 : vector<1x128xf32>
    %585 = arith.mulf %542, %498 : vector<1x128xf32>
    %586 = arith.addf %584, %585 : vector<1x128xf32>
    %587 = arith.mulf %534, %486 : vector<1x128xf32>
    %588 = arith.mulf %542, %499 : vector<1x128xf32>
    %589 = arith.addf %587, %588 : vector<1x128xf32>
    %590 = arith.mulf %534, %488 : vector<1x128xf32>
    %591 = arith.mulf %542, %498 : vector<1x128xf32>
    %592 = arith.addf %590, %591 : vector<1x128xf32>
    %593 = arith.mulf %542, %544 : vector<1x128xf32>
    %cst_146 = arith.constant 1.000000e+00 : f32
    %594 = vector.broadcast %cst_146 : f32 to vector<1x128xf32>
    %595 = arith.addf %594, %593 : vector<1x128xf32>
    %cst_147 = arith.constant 0.000000e+00 : f32
    %596 = vector.broadcast %cst_147 : f32 to vector<1x128xf32>
    %597 = arith.subf %596, %534 : vector<1x128xf32>
    %598 = arith.mulf %597, %484 : vector<1x128xf32>
    %599 = arith.mulf %542, %500 : vector<1x128xf32>
    %600 = arith.addf %598, %599 : vector<1x128xf32>
    %cst_148 = arith.constant 0.000000e+00 : f32
    %601 = vector.broadcast %cst_148 : f32 to vector<1x128xf32>
    %602 = arith.subf %601, %534 : vector<1x128xf32>
    %603 = arith.mulf %602, %486 : vector<1x128xf32>
    %604 = arith.mulf %542, %499 : vector<1x128xf32>
    %605 = arith.addf %603, %604 : vector<1x128xf32>
    %606 = arith.mulf %534, %484 : vector<1x128xf32>
    %607 = arith.mulf %542, %500 : vector<1x128xf32>
    %608 = arith.addf %606, %607 : vector<1x128xf32>
    %609 = arith.mulf %542, %545 : vector<1x128xf32>
    %cst_149 = arith.constant 1.000000e+00 : f32
    %610 = vector.broadcast %cst_149 : f32 to vector<1x128xf32>
    %611 = arith.addf %610, %609 : vector<1x128xf32>
    %612 = arith.mulf %581, %490 : vector<1x128xf32>
    %613 = arith.mulf %586, %492 : vector<1x128xf32>
    %614 = arith.addf %612, %613 : vector<1x128xf32>
    %615 = arith.mulf %589, %494 : vector<1x128xf32>
    %616 = arith.addf %614, %615 : vector<1x128xf32>
    %617 = arith.mulf %592, %490 : vector<1x128xf32>
    %618 = arith.mulf %595, %492 : vector<1x128xf32>
    %619 = arith.addf %617, %618 : vector<1x128xf32>
    %620 = arith.mulf %600, %494 : vector<1x128xf32>
    %621 = arith.addf %619, %620 : vector<1x128xf32>
    %622 = arith.mulf %605, %490 : vector<1x128xf32>
    %623 = arith.mulf %608, %492 : vector<1x128xf32>
    %624 = arith.addf %622, %623 : vector<1x128xf32>
    %625 = arith.mulf %611, %494 : vector<1x128xf32>
    %626 = arith.addf %624, %625 : vector<1x128xf32>
    %627 = arith.mulf %417, %548 : vector<1x128xf32>
    %628 = arith.mulf %422, %559 : vector<1x128xf32>
    %629 = arith.addf %627, %628 : vector<1x128xf32>
    %630 = arith.mulf %427, %572 : vector<1x128xf32>
    %631 = arith.addf %629, %630 : vector<1x128xf32>
    %632 = arith.mulf %417, %553 : vector<1x128xf32>
    %633 = arith.mulf %422, %562 : vector<1x128xf32>
    %634 = arith.addf %632, %633 : vector<1x128xf32>
    %635 = arith.mulf %427, %575 : vector<1x128xf32>
    %636 = arith.addf %634, %635 : vector<1x128xf32>
    %637 = arith.mulf %417, %556 : vector<1x128xf32>
    %638 = arith.mulf %422, %567 : vector<1x128xf32>
    %639 = arith.addf %637, %638 : vector<1x128xf32>
    %640 = arith.mulf %427, %578 : vector<1x128xf32>
    %641 = arith.addf %639, %640 : vector<1x128xf32>
    %642 = arith.mulf %432, %548 : vector<1x128xf32>
    %643 = arith.mulf %437, %559 : vector<1x128xf32>
    %644 = arith.addf %642, %643 : vector<1x128xf32>
    %645 = arith.mulf %442, %572 : vector<1x128xf32>
    %646 = arith.addf %644, %645 : vector<1x128xf32>
    %647 = arith.mulf %432, %553 : vector<1x128xf32>
    %648 = arith.mulf %437, %562 : vector<1x128xf32>
    %649 = arith.addf %647, %648 : vector<1x128xf32>
    %650 = arith.mulf %442, %575 : vector<1x128xf32>
    %651 = arith.addf %649, %650 : vector<1x128xf32>
    %652 = arith.mulf %432, %556 : vector<1x128xf32>
    %653 = arith.mulf %437, %567 : vector<1x128xf32>
    %654 = arith.addf %652, %653 : vector<1x128xf32>
    %655 = arith.mulf %442, %578 : vector<1x128xf32>
    %656 = arith.addf %654, %655 : vector<1x128xf32>
    %657 = arith.mulf %447, %548 : vector<1x128xf32>
    %658 = arith.mulf %452, %559 : vector<1x128xf32>
    %659 = arith.addf %657, %658 : vector<1x128xf32>
    %660 = arith.mulf %457, %572 : vector<1x128xf32>
    %661 = arith.addf %659, %660 : vector<1x128xf32>
    %662 = arith.mulf %447, %553 : vector<1x128xf32>
    %663 = arith.mulf %452, %562 : vector<1x128xf32>
    %664 = arith.addf %662, %663 : vector<1x128xf32>
    %665 = arith.mulf %457, %575 : vector<1x128xf32>
    %666 = arith.addf %664, %665 : vector<1x128xf32>
    %667 = arith.mulf %447, %556 : vector<1x128xf32>
    %668 = arith.mulf %452, %567 : vector<1x128xf32>
    %669 = arith.addf %667, %668 : vector<1x128xf32>
    %670 = arith.mulf %457, %578 : vector<1x128xf32>
    %671 = arith.addf %669, %670 : vector<1x128xf32>
    %672 = arith.mulf %417, %616 : vector<1x128xf32>
    %673 = arith.mulf %422, %621 : vector<1x128xf32>
    %674 = arith.addf %672, %673 : vector<1x128xf32>
    %675 = arith.mulf %427, %626 : vector<1x128xf32>
    %676 = arith.addf %674, %675 : vector<1x128xf32>
    %677 = arith.addf %676, %463 : vector<1x128xf32>
    %678 = arith.mulf %432, %616 : vector<1x128xf32>
    %679 = arith.mulf %437, %621 : vector<1x128xf32>
    %680 = arith.addf %678, %679 : vector<1x128xf32>
    %681 = arith.mulf %442, %626 : vector<1x128xf32>
    %682 = arith.addf %680, %681 : vector<1x128xf32>
    %683 = arith.addf %682, %469 : vector<1x128xf32>
    %684 = arith.mulf %447, %616 : vector<1x128xf32>
    %685 = arith.mulf %452, %621 : vector<1x128xf32>
    %686 = arith.addf %684, %685 : vector<1x128xf32>
    %687 = arith.mulf %457, %626 : vector<1x128xf32>
    %688 = arith.addf %686, %687 : vector<1x128xf32>
    %689 = arith.addf %688, %475 : vector<1x128xf32>
    %c18 = arith.constant 18 : index
    %690 = memref.load %arg26[%c18] : memref<24xf32, #tpu.memory_space<smem>>
    %c19 = arith.constant 19 : index
    %691 = memref.load %arg26[%c19] : memref<24xf32, #tpu.memory_space<smem>>
    %c20 = arith.constant 20 : index
    %692 = memref.load %arg26[%c20] : memref<24xf32, #tpu.memory_space<smem>>
    %c21 = arith.constant 21 : index
    %693 = memref.load %arg26[%c21] : memref<24xf32, #tpu.memory_space<smem>>
    %c22 = arith.constant 22 : index
    %694 = memref.load %arg26[%c22] : memref<24xf32, #tpu.memory_space<smem>>
    %c23 = arith.constant 23 : index
    %695 = memref.load %arg26[%c23] : memref<24xf32, #tpu.memory_space<smem>>
    %696 = vector.extract_strided_slice %108 {offsets = [3, 0], sizes = [1, 128], strides = [1, 1]} : vector<8x128xf32> to vector<1x128xf32>
    %697 = vector.broadcast %690 : f32 to vector<1x128xf32>
    %698 = arith.mulf %697, %696 : vector<1x128xf32>
    %699 = vector.broadcast %691 : f32 to vector<1x128xf32>
    %700 = arith.mulf %699, %696 : vector<1x128xf32>
    %701 = vector.broadcast %692 : f32 to vector<1x128xf32>
    %702 = arith.mulf %701, %696 : vector<1x128xf32>
    %703 = vector.broadcast %693 : f32 to vector<1x128xf32>
    %704 = arith.mulf %703, %696 : vector<1x128xf32>
    %705 = vector.broadcast %694 : f32 to vector<1x128xf32>
    %706 = arith.mulf %705, %696 : vector<1x128xf32>
    %707 = vector.broadcast %695 : f32 to vector<1x128xf32>
    %708 = arith.mulf %707, %696 : vector<1x128xf32>
    %709 = arith.mulf %698, %698 : vector<1x128xf32>
    %710 = arith.mulf %700, %700 : vector<1x128xf32>
    %711 = arith.mulf %702, %702 : vector<1x128xf32>
    %712 = arith.mulf %698, %700 : vector<1x128xf32>
    %713 = arith.mulf %698, %702 : vector<1x128xf32>
    %714 = arith.mulf %700, %702 : vector<1x128xf32>
    %715 = arith.addf %709, %710 : vector<1x128xf32>
    %716 = arith.addf %715, %711 : vector<1x128xf32>
    %717 = math.sqrt %716 : vector<1x128xf32>
    %cst_150 = arith.constant 0.00999999977 : f32
    %718 = vector.broadcast %cst_150 : f32 to vector<1x128xf32>
    %719 = arith.cmpf olt, %717, %718 : vector<1x128xf32>
    %cst_151 = arith.constant 1.000000e+00 : f32
    %720 = vector.broadcast %cst_151 : f32 to vector<1x128xf32>
    %721 = arith.select %719, %720, %717 : vector<1x128xi1>, vector<1x128xf32>
    %cst_152 = arith.constant 5.000000e-01 : f32
    %722 = vector.broadcast %cst_152 : f32 to vector<1x128xf32>
    %723 = arith.mulf %722, %721 : vector<1x128xf32>
    %724 = math.sin %723 : vector<1x128xf32>
    %cst_153 = arith.constant 5.000000e-01 : f32
    %725 = vector.broadcast %cst_153 : f32 to vector<1x128xf32>
    %726 = arith.mulf %725, %721 : vector<1x128xf32>
    %727 = math.cos %726 : vector<1x128xf32>
    %cst_154 = arith.constant 2.000000e+00 : f32
    %728 = vector.broadcast %cst_154 : f32 to vector<1x128xf32>
    %729 = arith.mulf %728, %724 : vector<1x128xf32>
    %730 = arith.mulf %729, %727 : vector<1x128xf32>
    %cst_155 = arith.constant 2.000000e+00 : f32
    %731 = vector.broadcast %cst_155 : f32 to vector<1x128xf32>
    %732 = arith.mulf %731, %724 : vector<1x128xf32>
    %733 = arith.mulf %732, %724 : vector<1x128xf32>
    %cst_156 = arith.constant 1.000000e+00 : f32
    %734 = vector.broadcast %cst_156 : f32 to vector<1x128xf32>
    %735 = arith.divf %734, %721 : vector<1x128xf32>
    %736 = arith.mulf %735, %735 : vector<1x128xf32>
    %cst_157 = arith.constant 0.166666672 : f32
    %737 = vector.broadcast %cst_157 : f32 to vector<1x128xf32>
    %738 = arith.mulf %716, %737 : vector<1x128xf32>
    %cst_158 = arith.constant 1.000000e+00 : f32
    %739 = vector.broadcast %cst_158 : f32 to vector<1x128xf32>
    %740 = arith.subf %739, %738 : vector<1x128xf32>
    %741 = arith.mulf %730, %735 : vector<1x128xf32>
    %742 = arith.select %719, %740, %741 : vector<1x128xi1>, vector<1x128xf32>
    %cst_159 = arith.constant 0.0416666679 : f32
    %743 = vector.broadcast %cst_159 : f32 to vector<1x128xf32>
    %744 = arith.mulf %716, %743 : vector<1x128xf32>
    %cst_160 = arith.constant 5.000000e-01 : f32
    %745 = vector.broadcast %cst_160 : f32 to vector<1x128xf32>
    %746 = arith.subf %745, %744 : vector<1x128xf32>
    %747 = arith.mulf %733, %736 : vector<1x128xf32>
    %748 = arith.select %719, %746, %747 : vector<1x128xi1>, vector<1x128xf32>
    %cst_161 = arith.constant 0.00833333377 : f32
    %749 = vector.broadcast %cst_161 : f32 to vector<1x128xf32>
    %750 = arith.mulf %716, %749 : vector<1x128xf32>
    %cst_162 = arith.constant 0.166666672 : f32
    %751 = vector.broadcast %cst_162 : f32 to vector<1x128xf32>
    %752 = arith.subf %751, %750 : vector<1x128xf32>
    %753 = arith.subf %721, %730 : vector<1x128xf32>
    %754 = arith.mulf %753, %736 : vector<1x128xf32>
    %755 = arith.mulf %754, %735 : vector<1x128xf32>
    %756 = arith.select %719, %752, %755 : vector<1x128xi1>, vector<1x128xf32>
    %757 = arith.subf %709, %716 : vector<1x128xf32>
    %758 = arith.subf %710, %716 : vector<1x128xf32>
    %759 = arith.subf %711, %716 : vector<1x128xf32>
    %760 = arith.mulf %748, %757 : vector<1x128xf32>
    %cst_163 = arith.constant 1.000000e+00 : f32
    %761 = vector.broadcast %cst_163 : f32 to vector<1x128xf32>
    %762 = arith.addf %761, %760 : vector<1x128xf32>
    %cst_164 = arith.constant 0.000000e+00 : f32
    %763 = vector.broadcast %cst_164 : f32 to vector<1x128xf32>
    %764 = arith.subf %763, %742 : vector<1x128xf32>
    %765 = arith.mulf %764, %702 : vector<1x128xf32>
    %766 = arith.mulf %748, %712 : vector<1x128xf32>
    %767 = arith.addf %765, %766 : vector<1x128xf32>
    %768 = arith.mulf %742, %700 : vector<1x128xf32>
    %769 = arith.mulf %748, %713 : vector<1x128xf32>
    %770 = arith.addf %768, %769 : vector<1x128xf32>
    %771 = arith.mulf %742, %702 : vector<1x128xf32>
    %772 = arith.mulf %748, %712 : vector<1x128xf32>
    %773 = arith.addf %771, %772 : vector<1x128xf32>
    %774 = arith.mulf %748, %758 : vector<1x128xf32>
    %cst_165 = arith.constant 1.000000e+00 : f32
    %775 = vector.broadcast %cst_165 : f32 to vector<1x128xf32>
    %776 = arith.addf %775, %774 : vector<1x128xf32>
    %cst_166 = arith.constant 0.000000e+00 : f32
    %777 = vector.broadcast %cst_166 : f32 to vector<1x128xf32>
    %778 = arith.subf %777, %742 : vector<1x128xf32>
    %779 = arith.mulf %778, %698 : vector<1x128xf32>
    %780 = arith.mulf %748, %714 : vector<1x128xf32>
    %781 = arith.addf %779, %780 : vector<1x128xf32>
    %cst_167 = arith.constant 0.000000e+00 : f32
    %782 = vector.broadcast %cst_167 : f32 to vector<1x128xf32>
    %783 = arith.subf %782, %742 : vector<1x128xf32>
    %784 = arith.mulf %783, %700 : vector<1x128xf32>
    %785 = arith.mulf %748, %713 : vector<1x128xf32>
    %786 = arith.addf %784, %785 : vector<1x128xf32>
    %787 = arith.mulf %742, %698 : vector<1x128xf32>
    %788 = arith.mulf %748, %714 : vector<1x128xf32>
    %789 = arith.addf %787, %788 : vector<1x128xf32>
    %790 = arith.mulf %748, %759 : vector<1x128xf32>
    %cst_168 = arith.constant 1.000000e+00 : f32
    %791 = vector.broadcast %cst_168 : f32 to vector<1x128xf32>
    %792 = arith.addf %791, %790 : vector<1x128xf32>
    %793 = arith.mulf %756, %757 : vector<1x128xf32>
    %cst_169 = arith.constant 1.000000e+00 : f32
    %794 = vector.broadcast %cst_169 : f32 to vector<1x128xf32>
    %795 = arith.addf %794, %793 : vector<1x128xf32>
    %cst_170 = arith.constant 0.000000e+00 : f32
    %796 = vector.broadcast %cst_170 : f32 to vector<1x128xf32>
    %797 = arith.subf %796, %748 : vector<1x128xf32>
    %798 = arith.mulf %797, %702 : vector<1x128xf32>
    %799 = arith.mulf %756, %712 : vector<1x128xf32>
    %800 = arith.addf %798, %799 : vector<1x128xf32>
    %801 = arith.mulf %748, %700 : vector<1x128xf32>
    %802 = arith.mulf %756, %713 : vector<1x128xf32>
    %803 = arith.addf %801, %802 : vector<1x128xf32>
    %804 = arith.mulf %748, %702 : vector<1x128xf32>
    %805 = arith.mulf %756, %712 : vector<1x128xf32>
    %806 = arith.addf %804, %805 : vector<1x128xf32>
    %807 = arith.mulf %756, %758 : vector<1x128xf32>
    %cst_171 = arith.constant 1.000000e+00 : f32
    %808 = vector.broadcast %cst_171 : f32 to vector<1x128xf32>
    %809 = arith.addf %808, %807 : vector<1x128xf32>
    %cst_172 = arith.constant 0.000000e+00 : f32
    %810 = vector.broadcast %cst_172 : f32 to vector<1x128xf32>
    %811 = arith.subf %810, %748 : vector<1x128xf32>
    %812 = arith.mulf %811, %698 : vector<1x128xf32>
    %813 = arith.mulf %756, %714 : vector<1x128xf32>
    %814 = arith.addf %812, %813 : vector<1x128xf32>
    %cst_173 = arith.constant 0.000000e+00 : f32
    %815 = vector.broadcast %cst_173 : f32 to vector<1x128xf32>
    %816 = arith.subf %815, %748 : vector<1x128xf32>
    %817 = arith.mulf %816, %700 : vector<1x128xf32>
    %818 = arith.mulf %756, %713 : vector<1x128xf32>
    %819 = arith.addf %817, %818 : vector<1x128xf32>
    %820 = arith.mulf %748, %698 : vector<1x128xf32>
    %821 = arith.mulf %756, %714 : vector<1x128xf32>
    %822 = arith.addf %820, %821 : vector<1x128xf32>
    %823 = arith.mulf %756, %759 : vector<1x128xf32>
    %cst_174 = arith.constant 1.000000e+00 : f32
    %824 = vector.broadcast %cst_174 : f32 to vector<1x128xf32>
    %825 = arith.addf %824, %823 : vector<1x128xf32>
    %826 = arith.mulf %795, %704 : vector<1x128xf32>
    %827 = arith.mulf %800, %706 : vector<1x128xf32>
    %828 = arith.addf %826, %827 : vector<1x128xf32>
    %829 = arith.mulf %803, %708 : vector<1x128xf32>
    %830 = arith.addf %828, %829 : vector<1x128xf32>
    %831 = arith.mulf %806, %704 : vector<1x128xf32>
    %832 = arith.mulf %809, %706 : vector<1x128xf32>
    %833 = arith.addf %831, %832 : vector<1x128xf32>
    %834 = arith.mulf %814, %708 : vector<1x128xf32>
    %835 = arith.addf %833, %834 : vector<1x128xf32>
    %836 = arith.mulf %819, %704 : vector<1x128xf32>
    %837 = arith.mulf %822, %706 : vector<1x128xf32>
    %838 = arith.addf %836, %837 : vector<1x128xf32>
    %839 = arith.mulf %825, %708 : vector<1x128xf32>
    %840 = arith.addf %838, %839 : vector<1x128xf32>
    %841 = arith.mulf %631, %762 : vector<1x128xf32>
    %842 = arith.mulf %636, %773 : vector<1x128xf32>
    %843 = arith.addf %841, %842 : vector<1x128xf32>
    %844 = arith.mulf %641, %786 : vector<1x128xf32>
    %845 = arith.addf %843, %844 : vector<1x128xf32>
    %846 = arith.mulf %631, %767 : vector<1x128xf32>
    %847 = arith.mulf %636, %776 : vector<1x128xf32>
    %848 = arith.addf %846, %847 : vector<1x128xf32>
    %849 = arith.mulf %641, %789 : vector<1x128xf32>
    %850 = arith.addf %848, %849 : vector<1x128xf32>
    %851 = arith.mulf %631, %770 : vector<1x128xf32>
    %852 = arith.mulf %636, %781 : vector<1x128xf32>
    %853 = arith.addf %851, %852 : vector<1x128xf32>
    %854 = arith.mulf %641, %792 : vector<1x128xf32>
    %855 = arith.addf %853, %854 : vector<1x128xf32>
    %856 = arith.mulf %646, %762 : vector<1x128xf32>
    %857 = arith.mulf %651, %773 : vector<1x128xf32>
    %858 = arith.addf %856, %857 : vector<1x128xf32>
    %859 = arith.mulf %656, %786 : vector<1x128xf32>
    %860 = arith.addf %858, %859 : vector<1x128xf32>
    %861 = arith.mulf %646, %767 : vector<1x128xf32>
    %862 = arith.mulf %651, %776 : vector<1x128xf32>
    %863 = arith.addf %861, %862 : vector<1x128xf32>
    %864 = arith.mulf %656, %789 : vector<1x128xf32>
    %865 = arith.addf %863, %864 : vector<1x128xf32>
    %866 = arith.mulf %646, %770 : vector<1x128xf32>
    %867 = arith.mulf %651, %781 : vector<1x128xf32>
    %868 = arith.addf %866, %867 : vector<1x128xf32>
    %869 = arith.mulf %656, %792 : vector<1x128xf32>
    %870 = arith.addf %868, %869 : vector<1x128xf32>
    %871 = arith.mulf %661, %762 : vector<1x128xf32>
    %872 = arith.mulf %666, %773 : vector<1x128xf32>
    %873 = arith.addf %871, %872 : vector<1x128xf32>
    %874 = arith.mulf %671, %786 : vector<1x128xf32>
    %875 = arith.addf %873, %874 : vector<1x128xf32>
    %876 = arith.mulf %661, %767 : vector<1x128xf32>
    %877 = arith.mulf %666, %776 : vector<1x128xf32>
    %878 = arith.addf %876, %877 : vector<1x128xf32>
    %879 = arith.mulf %671, %789 : vector<1x128xf32>
    %880 = arith.addf %878, %879 : vector<1x128xf32>
    %881 = arith.mulf %661, %770 : vector<1x128xf32>
    %882 = arith.mulf %666, %781 : vector<1x128xf32>
    %883 = arith.addf %881, %882 : vector<1x128xf32>
    %884 = arith.mulf %671, %792 : vector<1x128xf32>
    %885 = arith.addf %883, %884 : vector<1x128xf32>
    %886 = arith.mulf %631, %830 : vector<1x128xf32>
    %887 = arith.mulf %636, %835 : vector<1x128xf32>
    %888 = arith.addf %886, %887 : vector<1x128xf32>
    %889 = arith.mulf %641, %840 : vector<1x128xf32>
    %890 = arith.addf %888, %889 : vector<1x128xf32>
    %891 = arith.addf %890, %677 : vector<1x128xf32>
    %892 = arith.mulf %646, %830 : vector<1x128xf32>
    %893 = arith.mulf %651, %835 : vector<1x128xf32>
    %894 = arith.addf %892, %893 : vector<1x128xf32>
    %895 = arith.mulf %656, %840 : vector<1x128xf32>
    %896 = arith.addf %894, %895 : vector<1x128xf32>
    %897 = arith.addf %896, %683 : vector<1x128xf32>
    %898 = arith.mulf %661, %830 : vector<1x128xf32>
    %899 = arith.mulf %666, %835 : vector<1x128xf32>
    %900 = arith.addf %898, %899 : vector<1x128xf32>
    %901 = arith.mulf %671, %840 : vector<1x128xf32>
    %902 = arith.addf %900, %901 : vector<1x128xf32>
    %903 = arith.addf %902, %689 : vector<1x128xf32>
    %c0_175 = arith.constant 0 : index
    %904 = memref.load %arg27[%c0_175] : memref<16xf32, #tpu.memory_space<smem>>
    %c1_176 = arith.constant 1 : index
    %905 = memref.load %arg27[%c1_176] : memref<16xf32, #tpu.memory_space<smem>>
    %c2_177 = arith.constant 2 : index
    %906 = memref.load %arg27[%c2_177] : memref<16xf32, #tpu.memory_space<smem>>
    %c4_178 = arith.constant 4 : index
    %907 = memref.load %arg27[%c4_178] : memref<16xf32, #tpu.memory_space<smem>>
    %c5_179 = arith.constant 5 : index
    %908 = memref.load %arg27[%c5_179] : memref<16xf32, #tpu.memory_space<smem>>
    %c6_180 = arith.constant 6 : index
    %909 = memref.load %arg27[%c6_180] : memref<16xf32, #tpu.memory_space<smem>>
    %c8_181 = arith.constant 8 : index
    %910 = memref.load %arg27[%c8_181] : memref<16xf32, #tpu.memory_space<smem>>
    %c9_182 = arith.constant 9 : index
    %911 = memref.load %arg27[%c9_182] : memref<16xf32, #tpu.memory_space<smem>>
    %c10_183 = arith.constant 10 : index
    %912 = memref.load %arg27[%c10_183] : memref<16xf32, #tpu.memory_space<smem>>
    %c3_184 = arith.constant 3 : index
    %913 = memref.load %arg27[%c3_184] : memref<16xf32, #tpu.memory_space<smem>>
    %c7_185 = arith.constant 7 : index
    %914 = memref.load %arg27[%c7_185] : memref<16xf32, #tpu.memory_space<smem>>
    %c11_186 = arith.constant 11 : index
    %915 = memref.load %arg27[%c11_186] : memref<16xf32, #tpu.memory_space<smem>>
    %916 = vector.broadcast %904 : f32 to vector<1x128xf32>
    %917 = arith.mulf %845, %916 : vector<1x128xf32>
    %918 = vector.broadcast %907 : f32 to vector<1x128xf32>
    %919 = arith.mulf %850, %918 : vector<1x128xf32>
    %920 = arith.addf %917, %919 : vector<1x128xf32>
    %921 = vector.broadcast %910 : f32 to vector<1x128xf32>
    %922 = arith.mulf %855, %921 : vector<1x128xf32>
    %923 = arith.addf %920, %922 : vector<1x128xf32>
    %924 = vector.broadcast %905 : f32 to vector<1x128xf32>
    %925 = arith.mulf %845, %924 : vector<1x128xf32>
    %926 = vector.broadcast %908 : f32 to vector<1x128xf32>
    %927 = arith.mulf %850, %926 : vector<1x128xf32>
    %928 = arith.addf %925, %927 : vector<1x128xf32>
    %929 = vector.broadcast %911 : f32 to vector<1x128xf32>
    %930 = arith.mulf %855, %929 : vector<1x128xf32>
    %931 = arith.addf %928, %930 : vector<1x128xf32>
    %932 = vector.broadcast %906 : f32 to vector<1x128xf32>
    %933 = arith.mulf %845, %932 : vector<1x128xf32>
    %934 = vector.broadcast %909 : f32 to vector<1x128xf32>
    %935 = arith.mulf %850, %934 : vector<1x128xf32>
    %936 = arith.addf %933, %935 : vector<1x128xf32>
    %937 = vector.broadcast %912 : f32 to vector<1x128xf32>
    %938 = arith.mulf %855, %937 : vector<1x128xf32>
    %939 = arith.addf %936, %938 : vector<1x128xf32>
    %940 = vector.broadcast %904 : f32 to vector<1x128xf32>
    %941 = arith.mulf %860, %940 : vector<1x128xf32>
    %942 = vector.broadcast %907 : f32 to vector<1x128xf32>
    %943 = arith.mulf %865, %942 : vector<1x128xf32>
    %944 = arith.addf %941, %943 : vector<1x128xf32>
    %945 = vector.broadcast %910 : f32 to vector<1x128xf32>
    %946 = arith.mulf %870, %945 : vector<1x128xf32>
    %947 = arith.addf %944, %946 : vector<1x128xf32>
    %948 = vector.broadcast %905 : f32 to vector<1x128xf32>
    %949 = arith.mulf %860, %948 : vector<1x128xf32>
    %950 = vector.broadcast %908 : f32 to vector<1x128xf32>
    %951 = arith.mulf %865, %950 : vector<1x128xf32>
    %952 = arith.addf %949, %951 : vector<1x128xf32>
    %953 = vector.broadcast %911 : f32 to vector<1x128xf32>
    %954 = arith.mulf %870, %953 : vector<1x128xf32>
    %955 = arith.addf %952, %954 : vector<1x128xf32>
    %956 = vector.broadcast %906 : f32 to vector<1x128xf32>
    %957 = arith.mulf %860, %956 : vector<1x128xf32>
    %958 = vector.broadcast %909 : f32 to vector<1x128xf32>
    %959 = arith.mulf %865, %958 : vector<1x128xf32>
    %960 = arith.addf %957, %959 : vector<1x128xf32>
    %961 = vector.broadcast %912 : f32 to vector<1x128xf32>
    %962 = arith.mulf %870, %961 : vector<1x128xf32>
    %963 = arith.addf %960, %962 : vector<1x128xf32>
    %964 = vector.broadcast %904 : f32 to vector<1x128xf32>
    %965 = arith.mulf %875, %964 : vector<1x128xf32>
    %966 = vector.broadcast %907 : f32 to vector<1x128xf32>
    %967 = arith.mulf %880, %966 : vector<1x128xf32>
    %968 = arith.addf %965, %967 : vector<1x128xf32>
    %969 = vector.broadcast %910 : f32 to vector<1x128xf32>
    %970 = arith.mulf %885, %969 : vector<1x128xf32>
    %971 = arith.addf %968, %970 : vector<1x128xf32>
    %972 = vector.broadcast %905 : f32 to vector<1x128xf32>
    %973 = arith.mulf %875, %972 : vector<1x128xf32>
    %974 = vector.broadcast %908 : f32 to vector<1x128xf32>
    %975 = arith.mulf %880, %974 : vector<1x128xf32>
    %976 = arith.addf %973, %975 : vector<1x128xf32>
    %977 = vector.broadcast %911 : f32 to vector<1x128xf32>
    %978 = arith.mulf %885, %977 : vector<1x128xf32>
    %979 = arith.addf %976, %978 : vector<1x128xf32>
    %980 = vector.broadcast %906 : f32 to vector<1x128xf32>
    %981 = arith.mulf %875, %980 : vector<1x128xf32>
    %982 = vector.broadcast %909 : f32 to vector<1x128xf32>
    %983 = arith.mulf %880, %982 : vector<1x128xf32>
    %984 = arith.addf %981, %983 : vector<1x128xf32>
    %985 = vector.broadcast %912 : f32 to vector<1x128xf32>
    %986 = arith.mulf %885, %985 : vector<1x128xf32>
    %987 = arith.addf %984, %986 : vector<1x128xf32>
    %988 = vector.broadcast %913 : f32 to vector<1x128xf32>
    %989 = arith.mulf %845, %988 : vector<1x128xf32>
    %990 = vector.broadcast %914 : f32 to vector<1x128xf32>
    %991 = arith.mulf %850, %990 : vector<1x128xf32>
    %992 = arith.addf %989, %991 : vector<1x128xf32>
    %993 = vector.broadcast %915 : f32 to vector<1x128xf32>
    %994 = arith.mulf %855, %993 : vector<1x128xf32>
    %995 = arith.addf %992, %994 : vector<1x128xf32>
    %996 = arith.addf %995, %891 : vector<1x128xf32>
    %997 = vector.broadcast %913 : f32 to vector<1x128xf32>
    %998 = arith.mulf %860, %997 : vector<1x128xf32>
    %999 = vector.broadcast %914 : f32 to vector<1x128xf32>
    %1000 = arith.mulf %865, %999 : vector<1x128xf32>
    %1001 = arith.addf %998, %1000 : vector<1x128xf32>
    %1002 = vector.broadcast %915 : f32 to vector<1x128xf32>
    %1003 = arith.mulf %870, %1002 : vector<1x128xf32>
    %1004 = arith.addf %1001, %1003 : vector<1x128xf32>
    %1005 = arith.addf %1004, %897 : vector<1x128xf32>
    %1006 = vector.broadcast %913 : f32 to vector<1x128xf32>
    %1007 = arith.mulf %875, %1006 : vector<1x128xf32>
    %1008 = vector.broadcast %914 : f32 to vector<1x128xf32>
    %1009 = arith.mulf %880, %1008 : vector<1x128xf32>
    %1010 = arith.addf %1007, %1009 : vector<1x128xf32>
    %1011 = vector.broadcast %915 : f32 to vector<1x128xf32>
    %1012 = arith.mulf %885, %1011 : vector<1x128xf32>
    %1013 = arith.addf %1010, %1012 : vector<1x128xf32>
    %1014 = arith.addf %1013, %903 : vector<1x128xf32>
    %c0_187 = arith.constant 0 : index
    %c0_188 = arith.constant 0 : index
    %c0_189 = arith.constant 0 : index
    %1015 = vector.load %arg28[%c0_187, %c0_188, %c0_189] : memref<16x1x128xf32, #tpu.memory_space<vmem>>, vector<1x1x128xf32>
    %1016 = vector.shape_cast %1015 : vector<1x1x128xf32> to vector<1x128xf32>
    %1017 = vector.shape_cast %923 : vector<1x128xf32> to vector<1x1x128xf32>
    tpu.vector_store %arg28[%c0_187, %c0_188, %c0_189], %1017 {strides = array<i32>} : memref<16x1x128xf32, #tpu.memory_space<vmem>>, vector<1x1x128xf32>,
    %c1_190 = arith.constant 1 : index
    %c0_191 = arith.constant 0 : index
    %c0_192 = arith.constant 0 : index
    %1018 = vector.load %arg28[%c1_190, %c0_191, %c0_192] : memref<16x1x128xf32, #tpu.memory_space<vmem>>, vector<1x1x128xf32>
    %1019 = vector.shape_cast %1018 : vector<1x1x128xf32> to vector<1x128xf32>
    %1020 = vector.shape_cast %931 : vector<1x128xf32> to vector<1x1x128xf32>
    tpu.vector_store %arg28[%c1_190, %c0_191, %c0_192], %1020 {strides = array<i32>} : memref<16x1x128xf32, #tpu.memory_space<vmem>>, vector<1x1x128xf32>,
    %c2_193 = arith.constant 2 : index
    %c0_194 = arith.constant 0 : index
    %c0_195 = arith.constant 0 : index
    %1021 = vector.load %arg28[%c2_193, %c0_194, %c0_195] : memref<16x1x128xf32, #tpu.memory_space<vmem>>, vector<1x1x128xf32>
    %1022 = vector.shape_cast %1021 : vector<1x1x128xf32> to vector<1x128xf32>
    %1023 = vector.shape_cast %939 : vector<1x128xf32> to vector<1x1x128xf32>
    tpu.vector_store %arg28[%c2_193, %c0_194, %c0_195], %1023 {strides = array<i32>} : memref<16x1x128xf32, #tpu.memory_space<vmem>>, vector<1x1x128xf32>,
    %c3_196 = arith.constant 3 : index
    %c0_197 = arith.constant 0 : index
    %c0_198 = arith.constant 0 : index
    %1024 = vector.load %arg28[%c3_196, %c0_197, %c0_198] : memref<16x1x128xf32, #tpu.memory_space<vmem>>, vector<1x1x128xf32>
    %1025 = vector.shape_cast %1024 : vector<1x1x128xf32> to vector<1x128xf32>
    %1026 = vector.shape_cast %996 : vector<1x128xf32> to vector<1x1x128xf32>
    tpu.vector_store %arg28[%c3_196, %c0_197, %c0_198], %1026 {strides = array<i32>} : memref<16x1x128xf32, #tpu.memory_space<vmem>>, vector<1x1x128xf32>,
    %c4_199 = arith.constant 4 : index
    %c0_200 = arith.constant 0 : index
    %c0_201 = arith.constant 0 : index
    %1027 = vector.load %arg28[%c4_199, %c0_200, %c0_201] : memref<16x1x128xf32, #tpu.memory_space<vmem>>, vector<1x1x128xf32>
    %1028 = vector.shape_cast %1027 : vector<1x1x128xf32> to vector<1x128xf32>
    %1029 = vector.shape_cast %947 : vector<1x128xf32> to vector<1x1x128xf32>
    tpu.vector_store %arg28[%c4_199, %c0_200, %c0_201], %1029 {strides = array<i32>} : memref<16x1x128xf32, #tpu.memory_space<vmem>>, vector<1x1x128xf32>,
    %c5_202 = arith.constant 5 : index
    %c0_203 = arith.constant 0 : index
    %c0_204 = arith.constant 0 : index
    %1030 = vector.load %arg28[%c5_202, %c0_203, %c0_204] : memref<16x1x128xf32, #tpu.memory_space<vmem>>, vector<1x1x128xf32>
    %1031 = vector.shape_cast %1030 : vector<1x1x128xf32> to vector<1x128xf32>
    %1032 = vector.shape_cast %955 : vector<1x128xf32> to vector<1x1x128xf32>
    tpu.vector_store %arg28[%c5_202, %c0_203, %c0_204], %1032 {strides = array<i32>} : memref<16x1x128xf32, #tpu.memory_space<vmem>>, vector<1x1x128xf32>,
    %c6_205 = arith.constant 6 : index
    %c0_206 = arith.constant 0 : index
    %c0_207 = arith.constant 0 : index
    %1033 = vector.load %arg28[%c6_205, %c0_206, %c0_207] : memref<16x1x128xf32, #tpu.memory_space<vmem>>, vector<1x1x128xf32>
    %1034 = vector.shape_cast %1033 : vector<1x1x128xf32> to vector<1x128xf32>
    %1035 = vector.shape_cast %963 : vector<1x128xf32> to vector<1x1x128xf32>
    tpu.vector_store %arg28[%c6_205, %c0_206, %c0_207], %1035 {strides = array<i32>} : memref<16x1x128xf32, #tpu.memory_space<vmem>>, vector<1x1x128xf32>,
    %c7_208 = arith.constant 7 : index
    %c0_209 = arith.constant 0 : index
    %c0_210 = arith.constant 0 : index
    %1036 = vector.load %arg28[%c7_208, %c0_209, %c0_210] : memref<16x1x128xf32, #tpu.memory_space<vmem>>, vector<1x1x128xf32>
    %1037 = vector.shape_cast %1036 : vector<1x1x128xf32> to vector<1x128xf32>
    %1038 = vector.shape_cast %1005 : vector<1x128xf32> to vector<1x1x128xf32>
    tpu.vector_store %arg28[%c7_208, %c0_209, %c0_210], %1038 {strides = array<i32>} : memref<16x1x128xf32, #tpu.memory_space<vmem>>, vector<1x1x128xf32>,
    %c8_211 = arith.constant 8 : index
    %c0_212 = arith.constant 0 : index
    %c0_213 = arith.constant 0 : index
    %1039 = vector.load %arg28[%c8_211, %c0_212, %c0_213] : memref<16x1x128xf32, #tpu.memory_space<vmem>>, vector<1x1x128xf32>
    %1040 = vector.shape_cast %1039 : vector<1x1x128xf32> to vector<1x128xf32>
    %1041 = vector.shape_cast %971 : vector<1x128xf32> to vector<1x1x128xf32>
    tpu.vector_store %arg28[%c8_211, %c0_212, %c0_213], %1041 {strides = array<i32>} : memref<16x1x128xf32, #tpu.memory_space<vmem>>, vector<1x1x128xf32>,
    %c9_214 = arith.constant 9 : index
    %c0_215 = arith.constant 0 : index
    %c0_216 = arith.constant 0 : index
    %1042 = vector.load %arg28[%c9_214, %c0_215, %c0_216] : memref<16x1x128xf32, #tpu.memory_space<vmem>>, vector<1x1x128xf32>
    %1043 = vector.shape_cast %1042 : vector<1x1x128xf32> to vector<1x128xf32>
    %1044 = vector.shape_cast %979 : vector<1x128xf32> to vector<1x1x128xf32>
    tpu.vector_store %arg28[%c9_214, %c0_215, %c0_216], %1044 {strides = array<i32>} : memref<16x1x128xf32, #tpu.memory_space<vmem>>, vector<1x1x128xf32>,
    %c10_217 = arith.constant 10 : index
    %c0_218 = arith.constant 0 : index
    %c0_219 = arith.constant 0 : index
    %1045 = vector.load %arg28[%c10_217, %c0_218, %c0_219] : memref<16x1x128xf32, #tpu.memory_space<vmem>>, vector<1x1x128xf32>
    %1046 = vector.shape_cast %1045 : vector<1x1x128xf32> to vector<1x128xf32>
    %1047 = vector.shape_cast %987 : vector<1x128xf32> to vector<1x1x128xf32>
    tpu.vector_store %arg28[%c10_217, %c0_218, %c0_219], %1047 {strides = array<i32>} : memref<16x1x128xf32, #tpu.memory_space<vmem>>, vector<1x1x128xf32>,
    %c11_220 = arith.constant 11 : index
    %c0_221 = arith.constant 0 : index
    %c0_222 = arith.constant 0 : index
    %1048 = vector.load %arg28[%c11_220, %c0_221, %c0_222] : memref<16x1x128xf32, #tpu.memory_space<vmem>>, vector<1x1x128xf32>
    %1049 = vector.shape_cast %1048 : vector<1x1x128xf32> to vector<1x128xf32>
    %1050 = vector.shape_cast %1014 : vector<1x128xf32> to vector<1x1x128xf32>
    tpu.vector_store %arg28[%c11_220, %c0_221, %c0_222], %1050 {strides = array<i32>} : memref<16x1x128xf32, #tpu.memory_space<vmem>>, vector<1x1x128xf32>,
    %c12_223 = arith.constant 12 : index
    %c0_224 = arith.constant 0 : index
    %c0_225 = arith.constant 0 : index
    %1051 = vector.load %arg28[%c12_223, %c0_224, %c0_225] : memref<16x1x128xf32, #tpu.memory_space<vmem>>, vector<1x1x128xf32>
    %1052 = vector.shape_cast %1051 : vector<1x1x128xf32> to vector<1x128xf32>
    %1053 = vector.shape_cast %110 : vector<1x128xf32> to vector<1x1x128xf32>
    tpu.vector_store %arg28[%c12_223, %c0_224, %c0_225], %1053 {strides = array<i32>} : memref<16x1x128xf32, #tpu.memory_space<vmem>>, vector<1x1x128xf32>,
    %c13_226 = arith.constant 13 : index
    %c0_227 = arith.constant 0 : index
    %c0_228 = arith.constant 0 : index
    %1054 = vector.load %arg28[%c13_226, %c0_227, %c0_228] : memref<16x1x128xf32, #tpu.memory_space<vmem>>, vector<1x1x128xf32>
    %1055 = vector.shape_cast %1054 : vector<1x1x128xf32> to vector<1x128xf32>
    %1056 = vector.shape_cast %110 : vector<1x128xf32> to vector<1x1x128xf32>
    tpu.vector_store %arg28[%c13_226, %c0_227, %c0_228], %1056 {strides = array<i32>} : memref<16x1x128xf32, #tpu.memory_space<vmem>>, vector<1x1x128xf32>,
    %c14_229 = arith.constant 14 : index
    %c0_230 = arith.constant 0 : index
    %c0_231 = arith.constant 0 : index
    %1057 = vector.load %arg28[%c14_229, %c0_230, %c0_231] : memref<16x1x128xf32, #tpu.memory_space<vmem>>, vector<1x1x128xf32>
    %1058 = vector.shape_cast %1057 : vector<1x1x128xf32> to vector<1x128xf32>
    %1059 = vector.shape_cast %110 : vector<1x128xf32> to vector<1x1x128xf32>
    tpu.vector_store %arg28[%c14_229, %c0_230, %c0_231], %1059 {strides = array<i32>} : memref<16x1x128xf32, #tpu.memory_space<vmem>>, vector<1x1x128xf32>,
    %c15_232 = arith.constant 15 : index
    %c0_233 = arith.constant 0 : index
    %c0_234 = arith.constant 0 : index
    %1060 = vector.load %arg28[%c15_232, %c0_233, %c0_234] : memref<16x1x128xf32, #tpu.memory_space<vmem>>, vector<1x1x128xf32>
    %1061 = vector.shape_cast %1060 : vector<1x1x128xf32> to vector<1x128xf32>
    %1062 = vector.shape_cast %109 : vector<1x128xf32> to vector<1x1x128xf32>
    tpu.vector_store %arg28[%c15_232, %c0_233, %c0_234], %1062 {strides = array<i32>} : memref<16x1x128xf32, #tpu.memory_space<vmem>>, vector<1x1x128xf32>,
    return
  }
  func.func @transform_0(%arg0: i32) -> (i32, i32) {
    %c0_i32 = arith.constant 0 : i32
    %c0_i32_0 = arith.constant 0 : i32
    return %arg0, %c0_i32 : i32, i32
  }
  func.func @transform_1(%arg0: i32) -> (i32, i32) {
    %c0_i32 = arith.constant 0 : i32
    %c0_i32_0 = arith.constant 0 : i32
    %c0_i32_1 = arith.constant 0 : i32
    return %c0_i32, %c0_i32_0 : i32, i32
  }
  func.func @transform_2(%arg0: i32) -> (i32, i32) {
    %c0_i32 = arith.constant 0 : i32
    %c0_i32_0 = arith.constant 0 : i32
    %c0_i32_1 = arith.constant 0 : i32
    return %c0_i32, %c0_i32_0 : i32, i32
  }
  func.func @transform_3(%arg0: i32) -> (i32, i32) {
    %c0_i32 = arith.constant 0 : i32
    %c0_i32_0 = arith.constant 0 : i32
    %c0_i32_1 = arith.constant 0 : i32
    return %c0_i32, %c0_i32_0 : i32, i32
  }
  func.func @transform_4(%arg0: i32) -> (i32, i32) {
    %c0_i32 = arith.constant 0 : i32
    %c0_i32_0 = arith.constant 0 : i32
    %c0_i32_1 = arith.constant 0 : i32
    return %c0_i32, %c0_i32_0 : i32, i32
  }
  func.func @transform_5(%arg0: i32) -> (i32, i32) {
    %c0_i32 = arith.constant 0 : i32
    %c0_i32_0 = arith.constant 0 : i32
    %c0_i32_1 = arith.constant 0 : i32
    return %c0_i32, %c0_i32_0 : i32, i32
  }
  func.func @transform_6(%arg0: i32) -> (i32, i32) {
    %c0_i32 = arith.constant 0 : i32
    %c0_i32_0 = arith.constant 0 : i32
    %c0_i32_1 = arith.constant 0 : i32
    return %c0_i32, %c0_i32_0 : i32, i32
  }
  func.func @transform_7(%arg0: i32) -> (i32, i32) {
    %c0_i32 = arith.constant 0 : i32
    %c0_i32_0 = arith.constant 0 : i32
    %c0_i32_1 = arith.constant 0 : i32
    return %c0_i32, %c0_i32_0 : i32, i32
  }
  func.func @transform_8(%arg0: i32) -> (i32, i32) {
    %c0_i32 = arith.constant 0 : i32
    %c0_i32_0 = arith.constant 0 : i32
    %c0_i32_1 = arith.constant 0 : i32
    return %c0_i32, %c0_i32_0 : i32, i32
  }
  func.func @transform_9(%arg0: i32) -> (i32, i32) {
    %c0_i32 = arith.constant 0 : i32
    %c0_i32_0 = arith.constant 0 : i32
    %c0_i32_1 = arith.constant 0 : i32
    return %c0_i32, %c0_i32_0 : i32, i32
  }
  func.func @transform_10(%arg0: i32) -> (i32, i32) {
    %c0_i32 = arith.constant 0 : i32
    %c0_i32_0 = arith.constant 0 : i32
    %c0_i32_1 = arith.constant 0 : i32
    return %c0_i32, %c0_i32_0 : i32, i32
  }
  func.func @transform_11(%arg0: i32) -> (i32, i32) {
    %c0_i32 = arith.constant 0 : i32
    %c0_i32_0 = arith.constant 0 : i32
    %c0_i32_1 = arith.constant 0 : i32
    return %c0_i32, %c0_i32_0 : i32, i32
  }
  func.func @transform_12(%arg0: i32) -> (i32, i32) {
    %c0_i32 = arith.constant 0 : i32
    %c0_i32_0 = arith.constant 0 : i32
    %c0_i32_1 = arith.constant 0 : i32
    return %c0_i32, %c0_i32_0 : i32, i32
  }
  func.func @transform_13(%arg0: i32) -> (i32, i32) {
    %c0_i32 = arith.constant 0 : i32
    %c0_i32_0 = arith.constant 0 : i32
    %c0_i32_1 = arith.constant 0 : i32
    return %c0_i32, %c0_i32_0 : i32, i32
  }
  func.func @transform_14(%arg0: i32) -> (i32, i32) {
    %c0_i32 = arith.constant 0 : i32
    %c0_i32_0 = arith.constant 0 : i32
    %c0_i32_1 = arith.constant 0 : i32
    return %c0_i32, %c0_i32_0 : i32, i32
  }
  func.func @transform_15(%arg0: i32) -> (i32, i32) {
    %c0_i32 = arith.constant 0 : i32
    %c0_i32_0 = arith.constant 0 : i32
    %c0_i32_1 = arith.constant 0 : i32
    return %c0_i32, %c0_i32_0 : i32, i32
  }
  func.func @transform_16(%arg0: i32) -> (i32, i32) {
    %c0_i32 = arith.constant 0 : i32
    %c0_i32_0 = arith.constant 0 : i32
    %c0_i32_1 = arith.constant 0 : i32
    return %c0_i32, %c0_i32_0 : i32, i32
  }
  func.func @transform_17(%arg0: i32) -> (i32, i32) {
    %c0_i32 = arith.constant 0 : i32
    %c0_i32_0 = arith.constant 0 : i32
    %c0_i32_1 = arith.constant 0 : i32
    return %c0_i32, %c0_i32_0 : i32, i32
  }
  func.func @transform_18(%arg0: i32) -> (i32, i32) {
    %c0_i32 = arith.constant 0 : i32
    %c0_i32_0 = arith.constant 0 : i32
    %c0_i32_1 = arith.constant 0 : i32
    return %c0_i32, %c0_i32_0 : i32, i32
  }
  func.func @transform_19(%arg0: i32) -> (i32, i32) {
    %c0_i32 = arith.constant 0 : i32
    %c0_i32_0 = arith.constant 0 : i32
    %c0_i32_1 = arith.constant 0 : i32
    return %c0_i32, %c0_i32_0 : i32, i32
  }
  func.func @transform_20(%arg0: i32) -> (i32, i32) {
    %c0_i32 = arith.constant 0 : i32
    %c0_i32_0 = arith.constant 0 : i32
    %c0_i32_1 = arith.constant 0 : i32
    return %c0_i32, %c0_i32_0 : i32, i32
  }
  func.func @transform_21(%arg0: i32) -> (i32, i32) {
    %c0_i32 = arith.constant 0 : i32
    %c0_i32_0 = arith.constant 0 : i32
    %c0_i32_1 = arith.constant 0 : i32
    return %c0_i32, %c0_i32_0 : i32, i32
  }
  func.func @transform_22(%arg0: i32) -> (i32, i32) {
    %c0_i32 = arith.constant 0 : i32
    %c0_i32_0 = arith.constant 0 : i32
    %c0_i32_1 = arith.constant 0 : i32
    return %c0_i32, %c0_i32_0 : i32, i32
  }
  func.func @transform_23(%arg0: i32) -> (i32, i32) {
    %c0_i32 = arith.constant 0 : i32
    %c0_i32_0 = arith.constant 0 : i32
    %c0_i32_1 = arith.constant 0 : i32
    return %c0_i32, %c0_i32_0 : i32, i32
  }
  func.func @transform_24(%arg0: i32) -> (i32, i32) {
    %c0_i32 = arith.constant 0 : i32
    %c0_i32_0 = arith.constant 0 : i32
    %c0_i32_1 = arith.constant 0 : i32
    return %c0_i32, %c0_i32_0 : i32, i32
  }
  func.func @transform_25(%arg0: i32) -> i32 {
    %c0_i32 = arith.constant 0 : i32
    %c0_i32_0 = arith.constant 0 : i32
    return %c0_i32 : i32
  }
  func.func @transform_26(%arg0: i32) -> i32 {
    %c0_i32 = arith.constant 0 : i32
    %c0_i32_0 = arith.constant 0 : i32
    return %c0_i32 : i32
  }
  func.func @transform_27(%arg0: i32) -> (i32, i32, i32) {
    %c0_i32 = arith.constant 0 : i32
    %c0_i32_0 = arith.constant 0 : i32
    %c0_i32_1 = arith.constant 0 : i32
    return %c0_i32, %arg0, %c0_i32_0 : i32, i32, i32
  }
}

</mosaic_0001>

<bundles_post_ra>
// kernel: model_forward.1
= control target key start
LH: loop header
LB: loop body
LE: loop exit
PB: predicated region body
PF: predicated region fallthrough
CT: control target
= control target key end

     0   :  { %s16825_s0 = inlined_call_operand.vmem [shape: f32[128,8], index: 0, kind: input, shape index: {}]   ;;  %s16826_s1 = inlined_call_operand.vmem [shape: bf16[8,16], index: 1, kind: input, shape index: {}]   ;;  %s16827_s2 = inlined_call_operand.hbm [shape: f32[1,16], index: 2, kind: input, shape index: {}]   ;;  %s16828_s3 = inlined_call_operand.vmem [shape: bf16[16,32], index: 3, kind: input, shape index: {}]   ;;  %s16829_s4 = inlined_call_operand.hbm [shape: f32[1,32], index: 4, kind: input, shape index: {}]   ;;  %s16830_s5 = inlined_call_operand.hbm [shape: bf16[32,64], index: 5, kind: input, shape index: {}]   ;;  %s16831_s6 = inlined_call_operand.hbm [shape: f32[1,64], index: 6, kind: input, shape index: {}]   ;;  %s16832_s7 = inlined_call_operand.vmem [shape: bf16[64,128], index: 7, kind: input, shape index: {}]   ;;  %s16833_s8 = inlined_call_operand.hbm [shape: f32[1,128], index: 8, kind: input, shape index: {}]   ;;  %s16834_s9 = inlined_call_operand.hbm [shape: bf16[128,256], index: 9, kind: input, shape index: {}]   ;;  %s16835_s10 = inlined_call_operand.hbm [shape: f32[1,256], index: 10, kind: input, shape index: {}]   ;;  %s16836_s11 = inlined_call_operand.vmem [shape: bf16[256,512], index: 11, kind: input, shape index: {}]   ;;  %s16837_s12 = inlined_call_operand.hbm [shape: f32[1,512], index: 12, kind: input, shape index: {}]   ;;  %s16838_s13 = inlined_call_operand.hbm [shape: bf16[512,1024], index: 13, kind: input, shape index: {}]   ;;  %s16839_s14 = inlined_call_operand.hbm [shape: f32[1,1024], index: 14, kind: input, shape index: {}]   ;;  %s16840_s15 = inlined_call_operand.hbm [shape: bf16[1024,512], index: 15, kind: input, shape index: {}]   ;;  %s16841_s16 = inlined_call_operand.hbm [shape: f32[1,512], index: 16, kind: input, shape index: {}]   ;;  %s16842_s17 = inlined_call_operand.hbm [shape: bf16[512,256], index: 17, kind: input, shape index: {}]   ;;  %s16843_s18 = inlined_call_operand.hbm [shape: f32[1,256], index: 18, kind: input, shape index: {}]   ;;  %s16844_s19 = inlined_call_operand.hbm [shape: bf16[256,128], index: 19, kind: input, shape index: {}]   ;;  %s16845_s20 = inlined_call_operand.hbm [shape: f32[1,128], index: 20, kind: input, shape index: {}]   ;;  %s16846_s21 = inlined_call_operand.vmem [shape: bf16[128,64], index: 21, kind: input, shape index: {}]   ;;  %s16847_s22 = inlined_call_operand.hbm [shape: f32[1,64], index: 22, kind: input, shape index: {}]   ;;  %s16848_s23 = inlined_call_operand.vmem [shape: bf16[8,64], index: 23, kind: input, shape index: {}]   ;;  %s16849_s24 = inlined_call_operand.vmem [shape: f32[8,1], index: 24, kind: input, shape index: {}]   ;;  %s16850_s25 = inlined_call_operand.vmem [shape: f32[24], index: 25, kind: input, shape index: {}]   ;;  %s16851_s26 = inlined_call_operand.vmem [shape: f32[16], index: 26, kind: input, shape index: {}]   ;;  %s16852_s27 = inlined_call_operand.vmem [shape: f32[16,1,128], index: 27, kind: output, shape index: {}]  }
   0x1   :  { %16979 = sst [smem:[#allocation82_spill]] %s16825_s0 }
   0x2   :  { %16980 = sst [smem:[#allocation83_spill]] %s16826_s1 }
   0x3   :  { %16981 = sst [smem:[#allocation84_spill]] %s16827_s2 }
   0x4   :  { %16982 = sst [smem:[#allocation85_spill]] %s16828_s3 }
   0x5   :  { %16983 = sst [smem:[#allocation86_spill]] %s16829_s4 }
   0x6   :  { %16984 = sst [smem:[#allocation87_spill]] %s16830_s5 }
   0x7   :  { %16985 = sst [smem:[#allocation88_spill]] %s16831_s6 }
   0x8   :  { %16986 = sst [smem:[#allocation89_spill]] %s16832_s7 }
   0x9   :  { %16987 = sst [smem:[#allocation90_spill]] %s16833_s8 }
   0xa   :  { %16988 = sst [smem:[#allocation91_spill]] %s16834_s9 }
   0xb   :  { %16989 = sst [smem:[#allocation92_spill]] %s16835_s10 }
   0xc   :  { %16990 = sst [smem:[#allocation93_spill]] %s16836_s11 }
   0xd   :  { %16991 = sst [smem:[#allocation94_spill]] %s16848_s23 }
   0xe   :  { %16992 = sst [smem:[#allocation95_spill]] %s16849_s24 }
   0xf   :  { %32 = vsyncpa [#allocation3], 0 }
  0x10   :  { %33 = vsyncpa [#allocation6], 0 }
  0x11   :  { %34 = vsyncpa [#allocation9], 0 }
  0x12   :  { %35 = vsyncpa [#allocation12], 0 }
  0x13   :  { %36 = vsyncpa [#allocation15], 0 }
  0x14   :  { %37 = vsyncpa [#allocation18], 0 }
  0x15   :  { %38 = vsyncpa [#allocation21], 0 }
  0x16   :  { %39 = vsyncpa [#allocation24], 0 }
  0x17   :  { %40 = vsyncpa [#allocation27], 0 }
  0x18   :  { %41 = vsyncpa [#allocation4], 0 }
  0x19   :  { %42 = vsyncpa [#allocation31], 0  ;;  %s13369_s7 = smov [#allocation5]   ;;  %s13370_s8 = smov [#allocation8]  }
  0x1a   :  { %s65_s4 = sshll.u32 %s13369_s7, 4  ;;  %s87_s30 = sshll.u32 %s13370_s8, 4  ;;  %s66_s4 = int_to_ptr.vmem [resolvable:$true] %s65_s4  ;;  %s88_s30 = int_to_ptr.vmem [resolvable:$true] %s87_s30 }
  0x1b   :  { %s16993_s28 = sld [smem:[#allocation86_spill]] }
  0x21   :  { %s12949_s0 = scalar_lea.hbm %s16993_s28, 16 }
  0x22   :  { %p12950_p0 = scmp.ne.s32.totalorder %s16993_s28, %s12949_s0  ;;  %p12953_p1 = scmp.lt.u32.totalorder %s12949_s0, %s16993_s28 }
  0x24   :  { %p12955_p2 = pnand %p12953_p1, %p12950_p0 }
  0x26   :  { %12958 = shalt.err (!%p12955_p2)
}
  0x27   :  { %s12959_s11 = scalar_lea.vmem %s66_s4, 16  ;;  %s12963_s2 = scalar_lea.vmem %s66_s4, 32 }
  0x28   :  { %p12960_p3 = scmp.ne.s32.totalorder %s66_s4, %s12959_s11  ;;  %p12964_p4 = scmp.lt.s32.totalorder %s66_s4, %s66_s4 }
  0x29   :  { %p12965_p5 = scmp.lt.s32.totalorder %s12963_s2, %s12959_s11 }
  0x2b   :  { %p12966_p6 = por %p12965_p5, %p12964_p4 }
  0x2d   :  { %p12967_p7 = pnand %p12966_p6, %p12960_p3 }
  0x2f   :  { %12970 = shalt.err (!%p12967_p7)
}
  0x30   :  { %68 = dma.hbm_to_vmem [thread:$0]  %s16993_s28, 16, %s66_s4, [#allocation6]  }
  0x31   :  { %s16994_s5 = sld [smem:[#allocation88_spill]] }
  0x37   :  { %s12971_s10 = scalar_lea.hbm %s16994_s5, 16 }
  0x38   :  { %p12972_p8 = scmp.ne.s32.totalorder %s16994_s5, %s12971_s10  ;;  %p12975_p9 = scmp.lt.u32.totalorder %s12971_s10, %s16994_s5 }
  0x3a   :  { %p12977_p10 = pnand %p12975_p9, %p12972_p8 }
  0x3c   :  { %12980 = shalt.err (!%p12977_p10)
}
  0x3d   :  { %s12981_s11 = scalar_lea.vmem %s88_s30, 16  ;;  %s12985_s2 = scalar_lea.vmem %s88_s30, 32 }
  0x3e   :  { %p12982_p11 = scmp.ne.s32.totalorder %s88_s30, %s12981_s11  ;;  %p12986_p12 = scmp.lt.s32.totalorder %s88_s30, %s88_s30 }
  0x3f   :  { %p12987_p13 = scmp.lt.s32.totalorder %s12985_s2, %s12981_s11 }
  0x41   :  { %p12988_p0 = por %p12987_p13, %p12986_p12 }
  0x43   :  { %p12989_p1 = pnand %p12988_p0, %p12982_p11 }
  0x45   :  { %12992 = shalt.err (!%p12989_p1)
}
  0x46   :  { %90 = dma.hbm_to_vmem [thread:$0]  %s16994_s5, 16, %s88_s30, [#allocation9]  }
  0x47   :  { %s13371_s3 = smov [#allocation11]   ;;  %s16995_s10 = sld [smem:[#allocation91_spill]] }
  0x48   :  { %s108_s7 = sshll.u32 %s13371_s3, 4  ;;  %s109_s7 = int_to_ptr.vmem [resolvable:$true] %s108_s7 }
  0x4d   :  { %s12993_s29 = scalar_lea.hbm %s16995_s10, 2048 }
  0x4e   :  { %p12994_p2 = scmp.ne.s32.totalorder %s16995_s10, %s12993_s29  ;;  %p12997_p3 = scmp.lt.u32.totalorder %s12993_s29, %s16995_s10 }
  0x50   :  { %p12999_p4 = pnand %p12997_p3, %p12994_p2 }
  0x52   :  { %13002 = shalt.err (!%p12999_p4)
}
  0x53   :  { %s13003_s2 = scalar_lea.vmem %s109_s7, 2048  ;;  %p13008_p6 = scmp.lt.s32.totalorder %s109_s7, %s109_s7 }
  0x54   :  { %p13004_p5 = scmp.ne.s32.totalorder %s109_s7, %s13003_s2  ;;  %p13009_p7 = scmp.lt.s32.totalorder %s13003_s2, %s13003_s2 }
  0x56   :  { %p13010_p8 = por %p13009_p7, %p13008_p6 }
  0x58   :  { %p13011_p9 = pnand %p13010_p8, %p13004_p5 }
  0x5a   :  { %13014 = shalt.err (!%p13011_p9)
}
  0x5b   :  { %s13372_s30 = smov 128   ;;  %s13373_s5 = smov 8  }
  0x5c   :  { %114 = dma.hbm_to_vmem [thread:$0]  %s16995_s10, 2048, %s109_s7, [#allocation12], %s13372_s30, %s13372_s30, %s13373_s5  }
  0x5d   :  { %s13374_s3 = smov [#allocation14]   ;;  %s13375_s9 = smov [#allocation17]  }
  0x5e   :  { %s133_s8 = sshll.u32 %s13374_s3, 4  ;;  %s155_s29 = sshll.u32 %s13375_s9, 4  ;;  %s134_s8 = int_to_ptr.vmem [resolvable:$true] %s133_s8  ;;  %s156_s29 = int_to_ptr.vmem [resolvable:$true] %s155_s29 }
  0x5f   :  { %s13015_s6 = scalar_lea.hbm %s16837_s12, 64 }
  0x60   :  { %p13016_p10 = scmp.ne.s32.totalorder %s16837_s12, %s13015_s6  ;;  %p13019_p11 = scmp.lt.u32.totalorder %s13015_s6, %s16837_s12 }
  0x62   :  { %p13021_p12 = pnand %p13019_p11, %p13016_p10 }
  0x64   :  { %13024 = shalt.err (!%p13021_p12)
}
  0x65   :  { %s13025_s7 = scalar_lea.vmem %s134_s8, 64  ;;  %p13030_p0 = scmp.lt.s32.totalorder %s134_s8, %s134_s8 }
  0x66   :  { %p13026_p13 = scmp.ne.s32.totalorder %s134_s8, %s13025_s7  ;;  %p13031_p1 = scmp.lt.s32.totalorder %s13025_s7, %s13025_s7 }
  0x68   :  { %p13032_p2 = por %p13031_p1, %p13030_p0 }
  0x6a   :  { %p13033_p3 = pnand %p13032_p2, %p13026_p13 }
  0x6c   :  { %13036 = shalt.err (!%p13033_p3)
}
  0x6d   :  { %136 = dma.hbm_to_vmem [thread:$0]  %s16837_s12, 64, %s134_s8, [#allocation15]  }
  0x6e   :  { %s13037_s9 = scalar_lea.hbm %s16839_s14, 128 }
  0x6f   :  { %p13038_p4 = scmp.ne.s32.totalorder %s16839_s14, %s13037_s9  ;;  %p13041_p5 = scmp.lt.u32.totalorder %s13037_s9, %s16839_s14 }
  0x71   :  { %p13043_p6 = pnand %p13041_p5, %p13038_p4 }
  0x73   :  { %13046 = shalt.err (!%p13043_p6)
}
  0x74   :  { %s13047_s6 = scalar_lea.vmem %s156_s29, 128  ;;  %p13052_p8 = scmp.lt.s32.totalorder %s156_s29, %s156_s29 }
  0x75   :  { %p13048_p7 = scmp.ne.s32.totalorder %s156_s29, %s13047_s6  ;;  %p13053_p9 = scmp.lt.s32.totalorder %s13047_s6, %s13047_s6 }
  0x77   :  { %p13054_p10 = por %p13053_p9, %p13052_p8 }
  0x79   :  { %p13055_p11 = pnand %p13054_p10, %p13048_p7 }
  0x7b   :  { %13058 = shalt.err (!%p13055_p11)
}
  0x7c   :  { %158 = dma.hbm_to_vmem [thread:$0]  %s16839_s14, 128, %s156_s29, [#allocation18]  }
  0x7d   :  { %s13376_s11 = smov [#allocation20]   ;;  %s13377_s7 = smov [#allocation23]  }
  0x7e   :  { %s177_s2 = sshll.u32 %s13376_s11, 4  ;;  %s199_s10 = sshll.u32 %s13377_s7, 4  ;;  %s178_s2 = int_to_ptr.vmem [resolvable:$true] %s177_s2  ;;  %s200_s10 = int_to_ptr.vmem [resolvable:$true] %s199_s10 }
  0x7f   :  { %s13059_s3 = scalar_lea.hbm %s16841_s16, 64 }
  0x80   :  { %p13060_p12 = scmp.ne.s32.totalorder %s16841_s16, %s13059_s3  ;;  %p13063_p13 = scmp.lt.u32.totalorder %s13059_s3, %s16841_s16 }
  0x82   :  { %p13065_p0 = pnand %p13063_p13, %p13060_p12 }
  0x84   :  { %13068 = shalt.err (!%p13065_p0)
}
  0x85   :  { %s13069_s14 = scalar_lea.vmem %s178_s2, 64  ;;  %p13074_p2 = scmp.lt.s32.totalorder %s178_s2, %s178_s2 }
  0x86   :  { %p13070_p1 = scmp.ne.s32.totalorder %s178_s2, %s13069_s14  ;;  %p13075_p3 = scmp.lt.s32.totalorder %s13069_s14, %s13069_s14 }
  0x88   :  { %p13076_p4 = por %p13075_p3, %p13074_p2 }
  0x8a   :  { %p13077_p5 = pnand %p13076_p4, %p13070_p1 }
  0x8c   :  { %13080 = shalt.err (!%p13077_p5)
}
  0x8d   :  { %180 = dma.hbm_to_vmem [thread:$0]  %s16841_s16, 64, %s178_s2, [#allocation21]  }
  0x8e   :  { %s13081_s8 = scalar_lea.hbm %s16843_s18, 32 }
  0x8f   :  { %p13082_p6 = scmp.ne.s32.totalorder %s16843_s18, %s13081_s8  ;;  %p13085_p7 = scmp.lt.u32.totalorder %s13081_s8, %s16843_s18 }
  0x91   :  { %p13087_p8 = pnand %p13085_p7, %p13082_p6 }
  0x93   :  { %13090 = shalt.err (!%p13087_p8)
}
  0x94   :  { %s13091_s3 = scalar_lea.vmem %s200_s10, 32  ;;  %p13096_p10 = scmp.lt.s32.totalorder %s200_s10, %s200_s10 }
  0x95   :  { %p13092_p9 = scmp.ne.s32.totalorder %s200_s10, %s13091_s3  ;;  %p13097_p11 = scmp.lt.s32.totalorder %s13091_s3, %s13091_s3 }
  0x97   :  { %p13098_p12 = por %p13097_p11, %p13096_p10 }
  0x99   :  { %p13099_p13 = pnand %p13098_p12, %p13092_p9 }
  0x9b   :  { %13102 = shalt.err (!%p13099_p13)
}
  0x9c   :  { %202 = dma.hbm_to_vmem [thread:$0]  %s16843_s18, 32, %s200_s10, [#allocation24]  }
  0x9d   :  { %s13378_s9 = smov [#allocation26]   ;;  %s13379_s24 = smov [#allocation2]  }
  0x9e   :  { %s221_s23 = sshll.u32 %s13378_s9, 4  ;;  %s53_s0 = sshll.u32 %s13379_s24, 4  ;;  %s222_s23 = int_to_ptr.vmem [resolvable:$true] %s221_s23  ;;  %s54_s0 = int_to_ptr.vmem [resolvable:$true] %s53_s0 }
  0x9f   :  { %s13103_s1 = scalar_lea.hbm %s16845_s20, 16 }
  0xa0   :  { %p13104_p0 = scmp.ne.s32.totalorder %s16845_s20, %s13103_s1  ;;  %p13107_p1 = scmp.lt.u32.totalorder %s13103_s1, %s16845_s20 }
  0xa2   :  { %p13109_p2 = pnand %p13107_p1, %p13104_p0 }
  0xa4   :  { %13112 = shalt.err (!%p13109_p2)
}
  0xa5   :  { %s13113_s18 = scalar_lea.vmem %s222_s23, 16  ;;  %s13117_s10 = scalar_lea.vmem %s222_s23, 32 }
  0xa6   :  { %p13114_p3 = scmp.ne.s32.totalorder %s222_s23, %s13113_s18  ;;  %p13118_p4 = scmp.lt.s32.totalorder %s222_s23, %s222_s23 }
  0xa7   :  { %p13119_p5 = scmp.lt.s32.totalorder %s13117_s10, %s13113_s18 }
  0xa9   :  { %p13120_p6 = por %p13119_p5, %p13118_p4 }
  0xab   :  { %p13121_p7 = pnand %p13120_p6, %p13114_p3 }
  0xad   :  { %13124 = shalt.err (!%p13121_p7)
}
  0xae   :  { %224 = dma.hbm_to_vmem [thread:$0]  %s16845_s20, 16, %s222_s23, [#allocation27]  }
  0xaf   :  { %s16996_s16 = sld [smem:[#allocation84_spill]] }
  0xb5   :  { %s13125_s2 = scalar_lea.hbm %s16996_s16, 16 }
  0xb6   :  { %p13126_p8 = scmp.ne.s32.totalorder %s16996_s16, %s13125_s2  ;;  %p13129_p9 = scmp.lt.u32.totalorder %s13125_s2, %s16996_s16 }
  0xb8   :  { %p13131_p10 = pnand %p13129_p9, %p13126_p8 }
  0xba   :  { %13134 = shalt.err (!%p13131_p10)
}
  0xbb   :  { %s13135_s1 = scalar_lea.vmem %s54_s0, 16  ;;  %s13139_s6 = scalar_lea.vmem %s54_s0, 32 }
  0xbc   :  { %p13136_p11 = scmp.ne.s32.totalorder %s54_s0, %s13135_s1  ;;  %p13140_p12 = scmp.lt.s32.totalorder %s54_s0, %s54_s0 }
  0xbd   :  { %p13141_p13 = scmp.lt.s32.totalorder %s13139_s6, %s13135_s1 }
  0xbf   :  { %p13142_p0 = por %p13141_p13, %p13140_p12 }
  0xc1   :  { %p13143_p1 = pnand %p13142_p0, %p13136_p11 }
  0xc3   :  { %13146 = shalt.err (!%p13143_p1)
}
  0xc4   :  { %56 = dma.hbm_to_vmem [thread:$0]  %s16996_s16, 16, %s54_s0, [#allocation3]  }
  0xc5   :  { %s13380_s12 = smov [#allocation7]   ;;  %s16997_s10 = sld [smem:[#allocation87_spill]] }
  0xc6   :  { %s74_s8 = sshll.u32 %s13380_s12, 4  ;;  %s75_s8 = int_to_ptr.vmem [resolvable:$true] %s74_s8 }
  0xcb   :  { %s13147_s7 = scalar_lea.hbm %s16997_s10, 256 }
  0xcc   :  { %p13148_p2 = scmp.ne.s32.totalorder %s16997_s10, %s13147_s7  ;;  %p13151_p3 = scmp.lt.u32.totalorder %s13147_s7, %s16997_s10 }
  0xce   :  { %p13153_p4 = pnand %p13151_p3, %p13148_p2 }
  0xd0   :  { %13156 = shalt.err (!%p13153_p4)
}
  0xd1   :  { %s13157_s9 = scalar_lea.vmem %s75_s8, 256  ;;  %p13162_p6 = scmp.lt.s32.totalorder %s75_s8, %s75_s8 }
  0xd2   :  { %p13158_p5 = scmp.ne.s32.totalorder %s75_s8, %s13157_s9  ;;  %p13163_p7 = scmp.lt.s32.totalorder %s13157_s9, %s13157_s9 }
  0xd4   :  { %p13164_p8 = por %p13163_p7, %p13162_p6 }
  0xd6   :  { %p13165_p9 = pnand %p13164_p8, %p13158_p5 }
  0xd8   :  { %13168 = shalt.err (!%p13165_p9)
}
  0xd9   :  { %s13381_s0 = smov 64   ;;  %s13382_s16 = smov 4  }
  0xda   :  { %80 = dma.hbm_to_vmem [thread:$0]  %s16997_s10, 256, %s75_s8, [#allocation6], %s13381_s0, %s13381_s0, %s13382_s16  }
  0xdb   :  { %s13383_s29 = smov [#allocation10]   ;;  %s13384_s6 = smov [#allocation13]  }
  0xdc   :  { %s99_s1 = sshll.u32 %s13383_s29, 4  ;;  %s121_s20 = sshll.u32 %s13384_s6, 4  ;;  %s100_s1 = int_to_ptr.vmem [resolvable:$true] %s99_s1  ;;  %s122_s20 = int_to_ptr.vmem [resolvable:$true] %s121_s20 }
  0xdd   :  { %s16998_s11 = sld [smem:[#allocation90_spill]] }
  0xe3   :  { %s13169_s18 = scalar_lea.hbm %s16998_s11, 16 }
  0xe4   :  { %p13170_p10 = scmp.ne.s32.totalorder %s16998_s11, %s13169_s18  ;;  %p13173_p11 = scmp.lt.u32.totalorder %s13169_s18, %s16998_s11 }
  0xe6   :  { %p13175_p12 = pnand %p13173_p11, %p13170_p10 }
  0xe8   :  { %13178 = shalt.err (!%p13175_p12)
}
  0xe9   :  { %s13179_s8 = scalar_lea.vmem %s100_s1, 16  ;;  %s13183_s10 = scalar_lea.vmem %s100_s1, 32 }
  0xea   :  { %p13180_p13 = scmp.ne.s32.totalorder %s100_s1, %s13179_s8  ;;  %p13184_p0 = scmp.lt.s32.totalorder %s100_s1, %s100_s1 }
  0xeb   :  { %p13185_p1 = scmp.lt.s32.totalorder %s13183_s10, %s13179_s8 }
  0xed   :  { %p13186_p2 = por %p13185_p1, %p13184_p0 }
  0xef   :  { %p13187_p3 = pnand %p13186_p2, %p13180_p13 }
  0xf1   :  { %13190 = shalt.err (!%p13187_p3)
}
  0xf2   :  { %102 = dma.hbm_to_vmem [thread:$0]  %s16998_s11, 16, %s100_s1, [#allocation9]  }
  0xf3   :  { %s16999_s29 = sld [smem:[#allocation92_spill]] }
  0xf9   :  { %s13191_s6 = scalar_lea.hbm %s16999_s29, 32 }
  0xfa   :  { %p13192_p4 = scmp.ne.s32.totalorder %s16999_s29, %s13191_s6  ;;  %p13195_p5 = scmp.lt.u32.totalorder %s13191_s6, %s16999_s29 }
  0xfc   :  { %p13197_p6 = pnand %p13195_p5, %p13192_p4 }
  0xfe   :  { %13200 = shalt.err (!%p13197_p6)
}
  0xff   :  { %s13201_s4 = scalar_lea.vmem %s122_s20, 32  ;;  %p13206_p8 = scmp.lt.s32.totalorder %s122_s20, %s122_s20 }
 0x100   :  { %p13202_p7 = scmp.ne.s32.totalorder %s122_s20, %s13201_s4  ;;  %p13207_p9 = scmp.lt.s32.totalorder %s13201_s4, %s13201_s4 }
 0x102   :  { %p13208_p10 = por %p13207_p9, %p13206_p8 }
 0x104   :  { %p13209_p11 = pnand %p13208_p10, %p13202_p7 }
 0x106   :  { %13212 = shalt.err (!%p13209_p11)
}
 0x107   :  { %124 = dma.hbm_to_vmem [thread:$0]  %s16999_s29, 32, %s122_s20, [#allocation12]  }
 0x108   :  { %s13385_s28 = smov [#allocation16]   ;;  %s13213_s2 = scalar_lea.hbm %s16838_s13, 32768 }
 0x109   :  { %s142_s3 = sshll.u32 %s13385_s28, 4  ;;  %p13214_p12 = scmp.ne.s32.totalorder %s16838_s13, %s13213_s2  ;;  %s143_s3 = int_to_ptr.vmem [resolvable:$true] %s142_s3 }
 0x10a   :  { %p13217_p13 = scmp.lt.u32.totalorder %s13213_s2, %s16838_s13 }
 0x10c   :  { %p13219_p0 = pnand %p13217_p13, %p13214_p12 }
 0x10e   :  { %13222 = shalt.err (!%p13219_p0)
}
 0x10f   :  { %s13223_s23 = scalar_lea.vmem %s143_s3, 32768  ;;  %p13228_p2 = scmp.lt.s32.totalorder %s143_s3, %s143_s3 }
 0x110   :  { %p13224_p1 = scmp.ne.s32.totalorder %s143_s3, %s13223_s23  ;;  %p13229_p3 = scmp.lt.s32.totalorder %s13223_s23, %s13223_s23 }
 0x112   :  { %p13230_p4 = por %p13229_p3, %p13228_p2 }
 0x114   :  { %p13231_p5 = pnand %p13230_p4, %p13224_p1 }
 0x116   :  { %13234 = shalt.err (!%p13231_p5)
}
 0x117   :  { %s13386_s20 = smov 512   ;;  %s13387_s29 = smov 32  }
 0x118   :  { %148 = dma.hbm_to_vmem [thread:$0]  %s16838_s13, 32768, %s143_s3, [#allocation15], %s13386_s20, %s13386_s20, %s13387_s29  }
 0x119   :  { %s13388_s7 = smov [#allocation19]   ;;  %s13235_s28 = scalar_lea.hbm %s16840_s15, 32768 }
 0x11a   :  { %s164_s4 = sshll.u32 %s13388_s7, 4  ;;  %p13236_p6 = scmp.ne.s32.totalorder %s16840_s15, %s13235_s28  ;;  %s165_s4 = int_to_ptr.vmem [resolvable:$true] %s164_s4 }
 0x11b   :  { %p13239_p7 = scmp.lt.u32.totalorder %s13235_s28, %s16840_s15 }
 0x11d   :  { %p13241_p8 = pnand %p13239_p7, %p13236_p6 }
 0x11f   :  { %13244 = shalt.err (!%p13241_p8)
}
 0x120   :  { %s13245_s24 = scalar_lea.vmem %s165_s4, 32768  ;;  %p13250_p10 = scmp.lt.s32.totalorder %s165_s4, %s165_s4 }
 0x121   :  { %p13246_p9 = scmp.ne.s32.totalorder %s165_s4, %s13245_s24  ;;  %p13251_p11 = scmp.lt.s32.totalorder %s13245_s24, %s13245_s24 }
 0x123   :  { %p13252_p12 = por %p13251_p11, %p13250_p10 }
 0x125   :  { %p13253_p13 = pnand %p13252_p12, %p13246_p9 }
 0x127   :  { %13256 = shalt.err (!%p13253_p13)
}
 0x128   :  { %s13389_s13 = smov 256   ;;  %s13390_s3 = smov 16  }
 0x129   :  { %170 = dma.hbm_to_vmem [thread:$0]  %s16840_s15, 32768, %s165_s4, [#allocation18], %s13389_s13, %s13389_s13, %s13390_s3  }
 0x12a   :  { %s13391_s23 = smov [#allocation22]   ;;  %s13392_s29 = smov [#allocation25]  }
 0x12b   :  { %s186_s20 = sshll.u32 %s13391_s23, 4  ;;  %s208_s12 = sshll.u32 %s13392_s29, 4  ;;  %s187_s20 = int_to_ptr.vmem [resolvable:$true] %s186_s20  ;;  %s13720_s12 = int_to_ptr.vmem [resolvable:$true] %s208_s12 }
 0x12c   :  { %s13257_s1 = scalar_lea.hbm %s16842_s17, 8192 }
 0x12d   :  { %p13258_p0 = scmp.ne.s32.totalorder %s16842_s17, %s13257_s1  ;;  %p13261_p1 = scmp.lt.u32.totalorder %s13257_s1, %s16842_s17 }
 0x12f   :  { %p13263_p2 = pnand %p13261_p1, %p13258_p0 }
 0x131   :  { %13266 = shalt.err (!%p13263_p2)
}
 0x132   :  { %s13267_s15 = scalar_lea.vmem %s187_s20, 8192  ;;  %p13272_p4 = scmp.lt.s32.totalorder %s187_s20, %s187_s20 }
 0x133   :  { %p13268_p3 = scmp.ne.s32.totalorder %s187_s20, %s13267_s15  ;;  %p13273_p5 = scmp.lt.s32.totalorder %s13267_s15, %s13267_s15 }
 0x135   :  { %p13274_p6 = por %p13273_p5, %p13272_p4 }
 0x137   :  { %p13275_p7 = pnand %p13274_p6, %p13268_p3 }
 0x139   :  { %13278 = shalt.err (!%p13275_p7)
}
 0x13a   :  { %192 = dma.hbm_to_vmem [thread:$0]  %s16842_s17, 8192, %s187_s20, [#allocation21], %s13372_s30, %s13372_s30, %s13373_s5  }
 0x13b   :  { %s13279_s13 = scalar_lea.hbm %s16844_s19, 2048 }
 0x13c   :  { %p13280_p8 = scmp.ne.s32.totalorder %s16844_s19, %s13279_s13  ;;  %p13283_p9 = scmp.lt.u32.totalorder %s13279_s13, %s16844_s19 }
 0x13e   :  { %p13285_p10 = pnand %p13283_p9, %p13280_p8 }
 0x140   :  { %13288 = shalt.err (!%p13285_p10)
}
 0x141   :  { %s13289_s29 = scalar_lea.vmem %s13720_s12, 2048  ;;  %p13294_p12 = scmp.lt.s32.totalorder %s13720_s12, %s13720_s12 }
 0x142   :  { %p13290_p11 = scmp.ne.s32.totalorder %s13720_s12, %s13289_s29  ;;  %p13295_p13 = scmp.lt.s32.totalorder %s13289_s29, %s13289_s29 }
 0x144   :  { %p13296_p0 = por %p13295_p13, %p13294_p12 }
 0x146   :  { %p13297_p1 = pnand %p13296_p0, %p13290_p11 }
 0x148   :  { %13300 = shalt.err (!%p13297_p1)
}
 0x149   :  { %214 = dma.hbm_to_vmem [thread:$0]  %s16844_s19, 2048, %s13720_s12, [#allocation24], %s13381_s0, %s13381_s0, %s13382_s16  }
 0x14a   :  { %s247_s18 = sshll.u32 %s16850_s25, 4  ;;  %s13393_s7 = smov [#allocation28]   ;;  %s248_s18 = int_to_ptr.vmem [resolvable:$true] %s247_s18 }
 0x14b   :  { %s233_s1 = sshll.u32 %s13393_s7, 4  ;;  %s13301_s8 = scalar_lea.hbm %s16847_s22, 16  ;;  %s234_s1 = int_to_ptr.vmem [resolvable:$true] %s233_s1 }
 0x14c   :  { %p13302_p2 = scmp.ne.s32.totalorder %s16847_s22, %s13301_s8  ;;  %p13305_p3 = scmp.lt.u32.totalorder %s13301_s8, %s16847_s22 }
 0x14e   :  { %p13307_p4 = pnand %p13305_p3, %p13302_p2 }
 0x150   :  { %13310 = shalt.err (!%p13307_p4)
}
 0x151   :  { %s13311_s19 = scalar_lea.vmem %s234_s1, 16  ;;  %s13315_s25 = scalar_lea.vmem %s234_s1, 32 }
 0x152   :  { %p13312_p5 = scmp.ne.s32.totalorder %s234_s1, %s13311_s19  ;;  %p13316_p6 = scmp.lt.s32.totalorder %s234_s1, %s234_s1 }
 0x153   :  { %p13317_p7 = scmp.lt.s32.totalorder %s13315_s25, %s13311_s19 }
 0x155   :  { %p13318_p8 = por %p13317_p7, %p13316_p6 }
 0x157   :  { %p13319_p9 = pnand %p13318_p8, %p13312_p5 }
 0x159   :  { %13322 = shalt.err (!%p13319_p9)
}
 0x15a   :  { %236 = dma.hbm_to_vmem [thread:$0]  %s16847_s22, 16, %s234_s1, [#allocation27]  }
 0x15b   :  { %s13323_s12 = scalar_lea.vmem %s248_s18, 16  ;;  %p13328_p11 = scmp.lt.s32.totalorder %s248_s18, %s248_s18 }
 0x15c   :  { %p13324_p10 = scmp.ne.s32.totalorder %s248_s18, %s13323_s12  ;;  %p13329_p12 = scmp.lt.s32.totalorder %s13323_s12, %s13323_s12 }
 0x15e   :  { %p13330_p13 = por %p13329_p12, %p13328_p11 }
 0x160   :  { %p13331_p0 = pnand %p13330_p13, %p13324_p10 }
 0x162   :  { %13334 = shalt.err (!%p13331_p0)
}
 0x163   :  { %s13394_s9 = smov [#allocation29]   ;;  %s257_s3 = sshll.u32 %s16851_s26, 4  ;;  %s258_s3 = int_to_ptr.vmem [resolvable:$true] %s257_s3 }
 0x164   :  { %250 = dma.vmem_to_smem %s248_s18, 16, %s13394_s9, [#allocation4]  }
 0x165   :  { %s13335_s14 = scalar_lea.vmem %s258_s3, 16  ;;  %p13340_p2 = scmp.lt.s32.totalorder %s258_s3, %s258_s3 }
 0x166   :  { %p13336_p1 = scmp.ne.s32.totalorder %s258_s3, %s13335_s14  ;;  %p13341_p3 = scmp.lt.s32.totalorder %s13335_s14, %s13335_s14 }
 0x168   :  { %p13342_p4 = por %p13341_p3, %p13340_p2 }
 0x16a   :  { %p13343_p5 = pnand %p13342_p4, %p13336_p1 }
 0x16c   :  { %13346 = shalt.err (!%p13343_p5)
}
 0x16d   :  { %s13395_s22 = smov [#allocation30]  }
 0x16e   :  { %260 = dma.vmem_to_smem %s258_s3, 16, %s13395_s22, [#allocation31]  }
 0x16f   :  { %13347 = dma.done.wait [#allocation3], 16  }
 0x170   :  { %13348 = vsyncadd [#allocation3], 4294967280 }
 0x171   :  { %13349 = dma.done.wait [#allocation6], 272  }
 0x172   :  { %13350 = vsyncadd [#allocation6], 4294967024 }
 0x173   :  { %13351 = dma.done.wait [#allocation9], 32  }
 0x174   :  { %13352 = vsyncadd [#allocation9], 4294967264 }
 0x175   :  { %13353 = dma.done.wait [#allocation12], 2080  }
 0x176   :  { %13354 = vsyncadd [#allocation12], 4294965216 }
 0x177   :  { %13355 = dma.done.wait [#allocation15], 32832  }
 0x178   :  { %13356 = vsyncadd [#allocation15], 4294934464 }
 0x179   :  { %13357 = dma.done.wait [#allocation18], 32896  }
 0x17a   :  { %13358 = vsyncadd [#allocation18], 4294934400 }
 0x17b   :  { %13359 = dma.done.wait [#allocation21], 8256  }
 0x17c   :  { %13360 = vsyncadd [#allocation21], 4294959040 }
 0x17d   :  { %13361 = dma.done.wait [#allocation24], 2080  }
 0x17e   :  { %13362 = vsyncadd [#allocation24], 4294965216 }
 0x17f   :  { %13363 = dma.done.wait [#allocation27], 32  }
 0x180   :  { %13364 = vsyncadd [#allocation27], 4294967264 }
 0x181   :  { %13365 = dma.done.wait [#allocation4], 16  }
 0x182   :  { %13366 = vsyncadd [#allocation4], 4294967280 }
 0x183   :  { %13367 = dma.done.wait [#allocation31], 16  }
 0x184   :  { %13368 = vsyncadd [#allocation31], 4294967280 }
 0x185   :  { %318 = sfence }
 0x186   :  { %s17000_s23 = sld [smem:[#allocation83_spill]]  ;;  %vm377_vm0 = vcmask 1043456   ;;  %s17001_s30 = sld [smem:[#allocation82_spill]]  ;;  %vm352_vm1 = vcmask 64512   ;;  %v12286_v27 = vld [vmem:[#allocation7] sm:$0xff]   ;;  %v12287_v28 = vld [vmem:[#allocation7 + $0x8] sm:$0xff]  }
 0x187   :  { %s17002_s1 = sld [smem:[#allocation85_spill]]  ;;  %v13837_v29 = vld [vmem:[#allocation2] ss:$0 sm:$0xff]  ;;  %vm533_vm2 = vcmask 130048   ;;  %s17003_s28 = sld [smem:[#allocation89_spill]]  ;;  %vm718_vm3 = vcmask 261120  }
 0x188   :  { %vm919_vm4 = vcmask 523264   ;;  %s17004_s16 = sld [smem:[#allocation93_spill]]  ;;  %vm13398_vm5 = vmmov 0   ;;  %s17095_s6 = sld [smem:[#allocation95_spill]] }
 0x189   :  { %s17096_s17 = sld [smem:[#allocation94_spill]]  ;;  %s8856_s5 = sld [smem:[#allocation29]] }
 0x18a   :  { %s11312_s20 = sld [smem:[#allocation29 + $0x1]]  ;;  %s11325_s18 = sld [smem:[#allocation29 + $0x6]] }
 0x18b   :  { %s11326_s7 = sld [smem:[#allocation29 + $0x7]]  ;;  %s11340_s11 = sld [smem:[#allocation29 + $0xd]] }
 0x18c   :  { %v344_v0 = vld [vmem:[%s17000_s23] sm:$0xf]  ;;  %v321_v2 = vld [vmem:[%s17001_s30 + $0x8] sm:$0xff]  ;;  %v322_v5 = vld [vmem:[%s17001_s30 + $0x10] sm:$0xff]  ;;  %s15626_s8 = sld [smem:[#allocation29 + $0x12]]  ;;  %s15628_s10 = sld [smem:[#allocation29 + $0x13]] }
 0x18d   :  { %v320_v1 = vld [vmem:[%s17001_s30] sm:$0xff]  ;;  %12230 = vmatprep.subr.msk.bf16.mxu0 %vm377_vm0, %v344_v0  ;;  %v379_v3 = vsel %vm377_vm0, %v344_v0, 0  ;;  %v323_v6 = vld [vmem:[%s17001_s30 + $0x18] sm:$0xff]  ;;  %v325_v9 = vld [vmem:[%s17001_s30 + $0x28] sm:$0xff]  ;;  %s15635_s15 = sld [smem:[#allocation29 + $0x3]]  ;;  %s15637_s4 = sld [smem:[#allocation29 + $0x4]] }
 0x18e   :  { %v336_v4 = vpack.c.bf16 %v321_v2, %v320_v1  ;;  %v324_v7 = vld [vmem:[%s17001_s30 + $0x20] sm:$0xff]  ;;  %11523 = vmatpush3.bf16.msra.mxu0 %v379_v3  ;;  %v337_v8 = vpack.c.bf16 %v323_v6, %v322_v5  ;;  %v326_v11 = vld [vmem:[%s17001_s30 + $0x30] sm:$0xff]  ;;  %v327_v12 = vld [vmem:[%s17001_s30 + $0x38] sm:$0xff]  ;;  %s15642_s2 = sld [smem:[#allocation29 + $0x5]]  ;;  %s15646_s19 = sld [smem:[#allocation29 + $0x14]] }
 0x18f   :  { %v338_v10 = vpack.c.bf16 %v325_v9, %v324_v7  ;;  %v328_v13 = vld [vmem:[%s17001_s30 + $0x40] sm:$0xff]  ;;  %v329_v14 = vld [vmem:[%s17001_s30 + $0x48] sm:$0xff]  ;;  %v339_v15 = vpack.c.bf16 %v327_v12, %v326_v11  ;;  %v330_v17 = vld [vmem:[%s17001_s30 + $0x50] sm:$0xff]  ;;  %11558 = vmatprep.subr.bf16.mxu0 %v12286_v27  ;;  %s15660_s25 = sld [smem:[#allocation29 + $0x9]]  ;;  %s15662_s0 = sld [smem:[#allocation29 + $0xa]] }
 0x190   :  { %11524 = vmatprep.mubr.msk.bf16.mxu0 %vm352_vm1, %v336_v4  ;;  %v340_v16 = vpack.c.bf16 %v329_v14, %v328_v13  ;;  %v331_v18 = vld [vmem:[%s17001_s30 + $0x58] sm:$0xff]  ;;  %v332_v19 = vld [vmem:[%s17001_s30 + $0x60] sm:$0xff]  ;;  %v333_v20 = vld [vmem:[%s17001_s30 + $0x68] sm:$0xff]  ;;  %s15788_s12 = sld [smem:[#allocation29 + $0xb]]  ;;  %s16382_s9 = sld [smem:[#allocation29 + $0x10]] }
 0x191   :  { %11525 = vmatmul.mubr.msk.bf16.vlgmr.msra.gmra.mrb[0].mxu0 %vm352_vm1, %v337_v8  ;;  %v341_v21 = vpack.c.bf16 %v331_v18, %v330_v17  ;;  %v342_v22 = vpack.c.bf16 %v333_v20, %v332_v19  ;;  %v334_v23 = vld [vmem:[%s17001_s30 + $0x70] sm:$0xff]  ;;  %v335_v24 = vld [vmem:[%s17001_s30 + $0x78] sm:$0xff]  ;;  %v12285_v26 = vld [vmem:[%s17002_s1] sm:$0xff]   ;;  %s11327_s1 = sld [smem:[#allocation29 + $0x8]]  ;;  %s11339_s30 = sld [smem:[#allocation29 + $0xc]] }
 0x192   :  { %11528 = vmatprep.mubr.msk.bf16.mxu0 %vm352_vm1, %v338_v10  ;;  %v343_v25 = vpack.c.bf16 %v335_v24, %v334_v23  ;;  %11540 = vmatprep.subr.bf16.mxu1 %v12285_v26  ;;  %s16384_s24 = sld [smem:[#allocation29 + $0x11]]  ;;  %s11356_s14 = sld [smem:[#allocation29 + $0x15]] }
 0x193   :  { %11541 = vmatpush3.bf16.msra.mxu1 %v12285_v26  ;;  %11559 = vmatpush3.bf16.msra.mxu0 %v12286_v27  ;;  %s11357_s22 = sld [smem:[#allocation29 + $0x16]]  ;;  %s16535_s26 = sld [smem:[#allocation29 + $0x17]] }
 0x194   :  { %11560 = vmatprep.subr.bf16.mxu0 %v12287_v28  ;;  %s16549_s23 = sld [smem:[#allocation30 + $0x1]]  ;;  %s16551_s29 = sld [smem:[#allocation30 + $0x2]] }
 0x197   :  { %11561 = vmatpush3.bf16.msra.mxu0 %v12287_v28 }
 0x199   :  { %11529 = vmatmul.mubr.msk.bf16.gmra.mrb[4].mxu0 %vm352_vm1, %v339_v15 }
 0x19a   :  { %11532 = vmatprep.mubr.msk.bf16.mxu0 %vm352_vm1, %v340_v16 }
 0x1a1   :  { %11533 = vmatmul.mubr.msk.bf16.gmra.mrb[8].mxu0 %vm352_vm1, %v341_v21 }
 0x1a2   :  { %11536 = vmatprep.mubr.msk.bf16.mxu0 %vm352_vm1, %v342_v22 }
 0x1a9   :  { %11537 = vmatmul.mubr.msk.bf16.gmra.mrb[12].mxu0 %vm352_vm1, %v343_v25 }
 0x264   :  { %v11526_v30 = vpop.f32.mrb[0].mxu0 }
 0x265   :  { %v424_v31 = vadd.f32 %v11526_v30, %v13837_v29  ;;  %v415_v32 = vpop.f32.mrb[1].mxu0 }
 0x266   :  { %v416_v33 = vadd.f32 %v13837_v29, %v415_v32  ;;  %v11527_v34 = vpop.f32.mrb[2].mxu0 }
 0x267   :  { %v480_v35 = vmul.f32 0.01, %v424_v31  ;;  %v427_v36 = vadd.f32 %v11527_v34, %v13837_v29  ;;  %v418_v37 = vpop.f32.mrb[3].mxu0 }
 0x268   :  { %v478_v38 = vmul.f32 0.01, %v416_v33  ;;  %v419_v39 = vadd.f32 %v13837_v29, %v418_v37 }
 0x269   :  { %v481_v40 = vmul.f32 0.01, %v427_v36  ;;  %v496_v42 = vmax.f32 %v424_v31, %v480_v35 }
 0x26a   :  { %v479_v41 = vmul.f32 0.01, %v419_v39  ;;  %v494_v44 = vmax.f32 %v416_v33, %v478_v38 }
 0x26b   :  { %v497_v43 = vmax.f32 %v427_v36, %v481_v40  ;;  %v12290_v40 = vld [vmem:[%s17003_s28 + $0x10] sm:$0xff]  }
 0x26c   :  { %v495_v45 = vmax.f32 %v419_v39, %v479_v41  ;;  %v11530_v46 = vpop.f32.mrb[4].mxu0  ;;  %v12289_v39 = vld [vmem:[%s17003_s28 + $0x8] sm:$0xff]   ;;  %v13872_v41 = vld [vmem:[#allocation5] ss:$0 sm:$0xff] }
 0x26d   :  { %v511_v47 = vpack.c.bf16 %v497_v43, %v496_v42  ;;  %v440_v48 = vadd.f32 %v11530_v46, %v13837_v29  ;;  %v431_v49 = vpop.f32.mrb[5].mxu0 }
 0x26e   :  { %v432_v50 = vadd.f32 %v13837_v29, %v431_v49  ;;  %v11531_v51 = vpop.f32.mrb[6].mxu0  ;;  %v510_v52 = vpack.c.bf16 %v495_v45, %v494_v44 }
 0x26f   :  { %v484_v53 = vmul.f32 0.01, %v440_v48  ;;  %v443_v54 = vadd.f32 %v11531_v51, %v13837_v29  ;;  %v434_v55 = vpop.f32.mrb[7].mxu0 }
 0x270   :  { %v482_v56 = vmul.f32 0.01, %v432_v50  ;;  %v435_v57 = vadd.f32 %v13837_v29, %v434_v55  ;;  %11542 = vmatprep.mubr.msk.bf16.mxu1 %vm533_vm2, %v510_v52 }
 0x271   :  { %v500_v58 = vmax.f32 %v440_v48, %v484_v53  ;;  %v485_v59 = vmul.f32 0.01, %v443_v54  ;;  %11543 = vmatmul.mubr.msk.bf16.vlgmr.msra.gmra.mrb[0].mxu1 %vm533_vm2, %v511_v47 }
 0x272   :  { %v498_v60 = vmax.f32 %v432_v50, %v482_v56  ;;  %v483_v61 = vmul.f32 0.01, %v435_v57 }
 0x273   :  { %v501_v62 = vmax.f32 %v443_v54, %v485_v59 }
 0x274   :  { %v499_v63 = vmax.f32 %v435_v57, %v483_v61  ;;  %v11534_v0 = vpop.f32.mrb[8].mxu0 }
 0x275   :  { %v513_v1 = vpack.c.bf16 %v501_v62, %v500_v58  ;;  %v456_v2 = vadd.f32 %v11534_v0, %v13837_v29  ;;  %v447_v3 = vpop.f32.mrb[9].mxu0 }
 0x276   :  { %v512_v4 = vpack.c.bf16 %v499_v63, %v498_v60  ;;  %v448_v5 = vadd.f32 %v13837_v29, %v447_v3  ;;  %v11535_v6 = vpop.f32.mrb[10].mxu0 }
 0x277   :  { %v488_v7 = vmul.f32 0.01, %v456_v2  ;;  %v459_v8 = vadd.f32 %v11535_v6, %v13837_v29  ;;  %v450_v9 = vpop.f32.mrb[11].mxu0 }
 0x278   :  { %v486_v10 = vmul.f32 0.01, %v448_v5  ;;  %v451_v11 = vadd.f32 %v13837_v29, %v450_v9  ;;  %11546 = vmatprep.mubr.msk.bf16.mxu1 %vm533_vm2, %v512_v4 }
 0x279   :  { %v504_v12 = vmax.f32 %v456_v2, %v488_v7  ;;  %v489_v13 = vmul.f32 0.01, %v459_v8  ;;  %11547 = vmatmul.mubr.msk.bf16.gmra.mrb[4].mxu1 %vm533_vm2, %v513_v1 }
 0x27a   :  { %v502_v14 = vmax.f32 %v448_v5, %v486_v10  ;;  %v487_v15 = vmul.f32 0.01, %v451_v11 }
 0x27b   :  { %v505_v16 = vmax.f32 %v459_v8, %v489_v13 }
 0x27c   :  { %v503_v17 = vmax.f32 %v451_v11, %v487_v15  ;;  %v11538_v18 = vpop.f32.mrb[12].mxu0 }
 0x27d   :  { %v515_v19 = vpack.c.bf16 %v505_v16, %v504_v12  ;;  %v472_v20 = vadd.f32 %v11538_v18, %v13837_v29  ;;  %v463_v21 = vpop.f32.mrb[13].mxu0 }
 0x27e   :  { %v514_v22 = vpack.c.bf16 %v503_v17, %v502_v14  ;;  %v464_v23 = vadd.f32 %v13837_v29, %v463_v21  ;;  %v11539_v24 = vpop.f32.mrb[14].mxu0 }
 0x27f   :  { %v492_v25 = vmul.f32 0.01, %v472_v20  ;;  %v475_v26 = vadd.f32 %v11539_v24, %v13837_v29  ;;  %v466_v27 = vpop.f32.mrb[15].mxu0 }
 0x280   :  { %v490_v28 = vmul.f32 0.01, %v464_v23  ;;  %v467_v30 = vadd.f32 %v13837_v29, %v466_v27  ;;  %11550 = vmatprep.mubr.msk.bf16.mxu1 %vm533_vm2, %v514_v22  ;;  %v12288_v29 = vld [vmem:[%s17003_s28] sm:$0xff]  }
 0x281   :  { %v508_v31 = vmax.f32 %v472_v20, %v492_v25  ;;  %v493_v32 = vmul.f32 0.01, %v475_v26  ;;  %11551 = vmatmul.mubr.msk.bf16.gmra.mrb[8].mxu1 %vm533_vm2, %v515_v19  ;;  %11578 = vmatprep.subr.bf16.mxu1 %v12288_v29 }
 0x282   :  { %v506_v33 = vmax.f32 %v464_v23, %v490_v28  ;;  %v491_v34 = vmul.f32 0.01, %v467_v30  ;;  %11579 = vmatpush3.bf16.msra.mxu1 %v12288_v29 }
 0x283   :  { %v509_v35 = vmax.f32 %v475_v26, %v493_v32  ;;  %11580 = vmatprep.subr.bf16.mxu1 %v12289_v39 }
 0x284   :  { %v507_v36 = vmax.f32 %v467_v30, %v491_v34 }
 0x285   :  { %v517_v37 = vpack.c.bf16 %v509_v35, %v508_v31 }
 0x286   :  { %v516_v38 = vpack.c.bf16 %v507_v36, %v506_v33  ;;  %11581 = vmatpush3.bf16.msra.mxu1 %v12289_v39 }
 0x287   :  { %11582 = vmatprep.subr.bf16.mxu1 %v12290_v40 }
 0x288   :  { %11554 = vmatprep.mubr.msk.bf16.mxu1 %vm533_vm2, %v516_v38 }
 0x289   :  { %11555 = vmatmul.mubr.msk.bf16.gmra.mrb[12].mxu1 %vm533_vm2, %v517_v37 }
 0x28a   :  { %11583 = vmatpush3.bf16.msra.mxu1 %v12290_v40 }
 0x344   :  { %v11544_v42 = vpop.f32.mrb[0].mxu1 }
 0x345   :  { %v601_v43 = vadd.f32 %v11544_v42, %v13872_v41  ;;  %v592_v44 = vpop.f32.mrb[1].mxu1 }
 0x346   :  { %v593_v45 = vadd.f32 %v13872_v41, %v592_v44  ;;  %v11545_v46 = vpop.f32.mrb[2].mxu1 }
 0x347   :  { %v657_v47 = vmul.f32 0.01, %v601_v43  ;;  %v604_v48 = vadd.f32 %v11545_v46, %v13872_v41  ;;  %v595_v49 = vpop.f32.mrb[3].mxu1 }
 0x348   :  { %v655_v50 = vmul.f32 0.01, %v593_v45  ;;  %v596_v51 = vadd.f32 %v13872_v41, %v595_v49 }
 0x349   :  { %v658_v52 = vmul.f32 0.01, %v604_v48  ;;  %v673_v54 = vmax.f32 %v601_v43, %v657_v47 }
 0x34a   :  { %v656_v53 = vmul.f32 0.01, %v596_v51  ;;  %v671_v56 = vmax.f32 %v593_v45, %v655_v50 }
 0x34b   :  { %v674_v55 = vmax.f32 %v604_v48, %v658_v52  ;;  %v12294_v52 = vld [vmem:[#allocation11 + $0x4] ss:$8 sps:$4 sm:$0xff]  }
 0x34c   :  { %v672_v57 = vmax.f32 %v596_v51, %v656_v53  ;;  %v11548_v58 = vpop.f32.mrb[4].mxu1  ;;  %v12292_v51 = vld [vmem:[#allocation11] ss:$8 sps:$4 sm:$0xff]   ;;  %v12297_v53 = vld [vmem:[#allocation11 + $0x14] ss:$8 sps:$4 sm:$0xff]   ;;  %1189 = vmatprep.subr.bf16.mxu0 %v12294_v52 }
 0x34d   :  { %v688_v59 = vpack.c.bf16 %v674_v55, %v673_v54  ;;  %v617_v60 = vadd.f32 %v11548_v58, %v13872_v41  ;;  %v608_v61 = vpop.f32.mrb[5].mxu1  ;;  %v12295_v54 = vld [vmem:[#allocation11 + $0x10] ss:$8 sps:$4 sm:$0xff]   ;;  %v12300_v55 = vld [vmem:[#allocation11 + $0x24] ss:$8 sps:$4 sm:$0xff]  }
 0x34e   :  { %v687_v62 = vpack.c.bf16 %v672_v57, %v671_v56  ;;  %v609_v63 = vadd.f32 %v13872_v41, %v608_v61  ;;  %v11549_v0 = vpop.f32.mrb[6].mxu1  ;;  %v12298_v56 = vld [vmem:[#allocation11 + $0x20] ss:$8 sps:$4 sm:$0xff]   ;;  %v12303_v57 = vld [vmem:[#allocation11 + $0x34] ss:$8 sps:$4 sm:$0xff]  }
 0x34f   :  { %v661_v1 = vmul.f32 0.01, %v617_v60  ;;  %v620_v2 = vadd.f32 %v11549_v0, %v13872_v41  ;;  %v611_v3 = vpop.f32.mrb[7].mxu1  ;;  %v12301_v58 = vld [vmem:[#allocation11 + $0x30] ss:$8 sps:$4 sm:$0xff]  }
 0x350   :  { %v659_v4 = vmul.f32 0.01, %v609_v63  ;;  %v612_v5 = vadd.f32 %v13872_v41, %v611_v3  ;;  %11562 = vmatprep.mubr.msk.bf16.mxu0 %vm718_vm3, %v687_v62  ;;  %v13901_v61 = vld [vmem:[#allocation8] ss:$0 sm:$0xff] }
 0x351   :  { %v662_v6 = vmul.f32 0.01, %v620_v2  ;;  %11563 = vmatmul.mubr.msk.bf16.vlgmr.msra.gmra.mrb[16].mxu0 %vm718_vm3, %v688_v59  ;;  %v677_v8 = vmax.f32 %v617_v60, %v661_v1  ;;  %v12306_v59 = vld [vmem:[#allocation11 + $0x44] ss:$8 sps:$4 sm:$0xff]   ;;  %v12304_v60 = vld [vmem:[#allocation11 + $0x40] ss:$8 sps:$4 sm:$0xff]  }
 0x352   :  { %v660_v7 = vmul.f32 0.01, %v612_v5  ;;  %v675_v10 = vmax.f32 %v609_v63, %v659_v4  ;;  %1190 = vmatpush1.bf16.msra.mxu0 %v12292_v51 }
 0x353   :  { %v678_v9 = vmax.f32 %v620_v2, %v662_v6  ;;  %1191 = vmatprep.subr.bf16.mxu0 %v12297_v53 }
 0x354   :  { %v676_v11 = vmax.f32 %v612_v5, %v660_v7  ;;  %v11552_v12 = vpop.f32.mrb[8].mxu1 }
 0x355   :  { %v690_v13 = vpack.c.bf16 %v678_v9, %v677_v8  ;;  %v633_v14 = vadd.f32 %v11552_v12, %v13872_v41  ;;  %v624_v15 = vpop.f32.mrb[9].mxu1 }
 0x356   :  { %v689_v16 = vpack.c.bf16 %v676_v11, %v675_v10  ;;  %v625_v17 = vadd.f32 %v13872_v41, %v624_v15  ;;  %v11553_v18 = vpop.f32.mrb[10].mxu1  ;;  %1192 = vmatpush1.bf16.msra.mxu0 %v12295_v54 }
 0x357   :  { %v665_v19 = vmul.f32 0.01, %v633_v14  ;;  %v636_v20 = vadd.f32 %v11553_v18, %v13872_v41  ;;  %v627_v21 = vpop.f32.mrb[11].mxu1  ;;  %1193 = vmatprep.subr.bf16.mxu0 %v12300_v55 }
 0x358   :  { %v663_v22 = vmul.f32 0.01, %v625_v17  ;;  %v628_v23 = vadd.f32 %v13872_v41, %v627_v21  ;;  %11566 = vmatprep.mubr.msk.bf16.mxu0 %vm718_vm3, %v689_v16 }
 0x359   :  { %v681_v24 = vmax.f32 %v633_v14, %v665_v19  ;;  %v666_v25 = vmul.f32 0.01, %v636_v20  ;;  %11567 = vmatmul.mubr.msk.bf16.gmra.mrb[20].mxu0 %vm718_vm3, %v690_v13 }
 0x35a   :  { %v679_v26 = vmax.f32 %v625_v17, %v663_v22  ;;  %v664_v27 = vmul.f32 0.01, %v628_v23  ;;  %1194 = vmatpush1.bf16.msra.mxu0 %v12298_v56 }
 0x35b   :  { %v682_v28 = vmax.f32 %v636_v20, %v666_v25  ;;  %1195 = vmatprep.subr.bf16.mxu0 %v12303_v57 }
 0x35c   :  { %v680_v30 = vmax.f32 %v628_v23, %v664_v27  ;;  %v11556_v31 = vpop.f32.mrb[12].mxu1 }
 0x35d   :  { %v692_v32 = vpack.c.bf16 %v682_v28, %v681_v24  ;;  %v649_v33 = vadd.f32 %v11556_v31, %v13872_v41  ;;  %v640_v34 = vpop.f32.mrb[13].mxu1 }
 0x35e   :  { %v691_v35 = vpack.c.bf16 %v680_v30, %v679_v26  ;;  %v641_v36 = vadd.f32 %v13872_v41, %v640_v34  ;;  %v11557_v37 = vpop.f32.mrb[14].mxu1  ;;  %1196 = vmatpush1.bf16.msra.mxu0 %v12301_v58 }
 0x35f   :  { %v669_v38 = vmul.f32 0.01, %v649_v33  ;;  %v652_v29 = vadd.f32 %v11557_v37, %v13872_v41  ;;  %v643_v39 = vpop.f32.mrb[15].mxu1  ;;  %1197 = vmatprep.subr.bf16.mxu0 %v12306_v59 }
 0x360   :  { %v667_v40 = vmul.f32 0.01, %v641_v36  ;;  %v644_v42 = vadd.f32 %v13872_v41, %v643_v39  ;;  %11570 = vmatprep.mubr.msk.bf16.mxu0 %vm718_vm3, %v691_v35  ;;  %v12291_v41 = vld [vmem:[%s17003_s28 + $0x18] sm:$0xff]   ;;  %s11341_s28 = sld [smem:[#allocation29 + $0xe]] }
 0x361   :  { %v685_v43 = vmax.f32 %v649_v33, %v669_v38  ;;  %v670_v44 = vmul.f32 0.01, %v652_v29  ;;  %11571 = vmatmul.mubr.msk.bf16.gmra.mrb[24].mxu0 %vm718_vm3, %v692_v32  ;;  %11584 = vmatprep.subr.bf16.mxu1 %v12291_v41 }
 0x362   :  { %v683_v45 = vmax.f32 %v641_v36, %v667_v40  ;;  %v668_v46 = vmul.f32 0.01, %v644_v42  ;;  %11585 = vmatpush3.bf16.msra.mxu1 %v12291_v41  ;;  %1198 = vmatpush1.bf16.msra.mxu0 %v12304_v60 }
 0x363   :  { %v686_v47 = vmax.f32 %v652_v29, %v670_v44 }
 0x364   :  { %v684_v48 = vmax.f32 %v644_v42, %v668_v46 }
 0x365   :  { %v694_v49 = vpack.c.bf16 %v686_v47, %v685_v43 }
 0x366   :  { %v693_v50 = vpack.c.bf16 %v684_v48, %v683_v45 }
 0x368   :  { %11574 = vmatprep.mubr.msk.bf16.mxu0 %vm718_vm3, %v693_v50 }
 0x369   :  { %11575 = vmatmul.mubr.msk.bf16.gmra.mrb[28].mxu0 %vm718_vm3, %v694_v49 }
 0x424   :  { %v11564_v62 = vpop.f32.mrb[16].mxu0 }
 0x425   :  { %v786_v63 = vadd.f32 %v11564_v62, %v13901_v61  ;;  %v777_v0 = vpop.f32.mrb[17].mxu0 }
 0x426   :  { %v778_v1 = vadd.f32 %v13901_v61, %v777_v0  ;;  %v11565_v2 = vpop.f32.mrb[18].mxu0 }
 0x427   :  { %v842_v3 = vmul.f32 0.01, %v786_v63  ;;  %v789_v4 = vadd.f32 %v11565_v2, %v13901_v61  ;;  %v780_v5 = vpop.f32.mrb[19].mxu0 }
 0x428   :  { %v840_v6 = vmul.f32 0.01, %v778_v1  ;;  %v781_v7 = vadd.f32 %v13901_v61, %v780_v5 }
 0x429   :  { %v843_v8 = vmul.f32 0.01, %v789_v4  ;;  %v858_v10 = vmax.f32 %v786_v63, %v842_v3 }
 0x42a   :  { %v841_v9 = vmul.f32 0.01, %v781_v7  ;;  %v856_v12 = vmax.f32 %v778_v1, %v840_v6 }
 0x42b   :  { %v859_v11 = vmax.f32 %v789_v4, %v843_v8  ;;  %v12307_v8 = vld [vmem:[#allocation11 + $0x50] ss:$8 sps:$4 sm:$0xff]  }
 0x42c   :  { %v857_v13 = vmax.f32 %v781_v7, %v841_v9  ;;  %v11568_v14 = vpop.f32.mrb[20].mxu0  ;;  %v12309_v7 = vld [vmem:[#allocation11 + $0x54] ss:$8 sps:$4 sm:$0xff]   ;;  %v12310_v9 = vld [vmem:[#allocation11 + $0x60] ss:$8 sps:$4 sm:$0xff]  }
 0x42d   :  { %v873_v15 = vpack.c.bf16 %v859_v11, %v858_v10  ;;  %v802_v16 = vadd.f32 %v11568_v14, %v13901_v61  ;;  %v793_v17 = vpop.f32.mrb[21].mxu0  ;;  %1199 = vmatprep.subr.bf16.mxu0 %v12309_v7  ;;  %v12315_v10 = vld [vmem:[#allocation11 + $0x74] ss:$8 sps:$4 sm:$0xff]   ;;  %v12313_v11 = vld [vmem:[#allocation11 + $0x70] ss:$8 sps:$4 sm:$0xff]  }
 0x42e   :  { %v872_v18 = vpack.c.bf16 %v857_v13, %v856_v12  ;;  %v794_v19 = vadd.f32 %v13901_v61, %v793_v17  ;;  %v11569_v20 = vpop.f32.mrb[22].mxu0  ;;  %1200 = vmatpush1.bf16.msra.mxu0 %v12307_v8  ;;  %v13396_v12 = vmov 0   ;;  %v12316_v13 = vld [vmem:[%s17004_s16] ss:$16 sps:$4 sm:$0xff]   ;;  %v12318_v14 = vld [vmem:[%s17004_s16 + $0x4] ss:$16 sps:$4 sm:$0xff]  }
 0x42f   :  { %v846_v21 = vmul.f32 0.01, %v802_v16  ;;  %v805_v22 = vadd.f32 %v11569_v20, %v13901_v61  ;;  %v796_v23 = vpop.f32.mrb[23].mxu0  ;;  %1221 = vmatprep.mubr.bf16.mxu0 %v13396_v12  ;;  %12284 = vset.pattern.permute.xlu0 %v13396_v12  ;;  %v12322_v17 = vld [vmem:[%s17004_s16 + $0x20] ss:$16 sps:$4 sm:$0xff]  }
 0x430   :  { %v844_v24 = vmul.f32 0.01, %v794_v19  ;;  %v797_v25 = vadd.f32 %v13901_v61, %v796_v23  ;;  %11586 = vmatprep.mubr.msk.bf16.mxu1 %vm919_vm4, %v872_v18  ;;  %1788 = vmatprep.subr.bf16.mxu1 %v12318_v14  ;;  %v12330_v18 = vld [vmem:[%s17004_s16 + $0x44] ss:$16 sps:$4 sm:$0xff]   ;;  %v12340_v23 = vld [vmem:[%s17004_s16 + $0x80] ss:$16 sps:$4 sm:$0xff]  }
 0x431   :  { %v847_v26 = vmul.f32 0.01, %v805_v22  ;;  %11587 = vmatmul.mubr.msk.bf16.vlgmr.msra.gmra.mrb[16].mxu1 %vm919_vm4, %v873_v15  ;;  %v862_v28 = vmax.f32 %v802_v16, %v846_v21  ;;  %v12321_v15 = vld [vmem:[%s17004_s16 + $0xc] ss:$16 sps:$4 sm:$0xff]   ;;  %v12324_v16 = vld [vmem:[%s17004_s16 + $0x24] ss:$16 sps:$4 sm:$0xff]  }
 0x432   :  { %v845_v27 = vmul.f32 0.01, %v797_v25  ;;  %v860_v31 = vmax.f32 %v794_v19, %v844_v24  ;;  %1789 = vmatpush1.bf16.msra.mxu1 %v12316_v13  ;;  %v12328_v19 = vld [vmem:[%s17004_s16 + $0x40] ss:$16 sps:$4 sm:$0xff]   ;;  %v12336_v20 = vld [vmem:[%s17004_s16 + $0x64] ss:$16 sps:$4 sm:$0xff]  }
 0x433   :  { %v863_v30 = vmax.f32 %v805_v22, %v847_v26  ;;  %1790 = vmatprep.subr.bf16.mxu1 %v12324_v16  ;;  %v12334_v21 = vld [vmem:[%s17004_s16 + $0x60] ss:$16 sps:$4 sm:$0xff]   ;;  %v12342_v22 = vld [vmem:[%s17004_s16 + $0x84] ss:$16 sps:$4 sm:$0xff]  }
 0x434   :  { %v861_v32 = vmax.f32 %v797_v25, %v845_v27  ;;  %v11572_v33 = vpop.f32.mrb[24].mxu0  ;;  %v12348_v24 = vld [vmem:[%s17004_s16 + $0xa4] ss:$16 sps:$4 sm:$0xff]   ;;  %v12346_v25 = vld [vmem:[%s17004_s16 + $0xa0] ss:$16 sps:$4 sm:$0xff]  }
 0x435   :  { %v875_v34 = vpack.c.bf16 %v863_v30, %v862_v28  ;;  %v818_v35 = vadd.f32 %v11572_v33, %v13901_v61  ;;  %v809_v36 = vpop.f32.mrb[25].mxu0  ;;  %v12354_v26 = vld [vmem:[%s17004_s16 + $0xc4] ss:$16 sps:$4 sm:$0xff]   ;;  %v12352_v27 = vld [vmem:[%s17004_s16 + $0xc0] ss:$16 sps:$4 sm:$0xff]  }
 0x436   :  { %v874_v37 = vpack.c.bf16 %v861_v32, %v860_v31  ;;  %v810_v38 = vadd.f32 %v13901_v61, %v809_v36  ;;  %v11573_v29 = vpop.f32.mrb[26].mxu0  ;;  %1791 = vmatpush1.bf16.msra.mxu1 %v12322_v17  ;;  %v12360_v28 = vld [vmem:[%s17004_s16 + $0xe4] ss:$16 sps:$4 sm:$0xff]   ;;  %v12358_v30 = vld [vmem:[%s17004_s16 + $0xe0] ss:$16 sps:$4 sm:$0xff]  }
 0x437   :  { %v850_v39 = vmul.f32 0.01, %v818_v35  ;;  %v821_v40 = vadd.f32 %v11573_v29, %v13901_v61  ;;  %v812_v42 = vpop.f32.mrb[27].mxu0  ;;  %1792 = vmatprep.subr.bf16.mxu1 %v12330_v18  ;;  %v12366_v31 = vld [vmem:[%s17004_s16 + $0x104] ss:$16 sps:$4 sm:$0xff]  }
 0x438   :  { %v848_v43 = vmul.f32 0.01, %v810_v38  ;;  %v813_v44 = vadd.f32 %v13901_v61, %v812_v42  ;;  %11590 = vmatprep.mubr.msk.bf16.mxu1 %vm919_vm4, %v874_v37  ;;  %v12364_v32 = vld [vmem:[%s17004_s16 + $0x100] ss:$16 sps:$4 sm:$0xff]   ;;  %v12372_v33 = vld [vmem:[%s17004_s16 + $0x124] ss:$16 sps:$4 sm:$0xff]  }
 0x439   :  { %v866_v45 = vmax.f32 %v818_v35, %v850_v39  ;;  %v851_v46 = vmul.f32 0.01, %v821_v40  ;;  %11591 = vmatmul.mubr.msk.bf16.gmra.mrb[20].mxu1 %vm919_vm4, %v875_v34  ;;  %v12370_v34 = vld [vmem:[%s17004_s16 + $0x120] ss:$16 sps:$4 sm:$0xff]   ;;  %v12378_v35 = vld [vmem:[%s17004_s16 + $0x144] ss:$16 sps:$4 sm:$0xff]  }
 0x43a   :  { %v864_v47 = vmax.f32 %v810_v38, %v848_v43  ;;  %v849_v48 = vmul.f32 0.01, %v813_v44  ;;  %1793 = vmatpush1.bf16.msra.mxu1 %v12328_v19  ;;  %v12376_v36 = vld [vmem:[%s17004_s16 + $0x140] ss:$16 sps:$4 sm:$0xff]   ;;  %v12384_v37 = vld [vmem:[%s17004_s16 + $0x164] ss:$16 sps:$4 sm:$0xff]  }
 0x43b   :  { %v867_v49 = vmax.f32 %v821_v40, %v851_v46  ;;  %1794 = vmatprep.subr.bf16.mxu1 %v12336_v20  ;;  %v12382_v38 = vld [vmem:[%s17004_s16 + $0x160] ss:$16 sps:$4 sm:$0xff]   ;;  %v12390_v29 = vld [vmem:[%s17004_s16 + $0x184] ss:$16 sps:$4 sm:$0xff]   ;;  %v12331_v20 = vld [vmem:[%s17004_s16 + $0x48] ss:$16 sps:$4 sm:$0xff]  }
 0x43c   :  { %v865_v50 = vmax.f32 %v813_v44, %v849_v48  ;;  %v11576_v41 = vpop.f32.mrb[28].mxu0  ;;  %v12388_v39 = vld [vmem:[%s17004_s16 + $0x180] ss:$16 sps:$4 sm:$0xff]   ;;  %v14010_v40 = vld [vmem:[#allocation10] ss:$0 sm:$0xff] }
 0x43d   :  { %v877_v51 = vpack.c.bf16 %v867_v49, %v866_v45  ;;  %v834_v52 = vadd.f32 %v11576_v41, %v13901_v61  ;;  %v825_v53 = vpop.f32.mrb[29].mxu0 }
 0x43e   :  { %v876_v54 = vpack.c.bf16 %v865_v50, %v864_v47  ;;  %v826_v55 = vadd.f32 %v13901_v61, %v825_v53  ;;  %v11577_v56 = vpop.f32.mrb[30].mxu0  ;;  %1795 = vmatpush1.bf16.msra.mxu1 %v12334_v21 }
 0x43f   :  { %v854_v57 = vmul.f32 0.01, %v834_v52  ;;  %v837_v58 = vadd.f32 %v11577_v56, %v13901_v61  ;;  %v828_v59 = vpop.f32.mrb[31].mxu0  ;;  %1796 = vmatprep.subr.bf16.mxu1 %v12342_v22 }
 0x440   :  { %v852_v60 = vmul.f32 0.01, %v826_v55  ;;  %v829_v62 = vadd.f32 %v13901_v61, %v828_v59  ;;  %11594 = vmatprep.mubr.msk.bf16.mxu1 %vm919_vm4, %v876_v54  ;;  %v12312_v61 = vld [vmem:[#allocation11 + $0x64] ss:$8 sps:$4 sm:$0xff]  }
 0x441   :  { %v870_v63 = vmax.f32 %v834_v52, %v854_v57  ;;  %v855_v0 = vmul.f32 0.01, %v837_v58  ;;  %11595 = vmatmul.mubr.msk.bf16.gmra.mrb[24].mxu1 %vm919_vm4, %v877_v51  ;;  %1201 = vmatprep.subr.bf16.mxu0 %v12312_v61  ;;  %v12325_v61 = vld [vmem:[%s17004_s16 + $0x28] ss:$16 sps:$4 sm:$0xff]  }
 0x442   :  { %v868_v1 = vmax.f32 %v826_v55, %v852_v60  ;;  %v853_v2 = vmul.f32 0.01, %v829_v62  ;;  %1202 = vmatpush1.bf16.msra.mxu0 %v12310_v9  ;;  %1797 = vmatpush1.bf16.msra.mxu1 %v12340_v23 }
 0x443   :  { %v871_v3 = vmax.f32 %v837_v58, %v855_v0  ;;  %1203 = vmatprep.subr.bf16.mxu0 %v12315_v10  ;;  %1798 = vmatprep.subr.bf16.mxu1 %v12348_v24  ;;  %v12333_v10 = vld [vmem:[%s17004_s16 + $0x4c] ss:$16 sps:$4 sm:$0xff]  }
 0x444   :  { %v869_v4 = vmax.f32 %v829_v62, %v853_v2  ;;  %v12319_v62 = vld [vmem:[%s17004_s16 + $0x8] ss:$16 sps:$4 sm:$0xff]   ;;  %v12327_v2 = vld [vmem:[%s17004_s16 + $0x2c] ss:$16 sps:$4 sm:$0xff]  }
 0x445   :  { %v879_v5 = vpack.c.bf16 %v871_v3, %v870_v63  ;;  %v12339_v24 = vld [vmem:[%s17004_s16 + $0x6c] ss:$16 sps:$4 sm:$0xff]  }
 0x446   :  { %v878_v6 = vpack.c.bf16 %v869_v4, %v868_v1  ;;  %1204 = vmatpush1.bf16.msra.mxu0 %v12313_v11  ;;  %1799 = vmatpush1.bf16.msra.mxu1 %v12346_v25 }
 0x447   :  { %1901 = vmatprep.subr.bf16.mxu0 %v12321_v15  ;;  %1800 = vmatprep.subr.bf16.mxu1 %v12354_v26 }
 0x448   :  { %11598 = vmatprep.mubr.msk.bf16.mxu1 %vm919_vm4, %v878_v6 }
 0x449   :  { %11599 = vmatmul.mubr.msk.bf16.gmra.mrb[28].mxu1 %vm919_vm4, %v879_v5 }
 0x44a   :  { %1801 = vmatpush1.bf16.msra.mxu1 %v12352_v27 }
 0x44b   :  { %1802 = vmatprep.subr.bf16.mxu1 %v12360_v28 }
 0x44e   :  { %1803 = vmatpush1.bf16.msra.mxu1 %v12358_v30 }
 0x44f   :  { %1804 = vmatprep.subr.bf16.mxu1 %v12366_v31 }
 0x452   :  { %1805 = vmatpush1.bf16.msra.mxu1 %v12364_v32  ;;  %v12337_v32 = vld [vmem:[%s17004_s16 + $0x68] ss:$16 sps:$4 sm:$0xff]  }
 0x453   :  { %1806 = vmatprep.subr.bf16.mxu1 %v12372_v33 }
 0x456   :  { %1807 = vmatpush1.bf16.msra.mxu1 %v12370_v34  ;;  %v12345_v34 = vld [vmem:[%s17004_s16 + $0x8c] ss:$16 sps:$4 sm:$0xff]  }
 0x457   :  { %1808 = vmatprep.subr.bf16.mxu1 %v12378_v35 }
 0x45a   :  { %1809 = vmatpush1.bf16.msra.mxu1 %v12376_v36 }
 0x45b   :  { %1810 = vmatprep.subr.bf16.mxu1 %v12384_v37 }
 0x45e   :  { %1811 = vmatpush1.bf16.msra.mxu1 %v12382_v38 }
 0x45f   :  { %1812 = vmatprep.subr.bf16.mxu1 %v12390_v29 }
 0x462   :  { %1813 = vmatpush1.bf16.msra.mxu1 %v12388_v39 }
 0x504   :  { %v11588_v42 = vpop.f32.mrb[16].mxu1 }
 0x505   :  { %v987_v43 = vadd.f32 %v11588_v42, %v14010_v40  ;;  %v978_v44 = vpop.f32.mrb[17].mxu1 }
 0x506   :  { %v979_v45 = vadd.f32 %v14010_v40, %v978_v44  ;;  %v11589_v46 = vpop.f32.mrb[18].mxu1  ;;  %v12343_v44 = vld [vmem:[%s17004_s16 + $0x88] ss:$16 sps:$4 sm:$0xff]  }
 0x507   :  { %v1043_v47 = vmul.f32 0.01, %v987_v43  ;;  %v990_v48 = vadd.f32 %v11589_v46, %v14010_v40  ;;  %v981_v49 = vpop.f32.mrb[19].mxu1 }
 0x508   :  { %v1041_v50 = vmul.f32 0.01, %v979_v45  ;;  %v982_v41 = vadd.f32 %v14010_v40, %v981_v49 }
 0x509   :  { %v1044_v51 = vmul.f32 0.01, %v990_v48  ;;  %v1059_v53 = vmax.f32 %v987_v43, %v1043_v47 }
 0x50a   :  { %v1042_v52 = vmul.f32 0.01, %v982_v41  ;;  %v1057_v55 = vmax.f32 %v979_v45, %v1041_v50 }
 0x50b   :  { %v1060_v54 = vmax.f32 %v990_v48, %v1044_v51  ;;  %v12351_v48 = vld [vmem:[%s17004_s16 + $0xac] ss:$16 sps:$4 sm:$0xff]  }
 0x50c   :  { %v1058_v56 = vmax.f32 %v982_v41, %v1042_v52  ;;  %v11592_v57 = vpop.f32.mrb[20].mxu1 }
 0x50d   :  { %v1003_v58 = vadd.f32 %v11592_v57, %v14010_v40  ;;  %v994_v59 = vpop.f32.mrb[21].mxu1  ;;  %v1074_v60 = vpack.c.bf16 %v1060_v54, %v1059_v53 }
 0x50e   :  { %v1073_v63 = vpack.c.bf16 %v1058_v56, %v1057_v55  ;;  %v995_v0 = vadd.f32 %v14010_v40, %v994_v59  ;;  %v11593_v1 = vpop.f32.mrb[22].mxu1  ;;  %v12349_v55 = vld [vmem:[%s17004_s16 + $0xa8] ss:$16 sps:$4 sm:$0xff]  }
 0x50f   :  { %v1047_v3 = vmul.f32 0.01, %v1003_v58  ;;  %v1006_v4 = vadd.f32 %v11593_v1, %v14010_v40  ;;  %v997_v5 = vpop.f32.mrb[23].mxu1  ;;  %v12361_v1 = vld [vmem:[%s17004_s16 + $0xe8] ss:$16 sps:$4 sm:$0xff]  }
 0x510   :  { %v1045_v6 = vmul.f32 0.01, %v995_v0  ;;  %v998_v7 = vadd.f32 %v14010_v40, %v997_v5  ;;  %1222 = vmatmul.mubr.bf16.vlgmr.msra.gmra.mrb[32].mxu0 %v1073_v63  ;;  %v12373_v5 = vld [vmem:[%s17004_s16 + $0x128] ss:$16 sps:$4 sm:$0xff]  }
 0x511   :  { %v1048_v8 = vmul.f32 0.01, %v1006_v4  ;;  %1231 = vmatprep.mubr.bf16.mxu0 %v13396_v12  ;;  %1902 = vmatpush1.bf16.msra.mxu0 %v12319_v62  ;;  %v1063_v11 = vmax.f32 %v1003_v58, %v1047_v3  ;;  %v12357_v58 = vld [vmem:[%s17004_s16 + $0xcc] ss:$16 sps:$4 sm:$0xff]   ;;  %v12355_v62 = vld [vmem:[%s17004_s16 + $0xc8] ss:$16 sps:$4 sm:$0xff]  }
 0x512   :  { %v1046_v9 = vmul.f32 0.01, %v998_v7  ;;  %1903 = vmatprep.subr.bf16.mxu0 %v12327_v2  ;;  %v1061_v14 = vmax.f32 %v995_v0, %v1045_v6  ;;  %v12363_v0 = vld [vmem:[%s17004_s16 + $0xec] ss:$16 sps:$4 sm:$0xff]   ;;  %v12367_v3 = vld [vmem:[%s17004_s16 + $0x108] ss:$16 sps:$4 sm:$0xff]  }
 0x513   :  { %v1064_v13 = vmax.f32 %v1006_v4, %v1048_v8  ;;  %v12369_v2 = vld [vmem:[%s17004_s16 + $0x10c] ss:$16 sps:$4 sm:$0xff]  }
 0x514   :  { %v1062_v15 = vmax.f32 %v998_v7, %v1046_v9  ;;  %v11596_v16 = vpop.f32.mrb[24].mxu1  ;;  %v12375_v4 = vld [vmem:[%s17004_s16 + $0x12c] ss:$16 sps:$4 sm:$0xff]   ;;  %v12379_v7 = vld [vmem:[%s17004_s16 + $0x148] ss:$16 sps:$4 sm:$0xff]  }
 0x515   :  { %v1019_v17 = vadd.f32 %v11596_v16, %v14010_v40  ;;  %v1010_v18 = vpop.f32.mrb[25].mxu1  ;;  %v1076_v19 = vpack.c.bf16 %v1064_v13, %v1063_v11  ;;  %1904 = vmatpush1.bf16.msra.mxu0 %v12325_v61  ;;  %v12381_v6 = vld [vmem:[%s17004_s16 + $0x14c] ss:$16 sps:$4 sm:$0xff]   ;;  %v12385_v61 = vld [vmem:[%s17004_s16 + $0x168] ss:$16 sps:$4 sm:$0xff]  }
 0x516   :  { %v1011_v21 = vadd.f32 %v14010_v40, %v1010_v18  ;;  %v11597_v22 = vpop.f32.mrb[26].mxu1  ;;  %v1075_v23 = vpack.c.bf16 %v1062_v15, %v1061_v14  ;;  %1905 = vmatprep.subr.bf16.mxu0 %v12333_v10  ;;  %v12387_v8 = vld [vmem:[%s17004_s16 + $0x16c] ss:$16 sps:$4 sm:$0xff]   ;;  %v12391_v10 = vld [vmem:[%s17004_s16 + $0x188] ss:$16 sps:$4 sm:$0xff]  }
 0x517   :  { %v1051_v25 = vmul.f32 0.01, %v1019_v17  ;;  %v1022_v26 = vadd.f32 %v11597_v22, %v14010_v40  ;;  %v1013_v27 = vpop.f32.mrb[27].mxu1  ;;  %v12393_v9 = vld [vmem:[%s17004_s16 + $0x18c] ss:$16 sps:$4 sm:$0xff]  }
 0x518   :  { %v1049_v28 = vmul.f32 0.01, %v1011_v21  ;;  %v1014_v30 = vadd.f32 %v14010_v40, %v1013_v27  ;;  %1232 = vmatmul.mubr.bf16.gmra.mrb[36].mxu0 %v1074_v60  ;;  %v12396_v11 = vld [vmem:[%s17004_s16 + $0x1a4] ss:$16 sps:$4 sm:$0xff]   ;;  %v12399_v13 = vld [vmem:[%s17004_s16 + $0x1ac] ss:$16 sps:$4 sm:$0xff]  }
 0x519   :  { %v1052_v31 = vmul.f32 0.01, %v1022_v26  ;;  %1241 = vmatprep.mubr.bf16.mxu0 %v13396_v12  ;;  %1906 = vmatpush1.bf16.msra.mxu0 %v12331_v20  ;;  %v1067_v35 = vmax.f32 %v1019_v17, %v1051_v25  ;;  %v12394_v14 = vld [vmem:[%s17004_s16 + $0x1a0] ss:$16 sps:$4 sm:$0xff]   ;;  %v12397_v15 = vld [vmem:[%s17004_s16 + $0x1a8] ss:$16 sps:$4 sm:$0xff]  }
 0x51a   :  { %v1050_v33 = vmul.f32 0.01, %v1014_v30  ;;  %1907 = vmatprep.subr.bf16.mxu0 %v12339_v24  ;;  %v1065_v37 = vmax.f32 %v1011_v21, %v1049_v28  ;;  %1814 = vmatprep.subr.bf16.mxu1 %v12396_v11  ;;  %v12405_v16 = vld [vmem:[%s17004_s16 + $0x1cc] ss:$16 sps:$4 sm:$0xff]   ;;  %v12400_v17 = vld [vmem:[%s17004_s16 + $0x1c0] ss:$16 sps:$4 sm:$0xff]  }
 0x51b   :  { %v1068_v36 = vmax.f32 %v1022_v26, %v1052_v31  ;;  %1815 = vmatpush1.bf16.msra.mxu1 %v12394_v14  ;;  %v12403_v18 = vld [vmem:[%s17004_s16 + $0x1c8] ss:$16 sps:$4 sm:$0xff]   ;;  %v12411_v20 = vld [vmem:[%s17004_s16 + $0x1ec] ss:$16 sps:$4 sm:$0xff]   ;;  %v12406_v21 = vld [vmem:[%s17004_s16 + $0x1e0] ss:$16 sps:$4 sm:$0xff]  }
 0x51c   :  { %v1066_v38 = vmax.f32 %v1014_v30, %v1050_v33  ;;  %v11600_v29 = vpop.f32.mrb[28].mxu1  ;;  %v12409_v22 = vld [vmem:[%s17004_s16 + $0x1e8] ss:$16 sps:$4 sm:$0xff]   ;;  %v2178_v24 = vld [vmem:[#allocation16 + $0x20] sm:$0xff] }
 0x51d   :  { %v1035_v39 = vadd.f32 %v11600_v29, %v14010_v40  ;;  %v1026_v42 = vpop.f32.mrb[29].mxu1  ;;  %v1078_v43 = vpack.c.bf16 %v1068_v36, %v1067_v35  ;;  %1908 = vmatpush1.bf16.msra.mxu0 %v12337_v32  ;;  %v2175_v25 = vld [vmem:[#allocation16 + $0x8] sm:$0xff]  ;;  %v1099_v32 = vlaneseq  ;;  %v1097_v35 = vld [vmem:[#allocation13] sm:$0x3] }
 0x51e   :  { %v1027_v45 = vadd.f32 %v14010_v40, %v1026_v42  ;;  %v11601_v46 = vpop.f32.mrb[30].mxu1  ;;  %v1077_v47 = vpack.c.bf16 %v1066_v38, %v1065_v37  ;;  %1909 = vmatprep.subr.bf16.mxu0 %v12345_v34  ;;  %v2179_v28 = vld [vmem:[#allocation16 + $0x28] sm:$0xff] }
 0x51f   :  { %v1055_v49 = vmul.f32 0.01, %v1035_v39  ;;  %v1038_v50 = vadd.f32 %v11601_v46, %v14010_v40  ;;  %v1029_v41 = vpop.f32.mrb[31].mxu1  ;;  %v10711_v30 = vcombine.low %v2175_v25, %v2179_v28  ;;  %v10712_v31 = vcombine.high %v2175_v25, %v2179_v28  ;;  %v2195_v11 = vld [vmem:[#allocation16 + $0xa8] sm:$0xff] }
 0x520   :  { %v1053_v51 = vmul.f32 0.01, %v1027_v45  ;;  %v1030_v52 = vadd.f32 %v14010_v40, %v1029_v41  ;;  %1242 = vmatmul.mubr.bf16.gmra.mrb[40].mxu0 %v1075_v23  ;;  %v2174_v23 = vld [vmem:[#allocation16] sm:$0xff]  ;;  %v14146_v33 = vshrl.u32 %v1099_v32, 7  ;;  %v2199_v25 = vld [vmem:[#allocation16 + $0xc8] sm:$0xff] }
 0x521   :  { %v1071_v53 = vmax.f32 %v1035_v39, %v1055_v49  ;;  %v1056_v54 = vmul.f32 0.01, %v1038_v50  ;;  %1251 = vmatprep.mubr.bf16.mxu0 %v13396_v12  ;;  %1910 = vmatpush1.bf16.msra.mxu0 %v12343_v44  ;;  %v10709_v26 = vcombine.low %v2174_v23, %v2178_v24  ;;  %v10710_v27 = vcombine.high %v2174_v23, %v2178_v24  ;;  %v2202_v24 = vld [vmem:[#allocation16 + $0xe0] sm:$0xff] }
 0x522   :  { %v1069_v56 = vmax.f32 %v1027_v45, %v1053_v51  ;;  %v1054_v57 = vmul.f32 0.01, %v1030_v52  ;;  %1911 = vmatprep.subr.bf16.mxu0 %v12351_v48  ;;  %17005 = vst [vmem:[#allocation43_spill] sm:$0xff] %v14146_v33  ;;  %v14149_v34 = vsub.s32 0, %v14146_v33  ;;  %v14152_v36 = vsub.s32 1, %v14146_v33 }
 0x523   :  { %v1072_v59 = vmax.f32 %v1038_v50, %v1056_v54 }
 0x524   :  { %v1070_v60 = vmax.f32 %v1030_v52, %v1054_v57  ;;  %17006 = vst [vmem:[#allocation44_spill] sm:$0xff] %v14149_v34  ;;  %17007 = vst [vmem:[#allocation45_spill] sm:$0xff] %v14152_v36  ;;  %v14155_v37 = vrot.slane %v1097_v35, %v14149_v34  ;;  %v14158_v38 = vrot.slane %v1097_v35, %v14152_v36  ;;  %v2186_v57 = vld [vmem:[#allocation16 + $0x60] sm:$0xff] }
 0x525   :  { %v1080_v40 = vpack.c.bf16 %v1072_v59, %v1071_v53  ;;  %1912 = vmatpush1.bf16.msra.mxu0 %v12349_v55  ;;  %v2182_v53 = vld [vmem:[#allocation16 + $0x40] sm:$0xff]  ;;  %v2187_v59 = vld [vmem:[#allocation16 + $0x68] sm:$0xff] }
 0x526   :  { %v1079_v63 = vpack.c.bf16 %v1070_v60, %v1069_v56  ;;  %1913 = vmatprep.subr.bf16.mxu0 %v12357_v58  ;;  %v2183_v58 = vld [vmem:[#allocation16 + $0x48] sm:$0xff] }
 0x528   :  { %1252 = vmatmul.mubr.bf16.gmra.mrb[44].mxu0 %v1076_v19  ;;  %v12408_v19 = vld [vmem:[%s17004_s16 + $0x1e4] ss:$16 sps:$4 sm:$0xff]  }
 0x529   :  { %1261 = vmatprep.mubr.bf16.mxu0 %v13396_v12  ;;  %1914 = vmatpush1.bf16.msra.mxu0 %v12355_v62 }
 0x52a   :  { %1915 = vmatprep.subr.bf16.mxu0 %v12363_v0 }
 0x52d   :  { %1916 = vmatpush1.bf16.msra.mxu0 %v12361_v1 }
 0x52e   :  { %1917 = vmatprep.subr.bf16.mxu0 %v12369_v2 }
 0x530   :  { %1262 = vmatmul.mubr.bf16.gmra.mrb[48].mxu0 %v1077_v47 }
 0x531   :  { %1271 = vmatprep.mubr.bf16.mxu0 %v13396_v12  ;;  %1918 = vmatpush1.bf16.msra.mxu0 %v12367_v3 }
 0x532   :  { %1919 = vmatprep.subr.bf16.mxu0 %v12375_v4 }
 0x535   :  { %1920 = vmatpush1.bf16.msra.mxu0 %v12373_v5  ;;  %v10718_v5 = vcombine.high %v2182_v53, %v2186_v57 }
 0x536   :  { %1921 = vmatprep.subr.bf16.mxu0 %v12381_v6  ;;  %v10720_v6 = vcombine.high %v2183_v58, %v2187_v59 }
 0x538   :  { %1272 = vmatmul.mubr.bf16.gmra.mrb[52].mxu0 %v1078_v43 }
 0x539   :  { %1281 = vmatprep.mubr.bf16.mxu0 %v13396_v12  ;;  %1922 = vmatpush1.bf16.msra.mxu0 %v12379_v7  ;;  %v2190_v7 = vld [vmem:[#allocation16 + $0x80] sm:$0xff] }
 0x53a   :  { %1923 = vmatprep.subr.bf16.mxu0 %v12387_v8  ;;  %v2194_v8 = vld [vmem:[#allocation16 + $0xa0] sm:$0xff] }
 0x53d   :  { %1924 = vmatpush1.bf16.msra.mxu0 %v12385_v61 }
 0x53e   :  { %1925 = vmatprep.subr.bf16.mxu0 %v12393_v9 }
 0x540   :  { %1282 = vmatmul.mubr.bf16.gmra.mrb[56].mxu0 %v1079_v63 }
 0x541   :  { %1291 = vmatprep.mubr.bf16.mxu0 %v13396_v12  ;;  %1926 = vmatpush1.bf16.msra.mxu0 %v12391_v10  ;;  %v12402_v12 = vld [vmem:[%s17004_s16 + $0x1c4] ss:$16 sps:$4 sm:$0xff]   ;;  %s11313_s16 = sld [smem:[#allocation29 + $0x2]] }
 0x542   :  { %1927 = vmatprep.subr.bf16.mxu0 %v12399_v13  ;;  %1816 = vmatprep.subr.bf16.mxu1 %v12402_v12  ;;  %v2191_v10 = vld [vmem:[#allocation16 + $0x88] sm:$0xff]  ;;  %v10719_v12 = vcombine.low %v2183_v58, %v2187_v59 }
 0x543   :  { %1817 = vmatpush1.bf16.msra.mxu1 %v12400_v17 }
 0x544   :  { %1818 = vmatprep.subr.bf16.mxu1 %v12408_v19  ;;  %v10728_v19 = vcombine.high %v2191_v10, %v2195_v11 }
 0x545   :  { %1928 = vmatpush1.bf16.msra.mxu0 %v12397_v15  ;;  %v10717_v15 = vcombine.low %v2182_v53, %v2186_v57 }
 0x546   :  { %1929 = vmatprep.subr.bf16.mxu0 %v12405_v16  ;;  %v10726_v16 = vcombine.high %v2190_v7, %v2194_v8 }
 0x547   :  { %1819 = vmatpush1.bf16.msra.mxu1 %v12406_v21 }
 0x548   :  { %1292 = vmatmul.mubr.bf16.gmra.mrb[60].mxu0 %v1080_v40  ;;  %3752 = vmatprep.subr.bf16.mxu1 %v10710_v27  ;;  %v2203_v27 = vld [vmem:[#allocation16 + $0xe8] sm:$0xff] }
 0x549   :  { %1930 = vmatpush1.bf16.msra.mxu0 %v12403_v18 }
 0x54a   :  { %1931 = vmatprep.subr.bf16.mxu0 %v12411_v20  ;;  %v2198_v20 = vld [vmem:[#allocation16 + $0xc0] sm:$0xff] }
 0x54d   :  { %1932 = vmatpush1.bf16.msra.mxu0 %v12409_v22 }
 0x54e   :  { %3978 = vmatprep.subr.bf16.mxu0 %v10712_v31 }
 0x5e3   :  { %v1223_v29 = vpop.f32.mrb[32].mxu0 }
 0x5e4   :  { %v1224_v39 = vadd.f32 %v1223_v29, %v14155_v37  ;;  %v1225_v42 = vpop.f32.mrb[33].mxu0 }
 0x5e5   :  { %v1226_v43 = vadd.f32 %v1225_v42, %v14158_v38  ;;  %v1227_v44 = vpop.f32.mrb[34].mxu0 }
 0x5e6   :  { %v1302_v45 = vmul.f32 0.01, %v1224_v39  ;;  %v1228_v46 = vadd.f32 %v1227_v44, %v14155_v37  ;;  %v1229_v47 = vpop.f32.mrb[35].mxu0 }
 0x5e7   :  { %v1303_v48 = vmul.f32 0.01, %v1226_v43  ;;  %v1230_v49 = vadd.f32 %v1229_v47, %v14158_v38  ;;  %v2206_v47 = vld [vmem:[#allocation16 + $0x100] sm:$0xff] }
 0x5e8   :  { %v1304_v50 = vmul.f32 0.01, %v1228_v46  ;;  %v1334_v51 = vmax.f32 %v1224_v39, %v1302_v45  ;;  %v10727_v39 = vcombine.low %v2191_v10, %v2195_v11  ;;  %v10734_v45 = vcombine.high %v2198_v20, %v2202_v24 }
 0x5e9   :  { %v1305_v41 = vmul.f32 0.01, %v1230_v49  ;;  %v1335_v54 = vmax.f32 %v1226_v43, %v1303_v48  ;;  %v2210_v48 = vld [vmem:[#allocation16 + $0x120] sm:$0xff] }
 0x5ea   :  { %v1336_v52 = vmax.f32 %v1228_v46, %v1304_v50  ;;  %v10736_v46 = vcombine.high %v2199_v25, %v2203_v27 }
 0x5eb   :  { %v1337_v55 = vmax.f32 %v1230_v49, %v1305_v41  ;;  %v1233_v56 = vpop.f32.mrb[36].mxu0  ;;  %v2207_v41 = vld [vmem:[#allocation16 + $0x108] sm:$0xff] }
 0x5ec   :  { %v1366_v60 = vpack.c.bf16 %v1336_v52, %v1334_v51  ;;  %v1234_v40 = vadd.f32 %v1233_v56, %v14155_v37  ;;  %v1235_v62 = vpop.f32.mrb[37].mxu0  ;;  %v2211_v51 = vld [vmem:[#allocation16 + $0x128] sm:$0xff]  ;;  %v10742_v56 = vcombine.high %v2206_v47, %v2210_v48 }
 0x5ed   :  { %v1236_v63 = vadd.f32 %v1235_v62, %v14158_v38  ;;  %v1237_v0 = vpop.f32.mrb[38].mxu0  ;;  %v1367_v1 = vpack.c.bf16 %v1337_v55, %v1335_v54  ;;  %v10733_v54 = vcombine.low %v2198_v20, %v2202_v24  ;;  %v10735_v55 = vcombine.low %v2199_v25, %v2203_v27  ;;  %v2227_v20 = vld [vmem:[#allocation16 + $0x1a8] sm:$0xff] }
 0x5ee   :  { %v1306_v2 = vmul.f32 0.01, %v1234_v40  ;;  %v1238_v3 = vadd.f32 %v1237_v0, %v14155_v37  ;;  %v1239_v4 = vpop.f32.mrb[39].mxu0  ;;  %v10744_v59 = vcombine.high %v2207_v41, %v2211_v51  ;;  %v2218_v0 = vld [vmem:[#allocation16 + $0x160] sm:$0xff] }
 0x5ef   :  { %v1307_v61 = vmul.f32 0.01, %v1236_v63  ;;  %v1240_v9 = vadd.f32 %v1239_v4, %v14158_v38  ;;  %1820 = vmatprep.mubr.bf16.mxu1 %v1367_v1  ;;  %1933 = vmatprep.mubr.bf16.mxu0 %v1367_v1  ;;  %v2215_v1 = vld [vmem:[#allocation16 + $0x148] sm:$0xff] }
 0x5f0   :  { %v1308_v13 = vmul.f32 0.01, %v1238_v3  ;;  %1821 = vmatmul.mubr.bf16.vlgmr.msra.gmra.mrb[32].mxu1 %v1366_v60  ;;  %1934 = vmatmul.mubr.bf16.vlgmr.msra.gmra.mrb[64].mxu0 %v1366_v60  ;;  %v1338_v17 = vmax.f32 %v1234_v40, %v1306_v2  ;;  %v2214_v60 = vld [vmem:[#allocation16 + $0x140] sm:$0xff]  ;;  %v2219_v2 = vld [vmem:[#allocation16 + $0x168] sm:$0xff] }
 0x5f1   :  { %v1309_v14 = vmul.f32 0.01, %v1240_v9  ;;  %3753 = vmatpush1.bf16.msra.mxu1 %v10709_v26  ;;  %3979 = vmatpush1.bf16.msra.mxu0 %v10711_v30  ;;  %v1339_v21 = vmax.f32 %v1236_v63, %v1307_v61  ;;  %v10725_v30 = vcombine.low %v2190_v7, %v2194_v8  ;;  %v10751_v24 = vcombine.low %v2215_v1, %v2219_v2 }
 0x5f2   :  { %v1340_v18 = vmax.f32 %v1238_v3, %v1308_v13  ;;  %3754 = vmatprep.subr.bf16.mxu1 %v10718_v5  ;;  %3980 = vmatprep.subr.bf16.mxu0 %v10720_v6  ;;  %v10741_v6 = vcombine.low %v2206_v47, %v2210_v48 }
 0x5f3   :  { %v1341_v22 = vmax.f32 %v1240_v9, %v1309_v14  ;;  %v1243_v23 = vpop.f32.mrb[40].mxu0  ;;  %v10743_v9 = vcombine.low %v2207_v41, %v2211_v51  ;;  %v10750_v14 = vcombine.high %v2214_v60, %v2218_v0 }
 0x5f4   :  { %v1244_v28 = vadd.f32 %v1243_v23, %v14155_v37  ;;  %v1245_v31 = vpop.f32.mrb[41].mxu0  ;;  %v1368_v26 = vpack.c.bf16 %v1340_v18, %v1338_v17  ;;  %v10749_v23 = vcombine.low %v2214_v60, %v2218_v0  ;;  %v2243_v60 = vld [vmem:[#allocation16 + $0x228] sm:$0xff] }
 0x5f5   :  { %v1246_v32 = vadd.f32 %v1245_v31, %v14158_v38  ;;  %v1247_v35 = vpop.f32.mrb[42].mxu0  ;;  %v1369_v29 = vpack.c.bf16 %v1341_v22, %v1339_v21  ;;  %3755 = vmatpush1.bf16.msra.mxu1 %v10717_v15  ;;  %3981 = vmatpush1.bf16.msra.mxu0 %v10719_v12  ;;  %v10752_v15 = vcombine.high %v2215_v1, %v2219_v2  ;;  %v2222_v12 = vld [vmem:[#allocation16 + $0x180] sm:$0xff] }
 0x5f6   :  { %v1310_v42 = vmul.f32 0.01, %v1244_v28  ;;  %v1248_v43 = vadd.f32 %v1247_v35, %v14155_v37  ;;  %v1249_v44 = vpop.f32.mrb[43].mxu0  ;;  %3756 = vmatprep.subr.bf16.mxu1 %v10726_v16  ;;  %3982 = vmatprep.subr.bf16.mxu0 %v10728_v19  ;;  %v2226_v16 = vld [vmem:[#allocation16 + $0x1a0] sm:$0xff]  ;;  %v2223_v19 = vld [vmem:[#allocation16 + $0x188] sm:$0xff] }
 0x5f7   :  { %v1311_v49 = vmul.f32 0.01, %v1246_v32  ;;  %v1250_v50 = vadd.f32 %v1249_v44, %v14158_v38  ;;  %1830 = vmatprep.mubr.bf16.mxu1 %v1369_v29  ;;  %1943 = vmatprep.mubr.bf16.mxu0 %v1369_v29  ;;  %v10758_v25 = vcombine.high %v2222_v12, %v2226_v16  ;;  %v10760_v31 = vcombine.high %v2223_v19, %v2227_v20  ;;  %v2234_v29 = vld [vmem:[#allocation16 + $0x1e0] sm:$0xff] }
 0x5f8   :  { %v1312_v52 = vmul.f32 0.01, %v1248_v43  ;;  %1831 = vmatmul.mubr.bf16.gmra.mrb[36].mxu1 %v1368_v26  ;;  %1944 = vmatmul.mubr.bf16.gmra.mrb[68].mxu0 %v1368_v26  ;;  %v1342_v57 = vmax.f32 %v1244_v28, %v1310_v42  ;;  %v2230_v26 = vld [vmem:[#allocation16 + $0x1c0] sm:$0xff]  ;;  %v2235_v42 = vld [vmem:[#allocation16 + $0x1e8] sm:$0xff] }
 0x5f9   :  { %v1313_v53 = vmul.f32 0.01, %v1250_v50  ;;  %3757 = vmatpush1.bf16.msra.mxu1 %v10725_v30  ;;  %3983 = vmatpush1.bf16.msra.mxu0 %v10727_v39  ;;  %v1343_v40 = vmax.f32 %v1246_v32, %v1311_v49  ;;  %v2231_v39 = vld [vmem:[#allocation16 + $0x1c8] sm:$0xff] }
 0x5fa   :  { %v1344_v58 = vmax.f32 %v1248_v43, %v1312_v52  ;;  %3758 = vmatprep.subr.bf16.mxu1 %v10734_v45  ;;  %3984 = vmatprep.subr.bf16.mxu0 %v10736_v46  ;;  %v10757_v46 = vcombine.low %v2222_v12, %v2226_v16  ;;  %v10767_v0 = vcombine.low %v2231_v39, %v2235_v42 }
 0x5fb   :  { %v1345_v62 = vmax.f32 %v1250_v50, %v1313_v53  ;;  %v1253_v63 = vpop.f32.mrb[44].mxu0  ;;  %v10759_v50 = vcombine.low %v2223_v19, %v2227_v20  ;;  %v10766_v53 = vcombine.high %v2230_v26, %v2234_v29 }
 0x5fc   :  { %v1254_v3 = vadd.f32 %v1253_v63, %v14155_v37  ;;  %v1255_v4 = vpop.f32.mrb[45].mxu0  ;;  %v1370_v5 = vpack.c.bf16 %v1344_v58, %v1342_v57  ;;  %v10765_v63 = vcombine.low %v2230_v26, %v2234_v29  ;;  %v2259_v26 = vld [vmem:[#allocation16 + $0x2a8] sm:$0xff] }
 0x5fd   :  { %v1256_v7 = vadd.f32 %v1255_v4, %v14158_v38  ;;  %v1257_v8 = vpop.f32.mrb[46].mxu0  ;;  %v1371_v61 = vpack.c.bf16 %v1345_v62, %v1343_v40  ;;  %3759 = vmatpush1.bf16.msra.mxu1 %v10733_v54  ;;  %3985 = vmatpush1.bf16.msra.mxu0 %v10735_v55  ;;  %v10768_v54 = vcombine.high %v2231_v39, %v2235_v42  ;;  %v2238_v55 = vld [vmem:[#allocation16 + $0x200] sm:$0xff] }
 0x5fe   :  { %v1314_v10 = vmul.f32 0.01, %v1254_v3  ;;  %v1258_v11 = vadd.f32 %v1257_v8, %v14155_v37  ;;  %v1259_v13 = vpop.f32.mrb[47].mxu0  ;;  %3760 = vmatprep.subr.bf16.mxu1 %v10742_v56  ;;  %3986 = vmatprep.subr.bf16.mxu0 %v10744_v59  ;;  %v2242_v56 = vld [vmem:[#allocation16 + $0x220] sm:$0xff]  ;;  %v2239_v59 = vld [vmem:[#allocation16 + $0x208] sm:$0xff] }
 0x5ff   :  { %v1315_v17 = vmul.f32 0.01, %v1256_v7  ;;  %v1260_v18 = vadd.f32 %v1259_v13, %v14158_v38  ;;  %1840 = vmatprep.mubr.bf16.mxu1 %v1371_v61  ;;  %1953 = vmatprep.mubr.bf16.mxu0 %v1371_v61  ;;  %v10774_v1 = vcombine.high %v2238_v55, %v2242_v56  ;;  %v10776_v4 = vcombine.high %v2239_v59, %v2243_v60  ;;  %v2250_v61 = vld [vmem:[#allocation16 + $0x260] sm:$0xff] }
 0x600   :  { %v1316_v21 = vmul.f32 0.01, %v1258_v11  ;;  %1841 = vmatmul.mubr.bf16.gmra.mrb[40].mxu1 %v1370_v5  ;;  %1954 = vmatmul.mubr.bf16.gmra.mrb[72].mxu0 %v1370_v5  ;;  %v1346_v27 = vmax.f32 %v1254_v3, %v1314_v10  ;;  %v2246_v5 = vld [vmem:[#allocation16 + $0x240] sm:$0xff]  ;;  %v2251_v10 = vld [vmem:[#allocation16 + $0x268] sm:$0xff] }
 0x601   :  { %v1317_v22 = vmul.f32 0.01, %v1260_v18  ;;  %3761 = vmatpush1.bf16.msra.mxu1 %v10741_v6  ;;  %3987 = vmatpush1.bf16.msra.mxu0 %v10743_v9  ;;  %v1347_v30 = vmax.f32 %v1256_v7, %v1315_v17  ;;  %v2247_v9 = vld [vmem:[#allocation16 + $0x248] sm:$0xff] }
 0x602   :  { %v1348_v28 = vmax.f32 %v1258_v11, %v1316_v21  ;;  %3762 = vmatprep.subr.bf16.mxu1 %v10750_v14  ;;  %3988 = vmatprep.subr.bf16.mxu0 %v10752_v15  ;;  %v10773_v15 = vcombine.low %v2238_v55, %v2242_v56  ;;  %v10783_v29 = vcombine.low %v2247_v9, %v2251_v10 }
 0x603   :  { %v1349_v32 = vmax.f32 %v1260_v18, %v1317_v22  ;;  %v1263_v35 = vpop.f32.mrb[48].mxu0  ;;  %v10775_v18 = vcombine.low %v2239_v59, %v2243_v60  ;;  %v10782_v22 = vcombine.high %v2246_v5, %v2250_v61 }
 0x604   :  { %v1264_v43 = vadd.f32 %v1263_v35, %v14155_v37  ;;  %v1265_v44 = vpop.f32.mrb[49].mxu0  ;;  %v1372_v45 = vpack.c.bf16 %v1348_v28, %v1346_v27  ;;  %v10781_v35 = vcombine.low %v2246_v5, %v2250_v61  ;;  %v2275_v5 = vld [vmem:[#allocation16 + $0x328] sm:$0xff] }
 0x605   :  { %v1266_v47 = vadd.f32 %v1265_v44, %v14158_v38  ;;  %v1267_v48 = vpop.f32.mrb[50].mxu0  ;;  %v1373_v49 = vpack.c.bf16 %v1349_v32, %v1347_v30  ;;  %3763 = vmatpush1.bf16.msra.mxu1 %v10749_v23  ;;  %3989 = vmatpush1.bf16.msra.mxu0 %v10751_v24  ;;  %v10784_v23 = vcombine.high %v2247_v9, %v2251_v10  ;;  %v2254_v24 = vld [vmem:[#allocation16 + $0x280] sm:$0xff] }
 0x606   :  { %v1318_v41 = vmul.f32 0.01, %v1264_v43  ;;  %v1268_v51 = vadd.f32 %v1267_v48, %v14155_v37  ;;  %v1269_v52 = vpop.f32.mrb[51].mxu0  ;;  %3764 = vmatprep.subr.bf16.mxu1 %v10758_v25  ;;  %3990 = vmatprep.subr.bf16.mxu0 %v10760_v31  ;;  %v2258_v25 = vld [vmem:[#allocation16 + $0x2a0] sm:$0xff]  ;;  %v2255_v31 = vld [vmem:[#allocation16 + $0x288] sm:$0xff] }
 0x607   :  { %v1319_v57 = vmul.f32 0.01, %v1266_v47  ;;  %v1270_v58 = vadd.f32 %v1269_v52, %v14158_v38  ;;  %1850 = vmatprep.mubr.bf16.mxu1 %v1373_v49  ;;  %1963 = vmatprep.mubr.bf16.mxu0 %v1373_v49  ;;  %v10790_v39 = vcombine.high %v2254_v24, %v2258_v25  ;;  %v10792_v44 = vcombine.high %v2255_v31, %v2259_v26  ;;  %v2266_v49 = vld [vmem:[#allocation16 + $0x2e0] sm:$0xff] }
 0x608   :  { %v1320_v40 = vmul.f32 0.01, %v1268_v51  ;;  %1851 = vmatmul.mubr.bf16.gmra.mrb[44].mxu1 %v1372_v45  ;;  %1964 = vmatmul.mubr.bf16.gmra.mrb[76].mxu0 %v1372_v45  ;;  %v1350_v2 = vmax.f32 %v1264_v43, %v1318_v41  ;;  %v2262_v45 = vld [vmem:[#allocation16 + $0x2c0] sm:$0xff]  ;;  %v2267_v41 = vld [vmem:[#allocation16 + $0x2e8] sm:$0xff] }
 0x609   :  { %v1321_v62 = vmul.f32 0.01, %v1270_v58  ;;  %3765 = vmatpush1.bf16.msra.mxu1 %v10757_v46  ;;  %3991 = vmatpush1.bf16.msra.mxu0 %v10759_v50  ;;  %v1351_v6 = vmax.f32 %v1266_v47, %v1319_v57  ;;  %v2263_v50 = vld [vmem:[#allocation16 + $0x2c8] sm:$0xff] }
 0x60a   :  { %v1352_v3 = vmax.f32 %v1268_v51, %v1320_v40  ;;  %3766 = vmatprep.subr.bf16.mxu1 %v10766_v53  ;;  %3992 = vmatprep.subr.bf16.mxu0 %v10768_v54  ;;  %v10789_v54 = vcombine.low %v2254_v24, %v2258_v25  ;;  %v10799_v61 = vcombine.low %v2263_v50, %v2267_v41 }
 0x60b   :  { %v1353_v7 = vmax.f32 %v1270_v58, %v1321_v62  ;;  %v1273_v8 = vpop.f32.mrb[52].mxu0  ;;  %v10791_v58 = vcombine.low %v2255_v31, %v2259_v26  ;;  %v10798_v62 = vcombine.high %v2262_v45, %v2266_v49 }
 0x60c   :  { %v1274_v11 = vadd.f32 %v1273_v8, %v14155_v37  ;;  %v1275_v13 = vpop.f32.mrb[53].mxu0  ;;  %v1374_v14 = vpack.c.bf16 %v1352_v3, %v1350_v2  ;;  %v10797_v8 = vcombine.low %v2262_v45, %v2266_v49 }
 0x60d   :  { %v1276_v12 = vadd.f32 %v1275_v13, %v14158_v38  ;;  %v1277_v16 = vpop.f32.mrb[54].mxu0  ;;  %v1375_v17 = vpack.c.bf16 %v1353_v7, %v1351_v6  ;;  %3767 = vmatpush1.bf16.msra.mxu1 %v10765_v63  ;;  %3993 = vmatpush1.bf16.msra.mxu0 %v10767_v0  ;;  %v10800_v63 = vcombine.high %v2263_v50, %v2267_v41  ;;  %v2270_v0 = vld [vmem:[#allocation16 + $0x300] sm:$0xff] }
 0x60e   :  { %v1322_v19 = vmul.f32 0.01, %v1274_v11  ;;  %v1278_v20 = vadd.f32 %v1277_v16, %v14155_v37  ;;  %v1279_v21 = vpop.f32.mrb[55].mxu0  ;;  %3768 = vmatprep.subr.bf16.mxu1 %v10774_v1  ;;  %3994 = vmatprep.subr.bf16.mxu0 %v10776_v4  ;;  %v2274_v1 = vld [vmem:[#allocation16 + $0x320] sm:$0xff]  ;;  %v2271_v4 = vld [vmem:[#allocation16 + $0x308] sm:$0xff] }
 0x60f   :  { %v1323_v27 = vmul.f32 0.01, %v1276_v12  ;;  %v1280_v28 = vadd.f32 %v1279_v21, %v14158_v38  ;;  %1860 = vmatprep.mubr.bf16.mxu1 %v1375_v17  ;;  %1973 = vmatprep.mubr.bf16.mxu0 %v1375_v17  ;;  %v10806_v9 = vcombine.high %v2270_v0, %v2274_v1  ;;  %v10808_v13 = vcombine.high %v2271_v4, %v2275_v5  ;;  %v2286_v50 = vld [vmem:[#allocation16 + $0x380] sm:$0xff] }
 0x610   :  { %v1324_v30 = vmul.f32 0.01, %v1278_v20  ;;  %1861 = vmatmul.mubr.bf16.gmra.mrb[48].mxu1 %v1374_v14  ;;  %1974 = vmatmul.mubr.bf16.gmra.mrb[80].mxu0 %v1374_v14  ;;  %v1354_v42 = vmax.f32 %v1274_v11, %v1322_v19  ;;  %v10805_v19 = vcombine.low %v2270_v0, %v2274_v1  ;;  %v2290_v41 = vld [vmem:[#allocation16 + $0x3a0] sm:$0xff] }
 0x611   :  { %v1325_v32 = vmul.f32 0.01, %v1280_v28  ;;  %3769 = vmatpush1.bf16.msra.mxu1 %v10773_v15  ;;  %3995 = vmatpush1.bf16.msra.mxu0 %v10775_v18  ;;  %v1355_v46 = vmax.f32 %v1276_v12, %v1323_v27  ;;  %v14192_v1 = vld [vmem:[#allocation16 + $0x400] sm:$0xff] }
 0x612   :  { %v1356_v43 = vmax.f32 %v1278_v20, %v1324_v30  ;;  %3770 = vmatprep.subr.bf16.mxu1 %v10782_v22  ;;  %3996 = vmatprep.subr.bf16.mxu0 %v10784_v23  ;;  %v10807_v23 = vcombine.low %v2271_v4, %v2275_v5  ;;  %v14200_v5 = vld [vmem:[#allocation16 + $0x428] sm:$0xff] }
 0x613   :  { %v1357_v47 = vmax.f32 %v1280_v28, %v1325_v32  ;;  %v1283_v48 = vpop.f32.mrb[56].mxu0 }
 0x614   :  { %v1284_v51 = vadd.f32 %v1283_v48, %v14155_v37  ;;  %v1285_v52 = vpop.f32.mrb[57].mxu0  ;;  %v1376_v53 = vpack.c.bf16 %v1356_v43, %v1354_v42  ;;  %v2278_v43 = vld [vmem:[#allocation16 + $0x340] sm:$0xff] }
 0x615   :  { %v1286_v55 = vadd.f32 %v1285_v52, %v14158_v38  ;;  %v1287_v56 = vpop.f32.mrb[58].mxu0  ;;  %v1377_v57 = vpack.c.bf16 %v1357_v47, %v1355_v46  ;;  %3771 = vmatpush1.bf16.msra.mxu1 %v10781_v35  ;;  %3997 = vmatpush1.bf16.msra.mxu0 %v10783_v29  ;;  %v2283_v46 = vld [vmem:[#allocation16 + $0x368] sm:$0xff]  ;;  %v10822_v52 = vcombine.high %v2286_v50, %v2290_v41 }
 0x616   :  { %v1326_v59 = vmul.f32 0.01, %v1284_v51  ;;  %v1288_v60 = vadd.f32 %v1287_v56, %v14155_v37  ;;  %v1289_v40 = vpop.f32.mrb[59].mxu0  ;;  %3772 = vmatprep.subr.bf16.mxu1 %v10790_v39  ;;  %3998 = vmatprep.subr.bf16.mxu0 %v10792_v44  ;;  %v2279_v44 = vld [vmem:[#allocation16 + $0x348] sm:$0xff] }
 0x617   :  { %v1327_v2 = vmul.f32 0.01, %v1286_v55  ;;  %v1290_v3 = vadd.f32 %v1289_v40, %v14158_v38  ;;  %1870 = vmatprep.mubr.bf16.mxu1 %v1377_v57  ;;  %1983 = vmatprep.mubr.bf16.mxu0 %v1377_v57  ;;  %v10815_v48 = vcombine.low %v2279_v44, %v2283_v46  ;;  %v10816_v49 = vcombine.high %v2279_v44, %v2283_v46  ;;  %v2294_v57 = vld [vmem:[#allocation16 + $0x3c0] sm:$0xff]  ;;  %v2299_v40 = vld [vmem:[#allocation16 + $0x3e8] sm:$0xff] }
 0x618   :  { %v1328_v6 = vmul.f32 0.01, %v1288_v60  ;;  %1871 = vmatmul.mubr.bf16.gmra.mrb[52].mxu1 %v1376_v53  ;;  %1984 = vmatmul.mubr.bf16.gmra.mrb[84].mxu0 %v1376_v53  ;;  %v1358_v10 = vmax.f32 %v1284_v51, %v1326_v59  ;;  %v2287_v51 = vld [vmem:[#allocation16 + $0x388] sm:$0xff]  ;;  %v14344_v44 = vld [vmem:[#allocation16 + $0x620] sm:$0xff] }
 0x619   :  { %v1329_v7 = vmul.f32 0.01, %v1290_v3  ;;  %3773 = vmatpush1.bf16.msra.mxu1 %v10789_v54  ;;  %3999 = vmatpush1.bf16.msra.mxu0 %v10791_v58  ;;  %v1359_v14 = vmax.f32 %v1286_v55, %v1327_v2  ;;  %v2291_v53 = vld [vmem:[#allocation16 + $0x3a8] sm:$0xff]  ;;  %v10821_v54 = vcombine.low %v2286_v50, %v2290_v41  ;;  %v2298_v58 = vld [vmem:[#allocation16 + $0x3e0] sm:$0xff]  ;;  %17017 = vst [vmem:[#allocation55_spill] sm:$0xff] %v14344_v44 }
 0x61a   :  { %v1360_v11 = vmax.f32 %v1288_v60, %v1328_v6  ;;  %3774 = vmatprep.subr.bf16.mxu1 %v10798_v62  ;;  %4000 = vmatprep.subr.bf16.mxu0 %v10800_v63  ;;  %v10823_v55 = vcombine.low %v2287_v51, %v2291_v53  ;;  %v10824_v56 = vcombine.high %v2287_v51, %v2291_v53  ;;  %v2295_v59 = vld [vmem:[#allocation16 + $0x3c8] sm:$0xff]  ;;  %v14194_v2 = vld [vmem:[#allocation16 + $0x420] sm:$0xff] }
 0x61b   :  { %v1361_v15 = vmax.f32 %v1290_v3, %v1329_v7  ;;  %v1293_v12 = vpop.f32.mrb[60].mxu0  ;;  %v10830_v60 = vcombine.high %v2294_v57, %v2298_v58  ;;  %v10829_v62 = vcombine.low %v2294_v57, %v2298_v58  ;;  %v10831_v63 = vcombine.low %v2295_v59, %v2299_v40  ;;  %v14196_v3 = vld [vmem:[#allocation16 + $0x408] sm:$0xff]  ;;  %v14336_v51 = vld [vmem:[#allocation16 + $0x600] sm:$0xff] }
 0x61c   :  { %v1294_v16 = vadd.f32 %v1293_v12, %v14155_v37  ;;  %v1295_v17 = vpop.f32.mrb[61].mxu0  ;;  %v1378_v18 = vpack.c.bf16 %v1360_v11, %v1358_v10  ;;  %v10832_v0 = vcombine.high %v2295_v59, %v2299_v40  ;;  %v10838_v4 = vcombine.high %v14192_v1, %v14194_v2  ;;  %v14214_v11 = vld [vmem:[#allocation16 + $0x440] sm:$0xff]  ;;  %v14278_v46 = vld [vmem:[#allocation16 + $0x548] sm:$0xff]  ;;  %17016 = vst [vmem:[#allocation54_spill] sm:$0xff] %v14336_v51 }
 0x61d   :  { %v1296_v20 = vadd.f32 %v1295_v17, %v14158_v38  ;;  %v1297_v21 = vpop.f32.mrb[62].mxu0  ;;  %v1379_v22 = vpack.c.bf16 %v1361_v15, %v1359_v14  ;;  %3775 = vmatpush1.bf16.msra.mxu1 %v10797_v8  ;;  %4001 = vmatpush1.bf16.msra.mxu0 %v10799_v61  ;;  %v10840_v8 = vcombine.high %v14196_v3, %v14200_v5  ;;  %v1446_v61 = vld [vmem:[#allocation14] sm:$0xf]  ;;  %v14212_v10 = vsub.s32 3, %v14146_v33  ;;  %v14218_v14 = vld [vmem:[#allocation16 + $0x448] sm:$0xff]  ;;  %v14222_v12 = vld [vmem:[#allocation16 + $0x480] sm:$0xff] }
 0x61e   :  { %v1330_v24 = vmul.f32 0.01, %v1294_v16  ;;  %v1298_v25 = vadd.f32 %v1297_v21, %v14155_v37  ;;  %v1299_v27 = vpop.f32.mrb[63].mxu0  ;;  %3776 = vmatprep.subr.bf16.mxu1 %v10806_v9  ;;  %4002 = vmatprep.subr.bf16.mxu0 %v10808_v13  ;;  %v14209_v9 = vsub.s32 2, %v14146_v33  ;;  %v14216_v13 = vld [vmem:[#allocation16 + $0x460] sm:$0xff]  ;;  %v14220_v15 = vld [vmem:[#allocation16 + $0x468] sm:$0xff] }
 0x61f   :  { %v1331_v28 = vmul.f32 0.01, %v1296_v20  ;;  %v1300_v31 = vadd.f32 %v1299_v27, %v14158_v38  ;;  %1880 = vmatprep.mubr.bf16.mxu1 %v1379_v22  ;;  %1993 = vmatprep.mubr.bf16.mxu0 %v1379_v22  ;;  %v2282_v38 = vld [vmem:[#allocation16 + $0x360] sm:$0xff]  ;;  %17009 = vst [vmem:[#allocation47_spill] sm:$0xff] %v14212_v10  ;;  %v14226_v17 = vld [vmem:[#allocation16 + $0x488] sm:$0xff]  ;;  %v14248_v27 = vrot.slane %v1446_v61, %v14212_v10 }
 0x620   :  { %v1332_v26 = vmul.f32 0.01, %v1298_v25  ;;  %1881 = vmatmul.mubr.bf16.gmra.mrb[56].mxu1 %v1378_v18  ;;  %1994 = vmatmul.mubr.bf16.gmra.mrb[88].mxu0 %v1378_v18  ;;  %v1362_v32 = vmax.f32 %v1294_v16, %v1330_v24  ;;  %v10814_v45 = vcombine.high %v2278_v43, %v2282_v38  ;;  %v10813_v47 = vcombine.low %v2278_v43, %v2282_v38  ;;  %v14224_v16 = vld [vmem:[#allocation16 + $0x4a0] sm:$0xff]  ;;  %v14228_v18 = vld [vmem:[#allocation16 + $0x4a8] sm:$0xff] }
 0x621   :  { %v1333_v30 = vmul.f32 0.01, %v1300_v31  ;;  %3777 = vmatpush1.bf16.msra.mxu1 %v10805_v19  ;;  %4003 = vmatpush1.bf16.msra.mxu0 %v10807_v23  ;;  %v1363_v29 = vmax.f32 %v1296_v20, %v1331_v28  ;;  %17008 = vst [vmem:[#allocation46_spill] sm:$0xff] %v14209_v9  ;;  %v14230_v19 = vld [vmem:[#allocation16 + $0x4c0] sm:$0xff]  ;;  %v14234_v21 = vld [vmem:[#allocation16 + $0x4c8] sm:$0xff]  ;;  %v14239_v23 = vrot.slane %v1446_v61, %v14149_v34 }
 0x622   :  { %v1364_v35 = vmax.f32 %v1298_v25, %v1332_v26  ;;  %3778 = vmatprep.subr.bf16.mxu1 %v10814_v45  ;;  %4004 = vmatprep.subr.bf16.mxu0 %v10816_v49  ;;  %v14232_v20 = vld [vmem:[#allocation16 + $0x4e0] sm:$0xff]  ;;  %v14236_v22 = vld [vmem:[#allocation16 + $0x4e8] sm:$0xff]  ;;  %v14242_v24 = vrot.slane %v1446_v61, %v14209_v9  ;;  %v14245_v25 = vrot.slane %v1446_v61, %v14152_v36 }
 0x623   :  { %v1365_v39 = vmax.f32 %v1300_v31, %v1333_v30  ;;  %v14250_v28 = vld [vmem:[#allocation16 + $0x500] sm:$0xff]  ;;  %v14254_v26 = vld [vmem:[#allocation16 + $0x508] sm:$0xff] }
 0x624   :  { %v1380_v42 = vpack.c.bf16 %v1364_v35, %v1362_v32  ;;  %v14252_v31 = vld [vmem:[#allocation16 + $0x520] sm:$0xff]  ;;  %v14294_v53 = vld [vmem:[#allocation16 + $0x588] sm:$0xff] }
 0x625   :  { %v1381_v37 = vpack.c.bf16 %v1365_v39, %v1363_v29  ;;  %3779 = vmatpush1.bf16.msra.mxu1 %v10813_v47  ;;  %4005 = vmatpush1.bf16.msra.mxu0 %v10815_v48  ;;  %v14264_v39 = vld [vmem:[#allocation16 + $0x528] sm:$0xff]  ;;  %v14282_v48 = vld [vmem:[#allocation16 + $0x580] sm:$0xff]  ;;  %17010 = vst [vmem:[#allocation48_spill] sm:$0xff] %v14294_v53 }
 0x626   :  { %3780 = vmatprep.subr.bf16.mxu1 %v10822_v52  ;;  %4006 = vmatprep.subr.bf16.mxu0 %v10824_v56  ;;  %v14280_v47 = vld [vmem:[#allocation16 + $0x568] sm:$0xff]  ;;  %v14292_v52 = vld [vmem:[#allocation16 + $0x5a0] sm:$0xff] }
 0x627   :  { %1890 = vmatprep.mubr.bf16.mxu1 %v1381_v37  ;;  %2003 = vmatprep.mubr.bf16.mxu0 %v1381_v37  ;;  %v14268_v37 = vld [vmem:[#allocation16 + $0x560] sm:$0xff]  ;;  %v14346_v49 = vld [vmem:[#allocation16 + $0x608] sm:$0xff] }
 0x628   :  { %1891 = vmatmul.mubr.bf16.gmra.mrb[60].mxu1 %v1380_v42  ;;  %2004 = vmatmul.mubr.bf16.gmra.mrb[92].mxu0 %v1380_v42  ;;  %v14266_v42 = vld [vmem:[#allocation16 + $0x540] sm:$0xff]  ;;  %v14348_v43 = vld [vmem:[#allocation16 + $0x628] sm:$0xff] }
 0x629   :  { %3781 = vmatpush1.bf16.msra.mxu1 %v10821_v54  ;;  %4007 = vmatpush1.bf16.msra.mxu0 %v10823_v55  ;;  %v14296_v54 = vld [vmem:[#allocation16 + $0x5a8] sm:$0xff]  ;;  %v14306_v59 = vld [vmem:[#allocation16 + $0x5c0] sm:$0xff] }
 0x62a   :  { %3782 = vmatprep.subr.bf16.mxu1 %v10830_v60  ;;  %4008 = vmatprep.subr.bf16.mxu0 %v10832_v0  ;;  %17011 = vst [vmem:[#allocation49_spill] sm:$0xff] %v14296_v54  ;;  %17012 = vst [vmem:[#allocation50_spill] sm:$0xff] %v14306_v59  ;;  %v14308_v60 = vld [vmem:[#allocation16 + $0x5e0] sm:$0xff] }
 0x62b   :  { %17013 = vst [vmem:[#allocation51_spill] sm:$0xff] %v14308_v60 }
 0x62d   :  { %3783 = vmatpush1.bf16.msra.mxu1 %v10829_v62  ;;  %4009 = vmatpush1.bf16.msra.mxu0 %v10831_v63 }
 0x62e   :  { %3865 = vmatprep.subr.bf16.mxu1 %v10838_v4  ;;  %4091 = vmatprep.subr.bf16.mxu0 %v10840_v8  ;;  %v14318_v4 = vld [vmem:[#allocation16 + $0x5c8] sm:$0xff] }
 0x62f   :  { %17014 = vst [vmem:[#allocation52_spill] sm:$0xff] %v14318_v4  ;;  %v14320_v8 = vld [vmem:[#allocation16 + $0x5e8] sm:$0xff] }
 0x630   :  { %17015 = vst [vmem:[#allocation53_spill] sm:$0xff] %v14320_v8 }
 0x6c3   :  { %v1822_v61 = vpop.f32.mrb[32].mxu1  ;;  %v1935_v57 = vpop.f32.mrb[64].mxu0 }
 0x6c4   :  { %v1823_v0 = vadd.f32 %v1822_v61, %v14239_v23  ;;  %v1936_v58 = vadd.f32 %v1935_v57, %v14242_v24  ;;  %v1824_v56 = vpop.f32.mrb[33].mxu1  ;;  %v1937_v41 = vpop.f32.mrb[65].mxu0 }
 0x6c5   :  { %v1825_v40 = vadd.f32 %v1824_v56, %v14245_v25  ;;  %v1938_v62 = vadd.f32 %v1937_v41, %v14248_v27  ;;  %v1826_v50 = vpop.f32.mrb[34].mxu1  ;;  %v1939_v63 = vpop.f32.mrb[66].mxu0 }
 0x6c6   :  { %v2014_v55 = vmul.f32 0.01, %v1823_v0  ;;  %v2016_v45 = vmul.f32 0.01, %v1936_v58  ;;  %v1827_v56 = vadd.f32 %v1826_v50, %v14239_v23  ;;  %v1940_v41 = vadd.f32 %v1939_v63, %v14242_v24  ;;  %v1828_v38 = vpop.f32.mrb[35].mxu1  ;;  %v1941_v35 = vpop.f32.mrb[67].mxu0 }
 0x6c7   :  { %v2015_v30 = vmul.f32 0.01, %v1825_v40  ;;  %v2017_v29 = vmul.f32 0.01, %v1938_v62  ;;  %v1829_v61 = vadd.f32 %v1828_v38, %v14245_v25  ;;  %v1942_v57 = vadd.f32 %v1941_v35, %v14248_v27 }
 0x6c8   :  { %v2018_v32 = vmul.f32 0.01, %v1827_v56  ;;  %v2020_v7 = vmul.f32 0.01, %v1940_v41  ;;  %v2078_v9 = vmax.f32 %v1823_v0, %v2014_v55  ;;  %v2080_v38 = vmax.f32 %v1936_v58, %v2016_v45  ;;  %v14368_v55 = vld [vmem:[#allocation16 + $0x640] sm:$0xff]  ;;  %v14378_v45 = vld [vmem:[#allocation16 + $0x648] sm:$0xff] }
 0x6c9   :  { %v2019_v10 = vmul.f32 0.01, %v1829_v61  ;;  %v2021_v50 = vmul.f32 0.01, %v1942_v57  ;;  %v2079_v8 = vmax.f32 %v1825_v40, %v2015_v30  ;;  %v2081_v4 = vmax.f32 %v1938_v62, %v2017_v29  ;;  %v14376_v29 = vld [vmem:[#allocation16 + $0x660] sm:$0xff] }
 0x6ca   :  { %v2082_v34 = vmax.f32 %v1827_v56, %v2018_v32  ;;  %v2084_v35 = vmax.f32 %v1940_v41, %v2020_v7  ;;  %v17020_v56 = vcombine.high %v14214_v11, %v14216_v13 }
 0x6cb   :  { %v2083_v60 = vmax.f32 %v1829_v61, %v2019_v10  ;;  %v2085_v59 = vmax.f32 %v1942_v57, %v2021_v50  ;;  %v1832_v6 = vpop.f32.mrb[36].mxu1  ;;  %v1945_v54 = vpop.f32.mrb[68].mxu0 }
 0x6cc   :  { %v14362_v53 = vpack.c.bf16 %v2082_v34, %v2078_v9  ;;  %v14364_v33 = vpack.c.bf16 %v2084_v35, %v2080_v38  ;;  %v1833_v44 = vadd.f32 %v1832_v6, %v14239_v23  ;;  %v1946_v63 = vadd.f32 %v1945_v54, %v14242_v24  ;;  %v1834_v51 = vpop.f32.mrb[37].mxu1  ;;  %v1947_v36 = vpop.f32.mrb[69].mxu0  ;;  %v14380_v6 = vld [vmem:[#allocation16 + $0x668] sm:$0xff] }
 0x6cd   :  { %v14370_v32 = vpack.c.bf16 %v2083_v60, %v2079_v8  ;;  %v14372_v7 = vpack.c.bf16 %v2085_v59, %v2081_v4  ;;  %v1835_v10 = vadd.f32 %v1834_v51, %v14245_v25  ;;  %v1948_v30 = vadd.f32 %v1947_v36, %v14248_v27  ;;  %v1836_v34 = vpop.f32.mrb[38].mxu1  ;;  %v1949_v9 = vpop.f32.mrb[70].mxu0 }
 0x6ce   :  { %v2022_v54 = vmul.f32 0.01, %v1833_v44  ;;  %v2024_v58 = vmul.f32 0.01, %v1946_v63  ;;  %v1837_v40 = vadd.f32 %v1836_v34, %v14239_v23  ;;  %v1950_v60 = vadd.f32 %v1949_v9, %v14242_v24  ;;  %v1838_v59 = vpop.f32.mrb[39].mxu1  ;;  %v1951_v62 = vpop.f32.mrb[71].mxu0 }
 0x6cf   :  { %v2023_v0 = vmul.f32 0.01, %v1835_v10  ;;  %v2025_v51 = vmul.f32 0.01, %v1948_v30  ;;  %v1839_v36 = vadd.f32 %v1838_v59, %v14245_v25  ;;  %v1952_v4 = vadd.f32 %v1951_v62, %v14248_v27  ;;  %3784 = vmatprep.mubr.bf16.mxu1 %v14370_v32  ;;  %4010 = vmatprep.mubr.bf16.mxu0 %v14370_v32 }
 0x6d0   :  { %v2026_v8 = vmul.f32 0.01, %v1837_v40  ;;  %v2028_v61 = vmul.f32 0.01, %v1950_v60  ;;  %3785 = vmatmul.mubr.bf16.vlgmr.msra.gmra.mrb[64].mxu1 %v14362_v53  ;;  %4011 = vmatmul.mubr.bf16.vlgmr.msra.gmra.mrb[96].mxu0 %v14362_v53  ;;  %v2086_v41 = vmax.f32 %v1833_v44, %v2022_v54  ;;  %v17018_v35 = vcombine.low %v14192_v1, %v14194_v2 }
 0x6d1   :  { %v2027_v50 = vmul.f32 0.01, %v1839_v36  ;;  %v2029_v38 = vmul.f32 0.01, %v1952_v4  ;;  %v17019_v34 = vcombine.low %v14196_v3, %v14200_v5  ;;  %v2088_v59 = vmax.f32 %v1946_v63, %v2024_v58 }
 0x6d2   :  { %3866 = vmatpush1.bf16.msra.mxu1 %v17018_v35  ;;  %v2090_v62 = vmax.f32 %v1837_v40, %v2026_v8  ;;  %v2092_v57 = vmax.f32 %v1950_v60, %v2028_v61  ;;  %v17021_v44 = vcombine.high %v14218_v14, %v14220_v15  ;;  %v2087_v1 = vmax.f32 %v1835_v10, %v2023_v0 }
 0x6d3   :  { %4092 = vmatpush1.bf16.msra.mxu0 %v17019_v34  ;;  %3867 = vmatprep.subr.bf16.mxu1 %v17020_v56  ;;  %v2089_v2 = vmax.f32 %v1948_v30, %v2025_v51  ;;  %v2091_v54 = vmax.f32 %v1839_v36, %v2027_v50  ;;  %v2093_v35 = vmax.f32 %v1952_v4, %v2029_v38  ;;  %v1842_v3 = vpop.f32.mrb[40].mxu1  ;;  %v1955_v5 = vpop.f32.mrb[72].mxu0  ;;  %v14423_v4 = vld [vmem:[#allocation16 + $0x680] sm:$0xff] }
 0x6d4   :  { %4093 = vmatprep.subr.bf16.mxu0 %v17021_v44  ;;  %v14408_v34 = vpack.c.bf16 %v2090_v62, %v2086_v41  ;;  %v14410_v9 = vpack.c.bf16 %v2092_v57, %v2088_v59  ;;  %v1843_v63 = vadd.f32 %v1842_v3, %v14239_v23  ;;  %v1956_v58 = vadd.f32 %v1955_v5, %v14242_v24  ;;  %v1844_v40 = vpop.f32.mrb[41].mxu1  ;;  %v1957_v60 = vpop.f32.mrb[73].mxu0  ;;  %v14425_v57 = vld [vmem:[#allocation16 + $0x6a0] sm:$0xff] }
 0x6d5   :  { %v14414_v8 = vpack.c.bf16 %v2091_v54, %v2087_v1  ;;  %v14416_v61 = vpack.c.bf16 %v2093_v35, %v2089_v2  ;;  %v1845_v10 = vadd.f32 %v1844_v40, %v14245_v25  ;;  %v1958_v30 = vadd.f32 %v1957_v60, %v14248_v27  ;;  %v1846_v0 = vpop.f32.mrb[42].mxu1  ;;  %v1959_v51 = vpop.f32.mrb[74].mxu0 }
 0x6d6   :  { %v17022_v36 = vcombine.low %v14214_v11, %v14216_v13  ;;  %v2030_v56 = vmul.f32 0.01, %v1843_v63  ;;  %v2032_v41 = vmul.f32 0.01, %v1956_v58  ;;  %v1847_v50 = vadd.f32 %v1846_v0, %v14239_v23  ;;  %v1848_v62 = vpop.f32.mrb[43].mxu1  ;;  %v1961_v44 = vpop.f32.mrb[75].mxu0 }
 0x6d7   :  { %v1960_v38 = vadd.f32 %v1959_v51, %v14242_v24  ;;  %v17023_v59 = vcombine.low %v14218_v14, %v14220_v15  ;;  %v17024_v11 = vcombine.high %v14222_v12, %v14224_v16  ;;  %v2031_v13 = vmul.f32 0.01, %v1845_v10  ;;  %3794 = vmatprep.mubr.bf16.mxu1 %v14414_v8  ;;  %4020 = vmatprep.mubr.bf16.mxu0 %v14414_v8 }
 0x6d8   :  { %3868 = vmatpush1.bf16.msra.mxu1 %v17022_v36  ;;  %v2033_v1 = vmul.f32 0.01, %v1958_v30  ;;  %v1849_v2 = vadd.f32 %v1848_v62, %v14245_v25  ;;  %v1962_v54 = vadd.f32 %v1961_v44, %v14248_v27  ;;  %v2034_v35 = vmul.f32 0.01, %v1847_v50  ;;  %4021 = vmatmul.mubr.bf16.gmra.mrb[100].mxu0 %v14408_v34 }
 0x6d9   :  { %4094 = vmatpush1.bf16.msra.mxu0 %v17023_v59  ;;  %3869 = vmatprep.subr.bf16.mxu1 %v17024_v11  ;;  %v2036_v3 = vmul.f32 0.01, %v1960_v38  ;;  %v2094_v5 = vmax.f32 %v1843_v63, %v2030_v56  ;;  %v17025_v0 = vcombine.high %v14226_v17, %v14228_v18  ;;  %v17026_v51 = vcombine.low %v14222_v12, %v14224_v16 }
 0x6da   :  { %3795 = vmatmul.mubr.bf16.gmra.mrb[68].mxu1 %v14408_v34  ;;  %v2035_v40 = vmul.f32 0.01, %v1849_v2  ;;  %v2037_v60 = vmul.f32 0.01, %v1962_v54  ;;  %v2096_v59 = vmax.f32 %v1956_v58, %v2032_v41  ;;  %v2098_v62 = vmax.f32 %v1847_v50, %v2034_v35 }
 0x6db   :  { %4095 = vmatprep.subr.bf16.mxu0 %v17025_v0  ;;  %v2100_v44 = vmax.f32 %v1960_v38, %v2036_v3  ;;  %v17027_v11 = vcombine.low %v14226_v17, %v14228_v18  ;;  %v17028_v63 = vcombine.high %v14230_v19, %v14232_v20  ;;  %v2095_v56 = vmax.f32 %v1845_v10, %v2031_v13  ;;  %v1852_v12 = vpop.f32.mrb[44].mxu1  ;;  %v1965_v16 = vpop.f32.mrb[76].mxu0  ;;  %v14468_v10 = vld [vmem:[#allocation16 + $0x688] sm:$0xff] }
 0x6dc   :  { %3870 = vmatpush1.bf16.msra.mxu1 %v17026_v51  ;;  %v2097_v0 = vmax.f32 %v1958_v30, %v2033_v1  ;;  %v2099_v15 = vmax.f32 %v1849_v2, %v2035_v40  ;;  %v2101_v14 = vmax.f32 %v1962_v54, %v2037_v60  ;;  %v17029_v51 = vcombine.high %v14234_v21, %v14236_v22  ;;  %v1854_v50 = vpop.f32.mrb[45].mxu1  ;;  %v1967_v38 = vpop.f32.mrb[77].mxu0  ;;  %v14481_v40 = vld [vmem:[#allocation16 + $0x6c0] sm:$0xff] }
 0x6dd   :  { %4096 = vmatpush1.bf16.msra.mxu0 %v17027_v11  ;;  %3871 = vmatprep.subr.bf16.mxu1 %v17028_v63  ;;  %v14462_v58 = vpack.c.bf16 %v2098_v62, %v2094_v5  ;;  %v14464_v41 = vpack.c.bf16 %v2100_v44, %v2096_v59  ;;  %v1853_v17 = vadd.f32 %v1852_v12, %v14239_v23  ;;  %v1856_v54 = vpop.f32.mrb[46].mxu1  ;;  %v1969_v35 = vpop.f32.mrb[78].mxu0  ;;  %v14479_v5 = vld [vmem:[#allocation16 + $0x6a8] sm:$0xff]  ;;  %v14483_v60 = vld [vmem:[#allocation16 + $0x6e0] sm:$0xff] }
 0x6de   :  { %4097 = vmatprep.subr.bf16.mxu0 %v17029_v51  ;;  %v1966_v18 = vadd.f32 %v1965_v16, %v14242_v24  ;;  %v14470_v30 = vpack.c.bf16 %v2099_v15, %v2095_v56  ;;  %v14472_v13 = vpack.c.bf16 %v2101_v14, %v2097_v0  ;;  %v1855_v1 = vadd.f32 %v1854_v50, %v14245_v25  ;;  %v1858_v11 = vpop.f32.mrb[47].mxu1  ;;  %v1971_v63 = vpop.f32.mrb[79].mxu0 }
 0x6df   :  { %17030 = vst [vmem:[#allocation56_spill] sm:$0xff] %v14462_v58  ;;  %v1968_v2 = vadd.f32 %v1967_v38, %v14248_v27  ;;  %v17032_v3 = vcombine.low %v14230_v19, %v14232_v20  ;;  %v2038_v15 = vmul.f32 0.01, %v1853_v17  ;;  %v1857_v14 = vadd.f32 %v1856_v54, %v14239_v23 }
 0x6e0   :  { %17031 = vst [vmem:[#allocation57_spill] sm:$0xff] %v14470_v30  ;;  %v2040_v59 = vmul.f32 0.01, %v1966_v18  ;;  %v1970_v62 = vadd.f32 %v1969_v35, %v14242_v24  ;;  %v17033_v44 = vcombine.low %v14234_v21, %v14236_v22  ;;  %v17034_v19 = vcombine.high %v14250_v28, %v14252_v31  ;;  %3804 = vmatprep.mubr.bf16.mxu1 %v14470_v30 }
 0x6e1   :  { %3872 = vmatpush1.bf16.msra.mxu1 %v17032_v3  ;;  %v2039_v20 = vmul.f32 0.01, %v1855_v1  ;;  %v2041_v56 = vmul.f32 0.01, %v1968_v2  ;;  %v1859_v0 = vadd.f32 %v1858_v11, %v14245_v25  ;;  %v1972_v12 = vadd.f32 %v1971_v63, %v14248_v27  ;;  %4030 = vmatprep.mubr.bf16.mxu0 %v14470_v30 }
 0x6e2   :  { %4098 = vmatpush1.bf16.msra.mxu0 %v17033_v44  ;;  %3873 = vmatprep.subr.bf16.mxu1 %v17034_v19  ;;  %v2042_v16 = vmul.f32 0.01, %v1857_v14  ;;  %v2044_v51 = vmul.f32 0.01, %v1970_v62  ;;  %v2102_v50 = vmax.f32 %v1853_v17, %v2038_v15  ;;  %v17035_v35 = vcombine.high %v14254_v26, %v14264_v39 }
 0x6e3   :  { %3805 = vmatmul.mubr.bf16.gmra.mrb[72].mxu1 %v14462_v58  ;;  %4031 = vmatmul.mubr.bf16.gmra.mrb[104].mxu0 %v14462_v58  ;;  %v2043_v38 = vmul.f32 0.01, %v1859_v0  ;;  %v2045_v54 = vmul.f32 0.01, %v1972_v12  ;;  %v17036_v3 = vcombine.low %v14250_v28, %v14252_v31  ;;  %v2104_v11 = vmax.f32 %v1966_v18, %v2040_v59  ;;  %v1862_v28 = vpop.f32.mrb[48].mxu1  ;;  %v1975_v31 = vpop.f32.mrb[80].mxu0 }
 0x6e4   :  { %4099 = vmatprep.subr.bf16.mxu0 %v17035_v35  ;;  %v2106_v63 = vmax.f32 %v1857_v14, %v2042_v16  ;;  %v2108_v19 = vmax.f32 %v1970_v62, %v2044_v51  ;;  %v17037_v21 = vcombine.low %v14254_v26, %v14264_v39  ;;  %v17038_v17 = vcombine.high %v14266_v42, %v14268_v37  ;;  %v1864_v14 = vpop.f32.mrb[49].mxu1  ;;  %v1977_v62 = vpop.f32.mrb[81].mxu0  ;;  %v14535_v51 = vld [vmem:[#allocation16 + $0x6c8] sm:$0xff] }
 0x6e5   :  { %3874 = vmatpush1.bf16.msra.mxu1 %v17036_v3  ;;  %v2103_v15 = vmax.f32 %v1855_v1, %v2039_v20  ;;  %v2105_v35 = vmax.f32 %v1968_v2, %v2041_v56  ;;  %v2107_v36 = vmax.f32 %v1859_v0, %v2043_v38  ;;  %v2109_v22 = vmax.f32 %v1972_v12, %v2045_v54  ;;  %v1866_v0 = vpop.f32.mrb[50].mxu1  ;;  %v1979_v12 = vpop.f32.mrb[82].mxu0  ;;  %v17054_v58 = vld [vmem:[#allocation53_spill] sm:$0xff] }
 0x6e6   :  { %4100 = vmatpush1.bf16.msra.mxu0 %v17037_v21  ;;  %3875 = vmatprep.subr.bf16.mxu1 %v17038_v17  ;;  %v17039_v3 = vcombine.high %v14278_v46, %v14280_v47  ;;  %v14520_v18 = vpack.c.bf16 %v2106_v63, %v2102_v50  ;;  %v14522_v59 = vpack.c.bf16 %v2108_v19, %v2104_v11  ;;  %v14537_v21 = vld [vmem:[#allocation16 + $0x6e8] sm:$0xff]  ;;  %v1868_v11 = vpop.f32.mrb[51].mxu1  ;;  %v1981_v63 = vpop.f32.mrb[83].mxu0 }
 0x6e7   :  { %v1863_v26 = vadd.f32 %v1862_v28, %v14239_v23  ;;  %v1976_v39 = vadd.f32 %v1975_v31, %v14242_v24  ;;  %v14526_v1 = vpack.c.bf16 %v2107_v36, %v2103_v15  ;;  %v14528_v2 = vpack.c.bf16 %v2109_v22, %v2105_v35 }
 0x6e8   :  { %4101 = vmatprep.subr.bf16.mxu0 %v17039_v3  ;;  %17040 = vst [vmem:[#allocation58_spill] sm:$0xff] %v14520_v18  ;;  %v1865_v20 = vadd.f32 %v1864_v14, %v14245_v25  ;;  %v1978_v56 = vadd.f32 %v1977_v62, %v14248_v27  ;;  %v17042_v16 = vcombine.low %v14266_v42, %v14268_v37  ;;  %v17045_v62 = vld [vmem:[#allocation48_spill] sm:$0xff] }
 0x6e9   :  { %17041 = vst [vmem:[#allocation59_spill] sm:$0xff] %v14526_v1  ;;  %v2046_v50 = vmul.f32 0.01, %v1863_v26  ;;  %v2048_v38 = vmul.f32 0.01, %v1976_v39  ;;  %v1867_v36 = vadd.f32 %v1866_v0, %v14239_v23  ;;  %v1980_v22 = vadd.f32 %v1979_v12, %v14242_v24  ;;  %3814 = vmatprep.mubr.bf16.mxu1 %v14526_v1  ;;  %4040 = vmatprep.mubr.bf16.mxu0 %v14526_v1  ;;  %v17046_v0 = vld [vmem:[#allocation49_spill] sm:$0xff] }
 0x6ea   :  { %3876 = vmatpush1.bf16.msra.mxu1 %v17042_v16  ;;  %v17043_v54 = vcombine.low %v14278_v46, %v14280_v47  ;;  %v17044_v42 = vcombine.high %v14282_v48, %v14292_v52  ;;  %v2047_v37 = vmul.f32 0.01, %v1865_v20  ;;  %v2049_v19 = vmul.f32 0.01, %v1978_v56 }
 0x6eb   :  { %v1869_v17 = vadd.f32 %v1868_v11, %v14245_v25  ;;  %v1982_v15 = vadd.f32 %v1981_v63, %v14248_v27  ;;  %v2050_v35 = vmul.f32 0.01, %v1867_v36  ;;  %v2052_v28 = vmul.f32 0.01, %v1980_v22  ;;  %3815 = vmatmul.mubr.bf16.gmra.mrb[76].mxu1 %v14520_v18  ;;  %4041 = vmatmul.mubr.bf16.gmra.mrb[108].mxu0 %v14520_v18 }
 0x6ec   :  { %4102 = vmatpush1.bf16.msra.mxu0 %v17043_v54  ;;  %3877 = vmatprep.subr.bf16.mxu1 %v17044_v42  ;;  %v2110_v31 = vmax.f32 %v1863_v26, %v2046_v50  ;;  %v17047_v12 = vcombine.high %v17045_v62, %v17046_v0  ;;  %v17048_v16 = vcombine.low %v14282_v48, %v14292_v52  ;;  %v17050_v26 = vld [vmem:[#allocation50_spill] sm:$0xff]  ;;  %v17051_v50 = vld [vmem:[#allocation51_spill] sm:$0xff]  ;;  %v1872_v48 = vpop.f32.mrb[52].mxu1  ;;  %v1985_v52 = vpop.f32.mrb[84].mxu0 }
 0x6ed   :  { %v2051_v3 = vmul.f32 0.01, %v1869_v17  ;;  %v2053_v14 = vmul.f32 0.01, %v1982_v15  ;;  %v2112_v11 = vmax.f32 %v1976_v39, %v2048_v38  ;;  %v2114_v63 = vmax.f32 %v1867_v36, %v2050_v35  ;;  %v1874_v35 = vpop.f32.mrb[53].mxu1 }
 0x6ee   :  { %4103 = vmatprep.subr.bf16.mxu0 %v17047_v12  ;;  %3878 = vmatpush1.bf16.msra.mxu1 %v17048_v16  ;;  %v2116_v42 = vmax.f32 %v1980_v22, %v2052_v28  ;;  %v17049_v47 = vcombine.low %v17045_v62, %v17046_v0  ;;  %v17052_v46 = vcombine.high %v17050_v26, %v17051_v50  ;;  %v17053_v16 = vld [vmem:[#allocation52_spill] sm:$0xff]  ;;  %v1987_v28 = vpop.f32.mrb[85].mxu0 }
 0x6ef   :  { %v2111_v44 = vmax.f32 %v1865_v20, %v2047_v37  ;;  %v2113_v12 = vmax.f32 %v1978_v56, %v2049_v19  ;;  %v2115_v18 = vmax.f32 %v1869_v17, %v2051_v3  ;;  %v2117_v1 = vmax.f32 %v1982_v15, %v2053_v14  ;;  %v14580_v20 = vld [vmem:[#allocation16 + $0x700] sm:$0xff]  ;;  %v1876_v15 = vpop.f32.mrb[54].mxu1  ;;  %v14593_v3 = vld [vmem:[#allocation16 + $0x708] sm:$0xff] }
 0x6f0   :  { %4104 = vmatpush1.bf16.msra.mxu0 %v17049_v47  ;;  %3879 = vmatprep.subr.bf16.mxu1 %v17052_v46  ;;  %v17055_v54 = vcombine.high %v17053_v16, %v17054_v58  ;;  %v14574_v39 = vpack.c.bf16 %v2114_v63, %v2110_v31  ;;  %v14576_v38 = vpack.c.bf16 %v2116_v42, %v2112_v11  ;;  %v1989_v46 = vpop.f32.mrb[86].mxu0  ;;  %v14591_v31 = vld [vmem:[#allocation16 + $0x720] sm:$0xff]  ;;  %v14595_v14 = vld [vmem:[#allocation16 + $0x728] sm:$0xff]  ;;  %v17061_v42 = vld [vmem:[#allocation55_spill] sm:$0xff] }
 0x6f1   :  { %v1873_v36 = vadd.f32 %v1872_v48, %v14239_v23  ;;  %v1986_v22 = vadd.f32 %v1985_v52, %v14242_v24  ;;  %v14582_v56 = vpack.c.bf16 %v2115_v18, %v2111_v44  ;;  %v14584_v37 = vpack.c.bf16 %v2117_v1, %v2113_v12  ;;  %v1991_v11 = vpop.f32.mrb[87].mxu0  ;;  %v17060_v63 = vld [vmem:[#allocation54_spill] sm:$0xff] }
 0x6f2   :  { %4105 = vmatprep.subr.bf16.mxu0 %v17055_v54  ;;  %17056 = vst [vmem:[#allocation48_spill] sm:$0xff] %v14574_v39  ;;  %v1875_v19 = vadd.f32 %v1874_v35, %v14245_v25  ;;  %v1988_v17 = vadd.f32 %v1987_v28, %v14248_v27  ;;  %v17058_v47 = vcombine.low %v17050_v26, %v17051_v50  ;;  %v1878_v54 = vpop.f32.mrb[55].mxu1 }
 0x6f3   :  { %17057 = vst [vmem:[#allocation49_spill] sm:$0xff] %v14582_v56  ;;  %v2054_v44 = vmul.f32 0.01, %v1873_v36  ;;  %v2056_v18 = vmul.f32 0.01, %v1986_v22  ;;  %v1877_v1 = vadd.f32 %v1876_v15, %v14239_v23  ;;  %v1990_v62 = vadd.f32 %v1989_v46, %v14242_v24  ;;  %3824 = vmatprep.mubr.bf16.mxu1 %v14582_v56  ;;  %4050 = vmatprep.mubr.bf16.mxu0 %v14582_v56 }
 0x6f4   :  { %3880 = vmatpush1.bf16.msra.mxu1 %v17058_v47  ;;  %v17059_v0 = vcombine.low %v17053_v16, %v17054_v58  ;;  %v17062_v26 = vcombine.high %v17060_v63, %v17061_v42  ;;  %v2055_v50 = vmul.f32 0.01, %v1875_v19  ;;  %v2057_v12 = vmul.f32 0.01, %v1988_v17  ;;  %4051 = vmatmul.mubr.bf16.gmra.mrb[112].mxu0 %v14574_v39 }
 0x6f5   :  { %v1879_v48 = vadd.f32 %v1878_v54, %v14245_v25  ;;  %v1992_v52 = vadd.f32 %v1991_v11, %v14248_v27  ;;  %v2058_v35 = vmul.f32 0.01, %v1877_v1  ;;  %v2060_v28 = vmul.f32 0.01, %v1990_v62  ;;  %3825 = vmatmul.mubr.bf16.gmra.mrb[80].mxu1 %v14574_v39 }
 0x6f6   :  { %4106 = vmatpush1.bf16.msra.mxu0 %v17059_v0  ;;  %3881 = vmatprep.subr.bf16.mxu1 %v17062_v26  ;;  %v2118_v15 = vmax.f32 %v1873_v36, %v2054_v44  ;;  %v17063_v0 = vcombine.high %v14346_v49, %v14348_v43  ;;  %v17064_v54 = vcombine.low %v17060_v63, %v17061_v42  ;;  %v1882_v63 = vpop.f32.mrb[56].mxu1  ;;  %v1995_v42 = vpop.f32.mrb[88].mxu0 }
 0x6f7   :  { %v2059_v46 = vmul.f32 0.01, %v1879_v48  ;;  %v2061_v47 = vmul.f32 0.01, %v1992_v52  ;;  %v2120_v26 = vmax.f32 %v1986_v22, %v2056_v18  ;;  %v2122_v39 = vmax.f32 %v1877_v1, %v2058_v35  ;;  %v1884_v1 = vpop.f32.mrb[57].mxu1 }
 0x6f8   :  { %4107 = vmatprep.subr.bf16.mxu0 %v17063_v0  ;;  %3882 = vmatpush1.bf16.msra.mxu1 %v17064_v54  ;;  %v2124_v58 = vmax.f32 %v1990_v62, %v2060_v28  ;;  %v17065_v16 = vcombine.low %v14346_v49, %v14348_v43  ;;  %v17066_v36 = vcombine.high %v14368_v55, %v14376_v29  ;;  %v1997_v62 = vpop.f32.mrb[89].mxu0  ;;  %v14649_v28 = vld [vmem:[#allocation16 + $0x760] sm:$0xff] }
 0x6f9   :  { %v2119_v44 = vmax.f32 %v1875_v19, %v2055_v50  ;;  %v2121_v0 = vmax.f32 %v1988_v17, %v2057_v12  ;;  %v2123_v56 = vmax.f32 %v1879_v48, %v2059_v46  ;;  %v2125_v30 = vmax.f32 %v1992_v52, %v2061_v47  ;;  %v14638_v19 = vld [vmem:[#allocation16 + $0x740] sm:$0xff]  ;;  %v1999_v52 = vpop.f32.mrb[90].mxu0 }
 0x6fa   :  { %4108 = vmatpush1.bf16.msra.mxu0 %v17065_v16  ;;  %3883 = vmatprep.subr.bf16.mxu1 %v17066_v36  ;;  %v17067_v54 = vcombine.high %v14378_v45, %v14380_v6  ;;  %v14632_v22 = vpack.c.bf16 %v2122_v39, %v2118_v15  ;;  %v14634_v18 = vpack.c.bf16 %v2124_v58, %v2120_v26  ;;  %v1886_v39 = vpop.f32.mrb[58].mxu1  ;;  %v14651_v58 = vld [vmem:[#allocation16 + $0x748] sm:$0xff]  ;;  %v2001_v36 = vpop.f32.mrb[91].mxu0 }
 0x6fb   :  { %v1883_v43 = vadd.f32 %v1882_v63, %v14239_v23  ;;  %v1996_v49 = vadd.f32 %v1995_v42, %v14242_v24  ;;  %v14640_v17 = vpack.c.bf16 %v2123_v56, %v2119_v44  ;;  %v14642_v50 = vpack.c.bf16 %v2125_v30, %v2121_v0  ;;  %v14653_v16 = vld [vmem:[#allocation16 + $0x768] sm:$0xff]  ;;  %v1888_v26 = vpop.f32.mrb[59].mxu1 }
 0x6fc   :  { %4109 = vmatprep.subr.bf16.mxu0 %v17067_v54  ;;  %17068 = vst [vmem:[#allocation50_spill] sm:$0xff] %v14632_v22  ;;  %v1885_v12 = vadd.f32 %v1884_v1, %v14245_v25  ;;  %v1998_v48 = vadd.f32 %v1997_v62, %v14248_v27  ;;  %v17069_v35 = vcombine.low %v14368_v55, %v14376_v29 }
 0x6fd   :  { %v2062_v56 = vmul.f32 0.01, %v1883_v43  ;;  %v2064_v15 = vmul.f32 0.01, %v1996_v49  ;;  %v1887_v30 = vadd.f32 %v1886_v39, %v14239_v23  ;;  %v2000_v46 = vadd.f32 %v1999_v52, %v14242_v24  ;;  %3834 = vmatprep.mubr.bf16.mxu1 %v14640_v17  ;;  %4060 = vmatprep.mubr.bf16.mxu0 %v14640_v17 }
 0x6fe   :  { %3884 = vmatpush1.bf16.msra.mxu1 %v17069_v35  ;;  %v17070_v47 = vcombine.low %v14378_v45, %v14380_v6  ;;  %v17071_v55 = vcombine.high %v14423_v4, %v14425_v57  ;;  %v2063_v29 = vmul.f32 0.01, %v1885_v12  ;;  %v2065_v44 = vmul.f32 0.01, %v1998_v48  ;;  %4061 = vmatmul.mubr.bf16.gmra.mrb[116].mxu0 %v14632_v22 }
 0x6ff   :  { %v1889_v0 = vadd.f32 %v1888_v26, %v14245_v25  ;;  %v2002_v63 = vadd.f32 %v2001_v36, %v14248_v27  ;;  %v2066_v42 = vmul.f32 0.01, %v1887_v30  ;;  %v2068_v54 = vmul.f32 0.01, %v2000_v46  ;;  %3835 = vmatmul.mubr.bf16.gmra.mrb[84].mxu1 %v14632_v22 }
 0x700   :  { %4110 = vmatpush1.bf16.msra.mxu0 %v17070_v47  ;;  %3885 = vmatprep.subr.bf16.mxu1 %v17071_v55  ;;  %v10936_v45 = vcombine.high %v14593_v3, %v14595_v14  ;;  %v2126_v1 = vmax.f32 %v1883_v43, %v2062_v56  ;;  %v17072_v52 = vcombine.high %v14468_v10, %v14479_v5 }
 0x701   :  { %v2067_v62 = vmul.f32 0.01, %v1889_v0  ;;  %v2069_v39 = vmul.f32 0.01, %v2002_v63  ;;  %v17073_v35 = vcombine.low %v14423_v4, %v14425_v57  ;;  %v10944_v47 = vcombine.high %v14651_v58, %v14653_v16  ;;  %v1892_v4 = vpop.f32.mrb[60].mxu1  ;;  %v2005_v57 = vpop.f32.mrb[92].mxu0 }
 0x702   :  { %4111 = vmatprep.subr.bf16.mxu0 %v17072_v52  ;;  %v2128_v26 = vmax.f32 %v1996_v49, %v2064_v15  ;;  %v2130_v36 = vmax.f32 %v1887_v30, %v2066_v42  ;;  %v2132_v55 = vmax.f32 %v2000_v46, %v2068_v54  ;;  %v17074_v6 = vcombine.low %v14468_v10, %v14479_v5  ;;  %v1894_v30 = vpop.f32.mrb[61].mxu1  ;;  %v2007_v46 = vpop.f32.mrb[93].mxu0  ;;  %v14705_v54 = vld [vmem:[#allocation16 + $0x780] sm:$0xff] }
 0x703   :  { %3886 = vmatpush1.bf16.msra.mxu1 %v17073_v35  ;;  %v17075_v43 = vcombine.high %v14481_v40, %v14483_v60  ;;  %v2127_v56 = vmax.f32 %v1885_v12, %v2063_v29  ;;  %v2129_v52 = vmax.f32 %v1998_v48, %v2065_v44  ;;  %v2131_v11 = vmax.f32 %v1889_v0, %v2067_v62  ;;  %v1896_v0 = vpop.f32.mrb[62].mxu1 }
 0x704   :  { %4112 = vmatpush1.bf16.msra.mxu0 %v17074_v6  ;;  %v2133_v22 = vmax.f32 %v2002_v63, %v2069_v39  ;;  %v17076_v35 = vcombine.high %v14535_v51, %v14537_v21  ;;  %v14690_v49 = vpack.c.bf16 %v2130_v36, %v2126_v1  ;;  %v14692_v15 = vpack.c.bf16 %v2132_v55, %v2128_v26  ;;  %v2009_v63 = vpop.f32.mrb[94].mxu0  ;;  %v14707_v6 = vld [vmem:[#allocation16 + $0x7a0] sm:$0xff]  ;;  %v1898_v26 = vpop.f32.mrb[63].mxu1 }
 0x705   :  { %3887 = vmatprep.subr.bf16.mxu1 %v17075_v43  ;;  %v1893_v10 = vadd.f32 %v1892_v4, %v14239_v23  ;;  %v2006_v5 = vadd.f32 %v2005_v57, %v14242_v24  ;;  %v14696_v12 = vpack.c.bf16 %v2131_v11, %v2127_v56  ;;  %v1895_v29 = vadd.f32 %v1894_v30, %v14245_v25  ;;  %v2011_v36 = vpop.f32.mrb[95].mxu0 }
 0x706   :  { %4113 = vmatprep.subr.bf16.mxu0 %v17076_v35  ;;  %v14698_v48 = vpack.c.bf16 %v2133_v22, %v2129_v52  ;;  %v2008_v44 = vadd.f32 %v2007_v46, %v14248_v27  ;;  %v17077_v42 = vcombine.low %v14481_v40, %v14483_v60  ;;  %v1897_v11 = vadd.f32 %v1896_v0, %v14239_v23 }
 0x707   :  { %v2070_v1 = vmul.f32 0.01, %v1893_v10  ;;  %v2072_v62 = vmul.f32 0.01, %v2006_v5  ;;  %v2010_v22 = vadd.f32 %v2009_v63, %v14242_v24  ;;  %v17078_v39 = vcombine.low %v14535_v51, %v14537_v21  ;;  %3844 = vmatprep.mubr.bf16.mxu1 %v14696_v12  ;;  %4070 = vmatprep.mubr.bf16.mxu0 %v14696_v12  ;;  %v2415_v63 = vld [vmem:[#allocation16 + $0x788] sm:$0xff] }
 0x708   :  { %3888 = vmatpush1.bf16.msra.mxu1 %v17077_v42  ;;  %v17079_v40 = vcombine.high %v14580_v20, %v14591_v31  ;;  %v2071_v60 = vmul.f32 0.01, %v1895_v29  ;;  %v2073_v55 = vmul.f32 0.01, %v2008_v44  ;;  %v1899_v43 = vadd.f32 %v1898_v26, %v14245_v25  ;;  %4071 = vmatmul.mubr.bf16.gmra.mrb[120].mxu0 %v14690_v49 }
 0x709   :  { %4114 = vmatpush1.bf16.msra.mxu0 %v17078_v39  ;;  %v2012_v56 = vadd.f32 %v2011_v36, %v14248_v27  ;;  %v2074_v23 = vmul.f32 0.01, %v1897_v11  ;;  %v2076_v24 = vmul.f32 0.01, %v2010_v22  ;;  %3845 = vmatmul.mubr.bf16.gmra.mrb[88].mxu1 %v14690_v49  ;;  %v10941_v51 = vcombine.low %v14638_v19, %v14649_v28  ;;  %v2180_v39 = vld [vmem:[#allocation16 + $0x30] sm:$0xff]  ;;  %v2177_v36 = vld [vmem:[#allocation16 + $0x18] sm:$0xff] }
 0x70a   :  { %3889 = vmatprep.subr.bf16.mxu1 %v17079_v40  ;;  %v10943_v21 = vcombine.low %v14651_v58, %v14653_v16  ;;  %v2134_v52 = vmax.f32 %v1893_v10, %v2070_v1  ;;  %v2075_v25 = vmul.f32 0.01, %v1899_v43  ;;  %4115 = vmatprep.subr.bf16.mxu0 %v10936_v45  ;;  %v17080_v27 = vcombine.low %v14580_v20, %v14591_v31  ;;  %v2419_v45 = vld [vmem:[#allocation16 + $0x7a8] sm:$0xff] }
 0x70b   :  { %v2077_v4 = vmul.f32 0.01, %v2012_v56  ;;  %v10950_v57 = vcombine.high %v14705_v54, %v14707_v6  ;;  %v2136_v35 = vmax.f32 %v2006_v5, %v2072_v62  ;;  %v2138_v30 = vmax.f32 %v1897_v11, %v2074_v23  ;;  %v2185_v23 = vld [vmem:[#allocation16 + $0x58] sm:$0xff] }
 0x70c   :  { %3890 = vmatpush1.bf16.msra.mxu1 %v17080_v27  ;;  %v2140_v46 = vmax.f32 %v2010_v22, %v2076_v24  ;;  %v17081_v0 = vcombine.low %v14593_v3, %v14595_v14  ;;  %v17082_v10 = vcombine.high %v14638_v19, %v14649_v28  ;;  %v2135_v42 = vmax.f32 %v1895_v29, %v2071_v60  ;;  %v2422_v3 = vld [vmem:[#allocation16 + $0x7c0] sm:$0xff]  ;;  %v2427_v22 = vld [vmem:[#allocation16 + $0x7e8] sm:$0xff]  ;;  %v2189_v24 = vld [vmem:[#allocation16 + $0x78] sm:$0xff] }
 0x70d   :  { %v2137_v1 = vmax.f32 %v2008_v44, %v2073_v55  ;;  %v2139_v20 = vmax.f32 %v1899_v43, %v2075_v25  ;;  %v2141_v31 = vmax.f32 %v2012_v56, %v2077_v4  ;;  %v14741_v5 = vpack.c.bf16 %v2138_v30, %v2134_v52  ;;  %v2426_v14 = vld [vmem:[#allocation16 + $0x7e0] sm:$0xff]  ;;  %v2423_v44 = vld [vmem:[#allocation16 + $0x7c8] sm:$0xff]  ;;  %v2184_v43 = vld [vmem:[#allocation16 + $0x50] sm:$0xff] }
 0x70e   :  { %4116 = vmatpush1.bf16.msra.mxu0 %v17081_v0  ;;  %3891 = vmatprep.subr.bf16.mxu1 %v17082_v10  ;;  %v14743_v62 = vpack.c.bf16 %v2140_v46, %v2136_v35  ;;  %v10949_v28 = vcombine.low %v14705_v54, %v14707_v6  ;;  %v10952_v29 = vcombine.high %v2415_v63, %v2419_v45  ;;  %v2181_v54 = vld [vmem:[#allocation16 + $0x38] sm:$0xff]  ;;  %v2188_v56 = vld [vmem:[#allocation16 + $0x70] sm:$0xff] }
 0x70f   :  { %4117 = vmatprep.subr.bf16.mxu0 %v10944_v47  ;;  %v14745_v11 = vpack.c.bf16 %v2139_v20, %v2135_v42  ;;  %v14747_v19 = vpack.c.bf16 %v2141_v31, %v2137_v1  ;;  %v10951_v58 = vcombine.low %v2415_v63, %v2419_v45  ;;  %v10958_v16 = vcombine.high %v2422_v3, %v2426_v14  ;;  %v2176_v47 = vld [vmem:[#allocation16 + $0x10] sm:$0xff]  ;;  %v2197_v35 = vld [vmem:[#allocation16 + $0xb8] sm:$0xff] }
 0x710   :  { %3892 = vmatpush1.bf16.msra.mxu1 %v10941_v51  ;;  %v10960_v26 = vcombine.high %v2423_v44, %v2427_v22  ;;  %v10957_v6 = vcombine.low %v2422_v3, %v2426_v14  ;;  %v10959_v40 = vcombine.low %v2423_v44, %v2427_v22  ;;  %v10714_v60 = vcombine.high %v2176_v47, %v2180_v39  ;;  %v2192_v4 = vld [vmem:[#allocation16 + $0x90] sm:$0xff]  ;;  %v2201_v42 = vld [vmem:[#allocation16 + $0xd8] sm:$0xff] }
 0x711   :  { %3893 = vmatprep.subr.bf16.mxu1 %v10950_v57  ;;  %3854 = vmatprep.mubr.bf16.mxu1 %v14745_v11  ;;  %v10716_v55 = vcombine.high %v2177_v36, %v2181_v54  ;;  %v10713_v51 = vcombine.low %v2176_v47, %v2180_v39  ;;  %v10722_v52 = vcombine.high %v2184_v43, %v2188_v56  ;;  %v2196_v27 = vld [vmem:[#allocation16 + $0xb0] sm:$0xff]  ;;  %v2193_v57 = vld [vmem:[#allocation16 + $0x98] sm:$0xff] }
 0x712   :  { %4118 = vmatpush1.bf16.msra.mxu0 %v10943_v21  ;;  %4080 = vmatprep.mubr.bf16.mxu0 %v14745_v11  ;;  %v10715_v21 = vcombine.low %v2177_v36, %v2181_v54  ;;  %v10724_v25 = vcombine.high %v2185_v23, %v2189_v24  ;;  %v10721_v30 = vcombine.low %v2184_v43, %v2188_v56  ;;  %v2200_v63 = vld [vmem:[#allocation16 + $0xd0] sm:$0xff]  ;;  %v2205_v1 = vld [vmem:[#allocation16 + $0xf8] sm:$0xff] }
 0x713   :  { %3855 = vmatmul.mubr.bf16.gmra.mrb[92].mxu1 %v14741_v5  ;;  %4081 = vmatmul.mubr.bf16.gmra.mrb[124].mxu0 %v14741_v5  ;;  %v10723_v46 = vcombine.low %v2185_v23, %v2189_v24  ;;  %v10730_v0 = vcombine.high %v2192_v4, %v2196_v27  ;;  %v10732_v10 = vcombine.high %v2193_v57, %v2197_v35  ;;  %v2204_v45 = vld [vmem:[#allocation16 + $0xf0] sm:$0xff]  ;;  %v2209_v44 = vld [vmem:[#allocation16 + $0x118] sm:$0xff] }
 0x714   :  { %4119 = vmatprep.subr.bf16.mxu0 %v10952_v29  ;;  %3894 = vmatpush1.bf16.msra.mxu1 %v10949_v28  ;;  %v10729_v20 = vcombine.low %v2192_v4, %v2196_v27  ;;  %v10731_v31 = vcombine.low %v2193_v57, %v2197_v35  ;;  %v10738_v3 = vcombine.high %v2200_v63, %v2204_v45  ;;  %v2208_v28 = vld [vmem:[#allocation16 + $0x110] sm:$0xff]  ;;  %v2213_v22 = vld [vmem:[#allocation16 + $0x138] sm:$0xff] }
 0x715   :  { %3897 = vmatprep.mubr.bf16.mxu1 %v14372_v7  ;;  %4123 = vmatprep.mubr.bf16.mxu0 %v14372_v7  ;;  %v10740_v14 = vcombine.high %v2201_v42, %v2205_v1  ;;  %v2212_v29 = vld [vmem:[#allocation16 + $0x130] sm:$0xff]  ;;  %v10748_v39 = vcombine.high %v2209_v44, %v2213_v22  ;;  %v2217_v54 = vld [vmem:[#allocation16 + $0x158] sm:$0xff] }
 0x716   :  { %4120 = vmatpush1.bf16.msra.mxu0 %v10951_v58  ;;  %3895 = vmatprep.subr.bf16.mxu1 %v10958_v16  ;;  %v10737_v58 = vcombine.low %v2200_v63, %v2204_v45  ;;  %v10739_v16 = vcombine.low %v2201_v42, %v2205_v1  ;;  %v10746_v47 = vcombine.high %v2208_v28, %v2212_v29  ;;  %v2220_v36 = vld [vmem:[#allocation16 + $0x170] sm:$0xff]  ;;  %v2225_v24 = vld [vmem:[#allocation16 + $0x198] sm:$0xff] }
 0x717   :  { %4121 = vmatprep.subr.bf16.mxu0 %v10960_v26  ;;  %v2216_v26 = vld [vmem:[#allocation16 + $0x150] sm:$0xff]  ;;  %v2233_v35 = vld [vmem:[#allocation16 + $0x1d8] sm:$0xff] }
 0x718   :  { %3896 = vmatpush1.bf16.msra.mxu1 %v10957_v6  ;;  %v2221_v6 = vld [vmem:[#allocation16 + $0x178] sm:$0xff]  ;;  %v2224_v56 = vld [vmem:[#allocation16 + $0x190] sm:$0xff] }
 0x719   :  { %4204 = vmatprep.subr.bf16.mxu1 %v10714_v60  ;;  %v10747_v60 = vcombine.low %v2209_v44, %v2213_v22  ;;  %v10756_v43 = vcombine.high %v2217_v54, %v2221_v6  ;;  %v2228_v23 = vld [vmem:[#allocation16 + $0x1b0] sm:$0xff]  ;;  %v2241_v1 = vld [vmem:[#allocation16 + $0x218] sm:$0xff] }
 0x71a   :  { %4122 = vmatpush1.bf16.msra.mxu0 %v10959_v40  ;;  %v10745_v40 = vcombine.low %v2208_v28, %v2212_v29  ;;  %v2232_v27 = vld [vmem:[#allocation16 + $0x1d0] sm:$0xff]  ;;  %v2249_v22 = vld [vmem:[#allocation16 + $0x258] sm:$0xff] }
 0x71b   :  { %4430 = vmatprep.subr.bf16.mxu0 %v10716_v55  ;;  %3898 = vmatmul.mubr.bf16.vlgmr.msra.gmra.mrb[64].mxu1 %v14364_v33  ;;  %v10754_v55 = vcombine.high %v2216_v26, %v2220_v36  ;;  %v2236_v57 = vld [vmem:[#allocation16 + $0x1f0] sm:$0xff] }
 0x71c   :  { %3907 = vmatprep.mubr.bf16.mxu1 %v14416_v61  ;;  %4205 = vmatpush1.bf16.msra.mxu1 %v10713_v51  ;;  %v2229_v51 = vld [vmem:[#allocation16 + $0x1b8] sm:$0xff]  ;;  %v2240_v45 = vld [vmem:[#allocation16 + $0x210] sm:$0xff] }
 0x71d   :  { %4124 = vmatmul.mubr.bf16.vlgmr.msra.gmra.mrb[96].mxu0 %v14364_v33  ;;  %4206 = vmatprep.subr.bf16.mxu1 %v10722_v52  ;;  %v10755_v52 = vcombine.low %v2217_v54, %v2221_v6  ;;  %v10764_v4 = vcombine.high %v2225_v24, %v2229_v51  ;;  %v2244_v42 = vld [vmem:[#allocation16 + $0x230] sm:$0xff]  ;;  %v2257_v6 = vld [vmem:[#allocation16 + $0x298] sm:$0xff] }
 0x71e   :  { %4133 = vmatprep.mubr.bf16.mxu0 %v14416_v61  ;;  %4431 = vmatpush1.bf16.msra.mxu0 %v10715_v21  ;;  %v10753_v21 = vcombine.low %v2216_v26, %v2220_v36  ;;  %v2248_v29 = vld [vmem:[#allocation16 + $0x250] sm:$0xff] }
 0x71f   :  { %4432 = vmatprep.subr.bf16.mxu0 %v10724_v25  ;;  %v10762_v25 = vcombine.high %v2224_v56, %v2228_v23  ;;  %v2252_v44 = vld [vmem:[#allocation16 + $0x270] sm:$0xff] }
 0x720   :  { %4207 = vmatpush1.bf16.msra.mxu1 %v10721_v30  ;;  %v2237_v30 = vld [vmem:[#allocation16 + $0x1f8] sm:$0xff]  ;;  %v2256_v36 = vld [vmem:[#allocation16 + $0x290] sm:$0xff] }
 0x721   :  { %4208 = vmatprep.subr.bf16.mxu1 %v10730_v0  ;;  %v10763_v0 = vcombine.low %v2225_v24, %v2229_v51  ;;  %v10772_v63 = vcombine.high %v2233_v35, %v2237_v30  ;;  %v2260_v54 = vld [vmem:[#allocation16 + $0x2b0] sm:$0xff]  ;;  %v2265_v51 = vld [vmem:[#allocation16 + $0x2d8] sm:$0xff] }
 0x722   :  { %4433 = vmatpush1.bf16.msra.mxu0 %v10723_v46  ;;  %v10761_v46 = vcombine.low %v2224_v56, %v2228_v23  ;;  %v2264_v23 = vld [vmem:[#allocation16 + $0x2d0] sm:$0xff] }
 0x723   :  { %3908 = vmatmul.mubr.bf16.gmra.mrb[68].mxu1 %v14410_v9  ;;  %4434 = vmatprep.subr.bf16.mxu0 %v10732_v10  ;;  %v10770_v10 = vcombine.high %v2232_v27, %v2236_v57  ;;  %v2268_v24 = vld [vmem:[#allocation16 + $0x2f0] sm:$0xff] }
 0x724   :  { %3917 = vmatprep.mubr.bf16.mxu1 %v14472_v13  ;;  %4209 = vmatpush1.bf16.msra.mxu1 %v10729_v20  ;;  %v2245_v20 = vld [vmem:[#allocation16 + $0x238] sm:$0xff] }
 0x725   :  { %4134 = vmatmul.mubr.bf16.gmra.mrb[100].mxu0 %v14410_v9  ;;  %4210 = vmatprep.subr.bf16.mxu1 %v10738_v3  ;;  %v10771_v3 = vcombine.low %v2233_v35, %v2237_v30  ;;  %v10780_v28 = vcombine.high %v2241_v1, %v2245_v20  ;;  %v2276_v35 = vld [vmem:[#allocation16 + $0x330] sm:$0xff]  ;;  %v2273_v30 = vld [vmem:[#allocation16 + $0x318] sm:$0xff] }
 0x726   :  { %4143 = vmatprep.mubr.bf16.mxu0 %v14472_v13  ;;  %4435 = vmatpush1.bf16.msra.mxu0 %v10731_v31  ;;  %v10769_v31 = vcombine.low %v2232_v27, %v2236_v57  ;;  %v2272_v57 = vld [vmem:[#allocation16 + $0x310] sm:$0xff] }
 0x727   :  { %4436 = vmatprep.subr.bf16.mxu0 %v10740_v14  ;;  %v10778_v14 = vcombine.high %v2240_v45, %v2244_v42 }
 0x728   :  { %4211 = vmatpush1.bf16.msra.mxu1 %v10737_v58  ;;  %v2253_v58 = vld [vmem:[#allocation16 + $0x278] sm:$0xff] }
 0x729   :  { %4212 = vmatprep.subr.bf16.mxu1 %v10746_v47  ;;  %v10779_v47 = vcombine.low %v2241_v1, %v2245_v20  ;;  %v10788_v26 = vcombine.high %v2249_v22, %v2253_v58  ;;  %v2284_v1 = vld [vmem:[#allocation16 + $0x370] sm:$0xff]  ;;  %v2281_v20 = vld [vmem:[#allocation16 + $0x358] sm:$0xff] }
 0x72a   :  { %4437 = vmatpush1.bf16.msra.mxu0 %v10739_v16  ;;  %v10777_v16 = vcombine.low %v2240_v45, %v2244_v42  ;;  %v2280_v42 = vld [vmem:[#allocation16 + $0x350] sm:$0xff] }
 0x72b   :  { %3918 = vmatmul.mubr.bf16.gmra.mrb[72].mxu1 %v14464_v41  ;;  %4438 = vmatprep.subr.bf16.mxu0 %v10748_v39  ;;  %v10786_v39 = vcombine.high %v2248_v29, %v2252_v44 }
 0x72c   :  { %3927 = vmatprep.mubr.bf16.mxu1 %v14528_v2  ;;  %4213 = vmatpush1.bf16.msra.mxu1 %v10745_v40  ;;  %v2261_v40 = vld [vmem:[#allocation16 + $0x2b8] sm:$0xff] }
 0x72d   :  { %4144 = vmatmul.mubr.bf16.gmra.mrb[104].mxu0 %v14464_v41  ;;  %4214 = vmatprep.subr.bf16.mxu1 %v10754_v55  ;;  %v10787_v55 = vcombine.low %v2249_v22, %v2253_v58  ;;  %v10796_v56 = vcombine.high %v2257_v6, %v2261_v40  ;;  %v2292_v22 = vld [vmem:[#allocation16 + $0x3b0] sm:$0xff]  ;;  %v2289_v58 = vld [vmem:[#allocation16 + $0x398] sm:$0xff] }
 0x72e   :  { %4153 = vmatprep.mubr.bf16.mxu0 %v14528_v2  ;;  %4439 = vmatpush1.bf16.msra.mxu0 %v10747_v60  ;;  %v10785_v60 = vcombine.low %v2248_v29, %v2252_v44  ;;  %v2288_v44 = vld [vmem:[#allocation16 + $0x390] sm:$0xff] }
 0x72f   :  { %4440 = vmatprep.subr.bf16.mxu0 %v10756_v43  ;;  %v10794_v43 = vcombine.high %v2256_v36, %v2260_v54 }
 0x730   :  { %4215 = vmatpush1.bf16.msra.mxu1 %v10753_v21  ;;  %v2269_v21 = vld [vmem:[#allocation16 + $0x2f8] sm:$0xff] }
 0x731   :  { %4216 = vmatprep.subr.bf16.mxu1 %v10762_v25  ;;  %v10795_v25 = vcombine.low %v2257_v6, %v2261_v40  ;;  %v10804_v27 = vcombine.high %v2265_v51, %v2269_v21  ;;  %v2300_v6 = vld [vmem:[#allocation16 + $0x3f0] sm:$0xff]  ;;  %v2297_v40 = vld [vmem:[#allocation16 + $0x3d8] sm:$0xff] }
 0x732   :  { %4441 = vmatpush1.bf16.msra.mxu0 %v10755_v52  ;;  %v10793_v52 = vcombine.low %v2256_v36, %v2260_v54  ;;  %v2296_v54 = vld [vmem:[#allocation16 + $0x3d0] sm:$0xff] }
 0x733   :  { %3928 = vmatmul.mubr.bf16.gmra.mrb[76].mxu1 %v14522_v59  ;;  %4442 = vmatprep.subr.bf16.mxu0 %v10764_v4  ;;  %v10802_v4 = vcombine.high %v2264_v23, %v2268_v24 }
 0x734   :  { %3937 = vmatprep.mubr.bf16.mxu1 %v14584_v37  ;;  %4217 = vmatpush1.bf16.msra.mxu1 %v10761_v46  ;;  %v2277_v46 = vld [vmem:[#allocation16 + $0x338] sm:$0xff] }
 0x735   :  { %4154 = vmatmul.mubr.bf16.gmra.mrb[108].mxu0 %v14522_v59  ;;  %4218 = vmatprep.subr.bf16.mxu1 %v10770_v10  ;;  %v10803_v10 = vcombine.low %v2265_v51, %v2269_v21  ;;  %v10812_v45 = vcombine.high %v2273_v30, %v2277_v46  ;;  %v2308_v51 = vld [vmem:[#allocation16 + $0x430] sm:$0xff]  ;;  %v2305_v21 = vld [vmem:[#allocation16 + $0x418] sm:$0xff] }
 0x736   :  { %4163 = vmatprep.mubr.bf16.mxu0 %v14584_v37  ;;  %4443 = vmatpush1.bf16.msra.mxu0 %v10763_v0  ;;  %v10801_v0 = vcombine.low %v2264_v23, %v2268_v24  ;;  %v2304_v24 = vld [vmem:[#allocation16 + $0x410] sm:$0xff] }
 0x737   :  { %4444 = vmatprep.subr.bf16.mxu0 %v10772_v63  ;;  %v10810_v63 = vcombine.high %v2272_v57, %v2276_v35 }
 0x738   :  { %4219 = vmatpush1.bf16.msra.mxu1 %v10769_v31  ;;  %v2285_v31 = vld [vmem:[#allocation16 + $0x378] sm:$0xff] }
 0x739   :  { %4220 = vmatprep.subr.bf16.mxu1 %v10778_v14  ;;  %v10811_v14 = vcombine.low %v2273_v30, %v2277_v46  ;;  %v10820_v29 = vcombine.high %v2281_v20, %v2285_v31  ;;  %v2316_v30 = vld [vmem:[#allocation16 + $0x470] sm:$0xff]  ;;  %v2313_v46 = vld [vmem:[#allocation16 + $0x458] sm:$0xff] }
 0x73a   :  { %4445 = vmatpush1.bf16.msra.mxu0 %v10771_v3  ;;  %v10809_v3 = vcombine.low %v2272_v57, %v2276_v35  ;;  %v2312_v35 = vld [vmem:[#allocation16 + $0x450] sm:$0xff] }
 0x73b   :  { %3938 = vmatmul.mubr.bf16.gmra.mrb[80].mxu1 %v14576_v38  ;;  %4446 = vmatprep.subr.bf16.mxu0 %v10780_v28  ;;  %v10818_v28 = vcombine.high %v2280_v42, %v2284_v1 }
 0x73c   :  { %3947 = vmatprep.mubr.bf16.mxu1 %v14642_v50  ;;  %4221 = vmatpush1.bf16.msra.mxu1 %v10777_v16  ;;  %v2293_v16 = vld [vmem:[#allocation16 + $0x3b8] sm:$0xff] }
 0x73d   :  { %4164 = vmatmul.mubr.bf16.gmra.mrb[112].mxu0 %v14576_v38  ;;  %4222 = vmatprep.subr.bf16.mxu1 %v10786_v39  ;;  %v10819_v39 = vcombine.low %v2281_v20, %v2285_v31  ;;  %v10828_v36 = vcombine.high %v2289_v58, %v2293_v16  ;;  %v2321_v20 = vld [vmem:[#allocation16 + $0x498] sm:$0xff] }
 0x73e   :  { %4173 = vmatprep.mubr.bf16.mxu0 %v14642_v50  ;;  %4447 = vmatpush1.bf16.msra.mxu0 %v10779_v47  ;;  %v10817_v47 = vcombine.low %v2280_v42, %v2284_v1  ;;  %v2320_v42 = vld [vmem:[#allocation16 + $0x490] sm:$0xff]  ;;  %v2325_v31 = vld [vmem:[#allocation16 + $0x4b8] sm:$0xff] }
 0x73f   :  { %4448 = vmatprep.subr.bf16.mxu0 %v10788_v26  ;;  %v10826_v26 = vcombine.high %v2288_v44, %v2292_v22  ;;  %v2324_v1 = vld [vmem:[#allocation16 + $0x4b0] sm:$0xff] }
 0x740   :  { %4223 = vmatpush1.bf16.msra.mxu1 %v10785_v60  ;;  %v2301_v60 = vld [vmem:[#allocation16 + $0x3f8] sm:$0xff] }
 0x741   :  { %4224 = vmatprep.subr.bf16.mxu1 %v10794_v43  ;;  %v10827_v43 = vcombine.low %v2289_v58, %v2293_v16  ;;  %v10836_v23 = vcombine.high %v2297_v40, %v2301_v60  ;;  %v2329_v58 = vld [vmem:[#allocation16 + $0x4d8] sm:$0xff] }
 0x742   :  { %4449 = vmatpush1.bf16.msra.mxu0 %v10787_v55  ;;  %v10825_v55 = vcombine.low %v2288_v44, %v2292_v22  ;;  %v2328_v44 = vld [vmem:[#allocation16 + $0x4d0] sm:$0xff]  ;;  %v2333_v16 = vld [vmem:[#allocation16 + $0x4f8] sm:$0xff] }
 0x743   :  { %3948 = vmatmul.mubr.bf16.gmra.mrb[84].mxu1 %v14634_v18  ;;  %4450 = vmatprep.subr.bf16.mxu0 %v10796_v56  ;;  %v10834_v56 = vcombine.high %v2296_v54, %v2300_v6  ;;  %v2332_v22 = vld [vmem:[#allocation16 + $0x4f0] sm:$0xff] }
 0x744   :  { %3957 = vmatprep.mubr.bf16.mxu1 %v14698_v48  ;;  %4225 = vmatpush1.bf16.msra.mxu1 %v10793_v52  ;;  %v2309_v52 = vld [vmem:[#allocation16 + $0x438] sm:$0xff] }
 0x745   :  { %4174 = vmatmul.mubr.bf16.gmra.mrb[116].mxu0 %v14634_v18  ;;  %4226 = vmatprep.subr.bf16.mxu1 %v10802_v4  ;;  %v10835_v4 = vcombine.low %v2297_v40, %v2301_v60  ;;  %v10844_v57 = vcombine.high %v2305_v21, %v2309_v52  ;;  %v2341_v40 = vld [vmem:[#allocation16 + $0x538] sm:$0xff]  ;;  %v10865_v60 = vcombine.low %v2328_v44, %v2332_v22 }
 0x746   :  { %4183 = vmatprep.mubr.bf16.mxu0 %v14698_v48  ;;  %4451 = vmatpush1.bf16.msra.mxu0 %v10795_v25  ;;  %v10833_v25 = vcombine.low %v2296_v54, %v2300_v6  ;;  %v17083_v54 = vld [vmem:[#allocation57_spill] sm:$0xff]  ;;  %v2337_v6 = vld [vmem:[#allocation16 + $0x518] sm:$0xff] }
 0x747   :  { %4452 = vmatprep.subr.bf16.mxu0 %v10804_v27  ;;  %v10842_v27 = vcombine.high %v2304_v24, %v2308_v51 }
 0x748   :  { %4227 = vmatpush1.bf16.msra.mxu1 %v10801_v0  ;;  %v2317_v0 = vld [vmem:[#allocation16 + $0x478] sm:$0xff] }
 0x749   :  { %4228 = vmatprep.subr.bf16.mxu1 %v10810_v63  ;;  %v10843_v63 = vcombine.low %v2305_v21, %v2309_v52  ;;  %v2349_v21 = vld [vmem:[#allocation16 + $0x578] sm:$0xff]  ;;  %v10875_v52 = vcombine.low %v2337_v6, %v2341_v40 }
 0x74a   :  { %4453 = vmatpush1.bf16.msra.mxu0 %v10803_v10  ;;  %v10841_v10 = vcombine.low %v2304_v24, %v2308_v51  ;;  %v2348_v24 = vld [vmem:[#allocation16 + $0x570] sm:$0xff]  ;;  %v2345_v51 = vld [vmem:[#allocation16 + $0x558] sm:$0xff] }
 0x74b   :  { %3958 = vmatmul.mubr.bf16.gmra.mrb[88].mxu1 %v14692_v15  ;;  %4454 = vmatprep.subr.bf16.mxu0 %v10812_v45  ;;  %v10850_v45 = vcombine.high %v2312_v35, %v2316_v30 }
 0x74c   :  { %3967 = vmatprep.mubr.bf16.mxu1 %v14747_v19  ;;  %4229 = vmatpush1.bf16.msra.mxu1 %v10809_v3  ;;  %v10849_v3 = vcombine.low %v2312_v35, %v2316_v30  ;;  %v2356_v35 = vld [vmem:[#allocation16 + $0x5b0] sm:$0xff] }
 0x74d   :  { %4184 = vmatmul.mubr.bf16.gmra.mrb[120].mxu0 %v14692_v15  ;;  %4230 = vmatprep.subr.bf16.mxu1 %v10818_v28  ;;  %v10858_v28 = vcombine.high %v2320_v42, %v2324_v1  ;;  %v17085_v30 = vld [vmem:[#allocation59_spill] sm:$0xff] }
 0x74e   :  { %4193 = vmatprep.mubr.bf16.mxu0 %v14747_v19  ;;  %4455 = vmatpush1.bf16.msra.mxu0 %v10811_v14  ;;  %v10851_v14 = vcombine.low %v2313_v46, %v2317_v0 }
 0x74f   :  { %4456 = vmatprep.subr.bf16.mxu0 %v10820_v29  ;;  %v10860_v29 = vcombine.high %v2321_v20, %v2325_v31 }
 0x750   :  { %4231 = vmatpush1.bf16.msra.mxu1 %v10817_v47  ;;  %v10859_v47 = vcombine.low %v2321_v20, %v2325_v31  ;;  %v2361_v20 = vld [vmem:[#allocation16 + $0x5d8] sm:$0xff] }
 0x751   :  { %4232 = vmatprep.subr.bf16.mxu1 %v10826_v26  ;;  %v2336_v26 = vld [vmem:[#allocation16 + $0x510] sm:$0xff]  ;;  %v2365_v31 = vld [vmem:[#allocation16 + $0x5f8] sm:$0xff] }
 0x752   :  { %4457 = vmatpush1.bf16.msra.mxu0 %v10819_v39  ;;  %v10866_v39 = vcombine.high %v2328_v44, %v2332_v22  ;;  %v10900_v44 = vcombine.high %v2361_v20, %v2365_v31  ;;  %v2368_v22 = vld [vmem:[#allocation16 + $0x610] sm:$0xff] }
 0x753   :  { %3968 = vmatmul.mubr.bf16.gmra.mrb[92].mxu1 %v14743_v62  ;;  %4458 = vmatprep.subr.bf16.mxu0 %v10828_v36  ;;  %v2340_v36 = vld [vmem:[#allocation16 + $0x530] sm:$0xff] }
 0x754   :  { %4236 = vmatprep.mubr.bf16.mxu1 %v14370_v32  ;;  %4233 = vmatpush1.bf16.msra.mxu1 %v10825_v55  ;;  %v10867_v55 = vcombine.low %v2329_v58, %v2333_v16 }
 0x755   :  { %4194 = vmatmul.mubr.bf16.gmra.mrb[124].mxu0 %v14743_v62  ;;  %4234 = vmatprep.subr.bf16.mxu1 %v10834_v56  ;;  %v10876_v56 = vcombine.high %v2337_v6, %v2341_v40  ;;  %v2380_v6 = vld [vmem:[#allocation16 + $0x670] sm:$0xff]  ;;  %v2377_v40 = vld [vmem:[#allocation16 + $0x658] sm:$0xff] }
 0x756   :  { %4462 = vmatprep.mubr.bf16.mxu0 %v14370_v32  ;;  %4459 = vmatpush1.bf16.msra.mxu0 %v10827_v43  ;;  %v10852_v32 = vcombine.high %v2313_v46, %v2317_v0  ;;  %v10874_v43 = vcombine.high %v2336_v26, %v2340_v36  ;;  %v2353_v46 = vld [vmem:[#allocation16 + $0x598] sm:$0xff] }
 0x757   :  { %4460 = vmatprep.subr.bf16.mxu0 %v10836_v23  ;;  %v2344_v23 = vld [vmem:[#allocation16 + $0x550] sm:$0xff]  ;;  %v2357_v0 = vld [vmem:[#allocation16 + $0x5b8] sm:$0xff] }
 0x758   :  { %4235 = vmatpush1.bf16.msra.mxu1 %v10833_v25  ;;  %v10882_v25 = vcombine.high %v2344_v23, %v2348_v24 }
 0x759   :  { %4317 = vmatprep.subr.bf16.mxu1 %v10842_v27  ;;  %v10884_v27 = vcombine.high %v2345_v51, %v2349_v21 }
 0x75a   :  { %4461 = vmatpush1.bf16.msra.mxu0 %v10835_v4  ;;  %v17084_v4 = vld [vmem:[#allocation56_spill] sm:$0xff] }
 0x75b   :  { %4543 = vmatprep.subr.bf16.mxu0 %v10844_v57  ;;  %4237 = vmatmul.mubr.bf16.vlgmr.msra.gmra.mrb[96].mxu1 %v14362_v53  ;;  %v2352_v57 = vld [vmem:[#allocation16 + $0x590] sm:$0xff] }
 0x75c   :  { %4246 = vmatprep.mubr.bf16.mxu1 %v14414_v8  ;;  %4318 = vmatpush1.bf16.msra.mxu1 %v10841_v10  ;;  %v10881_v10 = vcombine.low %v2344_v23, %v2348_v24  ;;  %v17088_v23 = vld [vmem:[#allocation48_spill] sm:$0xff] }
 0x75d   :  { %4463 = vmatmul.mubr.bf16.vlgmr.msra.gmra.mrb[128].mxu0 %v14362_v53  ;;  %4319 = vmatprep.subr.bf16.mxu1 %v10850_v45  ;;  %v10857_v53 = vcombine.low %v2320_v42, %v2324_v1  ;;  %v10890_v45 = vcombine.high %v2352_v57, %v2356_v35  ;;  %v2360_v42 = vld [vmem:[#allocation16 + $0x5d0] sm:$0xff] }
 0x75e   :  { %4472 = vmatprep.mubr.bf16.mxu0 %v14414_v8  ;;  %4544 = vmatpush1.bf16.msra.mxu0 %v10843_v63  ;;  %v10868_v8 = vcombine.high %v2329_v58, %v2333_v16  ;;  %v10883_v63 = vcombine.low %v2345_v51, %v2349_v21  ;;  %v2364_v1 = vld [vmem:[#allocation16 + $0x5f0] sm:$0xff]  ;;  %v17087_v16 = vld [vmem:[#allocation49_spill] sm:$0xff] }
 0x75f   :  { %4545 = vmatprep.subr.bf16.mxu0 %v10852_v32  ;;  %v10892_v32 = vcombine.high %v2353_v46, %v2357_v0  ;;  %v2372_v58 = vld [vmem:[#allocation16 + $0x630] sm:$0xff] }
 0x760   :  { %4320 = vmatpush1.bf16.msra.mxu1 %v10849_v3  ;;  %v10889_v3 = vcombine.low %v2352_v57, %v2356_v35  ;;  %v2384_v51 = vld [vmem:[#allocation16 + $0x690] sm:$0xff] }
 0x761   :  { %4321 = vmatprep.subr.bf16.mxu1 %v10858_v28  ;;  %v10898_v28 = vcombine.high %v2360_v42, %v2364_v1  ;;  %v2388_v21 = vld [vmem:[#allocation16 + $0x6b0] sm:$0xff] }
 0x762   :  { %4546 = vmatpush1.bf16.msra.mxu0 %v10851_v14  ;;  %v10891_v14 = vcombine.low %v2353_v46, %v2357_v0  ;;  %v2392_v35 = vld [vmem:[#allocation16 + $0x6d0] sm:$0xff]  ;;  %v2393_v46 = vld [vmem:[#allocation16 + $0x6d8] sm:$0xff] }
 0x763   :  { %4247 = vmatmul.mubr.bf16.gmra.mrb[100].mxu1 %v14408_v34  ;;  %4547 = vmatprep.subr.bf16.mxu0 %v10860_v29  ;;  %v17086_v29 = vld [vmem:[#allocation58_spill] sm:$0xff]  ;;  %v2397_v0 = vld [vmem:[#allocation16 + $0x6f8] sm:$0xff] }
 0x764   :  { %4256 = vmatprep.mubr.bf16.mxu1 %v17083_v54  ;;  %4322 = vmatpush1.bf16.msra.mxu1 %v10857_v53  ;;  %v2369_v53 = vld [vmem:[#allocation16 + $0x618] sm:$0xff] }
 0x765   :  { %4473 = vmatmul.mubr.bf16.gmra.mrb[132].mxu0 %v14408_v34  ;;  %4323 = vmatprep.subr.bf16.mxu1 %v10866_v39  ;;  %v10873_v34 = vcombine.low %v2336_v26, %v2340_v36  ;;  %v10897_v39 = vcombine.low %v2360_v42, %v2364_v1  ;;  %v10906_v26 = vcombine.high %v2368_v22, %v2372_v58  ;;  %v2400_v42 = vld [vmem:[#allocation16 + $0x710] sm:$0xff] }
 0x766   :  { %4482 = vmatprep.mubr.bf16.mxu0 %v17083_v54  ;;  %4548 = vmatpush1.bf16.msra.mxu0 %v10859_v47  ;;  %v2373_v47 = vld [vmem:[#allocation16 + $0x638] sm:$0xff]  ;;  %v2376_v54 = vld [vmem:[#allocation16 + $0x650] sm:$0xff] }
 0x767   :  { %4549 = vmatprep.subr.bf16.mxu0 %v10868_v8  ;;  %v10899_v8 = vcombine.low %v2361_v20, %v2365_v31  ;;  %v10908_v36 = vcombine.high %v2369_v53, %v2373_v47  ;;  %v2404_v1 = vld [vmem:[#allocation16 + $0x730] sm:$0xff]  ;;  %v2401_v20 = vld [vmem:[#allocation16 + $0x718] sm:$0xff] }
 0x768   :  { %4324 = vmatpush1.bf16.msra.mxu1 %v10865_v60  ;;  %v2381_v60 = vld [vmem:[#allocation16 + $0x678] sm:$0xff] }
 0x769   :  { %4325 = vmatprep.subr.bf16.mxu1 %v10874_v43  ;;  %v10907_v43 = vcombine.low %v2369_v53, %v2373_v47  ;;  %v10916_v24 = vcombine.high %v2377_v40, %v2381_v60  ;;  %v2405_v31 = vld [vmem:[#allocation16 + $0x738] sm:$0xff]  ;;  %v10937_v53 = vcombine.low %v2400_v42, %v2404_v1 }
 0x76a   :  { %4550 = vmatpush1.bf16.msra.mxu0 %v10867_v55  ;;  %v10905_v55 = vcombine.low %v2368_v22, %v2372_v58  ;;  %v2412_v22 = vld [vmem:[#allocation16 + $0x770] sm:$0xff]  ;;  %v2409_v58 = vld [vmem:[#allocation16 + $0x758] sm:$0xff]  ;;  %v10939_v47 = vcombine.low %v2401_v20, %v2405_v31 }
 0x76b   :  { %4257 = vmatmul.mubr.bf16.gmra.mrb[104].mxu1 %v17084_v4  ;;  %4551 = vmatprep.subr.bf16.mxu0 %v10876_v56  ;;  %v10914_v56 = vcombine.high %v2376_v54, %v2380_v6 }
 0x76c   :  { %4266 = vmatprep.mubr.bf16.mxu1 %v17085_v30  ;;  %4326 = vmatpush1.bf16.msra.mxu1 %v10873_v34  ;;  %v2385_v34 = vld [vmem:[#allocation16 + $0x698] sm:$0xff] }
 0x76d   :  { %4483 = vmatmul.mubr.bf16.gmra.mrb[136].mxu0 %v17084_v4  ;;  %4327 = vmatprep.subr.bf16.mxu1 %v10882_v25  ;;  %v10913_v25 = vcombine.low %v2376_v54, %v2380_v6  ;;  %v10915_v4 = vcombine.low %v2377_v40, %v2381_v60  ;;  %v2421_v54 = vld [vmem:[#allocation16 + $0x7b8] sm:$0xff] }
 0x76e   :  { %4492 = vmatprep.mubr.bf16.mxu0 %v17085_v30  ;;  %4552 = vmatpush1.bf16.msra.mxu0 %v10875_v52  ;;  %v2389_v52 = vld [vmem:[#allocation16 + $0x6b8] sm:$0xff]  ;;  %v2396_v30 = vld [vmem:[#allocation16 + $0x6f0] sm:$0xff] }
 0x76f   :  { %4553 = vmatprep.subr.bf16.mxu0 %v10884_v27  ;;  %v10922_v27 = vcombine.high %v2384_v51, %v2388_v21  ;;  %v10924_v57 = vcombine.high %v2385_v34, %v2389_v52 }
 0x770   :  { %4328 = vmatpush1.bf16.msra.mxu1 %v10881_v10  ;;  %v10921_v10 = vcombine.low %v2384_v51, %v2388_v21 }
 0x771   :  { %4329 = vmatprep.subr.bf16.mxu1 %v10890_v45  ;;  %v10930_v45 = vcombine.high %v2392_v35, %v2396_v30 }
 0x772   :  { %4554 = vmatpush1.bf16.msra.mxu0 %v10883_v63  ;;  %v10923_v63 = vcombine.low %v2385_v34, %v2389_v52 }
 0x773   :  { %4267 = vmatmul.mubr.bf16.gmra.mrb[108].mxu1 %v17086_v29  ;;  %4555 = vmatprep.subr.bf16.mxu0 %v10892_v32  ;;  %v17089_v32 = vld [vmem:[#allocation50_spill] sm:$0xff] }
 0x774   :  { %4276 = vmatprep.mubr.bf16.mxu1 %v17087_v16  ;;  %4330 = vmatpush1.bf16.msra.mxu1 %v10889_v3  ;;  %v10929_v3 = vcombine.low %v2392_v35, %v2396_v30  ;;  %v12420_v35 = vld [vmem:[#allocation19 + $0x24] ss:$16 sps:$4 sm:$0xff]   ;;  %v12421_v30 = vld [vmem:[#allocation19 + $0x28] ss:$16 sps:$4 sm:$0xff]  }
 0x775   :  { %4493 = vmatmul.mubr.bf16.gmra.mrb[140].mxu0 %v17086_v29  ;;  %4331 = vmatprep.subr.bf16.mxu1 %v10898_v28  ;;  %v10938_v28 = vcombine.high %v2400_v42, %v2404_v1  ;;  %v10940_v29 = vcombine.high %v2401_v20, %v2405_v31  ;;  %v12441_v42 = vld [vmem:[#allocation19 + $0x8c] ss:$16 sps:$4 sm:$0xff]   ;;  %v12436_v1 = vld [vmem:[#allocation19 + $0x80] ss:$16 sps:$4 sm:$0xff]   ;;  %v12439_v20 = vld [vmem:[#allocation19 + $0x88] ss:$16 sps:$4 sm:$0xff]  }
 0x776   :  { %4502 = vmatprep.mubr.bf16.mxu0 %v17087_v16  ;;  %4556 = vmatpush1.bf16.msra.mxu0 %v10891_v14  ;;  %v10931_v14 = vcombine.low %v2393_v46, %v2397_v0  ;;  %v2413_v16 = vld [vmem:[#allocation16 + $0x778] sm:$0xff] }
 0x777   :  { %4557 = vmatprep.subr.bf16.mxu0 %v10900_v44  ;;  %v2408_v44 = vld [vmem:[#allocation16 + $0x750] sm:$0xff]  ;;  %v10947_v40 = vcombine.low %v2409_v58, %v2413_v16  ;;  %v12444_v31 = vld [vmem:[#allocation19 + $0xa4] ss:$16 sps:$4 sm:$0xff]  }
 0x778   :  { %4332 = vmatpush1.bf16.msra.mxu1 %v10897_v39  ;;  %v10946_v39 = vcombine.high %v2408_v44, %v2412_v22  ;;  %v10945_v6 = vcombine.low %v2408_v44, %v2412_v22  ;;  %v12451_v44 = vld [vmem:[#allocation19 + $0xc8] ss:$16 sps:$4 sm:$0xff]   ;;  %v12456_v22 = vld [vmem:[#allocation19 + $0xe4] ss:$16 sps:$4 sm:$0xff]  }
 0x779   :  { %4333 = vmatprep.subr.bf16.mxu1 %v10906_v26  ;;  %v2420_v26 = vld [vmem:[#allocation16 + $0x7b0] sm:$0xff] }
 0x77a   :  { %4558 = vmatpush1.bf16.msra.mxu0 %v10899_v8  ;;  %v2416_v8 = vld [vmem:[#allocation16 + $0x790] sm:$0xff] }
 0x77b   :  { %4277 = vmatmul.mubr.bf16.gmra.mrb[112].mxu1 %v17088_v23  ;;  %4559 = vmatprep.subr.bf16.mxu0 %v10908_v36  ;;  %v2417_v36 = vld [vmem:[#allocation16 + $0x798] sm:$0xff]  ;;  %v10954_v60 = vcombine.high %v2416_v8, %v2420_v26 }
 0x77c   :  { %4286 = vmatprep.mubr.bf16.mxu1 %v14640_v17  ;;  %4334 = vmatpush1.bf16.msra.mxu1 %v10905_v55  ;;  %v10956_v55 = vcombine.high %v2417_v36, %v2421_v54  ;;  %v10955_v51 = vcombine.low %v2417_v36, %v2421_v54  ;;  %v12477_v36 = vld [vmem:[#allocation19 + $0x14c] ss:$16 sps:$4 sm:$0xff]   ;;  %v12472_v54 = vld [vmem:[#allocation19 + $0x140] ss:$16 sps:$4 sm:$0xff]  }
 0x77d   :  { %4503 = vmatmul.mubr.bf16.gmra.mrb[144].mxu0 %v17088_v23  ;;  %4335 = vmatprep.subr.bf16.mxu1 %v10914_v56  ;;  %v2428_v56 = vld [vmem:[#allocation16 + $0x7f0] sm:$0xff]  ;;  %v2425_v23 = vld [vmem:[#allocation16 + $0x7d8] sm:$0xff] }
 0x77e   :  { %4512 = vmatprep.mubr.bf16.mxu0 %v14640_v17  ;;  %4560 = vmatpush1.bf16.msra.mxu0 %v10907_v43  ;;  %v10932_v17 = vcombine.high %v2393_v46, %v2397_v0  ;;  %v2424_v43 = vld [vmem:[#allocation16 + $0x7d0] sm:$0xff]  ;;  %v12426_v46 = vld [vmem:[#allocation19 + $0x44] ss:$16 sps:$4 sm:$0xff]  }
 0x77f   :  { %4561 = vmatprep.subr.bf16.mxu0 %v10916_v24  ;;  %v2429_v24 = vld [vmem:[#allocation16 + $0x7f8] sm:$0xff]  ;;  %v10962_v21 = vcombine.high %v2424_v43, %v2428_v56  ;;  %v10961_v34 = vcombine.low %v2424_v43, %v2428_v56  ;;  %v12429_v0 = vld [vmem:[#allocation19 + $0x4c] ss:$16 sps:$4 sm:$0xff]  }
 0x780   :  { %4336 = vmatpush1.bf16.msra.mxu1 %v10913_v25  ;;  %v10963_v52 = vcombine.low %v2425_v23, %v2429_v24  ;;  %v12414_v25 = vld [vmem:[#allocation19 + $0x4] ss:$16 sps:$4 sm:$0xff]   ;;  %v12489_v43 = vld [vmem:[#allocation19 + $0x18c] ss:$16 sps:$4 sm:$0xff]   ;;  %v12484_v56 = vld [vmem:[#allocation19 + $0x180] ss:$16 sps:$4 sm:$0xff]  }
 0x781   :  { %4337 = vmatprep.subr.bf16.mxu1 %v10922_v27  ;;  %v12412_v27 = vld [vmem:[#allocation19] ss:$16 sps:$4 sm:$0xff]  }
 0x782   :  { %4562 = vmatpush1.bf16.msra.mxu0 %v10915_v4  ;;  %v12417_v4 = vld [vmem:[#allocation19 + $0xc] ss:$16 sps:$4 sm:$0xff]  }
 0x783   :  { %4287 = vmatmul.mubr.bf16.gmra.mrb[116].mxu1 %v17089_v32  ;;  %4563 = vmatprep.subr.bf16.mxu0 %v10924_v57  ;;  %v12415_v57 = vld [vmem:[#allocation19 + $0x8] ss:$16 sps:$4 sm:$0xff]  }
 0x784   :  { %4296 = vmatprep.mubr.bf16.mxu1 %v14696_v12  ;;  %4338 = vmatpush1.bf16.msra.mxu1 %v10921_v10  ;;  %v12424_v10 = vld [vmem:[#allocation19 + $0x40] ss:$16 sps:$4 sm:$0xff]  }
 0x785   :  { %4513 = vmatmul.mubr.bf16.gmra.mrb[148].mxu0 %v17089_v32  ;;  %4339 = vmatprep.subr.bf16.mxu1 %v10930_v45  ;;  %v12432_v45 = vld [vmem:[#allocation19 + $0x64] ss:$16 sps:$4 sm:$0xff]   ;;  %v12433_v32 = vld [vmem:[#allocation19 + $0x68] ss:$16 sps:$4 sm:$0xff]  }
 0x786   :  { %4522 = vmatprep.mubr.bf16.mxu0 %v14696_v12  ;;  %4564 = vmatpush1.bf16.msra.mxu0 %v10923_v63  ;;  %v10948_v12 = vcombine.high %v2409_v58, %v2413_v16  ;;  %v12427_v63 = vld [vmem:[#allocation19 + $0x48] ss:$16 sps:$4 sm:$0xff]   ;;  %v12462_v16 = vld [vmem:[#allocation19 + $0x104] ss:$16 sps:$4 sm:$0xff]  }
 0x787   :  { %4565 = vmatprep.subr.bf16.mxu0 %v10932_v17  ;;  %v12438_v17 = vld [vmem:[#allocation19 + $0x84] ss:$16 sps:$4 sm:$0xff]   ;;  %v12457_v58 = vld [vmem:[#allocation19 + $0xe8] ss:$16 sps:$4 sm:$0xff]  }
 0x788   :  { %4340 = vmatpush1.bf16.msra.mxu1 %v10929_v3  ;;  %v12445_v3 = vld [vmem:[#allocation19 + $0xa8] ss:$16 sps:$4 sm:$0xff]  }
 0x789   :  { %4341 = vmatprep.subr.bf16.mxu1 %v10938_v28  ;;  %v12453_v28 = vld [vmem:[#allocation19 + $0xcc] ss:$16 sps:$4 sm:$0xff]  }
 0x78a   :  { %4566 = vmatpush1.bf16.msra.mxu0 %v10931_v14  ;;  %v12450_v14 = vld [vmem:[#allocation19 + $0xc4] ss:$16 sps:$4 sm:$0xff]  }
 0x78b   :  { %4297 = vmatmul.mubr.bf16.gmra.mrb[120].mxu1 %v14690_v49  ;;  %4567 = vmatprep.subr.bf16.mxu0 %v10940_v29  ;;  %v12448_v29 = vld [vmem:[#allocation19 + $0xc0] ss:$16 sps:$4 sm:$0xff]  }
 0x78c   :  { %4306 = vmatprep.mubr.bf16.mxu1 %v14745_v11  ;;  %4342 = vmatpush1.bf16.msra.mxu1 %v10937_v53  ;;  %v12465_v53 = vld [vmem:[#allocation19 + $0x10c] ss:$16 sps:$4 sm:$0xff]  }
 0x78d   :  { %4523 = vmatmul.mubr.bf16.gmra.mrb[152].mxu0 %v14690_v49  ;;  %4343 = vmatprep.subr.bf16.mxu1 %v10946_v39  ;;  %v10953_v49 = vcombine.low %v2416_v8, %v2420_v26  ;;  %v12463_v39 = vld [vmem:[#allocation19 + $0x108] ss:$16 sps:$4 sm:$0xff]   ;;  %v12474_v26 = vld [vmem:[#allocation19 + $0x144] ss:$16 sps:$4 sm:$0xff]  }
 0x78e   :  { %4532 = vmatprep.mubr.bf16.mxu0 %v14745_v11  ;;  %4568 = vmatpush1.bf16.msra.mxu0 %v10939_v47  ;;  %v10964_v11 = vcombine.high %v2425_v23, %v2429_v24  ;;  %v12460_v47 = vld [vmem:[#allocation19 + $0x100] ss:$16 sps:$4 sm:$0xff]   ;;  %v12469_v8 = vld [vmem:[#allocation19 + $0x128] ss:$16 sps:$4 sm:$0xff]   ;;  %v12492_v24 = vld [vmem:[#allocation19 + $0x1a4] ss:$16 sps:$4 sm:$0xff]  }
 0x78f   :  { %4569 = vmatprep.subr.bf16.mxu0 %v10948_v12  ;;  %v12468_v12 = vld [vmem:[#allocation19 + $0x124] ss:$16 sps:$4 sm:$0xff]   ;;  %v12487_v23 = vld [vmem:[#allocation19 + $0x188] ss:$16 sps:$4 sm:$0xff]  }
 0x790   :  { %4344 = vmatpush1.bf16.msra.mxu1 %v10945_v6  ;;  %v12475_v6 = vld [vmem:[#allocation19 + $0x148] ss:$16 sps:$4 sm:$0xff]  }
 0x791   :  { %4345 = vmatprep.subr.bf16.mxu1 %v10954_v60  ;;  %v12481_v60 = vld [vmem:[#allocation19 + $0x168] ss:$16 sps:$4 sm:$0xff]  }
 0x792   :  { %4570 = vmatpush1.bf16.msra.mxu0 %v10947_v40  ;;  %v12480_v40 = vld [vmem:[#allocation19 + $0x164] ss:$16 sps:$4 sm:$0xff]  }
 0x793   :  { %4307 = vmatmul.mubr.bf16.gmra.mrb[124].mxu1 %v14741_v5  ;;  %4571 = vmatprep.subr.bf16.mxu0 %v10956_v55  ;;  %v12486_v55 = vld [vmem:[#allocation19 + $0x184] ss:$16 sps:$4 sm:$0xff]  }
 0x794   :  { %4349 = vmatprep.mubr.bf16.mxu1 %v14372_v7  ;;  %4346 = vmatpush1.bf16.msra.mxu1 %v10953_v49  ;;  %v12493_v49 = vld [vmem:[#allocation19 + $0x1a8] ss:$16 sps:$4 sm:$0xff]  }
 0x795   :  { %4533 = vmatmul.mubr.bf16.gmra.mrb[156].mxu0 %v14741_v5  ;;  %4347 = vmatprep.subr.bf16.mxu1 %v10962_v21  ;;  %v12423_v5 = vld [vmem:[#allocation19 + $0x2c] ss:$16 sps:$4 sm:$0xff]  }
 0x796   :  { %4575 = vmatprep.mubr.bf16.mxu0 %v14372_v7  ;;  %4572 = vmatpush1.bf16.msra.mxu0 %v10955_v51  ;;  %v12418_v7 = vld [vmem:[#allocation19 + $0x20] ss:$16 sps:$4 sm:$0xff]   ;;  %v12498_v51 = vld [vmem:[#allocation19 + $0x1c4] ss:$16 sps:$4 sm:$0xff]   ;;  %v12501_v21 = vld [vmem:[#allocation19 + $0x1cc] ss:$16 sps:$4 sm:$0xff]  }
 0x797   :  { %4573 = vmatprep.subr.bf16.mxu0 %v10964_v11  ;;  %v12496_v11 = vld [vmem:[#allocation19 + $0x1c0] ss:$16 sps:$4 sm:$0xff]  }
 0x798   :  { %4348 = vmatpush1.bf16.msra.mxu1 %v10961_v34  ;;  %v12499_v34 = vld [vmem:[#allocation19 + $0x1c8] ss:$16 sps:$4 sm:$0xff]  }
 0x799   :  { %6534 = vmatprep.subr.bf16.mxu1 %v12414_v25  ;;  %v12505_v25 = vld [vmem:[#allocation19 + $0x1e8] ss:$16 sps:$4 sm:$0xff]  }
 0x79a   :  { %4574 = vmatpush1.bf16.msra.mxu0 %v10963_v52  ;;  %v12504_v52 = vld [vmem:[#allocation19 + $0x1e4] ss:$16 sps:$4 sm:$0xff]  }
 0x79b   :  { %6986 = vmatprep.subr.bf16.mxu0 %v12417_v4  ;;  %4350 = vmatmul.mubr.bf16.vlgmr.msra.gmra.mrb[96].mxu1 %v14364_v33  ;;  %v12510_v4 = vld [vmem:[#allocation19 + $0x204] ss:$16 sps:$4 sm:$0xff]  }
 0x79c   :  { %4359 = vmatprep.mubr.bf16.mxu1 %v14416_v61  ;;  %6535 = vmatpush1.bf16.msra.mxu1 %v12412_v27  ;;  %v12513_v27 = vld [vmem:[#allocation19 + $0x20c] ss:$16 sps:$4 sm:$0xff]  }
 0x79d   :  { %4576 = vmatmul.mubr.bf16.vlgmr.msra.gmra.mrb[128].mxu0 %v14364_v33  ;;  %6536 = vmatprep.subr.bf16.mxu1 %v12420_v35  ;;  %v12435_v33 = vld [vmem:[#allocation19 + $0x6c] ss:$16 sps:$4 sm:$0xff]   ;;  %v17090_v35 = vld [vmem:[#allocation44_spill] sm:$0xff] }
 0x79e   :  { %4585 = vmatprep.mubr.bf16.mxu0 %v14416_v61  ;;  %6987 = vmatpush1.bf16.msra.mxu0 %v12415_v57  ;;  %v12430_v61 = vld [vmem:[#allocation19 + $0x60] ss:$16 sps:$4 sm:$0xff]   ;;  %v2430_v57 = vld [vmem:[#allocation17] sm:$0xff] }
 0x79f   :  { %6988 = vmatprep.subr.bf16.mxu0 %v12423_v5  ;;  %v14852_v5 = vrot.slane %v2430_v57, %v17090_v35 }
 0x7a0   :  { %6537 = vmatpush1.bf16.msra.mxu1 %v12418_v7  ;;  %v17091_v7 = vld [vmem:[#allocation46_spill] sm:$0xff] }
 0x7a1   :  { %6538 = vmatprep.subr.bf16.mxu1 %v12426_v46 }
 0x7a2   :  { %6989 = vmatpush1.bf16.msra.mxu0 %v12421_v30  ;;  %v14855_v30 = vrot.slane %v2430_v57, %v17091_v7 }
 0x7a3   :  { %4360 = vmatmul.mubr.bf16.gmra.mrb[100].mxu1 %v14410_v9  ;;  %6990 = vmatprep.subr.bf16.mxu0 %v12429_v0  ;;  %v17093_v0 = vld [vmem:[#allocation47_spill] sm:$0xff] }
 0x7a4   :  { %4369 = vmatprep.mubr.bf16.mxu1 %v14472_v13  ;;  %6539 = vmatpush1.bf16.msra.mxu1 %v12424_v10  ;;  %v14861_v10 = vrot.slane %v2430_v57, %v17093_v0 }
 0x7a5   :  { %4586 = vmatmul.mubr.bf16.gmra.mrb[132].mxu0 %v14410_v9  ;;  %6540 = vmatprep.subr.bf16.mxu1 %v12432_v45  ;;  %v12447_v9 = vld [vmem:[#allocation19 + $0xac] ss:$16 sps:$4 sm:$0xff]  }
 0x7a6   :  { %4595 = vmatprep.mubr.bf16.mxu0 %v14472_v13  ;;  %6991 = vmatpush1.bf16.msra.mxu0 %v12427_v63  ;;  %v12442_v13 = vld [vmem:[#allocation19 + $0xa0] ss:$16 sps:$4 sm:$0xff]  }
 0x7a7   :  { %6992 = vmatprep.subr.bf16.mxu0 %v12435_v33 }
 0x7a8   :  { %6541 = vmatpush1.bf16.msra.mxu1 %v12430_v61 }
 0x7a9   :  { %6542 = vmatprep.subr.bf16.mxu1 %v12438_v17 }
 0x7aa   :  { %6993 = vmatpush1.bf16.msra.mxu0 %v12433_v32 }
 0x7ab   :  { %4370 = vmatmul.mubr.bf16.gmra.mrb[104].mxu1 %v14464_v41  ;;  %6994 = vmatprep.subr.bf16.mxu0 %v12441_v42 }
 0x7ac   :  { %4379 = vmatprep.mubr.bf16.mxu1 %v14528_v2  ;;  %6543 = vmatpush1.bf16.msra.mxu1 %v12436_v1 }
 0x7ad   :  { %4596 = vmatmul.mubr.bf16.gmra.mrb[136].mxu0 %v14464_v41  ;;  %6544 = vmatprep.subr.bf16.mxu1 %v12444_v31  ;;  %v12459_v41 = vld [vmem:[#allocation19 + $0xec] ss:$16 sps:$4 sm:$0xff]  }
 0x7ae   :  { %4605 = vmatprep.mubr.bf16.mxu0 %v14528_v2  ;;  %6995 = vmatpush1.bf16.msra.mxu0 %v12439_v20  ;;  %v12454_v2 = vld [vmem:[#allocation19 + $0xe0] ss:$16 sps:$4 sm:$0xff]  }
 0x7af   :  { %6996 = vmatprep.subr.bf16.mxu0 %v12447_v9 }
 0x7b0   :  { %6545 = vmatpush1.bf16.msra.mxu1 %v12442_v13 }
 0x7b1   :  { %6546 = vmatprep.subr.bf16.mxu1 %v12450_v14 }
 0x7b2   :  { %6997 = vmatpush1.bf16.msra.mxu0 %v12445_v3 }
 0x7b3   :  { %4380 = vmatmul.mubr.bf16.gmra.mrb[108].mxu1 %v14522_v59  ;;  %6998 = vmatprep.subr.bf16.mxu0 %v12453_v28 }
 0x7b4   :  { %4389 = vmatprep.mubr.bf16.mxu1 %v14584_v37  ;;  %6547 = vmatpush1.bf16.msra.mxu1 %v12448_v29 }
 0x7b5   :  { %4606 = vmatmul.mubr.bf16.gmra.mrb[140].mxu0 %v14522_v59  ;;  %6548 = vmatprep.subr.bf16.mxu1 %v12456_v22  ;;  %v12471_v59 = vld [vmem:[#allocation19 + $0x12c] ss:$16 sps:$4 sm:$0xff]  }
 0x7b6   :  { %4615 = vmatprep.mubr.bf16.mxu0 %v14584_v37  ;;  %6999 = vmatpush1.bf16.msra.mxu0 %v12451_v44  ;;  %v12466_v37 = vld [vmem:[#allocation19 + $0x120] ss:$16 sps:$4 sm:$0xff]  }
 0x7b7   :  { %7000 = vmatprep.subr.bf16.mxu0 %v12459_v41 }
 0x7b8   :  { %6549 = vmatpush1.bf16.msra.mxu1 %v12454_v2 }
 0x7b9   :  { %6550 = vmatprep.subr.bf16.mxu1 %v12462_v16 }
 0x7ba   :  { %7001 = vmatpush1.bf16.msra.mxu0 %v12457_v58 }
 0x7bb   :  { %4390 = vmatmul.mubr.bf16.gmra.mrb[112].mxu1 %v14576_v38  ;;  %7002 = vmatprep.subr.bf16.mxu0 %v12465_v53 }
 0x7bc   :  { %4399 = vmatprep.mubr.bf16.mxu1 %v14642_v50  ;;  %6551 = vmatpush1.bf16.msra.mxu1 %v12460_v47 }
 0x7bd   :  { %4616 = vmatmul.mubr.bf16.gmra.mrb[144].mxu0 %v14576_v38  ;;  %6552 = vmatprep.subr.bf16.mxu1 %v12468_v12  ;;  %v12483_v38 = vld [vmem:[#allocation19 + $0x16c] ss:$16 sps:$4 sm:$0xff]  }
 0x7be   :  { %4625 = vmatprep.mubr.bf16.mxu0 %v14642_v50  ;;  %7003 = vmatpush1.bf16.msra.mxu0 %v12463_v39  ;;  %v12478_v50 = vld [vmem:[#allocation19 + $0x160] ss:$16 sps:$4 sm:$0xff]  }
 0x7bf   :  { %7004 = vmatprep.subr.bf16.mxu0 %v12471_v59 }
 0x7c0   :  { %6553 = vmatpush1.bf16.msra.mxu1 %v12466_v37 }
 0x7c1   :  { %6554 = vmatprep.subr.bf16.mxu1 %v12474_v26 }
 0x7c2   :  { %7005 = vmatpush1.bf16.msra.mxu0 %v12469_v8 }
 0x7c3   :  { %4400 = vmatmul.mubr.bf16.gmra.mrb[116].mxu1 %v14634_v18  ;;  %7006 = vmatprep.subr.bf16.mxu0 %v12477_v36 }
 0x7c4   :  { %4409 = vmatprep.mubr.bf16.mxu1 %v14698_v48  ;;  %6555 = vmatpush1.bf16.msra.mxu1 %v12472_v54 }
 0x7c5   :  { %4626 = vmatmul.mubr.bf16.gmra.mrb[148].mxu0 %v14634_v18  ;;  %6556 = vmatprep.subr.bf16.mxu1 %v12480_v40  ;;  %v12495_v18 = vld [vmem:[#allocation19 + $0x1ac] ss:$16 sps:$4 sm:$0xff]  }
 0x7c6   :  { %4635 = vmatprep.mubr.bf16.mxu0 %v14698_v48  ;;  %7007 = vmatpush1.bf16.msra.mxu0 %v12475_v6  ;;  %v12490_v48 = vld [vmem:[#allocation19 + $0x1a0] ss:$16 sps:$4 sm:$0xff]  }
 0x7c7   :  { %7008 = vmatprep.subr.bf16.mxu0 %v12483_v38 }
 0x7c8   :  { %6557 = vmatpush1.bf16.msra.mxu1 %v12478_v50 }
 0x7c9   :  { %6558 = vmatprep.subr.bf16.mxu1 %v12486_v55  ;;  %v12508_v55 = vld [vmem:[#allocation19 + $0x200] ss:$16 sps:$4 sm:$0xff]  }
 0x7ca   :  { %7009 = vmatpush1.bf16.msra.mxu0 %v12481_v60 }
 0x7cb   :  { %4410 = vmatmul.mubr.bf16.gmra.mrb[120].mxu1 %v14692_v15  ;;  %7010 = vmatprep.subr.bf16.mxu0 %v12489_v43 }
 0x7cc   :  { %4419 = vmatprep.mubr.bf16.mxu1 %v14747_v19  ;;  %6559 = vmatpush1.bf16.msra.mxu1 %v12484_v56 }
 0x7cd   :  { %4636 = vmatmul.mubr.bf16.gmra.mrb[152].mxu0 %v14692_v15  ;;  %6560 = vmatprep.subr.bf16.mxu1 %v12492_v24  ;;  %v12507_v15 = vld [vmem:[#allocation19 + $0x1ec] ss:$16 sps:$4 sm:$0xff]  }
 0x7ce   :  { %4645 = vmatprep.mubr.bf16.mxu0 %v14747_v19  ;;  %7011 = vmatpush1.bf16.msra.mxu0 %v12487_v23  ;;  %v12502_v19 = vld [vmem:[#allocation19 + $0x1e0] ss:$16 sps:$4 sm:$0xff]  }
 0x7cf   :  { %7012 = vmatprep.subr.bf16.mxu0 %v12495_v18 }
 0x7d0   :  { %6561 = vmatpush1.bf16.msra.mxu1 %v12490_v48  ;;  %v12511_v48 = vld [vmem:[#allocation19 + $0x208] ss:$16 sps:$4 sm:$0xff]  }
 0x7d1   :  { %6562 = vmatprep.subr.bf16.mxu1 %v12498_v51 }
 0x7d2   :  { %7013 = vmatpush1.bf16.msra.mxu0 %v12493_v49  ;;  %v12516_v49 = vld [vmem:[#allocation19 + $0x224] ss:$16 sps:$4 sm:$0xff]  }
 0x7d3   :  { %4420 = vmatmul.mubr.bf16.gmra.mrb[124].mxu1 %v14743_v62  ;;  %7014 = vmatprep.subr.bf16.mxu0 %v12501_v21 }
 0x7d4   :  { %6563 = vmatpush1.bf16.msra.mxu1 %v12496_v11 }
 0x7d5   :  { %4646 = vmatmul.mubr.bf16.gmra.mrb[156].mxu0 %v14743_v62  ;;  %6564 = vmatprep.subr.bf16.mxu1 %v12504_v52  ;;  %v17092_v62 = vld [vmem:[#allocation45_spill] sm:$0xff] }
 0x7d6   :  { %7015 = vmatpush1.bf16.msra.mxu0 %v12499_v34  ;;  %v14858_v46 = vrot.slane %v2430_v57, %v17092_v62 }
 0x7d7   :  { %7016 = vmatprep.subr.bf16.mxu0 %v12507_v15  ;;  %v12519_v15 = vld [vmem:[#allocation19 + $0x22c] ss:$16 sps:$4 sm:$0xff]  }
 0x7d8   :  { %6565 = vmatpush1.bf16.msra.mxu1 %v12502_v19 }
 0x7d9   :  { %6647 = vmatprep.subr.bf16.mxu1 %v12510_v4 }
 0x7da   :  { %7017 = vmatpush1.bf16.msra.mxu0 %v12505_v25 }
 0x7db   :  { %7099 = vmatprep.subr.bf16.mxu0 %v12513_v27 }
 0x7ee   :  { %v3899_v63 = vpop.f32.mrb[64].mxu1 }
 0x7ef   :  { %v11654_v45 = vadd.f32 %v3899_v63, %v14852_v5  ;;  %v3901_v61 = vpop.f32.mrb[65].mxu1 }
 0x7f0   :  { %v4125_v33 = vpop.f32.mrb[96].mxu0  ;;  %v11655_v17 = vadd.f32 %v3901_v61, %v14858_v46  ;;  %v3903_v1 = vpop.f32.mrb[66].mxu1 }
 0x7f1   :  { %v11686_v32 = vadd.f32 %v4125_v33, %v14855_v30  ;;  %v4127_v42 = vpop.f32.mrb[97].mxu0  ;;  %v4656_v20 = vmul.f32 0.01, %v11654_v45  ;;  %v11656_v9 = vadd.f32 %v3903_v1, %v14852_v5  ;;  %v3905_v3 = vpop.f32.mrb[67].mxu1  ;;  %v12517_v1 = vld [vmem:[#allocation19 + $0x228] ss:$16 sps:$4 sm:$0xff]  }
 0x7f2   :  { %v11687_v31 = vadd.f32 %v4127_v42, %v14861_v10  ;;  %v4129_v13 = vpop.f32.mrb[98].mxu0  ;;  %v4657_v28 = vmul.f32 0.01, %v11655_v17  ;;  %v11657_v44 = vadd.f32 %v3905_v3, %v14858_v46  ;;  %v12525_v3 = vld [vmem:[#allocation19 + $0x24c] ss:$16 sps:$4 sm:$0xff]  }
 0x7f3   :  { %v4658_v14 = vmul.f32 0.01, %v11686_v32  ;;  %v11688_v29 = vadd.f32 %v4129_v13, %v14855_v30  ;;  %v4131_v22 = vpop.f32.mrb[99].mxu0  ;;  %v4664_v2 = vmul.f32 0.01, %v11656_v9  ;;  %v4784_v47 = vmax.f32 %v11654_v45, %v4656_v20 }
 0x7f4   :  { %v4659_v41 = vmul.f32 0.01, %v11687_v31  ;;  %v11689_v58 = vadd.f32 %v4131_v22, %v14861_v10  ;;  %v4665_v53 = vmul.f32 0.01, %v11657_v44  ;;  %v4785_v37 = vmax.f32 %v11655_v17, %v4657_v28  ;;  %v12522_v13 = vld [vmem:[#allocation19 + $0x244] ss:$16 sps:$4 sm:$0xff]  }
 0x7f5   :  { %v4666_v16 = vmul.f32 0.01, %v11688_v29  ;;  %v4792_v39 = vmax.f32 %v11656_v9, %v4664_v2  ;;  %v4786_v59 = vmax.f32 %v11686_v32, %v4658_v14  ;;  %v12514_v32 = vld [vmem:[#allocation19 + $0x220] ss:$16 sps:$4 sm:$0xff]  }
 0x7f6   :  { %v4667_v12 = vmul.f32 0.01, %v11689_v58  ;;  %v4793_v26 = vmax.f32 %v11657_v44, %v4665_v53  ;;  %v3909_v36 = vpop.f32.mrb[68].mxu1  ;;  %v4787_v54 = vmax.f32 %v11687_v31, %v4659_v41 }
 0x7f7   :  { %v4794_v8 = vmax.f32 %v11688_v29, %v4666_v16  ;;  %v4912_v6 = vpack.c.bf16 %v4792_v39, %v4784_v47  ;;  %v11658_v38 = vadd.f32 %v3909_v36, %v14852_v5  ;;  %v3911_v60 = vpop.f32.mrb[69].mxu1  ;;  %v12520_v47 = vld [vmem:[#allocation19 + $0x240] ss:$16 sps:$4 sm:$0xff]   ;;  %v12528_v36 = vld [vmem:[#allocation19 + $0x264] ss:$16 sps:$4 sm:$0xff]  }
 0x7f8   :  { %v4795_v40 = vmax.f32 %v11689_v58, %v4667_v12  ;;  %v4135_v50 = vpop.f32.mrb[100].mxu0  ;;  %v11659_v56 = vadd.f32 %v3911_v60, %v14858_v46  ;;  %v3913_v24 = vpop.f32.mrb[70].mxu1  ;;  %v4913_v18 = vpack.c.bf16 %v4793_v26, %v4785_v37  ;;  %v12523_v26 = vld [vmem:[#allocation19 + $0x248] ss:$16 sps:$4 sm:$0xff]   ;;  %v12531_v60 = vld [vmem:[#allocation19 + $0x26c] ss:$16 sps:$4 sm:$0xff]  }
 0x7f9   :  { %v14872_v43 = vpack.c.bf16 %v4794_v8, %v4786_v59  ;;  %v4137_v23 = vpop.f32.mrb[101].mxu0  ;;  %v4672_v51 = vmul.f32 0.01, %v11658_v38  ;;  %v11660_v11 = vadd.f32 %v3913_v24, %v14852_v5  ;;  %v3915_v52 = vpop.f32.mrb[71].mxu1  ;;  %v14880_v25 = vadd.f32 %v4135_v50, %v14855_v30 }
 0x7fa   :  { %v11691_v21 = vadd.f32 %v4137_v23, %v14861_v10  ;;  %v4139_v34 = vpop.f32.mrb[102].mxu0  ;;  %v14877_v19 = vpack.c.bf16 %v4795_v40, %v4787_v54  ;;  %v4673_v4 = vmul.f32 0.01, %v11659_v56  ;;  %v11661_v57 = vadd.f32 %v3915_v52, %v14858_v46  ;;  %6566 = vmatprep.mubr.bf16.mxu1 %v4913_v18  ;;  %7018 = vmatprep.mubr.bf16.mxu0 %v4913_v18 }
 0x7fb   :  { %v14883_v27 = vadd.f32 %v4139_v34, %v14855_v30  ;;  %v4141_v63 = vpop.f32.mrb[103].mxu0  ;;  %v4680_v33 = vmul.f32 0.01, %v11660_v11  ;;  %6567 = vmatmul.mubr.bf16.vlgmr.msra.gmra.mrb[128].mxu1 %v4912_v6  ;;  %7019 = vmatmul.mubr.bf16.vlgmr.msra.gmra.mrb[160].mxu0 %v4912_v6  ;;  %v4800_v20 = vmax.f32 %v11658_v38, %v4672_v51  ;;  %v4674_v14 = vmul.f32 0.01, %v14880_v25 }
 0x7fc   :  { %v4675_v45 = vmul.f32 0.01, %v11691_v21  ;;  %v11693_v61 = vadd.f32 %v4141_v63, %v14861_v10  ;;  %v4681_v42 = vmul.f32 0.01, %v11661_v57  ;;  %6648 = vmatpush1.bf16.msra.mxu1 %v12508_v55  ;;  %7100 = vmatpush1.bf16.msra.mxu0 %v12511_v48  ;;  %v4801_v28 = vmax.f32 %v11659_v56, %v4673_v4  ;;  %v12526_v34 = vld [vmem:[#allocation19 + $0x260] ss:$16 sps:$4 sm:$0xff]  }
 0x7fd   :  { %v14888_v17 = vmul.f32 0.01, %v14883_v27  ;;  %v4808_v31 = vmax.f32 %v11660_v11, %v4680_v33  ;;  %6649 = vmatprep.subr.bf16.mxu1 %v12516_v49  ;;  %7101 = vmatprep.subr.bf16.mxu0 %v12519_v15  ;;  %v4802_v49 = vmax.f32 %v14880_v25, %v4674_v14  ;;  %v12529_v4 = vld [vmem:[#allocation19 + $0x268] ss:$16 sps:$4 sm:$0xff]   ;;  %v12534_v25 = vld [vmem:[#allocation19 + $0x284] ss:$16 sps:$4 sm:$0xff]  }
 0x7fe   :  { %v4683_v9 = vmul.f32 0.01, %v11693_v61  ;;  %v4809_v29 = vmax.f32 %v11661_v57, %v4681_v42  ;;  %v3919_v44 = vpop.f32.mrb[72].mxu1  ;;  %v4803_v22 = vmax.f32 %v11691_v21, %v4675_v45  ;;  %v12537_v45 = vld [vmem:[#allocation19 + $0x28c] ss:$16 sps:$4 sm:$0xff]  }
 0x7ff   :  { %v11662_v2 = vadd.f32 %v3919_v44, %v14852_v5  ;;  %v3921_v16 = vpop.f32.mrb[73].mxu1  ;;  %v4920_v53 = vpack.c.bf16 %v4808_v31, %v4800_v20  ;;  %v4810_v39 = vmax.f32 %v14883_v27, %v14888_v17  ;;  %v12532_v14 = vld [vmem:[#allocation19 + $0x280] ss:$16 sps:$4 sm:$0xff]  }
 0x800   :  { %v4811_v41 = vmax.f32 %v11693_v61, %v4683_v9  ;;  %v4145_v58 = vpop.f32.mrb[104].mxu0  ;;  %v11663_v12 = vadd.f32 %v3921_v16, %v14858_v46  ;;  %v3923_v37 = vpop.f32.mrb[74].mxu1  ;;  %6650 = vmatpush1.bf16.msra.mxu1 %v12514_v32  ;;  %7102 = vmatpush1.bf16.msra.mxu0 %v12517_v1  ;;  %v4921_v8 = vpack.c.bf16 %v4809_v29, %v4801_v28 }
 0x801   :  { %v4147_v59 = vpop.f32.mrb[105].mxu0  ;;  %v4688_v54 = vmul.f32 0.01, %v11662_v2  ;;  %v11664_v40 = vadd.f32 %v3923_v37, %v14852_v5  ;;  %v3925_v50 = vpop.f32.mrb[75].mxu1  ;;  %6651 = vmatprep.subr.bf16.mxu1 %v12522_v13  ;;  %7103 = vmatprep.subr.bf16.mxu0 %v12525_v3  ;;  %v14902_v56 = vadd.f32 %v4145_v58, %v14855_v30  ;;  %v14914_v33 = vpack.c.bf16 %v4810_v39, %v4802_v49  ;;  %v12540_v58 = vld [vmem:[#allocation19 + $0x2a4] ss:$16 sps:$4 sm:$0xff]  }
 0x802   :  { %v14896_v6 = vadd.f32 %v4147_v59, %v14861_v10  ;;  %v4149_v38 = vpop.f32.mrb[106].mxu0  ;;  %v14899_v55 = vpack.c.bf16 %v4811_v41, %v4803_v22  ;;  %v4689_v23 = vmul.f32 0.01, %v11663_v12  ;;  %v11665_v18 = vadd.f32 %v3925_v50, %v14858_v46  ;;  %6576 = vmatprep.mubr.bf16.mxu1 %v4921_v8  ;;  %7028 = vmatprep.mubr.bf16.mxu0 %v4921_v8  ;;  %v12543_v59 = vld [vmem:[#allocation19 + $0x2ac] ss:$16 sps:$4 sm:$0xff]  }
 0x803   :  { %v14905_v24 = vadd.f32 %v4149_v38, %v14855_v30  ;;  %v4151_v48 = vpop.f32.mrb[107].mxu0  ;;  %v4696_v21 = vmul.f32 0.01, %v11664_v40  ;;  %6577 = vmatmul.mubr.bf16.gmra.mrb[132].mxu1 %v4920_v53  ;;  %7029 = vmatmul.mubr.bf16.gmra.mrb[164].mxu0 %v4920_v53  ;;  %v4816_v27 = vmax.f32 %v11662_v2, %v4688_v54  ;;  %v4690_v61 = vmul.f32 0.01, %v14902_v56 }
 0x804   :  { %v4691_v51 = vmul.f32 0.01, %v14896_v6  ;;  %v11697_v11 = vadd.f32 %v4151_v48, %v14861_v10  ;;  %v4697_v15 = vmul.f32 0.01, %v11665_v18  ;;  %6652 = vmatpush1.bf16.msra.mxu1 %v12520_v47  ;;  %7104 = vmatpush1.bf16.msra.mxu0 %v12523_v26  ;;  %v4817_v32 = vmax.f32 %v11663_v12, %v4689_v23  ;;  %v12535_v2 = vld [vmem:[#allocation19 + $0x288] ss:$16 sps:$4 sm:$0xff]  }
 0x805   :  { %v14912_v52 = vmul.f32 0.01, %v14905_v24  ;;  %v4824_v57 = vmax.f32 %v11664_v40, %v4696_v21  ;;  %6653 = vmatprep.subr.bf16.mxu1 %v12528_v36  ;;  %7105 = vmatprep.subr.bf16.mxu0 %v12531_v60  ;;  %v4818_v40 = vmax.f32 %v14902_v56, %v4690_v61  ;;  %v12538_v23 = vld [vmem:[#allocation19 + $0x2a0] ss:$16 sps:$4 sm:$0xff]   ;;  %v12541_v48 = vld [vmem:[#allocation19 + $0x2a8] ss:$16 sps:$4 sm:$0xff]  }
 0x806   :  { %v4699_v63 = vmul.f32 0.01, %v11697_v11  ;;  %v4825_v17 = vmax.f32 %v11665_v18, %v4697_v15  ;;  %v3929_v42 = vpop.f32.mrb[76].mxu1  ;;  %v4819_v1 = vmax.f32 %v14896_v6, %v4691_v51  ;;  %v12546_v56 = vld [vmem:[#allocation19 + $0x2c4] ss:$16 sps:$4 sm:$0xff]  }
 0x807   :  { %v11666_v31 = vadd.f32 %v3929_v42, %v14852_v5  ;;  %v3931_v13 = vpop.f32.mrb[77].mxu1  ;;  %v4928_v3 = vpack.c.bf16 %v4824_v57, %v4816_v27  ;;  %v4826_v28 = vmax.f32 %v14905_v24, %v14912_v52 }
 0x808   :  { %v4827_v20 = vmax.f32 %v11697_v11, %v4699_v63  ;;  %v4155_v9 = vpop.f32.mrb[108].mxu0  ;;  %v11667_v29 = vadd.f32 %v3931_v13, %v14858_v46  ;;  %v3933_v22 = vpop.f32.mrb[78].mxu1  ;;  %6654 = vmatpush1.bf16.msra.mxu1 %v12526_v34  ;;  %7106 = vmatpush1.bf16.msra.mxu0 %v12529_v4  ;;  %v4929_v41 = vpack.c.bf16 %v4825_v17, %v4817_v32  ;;  %v12549_v11 = vld [vmem:[#allocation19 + $0x2cc] ss:$16 sps:$4 sm:$0xff]   ;;  %v12544_v17 = vld [vmem:[#allocation19 + $0x2c0] ss:$16 sps:$4 sm:$0xff]  }
 0x809   :  { %v4157_v44 = vpop.f32.mrb[109].mxu0  ;;  %v4704_v16 = vmul.f32 0.01, %v11666_v31  ;;  %v11668_v47 = vadd.f32 %v3933_v22, %v14852_v5  ;;  %v3935_v12 = vpop.f32.mrb[79].mxu1  ;;  %6655 = vmatprep.subr.bf16.mxu1 %v12534_v25  ;;  %7107 = vmatprep.subr.bf16.mxu0 %v12537_v45  ;;  %v14929_v8 = vadd.f32 %v4155_v9, %v14855_v30  ;;  %v14941_v34 = vpack.c.bf16 %v4826_v28, %v4818_v40  ;;  %v12547_v13 = vld [vmem:[#allocation19 + $0x2c8] ss:$16 sps:$4 sm:$0xff]  }
 0x80a   :  { %v14923_v53 = vadd.f32 %v4157_v44, %v14861_v10  ;;  %v4159_v39 = vpop.f32.mrb[110].mxu0  ;;  %v14926_v37 = vpack.c.bf16 %v4827_v20, %v4819_v1  ;;  %v4705_v26 = vmul.f32 0.01, %v11667_v29  ;;  %v11669_v54 = vadd.f32 %v3935_v12, %v14858_v46  ;;  %6586 = vmatprep.mubr.bf16.mxu1 %v4929_v41  ;;  %7038 = vmatprep.mubr.bf16.mxu0 %v4929_v41  ;;  %v12555_v41 = vld [vmem:[#allocation19 + $0x2ec] ss:$16 sps:$4 sm:$0xff]  }
 0x80b   :  { %v14932_v36 = vadd.f32 %v4159_v39, %v14855_v30  ;;  %v4161_v6 = vpop.f32.mrb[111].mxu0  ;;  %v4712_v50 = vmul.f32 0.01, %v11668_v47  ;;  %6587 = vmatmul.mubr.bf16.gmra.mrb[136].mxu1 %v4928_v3  ;;  %7039 = vmatmul.mubr.bf16.gmra.mrb[168].mxu0 %v4928_v3  ;;  %v4832_v49 = vmax.f32 %v11666_v31, %v4704_v16  ;;  %v4706_v52 = vmul.f32 0.01, %v14929_v8 }
 0x80c   :  { %v4707_v38 = vmul.f32 0.01, %v14923_v53  ;;  %v11701_v60 = vadd.f32 %v4161_v6, %v14861_v10  ;;  %v4713_v18 = vmul.f32 0.01, %v11669_v54  ;;  %6656 = vmatpush1.bf16.msra.mxu1 %v12532_v14  ;;  %7108 = vmatpush1.bf16.msra.mxu0 %v12535_v2  ;;  %v4833_v15 = vmax.f32 %v11667_v29, %v4705_v26  ;;  %v12552_v3 = vld [vmem:[#allocation19 + $0x2e4] ss:$16 sps:$4 sm:$0xff]  }
 0x80d   :  { %v14939_v24 = vmul.f32 0.01, %v14932_v36  ;;  %v4840_v51 = vmax.f32 %v11668_v47, %v4712_v50  ;;  %6657 = vmatprep.subr.bf16.mxu1 %v12540_v58  ;;  %7109 = vmatprep.subr.bf16.mxu0 %v12543_v59  ;;  %v4834_v12 = vmax.f32 %v14929_v8, %v4706_v52  ;;  %v12558_v8 = vld [vmem:[#allocation19 + $0x304] ss:$16 sps:$4 sm:$0xff]  }
 0x80e   :  { %v4715_v21 = vmul.f32 0.01, %v11701_v60  ;;  %v4841_v4 = vmax.f32 %v11669_v54, %v4713_v18  ;;  %v3939_v27 = vpop.f32.mrb[80].mxu1  ;;  %v4835_v57 = vmax.f32 %v14923_v53, %v4707_v38  ;;  %v12550_v54 = vld [vmem:[#allocation19 + $0x2e0] ss:$16 sps:$4 sm:$0xff]  }
 0x80f   :  { %v11670_v25 = vadd.f32 %v3939_v27, %v14852_v5  ;;  %v3941_v61 = vpop.f32.mrb[81].mxu1  ;;  %v4936_v32 = vpack.c.bf16 %v4840_v51, %v4832_v49  ;;  %v4842_v42 = vmax.f32 %v14932_v36, %v14939_v24  ;;  %v12553_v38 = vld [vmem:[#allocation19 + $0x2e8] ss:$16 sps:$4 sm:$0xff]   ;;  %v12561_v24 = vld [vmem:[#allocation19 + $0x30c] ss:$16 sps:$4 sm:$0xff]  }
 0x810   :  { %v4843_v63 = vmax.f32 %v11701_v60, %v4715_v21  ;;  %v4165_v45 = vpop.f32.mrb[112].mxu0  ;;  %v11671_v1 = vadd.f32 %v3941_v61, %v14858_v46  ;;  %v3943_v31 = vpop.f32.mrb[82].mxu1  ;;  %6658 = vmatpush1.bf16.msra.mxu1 %v12538_v23  ;;  %7110 = vmatpush1.bf16.msra.mxu0 %v12541_v48  ;;  %v4937_v9 = vpack.c.bf16 %v4841_v4, %v4833_v15 }
 0x811   :  { %v4167_v20 = vpop.f32.mrb[113].mxu0  ;;  %v4720_v14 = vmul.f32 0.01, %v11670_v25  ;;  %v11672_v29 = vadd.f32 %v3943_v31, %v14852_v5  ;;  %v3945_v22 = vpop.f32.mrb[83].mxu1  ;;  %6659 = vmatprep.subr.bf16.mxu1 %v12546_v56  ;;  %7111 = vmatprep.subr.bf16.mxu0 %v12549_v11  ;;  %v14956_v58 = vadd.f32 %v4165_v45, %v14855_v30  ;;  %v14968_v18 = vpack.c.bf16 %v4842_v42, %v4834_v12  ;;  %v12564_v42 = vld [vmem:[#allocation19 + $0x324] ss:$16 sps:$4 sm:$0xff]  }
 0x812   :  { %v14950_v28 = vadd.f32 %v4167_v20, %v14861_v10  ;;  %v4169_v44 = vpop.f32.mrb[114].mxu0  ;;  %v14953_v2 = vpack.c.bf16 %v4843_v63, %v4835_v57  ;;  %v4721_v16 = vmul.f32 0.01, %v11671_v1  ;;  %v11673_v47 = vadd.f32 %v3945_v22, %v14858_v46  ;;  %6596 = vmatprep.mubr.bf16.mxu1 %v4937_v9  ;;  %7048 = vmatprep.mubr.bf16.mxu0 %v4937_v9  ;;  %v12556_v57 = vld [vmem:[#allocation19 + $0x300] ss:$16 sps:$4 sm:$0xff]  }
 0x813   :  { %v14959_v53 = vadd.f32 %v4169_v44, %v14855_v30  ;;  %v4171_v39 = vpop.f32.mrb[115].mxu0  ;;  %v4728_v26 = vmul.f32 0.01, %v11672_v29  ;;  %6597 = vmatmul.mubr.bf16.gmra.mrb[140].mxu1 %v4936_v32  ;;  %7049 = vmatmul.mubr.bf16.gmra.mrb[172].mxu0 %v4936_v32  ;;  %v4848_v50 = vmax.f32 %v11670_v25, %v4720_v14  ;;  %v4722_v48 = vmul.f32 0.01, %v14956_v58 }
 0x814   :  { %v4723_v59 = vmul.f32 0.01, %v14950_v28  ;;  %v11705_v36 = vadd.f32 %v4171_v39, %v14861_v10  ;;  %v4729_v40 = vmul.f32 0.01, %v11673_v47  ;;  %6660 = vmatpush1.bf16.msra.mxu1 %v12544_v17  ;;  %7112 = vmatpush1.bf16.msra.mxu0 %v12547_v13  ;;  %v4849_v49 = vmax.f32 %v11671_v1, %v4721_v16  ;;  %v12559_v17 = vld [vmem:[#allocation19 + $0x308] ss:$16 sps:$4 sm:$0xff]  }
 0x815   :  { %v14966_v6 = vmul.f32 0.01, %v14959_v53  ;;  %v4856_v60 = vmax.f32 %v11672_v29, %v4728_v26  ;;  %6661 = vmatprep.subr.bf16.mxu1 %v12552_v3  ;;  %7113 = vmatprep.subr.bf16.mxu0 %v12555_v41  ;;  %v12567_v3 = vld [vmem:[#allocation19 + $0x32c] ss:$16 sps:$4 sm:$0xff]   ;;  %v4850_v16 = vmax.f32 %v14956_v58, %v4722_v48  ;;  %v12562_v12 = vld [vmem:[#allocation19 + $0x320] ss:$16 sps:$4 sm:$0xff]  }
 0x816   :  { %v4731_v23 = vmul.f32 0.01, %v11705_v36  ;;  %v4857_v51 = vmax.f32 %v11673_v47, %v4729_v40  ;;  %v3949_v21 = vpop.f32.mrb[84].mxu1  ;;  %v4851_v56 = vmax.f32 %v14950_v28, %v4723_v59  ;;  %v12570_v58 = vld [vmem:[#allocation19 + $0x344] ss:$16 sps:$4 sm:$0xff]  }
 0x817   :  { %v11674_v52 = vadd.f32 %v3949_v21, %v14852_v5  ;;  %v3951_v4 = vpop.f32.mrb[85].mxu1  ;;  %v4944_v27 = vpack.c.bf16 %v4856_v60, %v4848_v50  ;;  %v4858_v63 = vmax.f32 %v14959_v53, %v14966_v6 }
 0x818   :  { %v4859_v11 = vmax.f32 %v11705_v36, %v4731_v23  ;;  %v4175_v15 = vpop.f32.mrb[116].mxu0  ;;  %v11675_v25 = vadd.f32 %v3951_v4, %v14858_v46  ;;  %v3953_v61 = vpop.f32.mrb[86].mxu1  ;;  %6662 = vmatpush1.bf16.msra.mxu1 %v12550_v54  ;;  %7114 = vmatpush1.bf16.msra.mxu0 %v12553_v38  ;;  %v4945_v32 = vpack.c.bf16 %v4857_v51, %v4849_v49  ;;  %v12565_v36 = vld [vmem:[#allocation19 + $0x328] ss:$16 sps:$4 sm:$0xff]   ;;  %v12573_v38 = vld [vmem:[#allocation19 + $0x34c] ss:$16 sps:$4 sm:$0xff]  }
 0x819   :  { %v4177_v45 = vpop.f32.mrb[117].mxu0  ;;  %v4736_v1 = vmul.f32 0.01, %v11674_v52  ;;  %v11676_v31 = vadd.f32 %v3953_v61, %v14852_v5  ;;  %v3955_v13 = vpop.f32.mrb[87].mxu1  ;;  %6663 = vmatprep.subr.bf16.mxu1 %v12558_v8  ;;  %7115 = vmatprep.subr.bf16.mxu0 %v12561_v24  ;;  %v14983_v28 = vadd.f32 %v4175_v15, %v14855_v30  ;;  %v14995_v50 = vpack.c.bf16 %v4858_v63, %v4850_v16 }
 0x81a   :  { %v14977_v20 = vadd.f32 %v4177_v45, %v14861_v10  ;;  %v4179_v9 = vpop.f32.mrb[118].mxu0  ;;  %v14980_v14 = vpack.c.bf16 %v4859_v11, %v4851_v56  ;;  %v4737_v29 = vmul.f32 0.01, %v11675_v25  ;;  %v11677_v22 = vadd.f32 %v3955_v13, %v14858_v46  ;;  %6606 = vmatprep.mubr.bf16.mxu1 %v4945_v32  ;;  %7058 = vmatprep.mubr.bf16.mxu0 %v4945_v32  ;;  %v12576_v45 = vld [vmem:[#allocation19 + $0x364] ss:$16 sps:$4 sm:$0xff]  }
 0x81b   :  { %v14986_v44 = vadd.f32 %v4179_v9, %v14855_v30  ;;  %v4181_v41 = vpop.f32.mrb[119].mxu0  ;;  %v4744_v47 = vmul.f32 0.01, %v11676_v31  ;;  %6607 = vmatmul.mubr.bf16.gmra.mrb[144].mxu1 %v4944_v27  ;;  %7059 = vmatmul.mubr.bf16.gmra.mrb[176].mxu0 %v4944_v27  ;;  %v4864_v54 = vmax.f32 %v11674_v52, %v4736_v1  ;;  %v4738_v60 = vmul.f32 0.01, %v14983_v28 }
 0x81c   :  { %v4739_v53 = vmul.f32 0.01, %v14977_v20  ;;  %v11709_v39 = vadd.f32 %v4181_v41, %v14861_v10  ;;  %v4745_v26 = vmul.f32 0.01, %v11677_v22  ;;  %6664 = vmatpush1.bf16.msra.mxu1 %v12556_v57  ;;  %7116 = vmatpush1.bf16.msra.mxu0 %v12559_v17  ;;  %v4865_v23 = vmax.f32 %v11675_v25, %v4737_v29  ;;  %v12568_v52 = vld [vmem:[#allocation19 + $0x340] ss:$16 sps:$4 sm:$0xff]  }
 0x81d   :  { %v14993_v59 = vmul.f32 0.01, %v14986_v44  ;;  %v4872_v6 = vmax.f32 %v11676_v31, %v4744_v47  ;;  %6665 = vmatprep.subr.bf16.mxu1 %v12564_v42  ;;  %7117 = vmatprep.subr.bf16.mxu0 %v12567_v3  ;;  %v12571_v25 = vld [vmem:[#allocation19 + $0x348] ss:$16 sps:$4 sm:$0xff]   ;;  %v12574_v47 = vld [vmem:[#allocation19 + $0x360] ss:$16 sps:$4 sm:$0xff]  }
 0x81e   :  { %v4747_v40 = vmul.f32 0.01, %v11709_v39  ;;  %v4873_v8 = vmax.f32 %v11677_v22, %v4745_v26  ;;  %v3959_v24 = vpop.f32.mrb[88].mxu1  ;;  %v4867_v48 = vmax.f32 %v14977_v20, %v4739_v53  ;;  %v12579_v20 = vld [vmem:[#allocation19 + $0x36c] ss:$16 sps:$4 sm:$0xff]   ;;  %v4866_v22 = vmax.f32 %v14983_v28, %v4738_v60 }
 0x81f   :  { %v11678_v51 = vadd.f32 %v3959_v24, %v14852_v5  ;;  %v3961_v56 = vpop.f32.mrb[89].mxu1  ;;  %v4952_v11 = vpack.c.bf16 %v4872_v6, %v4864_v54  ;;  %v4874_v15 = vmax.f32 %v14986_v44, %v14993_v59  ;;  %v12577_v59 = vld [vmem:[#allocation19 + $0x368] ss:$16 sps:$4 sm:$0xff]   ;;  %v12582_v28 = vld [vmem:[#allocation19 + $0x384] ss:$16 sps:$4 sm:$0xff]  }
 0x820   :  { %v4875_v49 = vmax.f32 %v11709_v39, %v4747_v40  ;;  %v4185_v21 = vpop.f32.mrb[120].mxu0  ;;  %v15003_v4 = vadd.f32 %v3961_v56, %v14858_v46  ;;  %v3963_v57 = vpop.f32.mrb[90].mxu1  ;;  %6666 = vmatpush1.bf16.msra.mxu1 %v12562_v12  ;;  %7118 = vmatpush1.bf16.msra.mxu0 %v12565_v36  ;;  %v4953_v63 = vpack.c.bf16 %v4873_v8, %v4865_v23  ;;  %v12585_v6 = vld [vmem:[#allocation19 + $0x38c] ss:$16 sps:$4 sm:$0xff]  }
 0x821   :  { %v4187_v27 = vpop.f32.mrb[121].mxu0  ;;  %v4752_v61 = vmul.f32 0.01, %v11678_v51  ;;  %v11680_v17 = vadd.f32 %v3963_v57, %v14852_v5  ;;  %v3965_v1 = vpop.f32.mrb[91].mxu1  ;;  %6667 = vmatprep.subr.bf16.mxu1 %v12570_v58  ;;  %7119 = vmatprep.subr.bf16.mxu0 %v12573_v38  ;;  %v15012_v9 = vadd.f32 %v4185_v21, %v14855_v30  ;;  %v15025_v40 = vpack.c.bf16 %v4874_v15, %v4866_v22 }
 0x822   :  { %v15006_v32 = vadd.f32 %v4187_v27, %v14861_v10  ;;  %v4189_v42 = vpop.f32.mrb[122].mxu0  ;;  %v15009_v31 = vpack.c.bf16 %v4875_v49, %v4867_v48  ;;  %v4753_v13 = vmul.f32 0.01, %v15003_v4  ;;  %v11681_v29 = vadd.f32 %v3965_v1, %v14858_v46  ;;  %6616 = vmatprep.mubr.bf16.mxu1 %v4953_v63  ;;  %7068 = vmatprep.mubr.bf16.mxu0 %v4953_v63  ;;  %v12583_v63 = vld [vmem:[#allocation19 + $0x388] ss:$16 sps:$4 sm:$0xff]  }
 0x823   :  { %v15016_v3 = vadd.f32 %v4189_v42, %v14855_v30  ;;  %v4191_v44 = vpop.f32.mrb[123].mxu0  ;;  %v4760_v16 = vmul.f32 0.01, %v11680_v17  ;;  %6617 = vmatmul.mubr.bf16.gmra.mrb[148].mxu1 %v4952_v11  ;;  %7069 = vmatmul.mubr.bf16.gmra.mrb[180].mxu0 %v4952_v11  ;;  %v4880_v26 = vmax.f32 %v11678_v51, %v4752_v61  ;;  %v4754_v58 = vmul.f32 0.01, %v15012_v9 }
 0x824   :  { %v4755_v41 = vmul.f32 0.01, %v15006_v32  ;;  %v11713_v53 = vadd.f32 %v4191_v44, %v14861_v10  ;;  %v4761_v12 = vmul.f32 0.01, %v11681_v29  ;;  %6668 = vmatpush1.bf16.msra.mxu1 %v12568_v52  ;;  %7120 = vmatpush1.bf16.msra.mxu0 %v12571_v25  ;;  %v4881_v38 = vmax.f32 %v15003_v4, %v4753_v13  ;;  %v12580_v11 = vld [vmem:[#allocation19 + $0x380] ss:$16 sps:$4 sm:$0xff]  }
 0x825   :  { %v15023_v39 = vmul.f32 0.01, %v15016_v3  ;;  %v4888_v36 = vmax.f32 %v11680_v17, %v4760_v16  ;;  %6669 = vmatprep.subr.bf16.mxu1 %v12576_v45  ;;  %7121 = vmatprep.subr.bf16.mxu0 %v12579_v20  ;;  %v12588_v25 = vld [vmem:[#allocation19 + $0x3a4] ss:$16 sps:$4 sm:$0xff]   ;;  %v12591_v1 = vld [vmem:[#allocation19 + $0x3ac] ss:$16 sps:$4 sm:$0xff]  }
 0x826   :  { %v4763_v54 = vmul.f32 0.01, %v11713_v53  ;;  %v4883_v60 = vmax.f32 %v15006_v32, %v4755_v41  ;;  %v4889_v23 = vmax.f32 %v11681_v29, %v4761_v12  ;;  %v3969_v8 = vpop.f32.mrb[92].mxu1  ;;  %v4882_v41 = vmax.f32 %v15012_v9, %v4754_v58 }
 0x827   :  { %v4890_v24 = vmax.f32 %v15016_v3, %v15023_v39  ;;  %v11682_v49 = vadd.f32 %v3969_v8, %v14852_v5  ;;  %v3971_v21 = vpop.f32.mrb[93].mxu1  ;;  %v4960_v56 = vpack.c.bf16 %v4888_v36, %v4880_v26  ;;  %v12594_v36 = vld [vmem:[#allocation19 + $0x3c4] ss:$16 sps:$4 sm:$0xff]  }
 0x828   :  { %v4891_v48 = vmax.f32 %v11713_v53, %v4763_v54  ;;  %v4195_v51 = vpop.f32.mrb[124].mxu0  ;;  %v11683_v15 = vadd.f32 %v3971_v21, %v14858_v46  ;;  %v3973_v4 = vpop.f32.mrb[94].mxu1  ;;  %6670 = vmatpush1.bf16.msra.mxu1 %v12574_v47  ;;  %7122 = vmatpush1.bf16.msra.mxu0 %v12577_v59  ;;  %v4961_v57 = vpack.c.bf16 %v4889_v23, %v4881_v38  ;;  %v12586_v47 = vld [vmem:[#allocation19 + $0x3a0] ss:$16 sps:$4 sm:$0xff]   ;;  %v12589_v59 = vld [vmem:[#allocation19 + $0x3a8] ss:$16 sps:$4 sm:$0xff]  }
 0x829   :  { %v11714_v52 = vadd.f32 %v4195_v51, %v14855_v30  ;;  %v4197_v27 = vpop.f32.mrb[125].mxu0  ;;  %v4768_v45 = vmul.f32 0.01, %v11682_v49  ;;  %v11684_v32 = vadd.f32 %v3973_v4, %v14852_v5  ;;  %v3975_v42 = vpop.f32.mrb[95].mxu1  ;;  %6671 = vmatprep.subr.bf16.mxu1 %v12582_v28  ;;  %7123 = vmatprep.subr.bf16.mxu0 %v12585_v6  ;;  %v12597_v54 = vld [vmem:[#allocation19 + $0x3cc] ss:$16 sps:$4 sm:$0xff]   ;;  %v15043_v9 = vpack.c.bf16 %v4890_v24, %v4882_v41 }
 0x82a   :  { %v11715_v61 = vadd.f32 %v4197_v27, %v14861_v10  ;;  %v4199_v17 = vpop.f32.mrb[126].mxu0  ;;  %v15037_v20 = vpack.c.bf16 %v4891_v48, %v4883_v60  ;;  %v4769_v3 = vmul.f32 0.01, %v11683_v15  ;;  %v11685_v44 = vadd.f32 %v3975_v42, %v14858_v46  ;;  %6626 = vmatprep.mubr.bf16.mxu1 %v4961_v57  ;;  %7078 = vmatprep.mubr.bf16.mxu0 %v4961_v57  ;;  %v12592_v48 = vld [vmem:[#allocation19 + $0x3c0] ss:$16 sps:$4 sm:$0xff]  }
 0x82b   :  { %v4770_v13 = vmul.f32 0.01, %v11714_v52  ;;  %v11716_v29 = vadd.f32 %v4199_v17, %v14855_v30  ;;  %v4201_v22 = vpop.f32.mrb[127].mxu0  ;;  %v4776_v5 = vmul.f32 0.01, %v11684_v32  ;;  %6627 = vmatmul.mubr.bf16.gmra.mrb[152].mxu1 %v4960_v56  ;;  %7079 = vmatmul.mubr.bf16.gmra.mrb[184].mxu0 %v4960_v56  ;;  %v4896_v30 = vmax.f32 %v11682_v49, %v4768_v45 }
 0x82c   :  { %v4771_v16 = vmul.f32 0.01, %v11715_v61  ;;  %v11717_v53 = vadd.f32 %v4201_v22, %v14861_v10  ;;  %v4777_v12 = vmul.f32 0.01, %v11685_v44  ;;  %6672 = vmatpush1.bf16.msra.mxu1 %v12580_v11  ;;  %7124 = vmatpush1.bf16.msra.mxu0 %v12583_v63  ;;  %v4897_v6 = vmax.f32 %v11683_v15, %v4769_v3  ;;  %v12595_v51 = vld [vmem:[#allocation19 + $0x3c8] ss:$16 sps:$4 sm:$0xff]  }
 0x82d   :  { %v4778_v39 = vmul.f32 0.01, %v11716_v29  ;;  %v4904_v26 = vmax.f32 %v11684_v32, %v4776_v5  ;;  %6673 = vmatprep.subr.bf16.mxu1 %v12588_v25  ;;  %7125 = vmatprep.subr.bf16.mxu0 %v12591_v1  ;;  %v4898_v28 = vmax.f32 %v11714_v52, %v4770_v13  ;;  %v12600_v24 = vld [vmem:[#allocation19 + $0x3e4] ss:$16 sps:$4 sm:$0xff]   ;;  %v12603_v56 = vld [vmem:[#allocation19 + $0x3ec] ss:$16 sps:$4 sm:$0xff]  }
 0x82e   :  { %v4779_v46 = vmul.f32 0.01, %v11717_v53  ;;  %v4905_v58 = vmax.f32 %v11685_v44, %v4777_v12  ;;  %v4899_v38 = vmax.f32 %v11715_v61, %v4771_v16  ;;  %v12598_v11 = vld [vmem:[#allocation19 + $0x3e0] ss:$16 sps:$4 sm:$0xff]   ;;  %v12601_v52 = vld [vmem:[#allocation19 + $0x3e8] ss:$16 sps:$4 sm:$0xff]  }
 0x82f   :  { %v4906_v10 = vmax.f32 %v11716_v29, %v4778_v39  ;;  %v4968_v23 = vpack.c.bf16 %v4904_v26, %v4896_v30  ;;  %v12606_v15 = vld [vmem:[#allocation19 + $0x404] ss:$16 sps:$4 sm:$0xff]   ;;  %v12609_v27 = vld [vmem:[#allocation19 + $0x40c] ss:$16 sps:$4 sm:$0xff]   ;;  %v12604_v4 = vld [vmem:[#allocation19 + $0x400] ss:$16 sps:$4 sm:$0xff]  }
 0x830   :  { %v4907_v60 = vmax.f32 %v11717_v53, %v4779_v46  ;;  %6674 = vmatpush1.bf16.msra.mxu1 %v12586_v47  ;;  %7126 = vmatpush1.bf16.msra.mxu0 %v12589_v59  ;;  %v4969_v8 = vpack.c.bf16 %v4905_v58, %v4897_v6  ;;  %v12607_v57 = vld [vmem:[#allocation19 + $0x408] ss:$16 sps:$4 sm:$0xff]   ;;  %v12612_v63 = vld [vmem:[#allocation19 + $0x424] ss:$16 sps:$4 sm:$0xff]   ;;  %v12615_v25 = vld [vmem:[#allocation19 + $0x42c] ss:$16 sps:$4 sm:$0xff]  }
 0x831   :  { %v15045_v49 = vpack.c.bf16 %v4906_v10, %v4898_v28  ;;  %6675 = vmatprep.subr.bf16.mxu1 %v12594_v36  ;;  %7127 = vmatprep.subr.bf16.mxu0 %v12597_v54  ;;  %v12613_v45 = vld [vmem:[#allocation19 + $0x428] ss:$16 sps:$4 sm:$0xff]   ;;  %v12618_v61 = vld [vmem:[#allocation19 + $0x444] ss:$16 sps:$4 sm:$0xff]   ;;  %v12621_v32 = vld [vmem:[#allocation19 + $0x44c] ss:$16 sps:$4 sm:$0xff]  }
 0x832   :  { %v15047_v21 = vpack.c.bf16 %v4907_v60, %v4899_v38  ;;  %6636 = vmatprep.mubr.bf16.mxu1 %v4969_v8  ;;  %7088 = vmatprep.mubr.bf16.mxu0 %v4969_v8  ;;  %v12616_v17 = vld [vmem:[#allocation19 + $0x440] ss:$16 sps:$4 sm:$0xff]   ;;  %v12619_v42 = vld [vmem:[#allocation19 + $0x448] ss:$16 sps:$4 sm:$0xff]   ;;  %v12624_v1 = vld [vmem:[#allocation19 + $0x464] ss:$16 sps:$4 sm:$0xff]  }
 0x833   :  { %6637 = vmatmul.mubr.bf16.gmra.mrb[156].mxu1 %v4968_v23  ;;  %7089 = vmatmul.mubr.bf16.gmra.mrb[188].mxu0 %v4968_v23  ;;  %v12625_v13 = vld [vmem:[#allocation19 + $0x468] ss:$16 sps:$4 sm:$0xff]   ;;  %v12630_v3 = vld [vmem:[#allocation19 + $0x484] ss:$16 sps:$4 sm:$0xff]   ;;  %v12633_v29 = vld [vmem:[#allocation19 + $0x48c] ss:$16 sps:$4 sm:$0xff]  }
 0x834   :  { %6676 = vmatpush1.bf16.msra.mxu1 %v12592_v48  ;;  %6679 = vmatprep.mubr.bf16.mxu1 %v14877_v19  ;;  %v12628_v44 = vld [vmem:[#allocation19 + $0x480] ss:$16 sps:$4 sm:$0xff]   ;;  %v12631_v22 = vld [vmem:[#allocation19 + $0x488] ss:$16 sps:$4 sm:$0xff]   ;;  %v12636_v41 = vld [vmem:[#allocation19 + $0x4a4] ss:$16 sps:$4 sm:$0xff]  }
 0x835   :  { %7128 = vmatpush1.bf16.msra.mxu0 %v12595_v51  ;;  %7131 = vmatprep.mubr.bf16.mxu0 %v14877_v19  ;;  %v12610_v19 = vld [vmem:[#allocation19 + $0x420] ss:$16 sps:$4 sm:$0xff]   ;;  %v12637_v16 = vld [vmem:[#allocation19 + $0x4a8] ss:$16 sps:$4 sm:$0xff]   ;;  %v12642_v5 = vld [vmem:[#allocation19 + $0x4c4] ss:$16 sps:$4 sm:$0xff]  }
 0x836   :  { %6677 = vmatprep.subr.bf16.mxu1 %v12600_v24  ;;  %7129 = vmatprep.subr.bf16.mxu0 %v12603_v56  ;;  %v12645_v53 = vld [vmem:[#allocation19 + $0x4cc] ss:$16 sps:$4 sm:$0xff]   ;;  %v12640_v47 = vld [vmem:[#allocation19 + $0x4c0] ss:$16 sps:$4 sm:$0xff]   ;;  %v12643_v39 = vld [vmem:[#allocation19 + $0x4c8] ss:$16 sps:$4 sm:$0xff]  }
 0x837   :  { %v12648_v12 = vld [vmem:[#allocation19 + $0x4e4] ss:$16 sps:$4 sm:$0xff]   ;;  %v12649_v59 = vld [vmem:[#allocation19 + $0x4e8] ss:$16 sps:$4 sm:$0xff]   ;;  %v12657_v26 = vld [vmem:[#allocation19 + $0x50c] ss:$16 sps:$4 sm:$0xff]  }
 0x838   :  { %6678 = vmatpush1.bf16.msra.mxu1 %v12598_v11  ;;  %v12654_v30 = vld [vmem:[#allocation19 + $0x504] ss:$16 sps:$4 sm:$0xff]   ;;  %v12652_v46 = vld [vmem:[#allocation19 + $0x500] ss:$16 sps:$4 sm:$0xff]   ;;  %v12655_v36 = vld [vmem:[#allocation19 + $0x508] ss:$16 sps:$4 sm:$0xff]  }
 0x839   :  { %7130 = vmatpush1.bf16.msra.mxu0 %v12601_v52  ;;  %6760 = vmatprep.subr.bf16.mxu1 %v12606_v15  ;;  %v12660_v54 = vld [vmem:[#allocation19 + $0x524] ss:$16 sps:$4 sm:$0xff]   ;;  %v12661_v28 = vld [vmem:[#allocation19 + $0x528] ss:$16 sps:$4 sm:$0xff]   ;;  %v12669_v10 = vld [vmem:[#allocation19 + $0x54c] ss:$16 sps:$4 sm:$0xff]  }
 0x83a   :  { %7212 = vmatprep.subr.bf16.mxu0 %v12609_v27  ;;  %v12666_v6 = vld [vmem:[#allocation19 + $0x544] ss:$16 sps:$4 sm:$0xff]   ;;  %v12664_v58 = vld [vmem:[#allocation19 + $0x540] ss:$16 sps:$4 sm:$0xff]   ;;  %v12667_v38 = vld [vmem:[#allocation19 + $0x548] ss:$16 sps:$4 sm:$0xff]  }
 0x83b   :  { %6680 = vmatmul.mubr.bf16.vlgmr.msra.gmra.mrb[128].mxu1 %v14872_v43  ;;  %v12672_v60 = vld [vmem:[#allocation19 + $0x564] ss:$16 sps:$4 sm:$0xff]   ;;  %v12673_v23 = vld [vmem:[#allocation19 + $0x568] ss:$16 sps:$4 sm:$0xff]   ;;  %v12681_v48 = vld [vmem:[#allocation19 + $0x58c] ss:$16 sps:$4 sm:$0xff]  }
 0x83c   :  { %7132 = vmatmul.mubr.bf16.vlgmr.msra.gmra.mrb[160].mxu0 %v14872_v43  ;;  %6689 = vmatprep.mubr.bf16.mxu1 %v14899_v55  ;;  %v12627_v43 = vld [vmem:[#allocation19 + $0x46c] ss:$16 sps:$4 sm:$0xff]   ;;  %v12678_v8 = vld [vmem:[#allocation19 + $0x584] ss:$16 sps:$4 sm:$0xff]   ;;  %v12676_v51 = vld [vmem:[#allocation19 + $0x580] ss:$16 sps:$4 sm:$0xff]  }
 0x83d   :  { %6761 = vmatpush1.bf16.msra.mxu1 %v12604_v4  ;;  %7141 = vmatprep.mubr.bf16.mxu0 %v14899_v55  ;;  %v12622_v55 = vld [vmem:[#allocation19 + $0x460] ss:$16 sps:$4 sm:$0xff]   ;;  %v12679_v11 = vld [vmem:[#allocation19 + $0x588] ss:$16 sps:$4 sm:$0xff]   ;;  %v12684_v15 = vld [vmem:[#allocation19 + $0x5a4] ss:$16 sps:$4 sm:$0xff]  }
 0x83e   :  { %7213 = vmatpush1.bf16.msra.mxu0 %v12607_v57  ;;  %6762 = vmatprep.subr.bf16.mxu1 %v12612_v63  ;;  %v17094_v24 = vld [vmem:[#allocation43_spill] sm:$0xff]  ;;  %v12948_v4 = vld [vmem:[#allocation17] sm:$0xff] }
 0x83f   :  { %7214 = vmatprep.subr.bf16.mxu0 %v12615_v25  ;;  %v2450_v56 = vsub.s32 4, %v17094_v24  ;;  %v2454_v52 = vsub.s32 5, %v17094_v24  ;;  %v12687_v27 = vld [vmem:[#allocation19 + $0x5ac] ss:$16 sps:$4 sm:$0xff]   ;;  %v12682_v63 = vld [vmem:[#allocation19 + $0x5a0] ss:$16 sps:$4 sm:$0xff]  }
 0x841   :  { %6763 = vmatpush1.bf16.msra.mxu1 %v12610_v19  ;;  %v15083_v57 = vrot.slane %v12948_v4, %v2450_v56  ;;  %v15087_v19 = vrot.slane %v12948_v4, %v2454_v52 }
 0x842   :  { %7215 = vmatpush1.bf16.msra.mxu0 %v12613_v45  ;;  %6764 = vmatprep.subr.bf16.mxu1 %v12618_v61  ;;  %v12685_v45 = vld [vmem:[#allocation19 + $0x5a8] ss:$16 sps:$4 sm:$0xff]   ;;  %v12690_v61 = vld [vmem:[#allocation19 + $0x5c4] ss:$16 sps:$4 sm:$0xff]  }
 0x843   :  { %6690 = vmatmul.mubr.bf16.gmra.mrb[132].mxu1 %v14914_v33  ;;  %7216 = vmatprep.subr.bf16.mxu0 %v12621_v32 }
 0x844   :  { %7142 = vmatmul.mubr.bf16.gmra.mrb[164].mxu0 %v14914_v33  ;;  %6699 = vmatprep.mubr.bf16.mxu1 %v14926_v37  ;;  %v12639_v33 = vld [vmem:[#allocation19 + $0x4ac] ss:$16 sps:$4 sm:$0xff]  }
 0x845   :  { %6765 = vmatpush1.bf16.msra.mxu1 %v12616_v17  ;;  %7151 = vmatprep.mubr.bf16.mxu0 %v14926_v37  ;;  %v12634_v37 = vld [vmem:[#allocation19 + $0x4a0] ss:$16 sps:$4 sm:$0xff]  }
 0x846   :  { %7217 = vmatpush1.bf16.msra.mxu0 %v12619_v42  ;;  %6766 = vmatprep.subr.bf16.mxu1 %v12624_v1 }
 0x847   :  { %7218 = vmatprep.subr.bf16.mxu0 %v12627_v43  ;;  %v12688_v43 = vld [vmem:[#allocation19 + $0x5c0] ss:$16 sps:$4 sm:$0xff]  }
 0x849   :  { %6767 = vmatpush1.bf16.msra.mxu1 %v12622_v55 }
 0x84a   :  { %7219 = vmatpush1.bf16.msra.mxu0 %v12625_v13  ;;  %6768 = vmatprep.subr.bf16.mxu1 %v12630_v3 }
 0x84b   :  { %6700 = vmatmul.mubr.bf16.gmra.mrb[136].mxu1 %v14941_v34  ;;  %7220 = vmatprep.subr.bf16.mxu0 %v12633_v29 }
 0x84c   :  { %7152 = vmatmul.mubr.bf16.gmra.mrb[168].mxu0 %v14941_v34  ;;  %6709 = vmatprep.mubr.bf16.mxu1 %v14953_v2  ;;  %v12651_v34 = vld [vmem:[#allocation19 + $0x4ec] ss:$16 sps:$4 sm:$0xff]  }
 0x84d   :  { %6769 = vmatpush1.bf16.msra.mxu1 %v12628_v44  ;;  %7161 = vmatprep.mubr.bf16.mxu0 %v14953_v2  ;;  %v12646_v2 = vld [vmem:[#allocation19 + $0x4e0] ss:$16 sps:$4 sm:$0xff]   ;;  %v12691_v44 = vld [vmem:[#allocation19 + $0x5c8] ss:$16 sps:$4 sm:$0xff]  }
 0x84e   :  { %7221 = vmatpush1.bf16.msra.mxu0 %v12631_v22  ;;  %6770 = vmatprep.subr.bf16.mxu1 %v12636_v41  ;;  %v12696_v22 = vld [vmem:[#allocation19 + $0x5e4] ss:$16 sps:$4 sm:$0xff]  }
 0x84f   :  { %7222 = vmatprep.subr.bf16.mxu0 %v12639_v33 }
 0x851   :  { %6771 = vmatpush1.bf16.msra.mxu1 %v12634_v37 }
 0x852   :  { %7223 = vmatpush1.bf16.msra.mxu0 %v12637_v16  ;;  %6772 = vmatprep.subr.bf16.mxu1 %v12642_v5 }
 0x853   :  { %6710 = vmatmul.mubr.bf16.gmra.mrb[140].mxu1 %v14968_v18  ;;  %7224 = vmatprep.subr.bf16.mxu0 %v12645_v53  ;;  %v12699_v53 = vld [vmem:[#allocation19 + $0x5ec] ss:$16 sps:$4 sm:$0xff]  }
 0x854   :  { %7162 = vmatmul.mubr.bf16.gmra.mrb[172].mxu0 %v14968_v18  ;;  %6719 = vmatprep.mubr.bf16.mxu1 %v14980_v14  ;;  %v12663_v18 = vld [vmem:[#allocation19 + $0x52c] ss:$16 sps:$4 sm:$0xff]  }
 0x855   :  { %6773 = vmatpush1.bf16.msra.mxu1 %v12640_v47  ;;  %7171 = vmatprep.mubr.bf16.mxu0 %v14980_v14  ;;  %v12658_v14 = vld [vmem:[#allocation19 + $0x520] ss:$16 sps:$4 sm:$0xff]  }
 0x856   :  { %7225 = vmatpush1.bf16.msra.mxu0 %v12643_v39  ;;  %6774 = vmatprep.subr.bf16.mxu1 %v12648_v12 }
 0x857   :  { %7226 = vmatprep.subr.bf16.mxu0 %v12651_v34 }
 0x859   :  { %6775 = vmatpush1.bf16.msra.mxu1 %v12646_v2 }
 0x85a   :  { %7227 = vmatpush1.bf16.msra.mxu0 %v12649_v59  ;;  %6776 = vmatprep.subr.bf16.mxu1 %v12654_v30 }
 0x85b   :  { %6720 = vmatmul.mubr.bf16.gmra.mrb[144].mxu1 %v14995_v50  ;;  %7228 = vmatprep.subr.bf16.mxu0 %v12657_v26 }
 0x85c   :  { %7172 = vmatmul.mubr.bf16.gmra.mrb[176].mxu0 %v14995_v50  ;;  %6729 = vmatprep.mubr.bf16.mxu1 %v15009_v31  ;;  %v12675_v50 = vld [vmem:[#allocation19 + $0x56c] ss:$16 sps:$4 sm:$0xff]  }
 0x85d   :  { %6777 = vmatpush1.bf16.msra.mxu1 %v12652_v46  ;;  %7181 = vmatprep.mubr.bf16.mxu0 %v15009_v31  ;;  %v12670_v31 = vld [vmem:[#allocation19 + $0x560] ss:$16 sps:$4 sm:$0xff]  }
 0x85e   :  { %7229 = vmatpush1.bf16.msra.mxu0 %v12655_v36  ;;  %6778 = vmatprep.subr.bf16.mxu1 %v12660_v54  ;;  %v12694_v46 = vld [vmem:[#allocation19 + $0x5e0] ss:$16 sps:$4 sm:$0xff]  }
 0x85f   :  { %7230 = vmatprep.subr.bf16.mxu0 %v12663_v18  ;;  %v12697_v18 = vld [vmem:[#allocation19 + $0x5e8] ss:$16 sps:$4 sm:$0xff]  }
 0x861   :  { %6779 = vmatpush1.bf16.msra.mxu1 %v12658_v14 }
 0x862   :  { %7231 = vmatpush1.bf16.msra.mxu0 %v12661_v28  ;;  %6780 = vmatprep.subr.bf16.mxu1 %v12666_v6 }
 0x863   :  { %6730 = vmatmul.mubr.bf16.gmra.mrb[148].mxu1 %v15025_v40  ;;  %7232 = vmatprep.subr.bf16.mxu0 %v12669_v10  ;;  %v12702_v10 = vld [vmem:[#allocation19 + $0x604] ss:$16 sps:$4 sm:$0xff]  }
 0x864   :  { %7182 = vmatmul.mubr.bf16.gmra.mrb[180].mxu0 %v15025_v40  ;;  %6739 = vmatprep.mubr.bf16.mxu1 %v15037_v20  ;;  %v2458_v40 = vsub.s32 6, %v17094_v24 }
 0x865   :  { %6781 = vmatpush1.bf16.msra.mxu1 %v12664_v58  ;;  %7191 = vmatprep.mubr.bf16.mxu0 %v15037_v20  ;;  %v2462_v20 = vsub.s32 7, %v17094_v24  ;;  %v12705_v58 = vld [vmem:[#allocation19 + $0x60c] ss:$16 sps:$4 sm:$0xff]  }
 0x866   :  { %7233 = vmatpush1.bf16.msra.mxu0 %v12667_v38  ;;  %6782 = vmatprep.subr.bf16.mxu1 %v12672_v60  ;;  %v15085_v25 = vrot.slane %v12948_v4, %v2458_v40 }
 0x867   :  { %7234 = vmatprep.subr.bf16.mxu0 %v12675_v50  ;;  %v15089_v32 = vrot.slane %v12948_v4, %v2462_v20  ;;  %v12703_v4 = vld [vmem:[#allocation19 + $0x608] ss:$16 sps:$4 sm:$0xff]  }
 0x869   :  { %6783 = vmatpush1.bf16.msra.mxu1 %v12670_v31 }
 0x86a   :  { %7235 = vmatpush1.bf16.msra.mxu0 %v12673_v23  ;;  %6784 = vmatprep.subr.bf16.mxu1 %v12678_v8 }
 0x86b   :  { %6740 = vmatmul.mubr.bf16.gmra.mrb[152].mxu1 %v15043_v9  ;;  %7236 = vmatprep.subr.bf16.mxu0 %v12681_v48 }
 0x86c   :  { %7192 = vmatmul.mubr.bf16.gmra.mrb[184].mxu0 %v15043_v9  ;;  %6749 = vmatprep.mubr.bf16.mxu1 %v15047_v21  ;;  %v12693_v9 = vld [vmem:[#allocation19 + $0x5cc] ss:$16 sps:$4 sm:$0xff]  }
 0x86d   :  { %6785 = vmatpush1.bf16.msra.mxu1 %v12676_v51  ;;  %7201 = vmatprep.mubr.bf16.mxu0 %v15047_v21 }
 0x86e   :  { %7237 = vmatpush1.bf16.msra.mxu0 %v12679_v11  ;;  %6786 = vmatprep.subr.bf16.mxu1 %v12684_v15  ;;  %v4351_v17 = vpop.f32.mrb[96].mxu1  ;;  %v12700_v11 = vld [vmem:[#allocation19 + $0x600] ss:$16 sps:$4 sm:$0xff]  }
 0x86f   :  { %7238 = vmatprep.subr.bf16.mxu0 %v12687_v27  ;;  %v11718_v42 = vadd.f32 %v4351_v17, %v15083_v57  ;;  %v4353_v1 = vpop.f32.mrb[97].mxu1 }
 0x870   :  { %v4577_v21 = vpop.f32.mrb[128].mxu0  ;;  %v11719_v13 = vadd.f32 %v4353_v1, %v15087_v19  ;;  %v4355_v29 = vpop.f32.mrb[98].mxu1 }
 0x871   :  { %6787 = vmatpush1.bf16.msra.mxu1 %v12682_v63  ;;  %v11750_v55 = vadd.f32 %v4577_v21, %v15085_v25  ;;  %v4579_v3 = vpop.f32.mrb[129].mxu0  ;;  %v4660_v41 = vmul.f32 0.01, %v11718_v42  ;;  %v11720_v37 = vadd.f32 %v4355_v29, %v15083_v57  ;;  %v4357_v5 = vpop.f32.mrb[99].mxu1  ;;  %v12708_v63 = vld [vmem:[#allocation19 + $0x624] ss:$16 sps:$4 sm:$0xff]  }
 0x872   :  { %7239 = vmatpush1.bf16.msra.mxu0 %v12685_v45  ;;  %6788 = vmatprep.subr.bf16.mxu1 %v12690_v61  ;;  %v11751_v33 = vadd.f32 %v4579_v3, %v15089_v32  ;;  %v4581_v16 = vpop.f32.mrb[130].mxu0  ;;  %v4661_v39 = vmul.f32 0.01, %v11719_v13  ;;  %v11721_v34 = vadd.f32 %v4357_v5, %v15087_v19  ;;  %v12711_v21 = vld [vmem:[#allocation19 + $0x62c] ss:$16 sps:$4 sm:$0xff]  }
 0x873   :  { %6750 = vmatmul.mubr.bf16.gmra.mrb[156].mxu1 %v15045_v49  ;;  %7240 = vmatprep.subr.bf16.mxu0 %v12693_v9  ;;  %v4662_v47 = vmul.f32 0.01, %v11750_v55  ;;  %v11752_v12 = vadd.f32 %v4581_v16, %v15085_v25  ;;  %v4583_v2 = vpop.f32.mrb[131].mxu0  ;;  %v4668_v30 = vmul.f32 0.01, %v11720_v37  ;;  %v4788_v14 = vmax.f32 %v11718_v42, %v4660_v41 }
 0x874   :  { %7202 = vmatmul.mubr.bf16.gmra.mrb[188].mxu0 %v15045_v49  ;;  %v4663_v59 = vmul.f32 0.01, %v11751_v33  ;;  %v11753_v26 = vadd.f32 %v4583_v2, %v15089_v32  ;;  %v4669_v54 = vmul.f32 0.01, %v11721_v34  ;;  %v4789_v60 = vmax.f32 %v11719_v13, %v4661_v39  ;;  %v12709_v5 = vld [vmem:[#allocation19 + $0x628] ss:$16 sps:$4 sm:$0xff]  }
 0x875   :  { %6789 = vmatpush1.bf16.msra.mxu1 %v12688_v43  ;;  %v4670_v36 = vmul.f32 0.01, %v11752_v12  ;;  %v4796_v28 = vmax.f32 %v11720_v37, %v4668_v30  ;;  %v4790_v38 = vmax.f32 %v11750_v55, %v4662_v47 }
 0x876   :  { %7241 = vmatpush1.bf16.msra.mxu0 %v12691_v44  ;;  %6790 = vmatprep.subr.bf16.mxu1 %v12696_v22  ;;  %v4671_v6 = vmul.f32 0.01, %v11753_v26  ;;  %v4797_v50 = vmax.f32 %v11721_v34, %v4669_v54  ;;  %v4361_v31 = vpop.f32.mrb[100].mxu1  ;;  %v4791_v23 = vmax.f32 %v11751_v33, %v4663_v59  ;;  %v12706_v33 = vld [vmem:[#allocation19 + $0x620] ss:$16 sps:$4 sm:$0xff]  }
 0x877   :  { %7242 = vmatprep.subr.bf16.mxu0 %v12699_v53  ;;  %v4798_v49 = vmax.f32 %v11752_v12, %v4670_v36  ;;  %v4916_v8 = vpack.c.bf16 %v4796_v28, %v4788_v14  ;;  %v11722_v51 = vadd.f32 %v4361_v31, %v15083_v57  ;;  %v4363_v56 = vpop.f32.mrb[101].mxu1  ;;  %v12714_v12 = vld [vmem:[#allocation19 + $0x644] ss:$16 sps:$4 sm:$0xff]   ;;  %v12717_v34 = vld [vmem:[#allocation19 + $0x64c] ss:$16 sps:$4 sm:$0xff]  }
 0x878   :  { %v4799_v48 = vmax.f32 %v11753_v26, %v4671_v6  ;;  %v4587_v24 = vpop.f32.mrb[132].mxu0  ;;  %v11723_v52 = vadd.f32 %v4363_v56, %v15087_v19  ;;  %v4365_v20 = vpop.f32.mrb[102].mxu1  ;;  %v4917_v27 = vpack.c.bf16 %v4797_v50, %v4789_v60  ;;  %v12712_v6 = vld [vmem:[#allocation19 + $0x640] ss:$16 sps:$4 sm:$0xff]   ;;  %v12715_v50 = vld [vmem:[#allocation19 + $0x648] ss:$16 sps:$4 sm:$0xff]  }
 0x879   :  { %6791 = vmatpush1.bf16.msra.mxu1 %v12694_v46  ;;  %v15102_v40 = vpack.c.bf16 %v4798_v49, %v4790_v38  ;;  %v4589_v15 = vpop.f32.mrb[133].mxu0  ;;  %v4676_v45 = vmul.f32 0.01, %v11722_v51  ;;  %v11724_v9 = vadd.f32 %v4365_v20, %v15083_v57  ;;  %v4367_v42 = vpop.f32.mrb[103].mxu1  ;;  %v15110_v43 = vadd.f32 %v4587_v24, %v15085_v25  ;;  %v12720_v31 = vld [vmem:[#allocation19 + $0x664] ss:$16 sps:$4 sm:$0xff]  }
 0x87a   :  { %7243 = vmatpush1.bf16.msra.mxu0 %v12697_v18  ;;  %v11755_v61 = vadd.f32 %v4589_v15, %v15089_v32  ;;  %v4591_v17 = vpop.f32.mrb[134].mxu0  ;;  %6873 = vmatprep.subr.bf16.mxu1 %v12702_v10  ;;  %v15107_v1 = vpack.c.bf16 %v4799_v48, %v4791_v23  ;;  %v4677_v55 = vmul.f32 0.01, %v11723_v52  ;;  %v11725_v3 = vadd.f32 %v4367_v42, %v15087_v19  ;;  %v12723_v56 = vld [vmem:[#allocation19 + $0x66c] ss:$16 sps:$4 sm:$0xff]  }
 0x87b   :  { %7325 = vmatprep.subr.bf16.mxu0 %v12705_v58  ;;  %v15113_v13 = vadd.f32 %v4591_v17, %v15085_v25  ;;  %v4593_v29 = vpop.f32.mrb[135].mxu0  ;;  %6792 = vmatprep.mubr.bf16.mxu1 %v4917_v27  ;;  %v4684_v22 = vmul.f32 0.01, %v11724_v9  ;;  %v4804_v53 = vmax.f32 %v11722_v51, %v4676_v45  ;;  %v4678_v2 = vmul.f32 0.01, %v15110_v43 }
 0x87c   :  { %7244 = vmatprep.mubr.bf16.mxu0 %v4917_v27  ;;  %v4679_v44 = vmul.f32 0.01, %v11755_v61  ;;  %v11757_v41 = vadd.f32 %v4593_v29, %v15089_v32  ;;  %6793 = vmatmul.mubr.bf16.vlgmr.msra.gmra.mrb[128].mxu1 %v4916_v8  ;;  %v4685_v16 = vmul.f32 0.01, %v11725_v3  ;;  %v4805_v59 = vmax.f32 %v11723_v52, %v4677_v55  ;;  %v12718_v17 = vld [vmem:[#allocation19 + $0x660] ss:$16 sps:$4 sm:$0xff]  }
 0x87d   :  { %7245 = vmatmul.mubr.bf16.vlgmr.msra.gmra.mrb[160].mxu0 %v4916_v8  ;;  %v15118_v37 = vmul.f32 0.01, %v15113_v13  ;;  %6874 = vmatpush1.bf16.msra.mxu1 %v12700_v11  ;;  %v4812_v47 = vmax.f32 %v11724_v9, %v4684_v22  ;;  %v12721_v55 = vld [vmem:[#allocation19 + $0x668] ss:$16 sps:$4 sm:$0xff]  }
 0x87e   :  { %7326 = vmatpush1.bf16.msra.mxu0 %v12703_v4  ;;  %v4687_v39 = vmul.f32 0.01, %v11757_v41  ;;  %6875 = vmatprep.subr.bf16.mxu1 %v12708_v63  ;;  %v4813_v30 = vmax.f32 %v11725_v3, %v4685_v16  ;;  %v4371_v26 = vpop.f32.mrb[104].mxu1  ;;  %v4807_v46 = vmax.f32 %v11755_v61, %v4679_v44  ;;  %v4806_v63 = vmax.f32 %v15110_v43, %v4678_v2  ;;  %v12726_v43 = vld [vmem:[#allocation19 + $0x684] ss:$16 sps:$4 sm:$0xff]  }
 0x87f   :  { %7327 = vmatprep.subr.bf16.mxu0 %v12711_v21  ;;  %v11726_v54 = vadd.f32 %v4371_v26, %v15083_v57  ;;  %v4373_v14 = vpop.f32.mrb[105].mxu1  ;;  %v4924_v28 = vpack.c.bf16 %v4812_v47, %v4804_v53  ;;  %v4814_v10 = vmax.f32 %v15113_v13, %v15118_v37  ;;  %v12729_v44 = vld [vmem:[#allocation19 + $0x68c] ss:$16 sps:$4 sm:$0xff]   ;;  %v12724_v2 = vld [vmem:[#allocation19 + $0x680] ss:$16 sps:$4 sm:$0xff]  }
 0x880   :  { %v4815_v36 = vmax.f32 %v11757_v41, %v4687_v39  ;;  %v4597_v18 = vpop.f32.mrb[136].mxu0  ;;  %v11727_v58 = vadd.f32 %v4373_v14, %v15087_v19  ;;  %v4375_v60 = vpop.f32.mrb[106].mxu1  ;;  %v4925_v49 = vpack.c.bf16 %v4813_v30, %v4805_v59 }
 0x881   :  { %v4599_v38 = vpop.f32.mrb[137].mxu0  ;;  %6876 = vmatpush1.bf16.msra.mxu1 %v12706_v33  ;;  %v4692_v23 = vmul.f32 0.01, %v11726_v54  ;;  %v11728_v48 = vadd.f32 %v4375_v60, %v15083_v57  ;;  %v4377_v24 = vpop.f32.mrb[107].mxu1  ;;  %v15132_v52 = vadd.f32 %v4597_v18, %v15085_v25  ;;  %v15144_v22 = vpack.c.bf16 %v4814_v10, %v4806_v63  ;;  %v12732_v18 = vld [vmem:[#allocation19 + $0x6a4] ss:$16 sps:$4 sm:$0xff]  }
 0x882   :  { %7328 = vmatpush1.bf16.msra.mxu0 %v12709_v5  ;;  %v15126_v8 = vadd.f32 %v4599_v38, %v15089_v32  ;;  %v4601_v51 = vpop.f32.mrb[138].mxu0  ;;  %6877 = vmatprep.subr.bf16.mxu1 %v12714_v12  ;;  %v15129_v11 = vpack.c.bf16 %v4815_v36, %v4807_v46  ;;  %v4693_v15 = vmul.f32 0.01, %v11727_v58  ;;  %v11729_v27 = vadd.f32 %v4377_v24, %v15087_v19  ;;  %v12735_v38 = vld [vmem:[#allocation19 + $0x6ac] ss:$16 sps:$4 sm:$0xff]  }
 0x883   :  { %7329 = vmatprep.subr.bf16.mxu0 %v12717_v34  ;;  %v15135_v20 = vadd.f32 %v4601_v51, %v15085_v25  ;;  %v4603_v4 = vpop.f32.mrb[139].mxu0  ;;  %6802 = vmatprep.mubr.bf16.mxu1 %v4925_v49  ;;  %v4700_v61 = vmul.f32 0.01, %v11728_v48  ;;  %v4820_v13 = vmax.f32 %v11726_v54, %v4692_v23  ;;  %v4694_v41 = vmul.f32 0.01, %v15132_v52 }
 0x884   :  { %7254 = vmatprep.mubr.bf16.mxu0 %v4925_v49  ;;  %v4695_v45 = vmul.f32 0.01, %v15126_v8  ;;  %v11761_v9 = vadd.f32 %v4603_v4, %v15089_v32  ;;  %6803 = vmatmul.mubr.bf16.gmra.mrb[132].mxu1 %v4924_v28  ;;  %v4701_v21 = vmul.f32 0.01, %v11729_v27  ;;  %v4821_v33 = vmax.f32 %v11727_v58, %v4693_v15  ;;  %v12727_v54 = vld [vmem:[#allocation19 + $0x688] ss:$16 sps:$4 sm:$0xff]  }
 0x885   :  { %7255 = vmatmul.mubr.bf16.gmra.mrb[164].mxu0 %v4924_v28  ;;  %v15142_v42 = vmul.f32 0.01, %v15135_v20  ;;  %6878 = vmatpush1.bf16.msra.mxu1 %v12712_v6  ;;  %v4828_v3 = vmax.f32 %v11728_v48, %v4700_v61  ;;  %v4822_v48 = vmax.f32 %v15132_v52, %v4694_v41  ;;  %v12730_v15 = vld [vmem:[#allocation19 + $0x6a0] ss:$16 sps:$4 sm:$0xff]   ;;  %v12733_v4 = vld [vmem:[#allocation19 + $0x6a8] ss:$16 sps:$4 sm:$0xff]  }
 0x886   :  { %7330 = vmatpush1.bf16.msra.mxu0 %v12715_v50  ;;  %v4703_v29 = vmul.f32 0.01, %v11761_v9  ;;  %6879 = vmatprep.subr.bf16.mxu1 %v12720_v31  ;;  %v4829_v37 = vmax.f32 %v11729_v27, %v4701_v21  ;;  %v4381_v16 = vpop.f32.mrb[108].mxu1  ;;  %v4823_v5 = vmax.f32 %v15126_v8, %v4695_v45  ;;  %v12738_v52 = vld [vmem:[#allocation19 + $0x6c4] ss:$16 sps:$4 sm:$0xff]  }
 0x887   :  { %7331 = vmatprep.subr.bf16.mxu0 %v12723_v56  ;;  %v11730_v47 = vadd.f32 %v4381_v16, %v15083_v57  ;;  %v4383_v12 = vpop.f32.mrb[109].mxu1  ;;  %v4932_v34 = vpack.c.bf16 %v4828_v3, %v4820_v13  ;;  %v4830_v59 = vmax.f32 %v15135_v20, %v15142_v42 }
 0x888   :  { %v4831_v53 = vmax.f32 %v11761_v9, %v4703_v29  ;;  %v4607_v39 = vpop.f32.mrb[140].mxu0  ;;  %v11731_v30 = vadd.f32 %v4383_v12, %v15087_v19  ;;  %v4385_v46 = vpop.f32.mrb[110].mxu1  ;;  %v4933_v36 = vpack.c.bf16 %v4829_v37, %v4821_v33  ;;  %v12741_v9 = vld [vmem:[#allocation19 + $0x6cc] ss:$16 sps:$4 sm:$0xff]   ;;  %v12736_v37 = vld [vmem:[#allocation19 + $0x6c0] ss:$16 sps:$4 sm:$0xff]  }
 0x889   :  { %v4609_v26 = vpop.f32.mrb[141].mxu0  ;;  %6880 = vmatpush1.bf16.msra.mxu1 %v12718_v17  ;;  %v4708_v14 = vmul.f32 0.01, %v11730_v47  ;;  %v11732_v6 = vadd.f32 %v4385_v46, %v15083_v57  ;;  %v4387_v58 = vpop.f32.mrb[111].mxu1  ;;  %v15159_v49 = vadd.f32 %v4607_v39, %v15085_v25  ;;  %v15171_v17 = vpack.c.bf16 %v4830_v59, %v4822_v48  ;;  %v12739_v12 = vld [vmem:[#allocation19 + $0x6c8] ss:$16 sps:$4 sm:$0xff]  }
 0x88a   :  { %7332 = vmatpush1.bf16.msra.mxu0 %v12721_v55  ;;  %v15153_v28 = vadd.f32 %v4609_v26, %v15089_v32  ;;  %v4611_v10 = vpop.f32.mrb[142].mxu0  ;;  %6881 = vmatprep.subr.bf16.mxu1 %v12726_v43  ;;  %v15156_v60 = vpack.c.bf16 %v4831_v53, %v4823_v5  ;;  %v4709_v50 = vmul.f32 0.01, %v11731_v30  ;;  %v11733_v23 = vadd.f32 %v4387_v58, %v15087_v19 }
 0x88b   :  { %7333 = vmatprep.subr.bf16.mxu0 %v12729_v44  ;;  %v15162_v31 = vadd.f32 %v4611_v10, %v15085_v25  ;;  %v4613_v8 = vpop.f32.mrb[143].mxu0  ;;  %6812 = vmatprep.mubr.bf16.mxu1 %v4933_v36  ;;  %v4716_v24 = vmul.f32 0.01, %v11732_v6  ;;  %v4836_v63 = vmax.f32 %v11730_v47, %v4708_v14  ;;  %v4710_v42 = vmul.f32 0.01, %v15159_v49 }
 0x88c   :  { %7264 = vmatprep.mubr.bf16.mxu0 %v4933_v36  ;;  %v4711_v51 = vmul.f32 0.01, %v15153_v28  ;;  %v11765_v56 = vadd.f32 %v4613_v8, %v15089_v32  ;;  %6813 = vmatmul.mubr.bf16.gmra.mrb[136].mxu1 %v4932_v34  ;;  %v4717_v27 = vmul.f32 0.01, %v11733_v23  ;;  %v4837_v21 = vmax.f32 %v11731_v30, %v4709_v50  ;;  %v12747_v36 = vld [vmem:[#allocation19 + $0x6ec] ss:$16 sps:$4 sm:$0xff]  }
 0x88d   :  { %7265 = vmatmul.mubr.bf16.gmra.mrb[168].mxu0 %v4932_v34  ;;  %v15169_v20 = vmul.f32 0.01, %v15162_v31  ;;  %6882 = vmatpush1.bf16.msra.mxu1 %v12724_v2  ;;  %v4844_v45 = vmax.f32 %v11732_v6, %v4716_v24  ;;  %v12744_v34 = vld [vmem:[#allocation19 + $0x6e4] ss:$16 sps:$4 sm:$0xff]   ;;  %v4838_v58 = vmax.f32 %v15159_v49, %v4710_v42 }
 0x88e   :  { %7334 = vmatpush1.bf16.msra.mxu0 %v12727_v54  ;;  %v4719_v61 = vmul.f32 0.01, %v11765_v56  ;;  %6883 = vmatprep.subr.bf16.mxu1 %v12732_v18  ;;  %v4845_v55 = vmax.f32 %v11733_v23, %v4717_v27  ;;  %v4391_v13 = vpop.f32.mrb[112].mxu1  ;;  %v4839_v3 = vmax.f32 %v15153_v28, %v4711_v51  ;;  %v12742_v23 = vld [vmem:[#allocation19 + $0x6e0] ss:$16 sps:$4 sm:$0xff]  }
 0x88f   :  { %7335 = vmatprep.subr.bf16.mxu0 %v12735_v38  ;;  %v11734_v43 = vadd.f32 %v4391_v13, %v15083_v57  ;;  %v4393_v41 = vpop.f32.mrb[113].mxu1  ;;  %v4940_v33 = vpack.c.bf16 %v4844_v45, %v4836_v63  ;;  %v4846_v16 = vmax.f32 %v15162_v31, %v15169_v20  ;;  %v12745_v51 = vld [vmem:[#allocation19 + $0x6e8] ss:$16 sps:$4 sm:$0xff]   ;;  %v12750_v49 = vld [vmem:[#allocation19 + $0x704] ss:$16 sps:$4 sm:$0xff]  }
 0x890   :  { %v4847_v29 = vmax.f32 %v11765_v56, %v4719_v61  ;;  %v4617_v44 = vpop.f32.mrb[144].mxu0  ;;  %v11735_v5 = vadd.f32 %v4393_v41, %v15087_v19  ;;  %v4395_v47 = vpop.f32.mrb[114].mxu1  ;;  %v4941_v39 = vpack.c.bf16 %v4845_v55, %v4837_v21  ;;  %v12753_v20 = vld [vmem:[#allocation19 + $0x70c] ss:$16 sps:$4 sm:$0xff]  }
 0x891   :  { %v4619_v53 = vpop.f32.mrb[145].mxu0  ;;  %6884 = vmatpush1.bf16.msra.mxu1 %v12730_v15  ;;  %v4724_v2 = vmul.f32 0.01, %v11734_v43  ;;  %v11736_v30 = vadd.f32 %v4395_v47, %v15083_v57  ;;  %v4397_v46 = vpop.f32.mrb[115].mxu1  ;;  %v15186_v18 = vadd.f32 %v4617_v44, %v15085_v25  ;;  %v15198_v27 = vpack.c.bf16 %v4846_v16, %v4838_v58  ;;  %v12756_v16 = vld [vmem:[#allocation19 + $0x724] ss:$16 sps:$4 sm:$0xff]  }
 0x892   :  { %7336 = vmatpush1.bf16.msra.mxu0 %v12733_v4  ;;  %v15180_v59 = vadd.f32 %v4619_v53, %v15089_v32  ;;  %v4621_v26 = vpop.f32.mrb[146].mxu0  ;;  %6885 = vmatprep.subr.bf16.mxu1 %v12738_v52  ;;  %v15183_v54 = vpack.c.bf16 %v4847_v29, %v4839_v3  ;;  %v4725_v14 = vmul.f32 0.01, %v11735_v5  ;;  %v11737_v6 = vadd.f32 %v4397_v46, %v15087_v19  ;;  %v12748_v3 = vld [vmem:[#allocation19 + $0x700] ss:$16 sps:$4 sm:$0xff]  }
 0x893   :  { %7337 = vmatprep.subr.bf16.mxu0 %v12741_v9  ;;  %v15189_v28 = vadd.f32 %v4621_v26, %v15085_v25  ;;  %v4623_v10 = vpop.f32.mrb[147].mxu0  ;;  %6822 = vmatprep.mubr.bf16.mxu1 %v4941_v39  ;;  %v4732_v50 = vmul.f32 0.01, %v11736_v30  ;;  %v4852_v24 = vmax.f32 %v11734_v43, %v4724_v2  ;;  %v4726_v4 = vmul.f32 0.01, %v15186_v18 }
 0x894   :  { %7274 = vmatprep.mubr.bf16.mxu0 %v4941_v39  ;;  %v4727_v38 = vmul.f32 0.01, %v15180_v59  ;;  %v11769_v31 = vadd.f32 %v4623_v10, %v15089_v32  ;;  %6823 = vmatmul.mubr.bf16.gmra.mrb[140].mxu1 %v4940_v33  ;;  %v4733_v48 = vmul.f32 0.01, %v11737_v6  ;;  %v4853_v63 = vmax.f32 %v11735_v5, %v4725_v14  ;;  %v12754_v58 = vld [vmem:[#allocation19 + $0x720] ss:$16 sps:$4 sm:$0xff]  }
 0x895   :  { %7275 = vmatmul.mubr.bf16.gmra.mrb[172].mxu0 %v4940_v33  ;;  %v15196_v8 = vmul.f32 0.01, %v15189_v28  ;;  %6886 = vmatpush1.bf16.msra.mxu1 %v12736_v37  ;;  %v4860_v56 = vmax.f32 %v11736_v30, %v4732_v50  ;;  %v12751_v37 = vld [vmem:[#allocation19 + $0x708] ss:$16 sps:$4 sm:$0xff]   ;;  %v4854_v14 = vmax.f32 %v15186_v18, %v4726_v4  ;;  %v12762_v18 = vld [vmem:[#allocation19 + $0x744] ss:$16 sps:$4 sm:$0xff]  }
 0x896   :  { %7338 = vmatpush1.bf16.msra.mxu0 %v12739_v12  ;;  %v4735_v15 = vmul.f32 0.01, %v11769_v31  ;;  %6887 = vmatprep.subr.bf16.mxu1 %v12744_v34  ;;  %v4861_v45 = vmax.f32 %v11737_v6, %v4733_v48  ;;  %v4401_v61 = vpop.f32.mrb[116].mxu1  ;;  %v4855_v52 = vmax.f32 %v15180_v59, %v4727_v38  ;;  %v12759_v34 = vld [vmem:[#allocation19 + $0x72c] ss:$16 sps:$4 sm:$0xff]  }
 0x897   :  { %7339 = vmatprep.subr.bf16.mxu0 %v12747_v36  ;;  %v11738_v42 = vadd.f32 %v4401_v61, %v15083_v57  ;;  %v4403_v55 = vpop.f32.mrb[117].mxu1  ;;  %v4948_v13 = vpack.c.bf16 %v4860_v56, %v4852_v24  ;;  %v4862_v29 = vmax.f32 %v15189_v28, %v15196_v8 }
 0x898   :  { %v4863_v9 = vmax.f32 %v11769_v31, %v4735_v15  ;;  %v4627_v21 = vpop.f32.mrb[148].mxu0  ;;  %v11739_v43 = vadd.f32 %v4403_v55, %v15087_v19  ;;  %v4405_v41 = vpop.f32.mrb[118].mxu1  ;;  %v4949_v33 = vpack.c.bf16 %v4861_v45, %v4853_v63  ;;  %v12757_v31 = vld [vmem:[#allocation19 + $0x728] ss:$16 sps:$4 sm:$0xff]  }
 0x899   :  { %v4629_v44 = vpop.f32.mrb[149].mxu0  ;;  %6888 = vmatpush1.bf16.msra.mxu1 %v12742_v23  ;;  %v4740_v5 = vmul.f32 0.01, %v11738_v42  ;;  %v11740_v47 = vadd.f32 %v4405_v41, %v15083_v57  ;;  %v4407_v12 = vpop.f32.mrb[119].mxu1  ;;  %v15213_v59 = vadd.f32 %v4627_v21, %v15085_v25  ;;  %v15225_v24 = vpack.c.bf16 %v4862_v29, %v4854_v14 }
 0x89a   :  { %7340 = vmatpush1.bf16.msra.mxu0 %v12745_v51  ;;  %v15207_v53 = vadd.f32 %v4629_v44, %v15089_v32  ;;  %v4631_v39 = vpop.f32.mrb[150].mxu0  ;;  %6889 = vmatprep.subr.bf16.mxu1 %v12750_v49  ;;  %v15210_v2 = vpack.c.bf16 %v4863_v9, %v4855_v52  ;;  %v4741_v30 = vmul.f32 0.01, %v11739_v43  ;;  %v11741_v46 = vadd.f32 %v4407_v12, %v15087_v19  ;;  %v12765_v51 = vld [vmem:[#allocation19 + $0x74c] ss:$16 sps:$4 sm:$0xff]  }
 0x89b   :  { %7341 = vmatprep.subr.bf16.mxu0 %v12753_v20  ;;  %v15216_v26 = vadd.f32 %v4631_v39, %v15085_v25  ;;  %v4633_v36 = vpop.f32.mrb[151].mxu0  ;;  %6832 = vmatprep.mubr.bf16.mxu1 %v4949_v33  ;;  %v4748_v6 = vmul.f32 0.01, %v11740_v47  ;;  %v4868_v23 = vmax.f32 %v11738_v42, %v4740_v5  ;;  %v4742_v56 = vmul.f32 0.01, %v15213_v59 }
 0x89c   :  { %7284 = vmatprep.mubr.bf16.mxu0 %v4949_v33  ;;  %v4743_v28 = vmul.f32 0.01, %v15207_v53  ;;  %v11773_v10 = vadd.f32 %v4633_v36, %v15089_v32  ;;  %6833 = vmatmul.mubr.bf16.gmra.mrb[144].mxu1 %v4948_v13  ;;  %v4749_v50 = vmul.f32 0.01, %v11741_v46  ;;  %v4869_v15 = vmax.f32 %v11739_v43, %v4741_v30  ;;  %v12760_v42 = vld [vmem:[#allocation19 + $0x740] ss:$16 sps:$4 sm:$0xff]  }
 0x89d   :  { %7285 = vmatmul.mubr.bf16.gmra.mrb[176].mxu0 %v4948_v13  ;;  %v15223_v38 = vmul.f32 0.01, %v15216_v26  ;;  %6890 = vmatpush1.bf16.msra.mxu1 %v12748_v3  ;;  %v4876_v8 = vmax.f32 %v11740_v47, %v4748_v6  ;;  %v12763_v43 = vld [vmem:[#allocation19 + $0x748] ss:$16 sps:$4 sm:$0xff]   ;;  %v12768_v44 = vld [vmem:[#allocation19 + $0x764] ss:$16 sps:$4 sm:$0xff]  }
 0x89e   :  { %7342 = vmatpush1.bf16.msra.mxu0 %v12751_v37  ;;  %v4751_v48 = vmul.f32 0.01, %v11773_v10  ;;  %6891 = vmatprep.subr.bf16.mxu1 %v12756_v16  ;;  %v4877_v49 = vmax.f32 %v11741_v46, %v4749_v50  ;;  %v4411_v20 = vpop.f32.mrb[120].mxu1  ;;  %v4871_v4 = vmax.f32 %v15207_v53, %v4743_v28  ;;  %v12771_v53 = vld [vmem:[#allocation19 + $0x76c] ss:$16 sps:$4 sm:$0xff]   ;;  %v4870_v46 = vmax.f32 %v15213_v59, %v4742_v56 }
 0x89f   :  { %7343 = vmatprep.subr.bf16.mxu0 %v12759_v34  ;;  %v11742_v45 = vadd.f32 %v4411_v20, %v15083_v57  ;;  %v4413_v52 = vpop.f32.mrb[121].mxu1  ;;  %v4956_v9 = vpack.c.bf16 %v4876_v8, %v4868_v23  ;;  %v4878_v21 = vmax.f32 %v15216_v26, %v15223_v38  ;;  %v12766_v6 = vld [vmem:[#allocation19 + $0x760] ss:$16 sps:$4 sm:$0xff]   ;;  %v12769_v38 = vld [vmem:[#allocation19 + $0x768] ss:$16 sps:$4 sm:$0xff]  }
 0x8a0   :  { %v4879_v63 = vmax.f32 %v11773_v10, %v4751_v48  ;;  %v4637_v61 = vpop.f32.mrb[152].mxu0  ;;  %v15233_v55 = vadd.f32 %v4413_v52, %v15087_v19  ;;  %v4415_v3 = vpop.f32.mrb[122].mxu1  ;;  %v4957_v29 = vpack.c.bf16 %v4877_v49, %v4869_v15  ;;  %v12774_v59 = vld [vmem:[#allocation19 + $0x784] ss:$16 sps:$4 sm:$0xff]   ;;  %v12777_v8 = vld [vmem:[#allocation19 + $0x78c] ss:$16 sps:$4 sm:$0xff]  }
 0x8a1   :  { %v4639_v13 = vpop.f32.mrb[153].mxu0  ;;  %6892 = vmatpush1.bf16.msra.mxu1 %v12754_v58  ;;  %v4756_v41 = vmul.f32 0.01, %v11742_v45  ;;  %v11744_v37 = vadd.f32 %v4415_v3, %v15083_v57  ;;  %v4417_v5 = vpop.f32.mrb[123].mxu1  ;;  %v15242_v39 = vadd.f32 %v4637_v61, %v15085_v25  ;;  %v15255_v48 = vpack.c.bf16 %v4878_v21, %v4870_v46 }
 0x8a2   :  { %7344 = vmatpush1.bf16.msra.mxu0 %v12757_v31  ;;  %v15236_v33 = vadd.f32 %v4639_v13, %v15089_v32  ;;  %v4641_v16 = vpop.f32.mrb[154].mxu0  ;;  %6893 = vmatprep.subr.bf16.mxu1 %v12762_v18  ;;  %v15239_v47 = vpack.c.bf16 %v4879_v63, %v4871_v4  ;;  %v4757_v12 = vmul.f32 0.01, %v15233_v55  ;;  %v11745_v30 = vadd.f32 %v4417_v5, %v15087_v19  ;;  %v12783_v5 = vld [vmem:[#allocation19 + $0x7ac] ss:$16 sps:$4 sm:$0xff]  }
 0x8a3   :  { %7345 = vmatprep.subr.bf16.mxu0 %v12765_v51  ;;  %v15246_v34 = vadd.f32 %v4641_v16, %v15085_v25  ;;  %v4643_v26 = vpop.f32.mrb[155].mxu0  ;;  %6842 = vmatprep.mubr.bf16.mxu1 %v4957_v29  ;;  %v4764_v14 = vmul.f32 0.01, %v11744_v37  ;;  %v4884_v50 = vmax.f32 %v11742_v45, %v4756_v41  ;;  %v4758_v18 = vmul.f32 0.01, %v15242_v39 }
 0x8a4   :  { %7294 = vmatprep.mubr.bf16.mxu0 %v4957_v29  ;;  %v4759_v36 = vmul.f32 0.01, %v15236_v33  ;;  %v11777_v28 = vadd.f32 %v4643_v26, %v15089_v32  ;;  %6843 = vmatmul.mubr.bf16.gmra.mrb[148].mxu1 %v4956_v9  ;;  %v4765_v58 = vmul.f32 0.01, %v11745_v30  ;;  %v4885_v51 = vmax.f32 %v15233_v55, %v4757_v12  ;;  %v12775_v29 = vld [vmem:[#allocation19 + $0x788] ss:$16 sps:$4 sm:$0xff]  }
 0x8a5   :  { %7295 = vmatmul.mubr.bf16.gmra.mrb[180].mxu0 %v4956_v9  ;;  %v15253_v10 = vmul.f32 0.01, %v15246_v34  ;;  %6894 = vmatpush1.bf16.msra.mxu1 %v12760_v42  ;;  %v4892_v31 = vmax.f32 %v11744_v37, %v4764_v14  ;;  %v12772_v9 = vld [vmem:[#allocation19 + $0x780] ss:$16 sps:$4 sm:$0xff]  }
 0x8a6   :  { %7346 = vmatpush1.bf16.msra.mxu0 %v12763_v43  ;;  %v4767_v23 = vmul.f32 0.01, %v11777_v28  ;;  %6895 = vmatprep.subr.bf16.mxu1 %v12768_v44  ;;  %v4887_v56 = vmax.f32 %v15236_v33, %v4759_v36  ;;  %v4893_v15 = vmax.f32 %v11745_v30, %v4765_v58  ;;  %v4421_v49 = vpop.f32.mrb[124].mxu1  ;;  %v12780_v43 = vld [vmem:[#allocation19 + $0x7a4] ss:$16 sps:$4 sm:$0xff]   ;;  %v4886_v36 = vmax.f32 %v15242_v39, %v4758_v18 }
 0x8a7   :  { %7347 = vmatprep.subr.bf16.mxu0 %v12771_v53  ;;  %v4894_v20 = vmax.f32 %v15246_v34, %v15253_v10  ;;  %v11746_v63 = vadd.f32 %v4421_v49, %v15083_v57  ;;  %v4423_v61 = vpop.f32.mrb[125].mxu1  ;;  %v4964_v52 = vpack.c.bf16 %v4892_v31, %v4884_v50  ;;  %v12786_v31 = vld [vmem:[#allocation19 + $0x7c4] ss:$16 sps:$4 sm:$0xff]  }
 0x8a8   :  { %v4895_v4 = vmax.f32 %v11777_v28, %v4767_v23  ;;  %v4647_v45 = vpop.f32.mrb[156].mxu0  ;;  %v11747_v21 = vadd.f32 %v4423_v61, %v15087_v19  ;;  %v4425_v55 = vpop.f32.mrb[126].mxu1  ;;  %v4965_v3 = vpack.c.bf16 %v4893_v15, %v4885_v51  ;;  %v12789_v23 = vld [vmem:[#allocation19 + $0x7cc] ss:$16 sps:$4 sm:$0xff]  }
 0x8a9   :  { %v11778_v42 = vadd.f32 %v4647_v45, %v15085_v25  ;;  %v4649_v13 = vpop.f32.mrb[157].mxu0  ;;  %6896 = vmatpush1.bf16.msra.mxu1 %v12766_v6  ;;  %v4772_v44 = vmul.f32 0.01, %v11746_v63  ;;  %v11748_v33 = vadd.f32 %v4425_v55, %v15083_v57  ;;  %v4427_v16 = vpop.f32.mrb[127].mxu1  ;;  %v12778_v6 = vld [vmem:[#allocation19 + $0x7a0] ss:$16 sps:$4 sm:$0xff]   ;;  %v15273_v39 = vpack.c.bf16 %v4894_v20, %v4886_v36 }
 0x8aa   :  { %7348 = vmatpush1.bf16.msra.mxu0 %v12769_v38  ;;  %v11779_v41 = vadd.f32 %v4649_v13, %v15089_v32  ;;  %v4651_v37 = vpop.f32.mrb[158].mxu0  ;;  %6897 = vmatprep.subr.bf16.mxu1 %v12774_v59  ;;  %v15267_v53 = vpack.c.bf16 %v4895_v4, %v4887_v56  ;;  %v4773_v34 = vmul.f32 0.01, %v11747_v21  ;;  %v11749_v26 = vadd.f32 %v4427_v16, %v15087_v19  ;;  %v12781_v38 = vld [vmem:[#allocation19 + $0x7a8] ss:$16 sps:$4 sm:$0xff]  }
 0x8ab   :  { %7349 = vmatprep.subr.bf16.mxu0 %v12777_v8  ;;  %v4774_v12 = vmul.f32 0.01, %v11778_v42  ;;  %v11780_v30 = vadd.f32 %v4651_v37, %v15085_v25  ;;  %v4653_v46 = vpop.f32.mrb[159].mxu0  ;;  %6852 = vmatprep.mubr.bf16.mxu1 %v4965_v3  ;;  %v4780_v57 = vmul.f32 0.01, %v11748_v33  ;;  %v4900_v25 = vmax.f32 %v11746_v63, %v4772_v44 }
 0x8ac   :  { %7304 = vmatprep.mubr.bf16.mxu0 %v4965_v3  ;;  %v4775_v14 = vmul.f32 0.01, %v11779_v41  ;;  %v11781_v28 = vadd.f32 %v4653_v46, %v15089_v32  ;;  %6853 = vmatmul.mubr.bf16.gmra.mrb[152].mxu1 %v4964_v52  ;;  %v4781_v58 = vmul.f32 0.01, %v11749_v26  ;;  %v4901_v8 = vmax.f32 %v11747_v21, %v4773_v34  ;;  %v12784_v4 = vld [vmem:[#allocation19 + $0x7c0] ss:$16 sps:$4 sm:$0xff]  }
 0x8ad   :  { %7305 = vmatmul.mubr.bf16.gmra.mrb[184].mxu0 %v4964_v52  ;;  %v4782_v10 = vmul.f32 0.01, %v11780_v30  ;;  %6898 = vmatpush1.bf16.msra.mxu1 %v12772_v9  ;;  %v4908_v50 = vmax.f32 %v11748_v33, %v4780_v57  ;;  %v4902_v59 = vmax.f32 %v11778_v42, %v4774_v12  ;;  %v12787_v45 = vld [vmem:[#allocation19 + $0x7c8] ss:$16 sps:$4 sm:$0xff]   ;;  %v12792_v20 = vld [vmem:[#allocation19 + $0x7e4] ss:$16 sps:$4 sm:$0xff]  }
 0x8ae   :  { %7350 = vmatpush1.bf16.msra.mxu0 %v12775_v29  ;;  %v4783_v19 = vmul.f32 0.01, %v11781_v28  ;;  %6899 = vmatprep.subr.bf16.mxu1 %v12780_v43  ;;  %v4909_v18 = vmax.f32 %v11749_v26, %v4781_v58  ;;  %v4903_v51 = vmax.f32 %v11779_v41, %v4775_v14  ;;  %v12795_v52 = vld [vmem:[#allocation19 + $0x7ec] ss:$16 sps:$4 sm:$0xff]   ;;  %v12790_v9 = vld [vmem:[#allocation19 + $0x7e0] ss:$16 sps:$4 sm:$0xff]  }
 0x8af   :  { %7351 = vmatprep.subr.bf16.mxu0 %v12783_v5  ;;  %v4910_v32 = vmax.f32 %v11780_v30, %v4782_v10  ;;  %v4972_v15 = vpack.c.bf16 %v4908_v50, %v4900_v25  ;;  %v12793_v42 = vld [vmem:[#allocation19 + $0x7e8] ss:$16 sps:$4 sm:$0xff]   ;;  %v12796_v13 = vld [vmem:[#allocation22] ss:$8 sps:$4 sm:$0xff]   ;;  %v12799_v3 = vld [vmem:[#allocation22 + $0x10] ss:$8 sps:$4 sm:$0xff]  }
 0x8b0   :  { %v4911_v56 = vmax.f32 %v11781_v28, %v4783_v19  ;;  %v4973_v49 = vpack.c.bf16 %v4909_v18, %v4901_v8  ;;  %v12798_v21 = vld [vmem:[#allocation22 + $0x4] ss:$8 sps:$4 sm:$0xff]   ;;  %v12801_v55 = vld [vmem:[#allocation22 + $0x14] ss:$8 sps:$4 sm:$0xff]   ;;  %v12802_v29 = vld [vmem:[#allocation22 + $0x20] ss:$8 sps:$4 sm:$0xff]  }
 0x8b1   :  { %6900 = vmatpush1.bf16.msra.mxu1 %v12778_v6  ;;  %v15275_v63 = vpack.c.bf16 %v4910_v32, %v4902_v59  ;;  %v12807_v43 = vld [vmem:[#allocation22 + $0x34] ss:$8 sps:$4 sm:$0xff]   ;;  %v12808_v44 = vld [vmem:[#allocation22 + $0x40] ss:$8 sps:$4 sm:$0xff]   ;;  %v12840_v26 = vld [vmem:[#allocation22 + $0xe4] ss:$8 sps:$4 sm:$0xff]  }
 0x8b2   :  { %7352 = vmatpush1.bf16.msra.mxu0 %v12781_v38  ;;  %6901 = vmatprep.subr.bf16.mxu1 %v12786_v31  ;;  %v15277_v61 = vpack.c.bf16 %v4911_v56, %v4903_v51  ;;  %v12813_v41 = vld [vmem:[#allocation22 + $0x54] ss:$8 sps:$4 sm:$0xff]   ;;  %v12814_v33 = vld [vmem:[#allocation22 + $0x60] ss:$8 sps:$4 sm:$0xff]   ;;  %v12841_v14 = vld [vmem:[#allocation22 + $0xf0] ss:$8 sps:$4 sm:$0xff]  }
 0x8b3   :  { %7353 = vmatprep.subr.bf16.mxu0 %v12789_v23  ;;  %6862 = vmatprep.mubr.bf16.mxu1 %v4973_v49  ;;  %v12819_v37 = vld [vmem:[#allocation22 + $0x74] ss:$8 sps:$4 sm:$0xff]   ;;  %v12820_v16 = vld [vmem:[#allocation22 + $0x80] ss:$8 sps:$4 sm:$0xff]   ;;  %v12846_v57 = vld [vmem:[#allocation22 + $0x104] ss:$8 sps:$4 sm:$0xff]  }
 0x8b4   :  { %7314 = vmatprep.mubr.bf16.mxu0 %v4973_v49  ;;  %6863 = vmatmul.mubr.bf16.gmra.mrb[156].mxu1 %v4972_v15  ;;  %v12825_v5 = vld [vmem:[#allocation22 + $0x94] ss:$8 sps:$4 sm:$0xff]   ;;  %v12826_v12 = vld [vmem:[#allocation22 + $0xa0] ss:$8 sps:$4 sm:$0xff]  }
 0x8b5   :  { %7315 = vmatmul.mubr.bf16.gmra.mrb[188].mxu0 %v4972_v15  ;;  %6902 = vmatpush1.bf16.msra.mxu1 %v12784_v4  ;;  %v12831_v34 = vld [vmem:[#allocation22 + $0xb4] ss:$8 sps:$4 sm:$0xff]   ;;  %v12832_v30 = vld [vmem:[#allocation22 + $0xc0] ss:$8 sps:$4 sm:$0xff]  }
 0x8b6   :  { %6905 = vmatprep.mubr.bf16.mxu1 %v15107_v1  ;;  %7354 = vmatpush1.bf16.msra.mxu0 %v12787_v45  ;;  %v12838_v46 = vld [vmem:[#allocation22 + $0xe0] ss:$8 sps:$4 sm:$0xff]   ;;  %v12843_v36 = vld [vmem:[#allocation22 + $0xf4] ss:$8 sps:$4 sm:$0xff]  }
 0x8b7   :  { %7357 = vmatprep.mubr.bf16.mxu0 %v15107_v1  ;;  %6903 = vmatprep.subr.bf16.mxu1 %v12792_v20  ;;  %v12804_v1 = vld [vmem:[#allocation22 + $0x24] ss:$8 sps:$4 sm:$0xff]   ;;  %v5232_v28 = vld [vmem:[#allocation20] sm:$0xf] }
 0x8b8   :  { %7355 = vmatprep.subr.bf16.mxu0 %v12795_v52  ;;  %v15312_v6 = vrot.slane %v5232_v28, %v17090_v35  ;;  %v15315_v10 = vrot.slane %v5232_v28, %v17091_v7  ;;  %v15318_v58 = vrot.slane %v5232_v28, %v17092_v62  ;;  %v15321_v38 = vrot.slane %v5232_v28, %v17093_v0  ;;  %v12892_v52 = vld [vmem:[#allocation25 + $0x40] sm:$0xff]  }
 0x8b9   :  { %6904 = vmatpush1.bf16.msra.mxu1 %v12790_v9  ;;  %v12893_v9 = vld [vmem:[#allocation25] sm:$0xff]  }
 0x8ba   :  { %7356 = vmatpush1.bf16.msra.mxu0 %v12793_v42  ;;  %7994 = vmatprep.subr.bf16.mxu1 %v12798_v21 }
 0x8bb   :  { %11433 = vmatprep.subr.bf16.mxu0 %v12892_v52 }
 0x8bc   :  { %6906 = vmatmul.mubr.bf16.vlgmr.msra.gmra.mrb[128].mxu1 %v15102_v40 }
 0x8bd   :  { %7358 = vmatmul.mubr.bf16.vlgmr.msra.gmra.mrb[160].mxu0 %v15102_v40  ;;  %6915 = vmatprep.mubr.bf16.mxu1 %v15129_v11  ;;  %v12805_v40 = vld [vmem:[#allocation22 + $0x30] ss:$8 sps:$4 sm:$0xff]  }
 0x8be   :  { %7367 = vmatprep.mubr.bf16.mxu0 %v15129_v11  ;;  %7995 = vmatpush1.bf16.msra.mxu1 %v12796_v13  ;;  %v12810_v11 = vld [vmem:[#allocation22 + $0x44] ss:$8 sps:$4 sm:$0xff]  }
 0x8bf   :  { %7996 = vmatprep.subr.bf16.mxu1 %v12801_v55  ;;  %v12894_v13 = vld [vmem:[#allocation25 + $0x48] sm:$0xff]   ;;  %11434 = vmatpush3.bf16.msra.mxu0 %v12893_v9 }
 0x8c0   :  { %11435 = vmatprep.subr.bf16.mxu0 %v12894_v13 }
 0x8c2   :  { %7997 = vmatpush1.bf16.msra.mxu1 %v12799_v3 }
 0x8c3   :  { %7998 = vmatprep.subr.bf16.mxu1 %v12804_v1 }
 0x8c4   :  { %6916 = vmatmul.mubr.bf16.gmra.mrb[132].mxu1 %v15144_v22 }
 0x8c5   :  { %7368 = vmatmul.mubr.bf16.gmra.mrb[164].mxu0 %v15144_v22  ;;  %6925 = vmatprep.mubr.bf16.mxu1 %v15156_v60  ;;  %v12811_v22 = vld [vmem:[#allocation22 + $0x50] ss:$8 sps:$4 sm:$0xff]  }
 0x8c6   :  { %7377 = vmatprep.mubr.bf16.mxu0 %v15156_v60  ;;  %7999 = vmatpush1.bf16.msra.mxu1 %v12802_v29  ;;  %v12816_v60 = vld [vmem:[#allocation22 + $0x64] ss:$8 sps:$4 sm:$0xff]  }
 0x8c7   :  { %8000 = vmatprep.subr.bf16.mxu1 %v12807_v43 }
 0x8ca   :  { %8001 = vmatpush1.bf16.msra.mxu1 %v12805_v40 }
 0x8cb   :  { %8002 = vmatprep.subr.bf16.mxu1 %v12810_v11 }
 0x8cc   :  { %6926 = vmatmul.mubr.bf16.gmra.mrb[136].mxu1 %v15171_v17 }
 0x8cd   :  { %7378 = vmatmul.mubr.bf16.gmra.mrb[168].mxu0 %v15171_v17  ;;  %6935 = vmatprep.mubr.bf16.mxu1 %v15183_v54  ;;  %v12817_v17 = vld [vmem:[#allocation22 + $0x70] ss:$8 sps:$4 sm:$0xff]  }
 0x8ce   :  { %7387 = vmatprep.mubr.bf16.mxu0 %v15183_v54  ;;  %8003 = vmatpush1.bf16.msra.mxu1 %v12808_v44  ;;  %v12822_v54 = vld [vmem:[#allocation22 + $0x84] ss:$8 sps:$4 sm:$0xff]  }
 0x8cf   :  { %8004 = vmatprep.subr.bf16.mxu1 %v12813_v41  ;;  %v12895_v41 = vld [vmem:[#allocation25 + $0x8] sm:$0xff]  }
 0x8d0   :  { %11436 = vmatpush3.bf16.msra.mxu0 %v12895_v41 }
 0x8d2   :  { %8005 = vmatpush1.bf16.msra.mxu1 %v12811_v22 }
 0x8d3   :  { %8006 = vmatprep.subr.bf16.mxu1 %v12816_v60 }
 0x8d4   :  { %6936 = vmatmul.mubr.bf16.gmra.mrb[140].mxu1 %v15198_v27 }
 0x8d5   :  { %7388 = vmatmul.mubr.bf16.gmra.mrb[172].mxu0 %v15198_v27  ;;  %6945 = vmatprep.mubr.bf16.mxu1 %v15210_v2  ;;  %v12823_v27 = vld [vmem:[#allocation22 + $0x90] ss:$8 sps:$4 sm:$0xff]  }
 0x8d6   :  { %7397 = vmatprep.mubr.bf16.mxu0 %v15210_v2  ;;  %8007 = vmatpush1.bf16.msra.mxu1 %v12814_v33  ;;  %v12828_v2 = vld [vmem:[#allocation22 + $0xa4] ss:$8 sps:$4 sm:$0xff]  }
 0x8d7   :  { %8008 = vmatprep.subr.bf16.mxu1 %v12819_v37 }
 0x8da   :  { %8009 = vmatpush1.bf16.msra.mxu1 %v12817_v17 }
 0x8db   :  { %8010 = vmatprep.subr.bf16.mxu1 %v12822_v54 }
 0x8dc   :  { %6946 = vmatmul.mubr.bf16.gmra.mrb[144].mxu1 %v15225_v24 }
 0x8dd   :  { %7398 = vmatmul.mubr.bf16.gmra.mrb[176].mxu0 %v15225_v24  ;;  %6955 = vmatprep.mubr.bf16.mxu1 %v15239_v47  ;;  %v12829_v24 = vld [vmem:[#allocation22 + $0xb0] ss:$8 sps:$4 sm:$0xff]  }
 0x8de   :  { %7407 = vmatprep.mubr.bf16.mxu0 %v15239_v47  ;;  %8011 = vmatpush1.bf16.msra.mxu1 %v12820_v16  ;;  %v12834_v47 = vld [vmem:[#allocation22 + $0xc4] ss:$8 sps:$4 sm:$0xff]   ;;  %v12896_v16 = vld [vmem:[#allocation25 + $0x50] sm:$0xff]  }
 0x8df   :  { %8012 = vmatprep.subr.bf16.mxu1 %v12825_v5  ;;  %11437 = vmatprep.subr.bf16.mxu0 %v12896_v16 }
 0x8e2   :  { %8013 = vmatpush1.bf16.msra.mxu1 %v12823_v27 }
 0x8e3   :  { %8014 = vmatprep.subr.bf16.mxu1 %v12828_v2 }
 0x8e4   :  { %6956 = vmatmul.mubr.bf16.gmra.mrb[148].mxu1 %v15255_v48 }
 0x8e5   :  { %7408 = vmatmul.mubr.bf16.gmra.mrb[180].mxu0 %v15255_v48  ;;  %6965 = vmatprep.mubr.bf16.mxu1 %v15267_v53  ;;  %v12837_v48 = vld [vmem:[#allocation22 + $0xd4] ss:$8 sps:$4 sm:$0xff]  }
 0x8e6   :  { %7417 = vmatprep.mubr.bf16.mxu0 %v15267_v53  ;;  %8015 = vmatpush1.bf16.msra.mxu1 %v12826_v12  ;;  %v12835_v53 = vld [vmem:[#allocation22 + $0xd0] ss:$8 sps:$4 sm:$0xff]  }
 0x8e7   :  { %8016 = vmatprep.subr.bf16.mxu1 %v12831_v34 }
 0x8ea   :  { %8017 = vmatpush1.bf16.msra.mxu1 %v12829_v24 }
 0x8eb   :  { %8018 = vmatprep.subr.bf16.mxu1 %v12834_v47  ;;  %v12844_v47 = vld [vmem:[#allocation22 + $0x100] ss:$8 sps:$4 sm:$0xff]  }
 0x8ec   :  { %6966 = vmatmul.mubr.bf16.gmra.mrb[152].mxu1 %v15273_v39 }
 0x8ed   :  { %7418 = vmatmul.mubr.bf16.gmra.mrb[184].mxu0 %v15273_v39  ;;  %6975 = vmatprep.mubr.bf16.mxu1 %v15277_v61 }
 0x8ee   :  { %7427 = vmatprep.mubr.bf16.mxu0 %v15277_v61  ;;  %8019 = vmatpush1.bf16.msra.mxu1 %v12832_v30 }
 0x8ef   :  { %8020 = vmatprep.subr.bf16.mxu1 %v12837_v48 }
 0x8f2   :  { %8021 = vmatpush1.bf16.msra.mxu1 %v12835_v53 }
 0x8f3   :  { %8022 = vmatprep.subr.bf16.mxu1 %v12840_v26 }
 0x8f4   :  { %6976 = vmatmul.mubr.bf16.gmra.mrb[156].mxu1 %v15275_v63 }
 0x8f5   :  { %7428 = vmatmul.mubr.bf16.gmra.mrb[188].mxu0 %v15275_v63 }
 0x8f6   :  { %8023 = vmatpush1.bf16.msra.mxu1 %v12838_v46 }
 0x8f7   :  { %8024 = vmatprep.subr.bf16.mxu1 %v12843_v36  ;;  %v12849_v36 = vld [vmem:[#allocation22 + $0x114] ss:$8 sps:$4 sm:$0xff]  }
 0x8fa   :  { %8025 = vmatpush1.bf16.msra.mxu1 %v12841_v14 }
 0x8fb   :  { %8107 = vmatprep.subr.bf16.mxu1 %v12846_v57 }
 0x98f   :  { %v6907_v25 = vpop.f32.mrb[128].mxu1 }
 0x990   :  { %v11782_v50 = vadd.f32 %v6907_v25, %v15312_v6  ;;  %v7359_v19 = vpop.f32.mrb[160].mxu0  ;;  %v6909_v31 = vpop.f32.mrb[129].mxu1 }
 0x991   :  { %v11814_v23 = vadd.f32 %v7359_v19, %v15315_v10  ;;  %v11783_v39 = vadd.f32 %v6909_v31, %v15318_v58  ;;  %v7361_v59 = vpop.f32.mrb[161].mxu0  ;;  %v6911_v8 = vpop.f32.mrb[130].mxu1  ;;  %v12897_v31 = vld [vmem:[#allocation25 + $0x10] sm:$0xff]  }
 0x992   :  { %v7438_v32 = vmul.f32 0.01, %v11782_v50  ;;  %v11815_v7 = vadd.f32 %v7361_v59, %v15321_v38  ;;  %v11784_v18 = vadd.f32 %v6911_v8, %v15312_v6  ;;  %v7363_v51 = vpop.f32.mrb[162].mxu0  ;;  %v6913_v56 = vpop.f32.mrb[131].mxu1  ;;  %v12898_v8 = vld [vmem:[#allocation25 + $0x58] sm:$0xff]   ;;  %11438 = vmatpush3.bf16.msra.mxu0 %v12897_v31 }
 0x993   :  { %v7440_v0 = vmul.f32 0.01, %v11814_v23  ;;  %v7439_v15 = vmul.f32 0.01, %v11783_v39  ;;  %v11816_v49 = vadd.f32 %v7363_v51, %v15315_v10  ;;  %v11785_v4 = vadd.f32 %v6913_v56, %v15318_v58  ;;  %v7365_v63 = vpop.f32.mrb[163].mxu0  ;;  %11439 = vmatprep.subr.bf16.mxu0 %v12898_v8 }
 0x994   :  { %v7441_v45 = vmul.f32 0.01, %v11815_v7  ;;  %v7442_v61 = vmul.f32 0.01, %v11784_v18  ;;  %v11817_v20 = vadd.f32 %v7365_v63, %v15321_v38  ;;  %v7502_v55 = vmax.f32 %v11782_v50, %v7438_v32 }
 0x995   :  { %v7444_v42 = vmul.f32 0.01, %v11816_v49  ;;  %v7443_v21 = vmul.f32 0.01, %v11785_v4  ;;  %v7504_v29 = vmax.f32 %v11814_v23, %v7440_v0  ;;  %v7503_v43 = vmax.f32 %v11783_v39, %v7439_v15  ;;  %v12852_v15 = vld [vmem:[#allocation22 + $0x124] ss:$8 sps:$4 sm:$0xff]  }
 0x996   :  { %v7506_v3 = vmax.f32 %v11784_v18, %v7442_v61  ;;  %v7445_v1 = vmul.f32 0.01, %v11817_v20  ;;  %v7505_v22 = vmax.f32 %v11815_v7, %v7441_v45  ;;  %v12847_v18 = vld [vmem:[#allocation22 + $0x110] ss:$8 sps:$4 sm:$0xff]  }
 0x997   :  { %v7508_v40 = vmax.f32 %v11816_v49, %v7444_v42  ;;  %v7507_v11 = vmax.f32 %v11785_v4, %v7443_v21  ;;  %v6917_v44 = vpop.f32.mrb[132].mxu1 }
 0x998   :  { %v7566_v60 = vpack.c.bf16 %v7506_v3, %v7502_v55  ;;  %v7509_v33 = vmax.f32 %v11817_v20, %v7445_v1  ;;  %v11786_v37 = vadd.f32 %v6917_v44, %v15312_v6  ;;  %v7369_v17 = vpop.f32.mrb[164].mxu0  ;;  %v6919_v54 = vpop.f32.mrb[133].mxu1  ;;  %v12899_v20 = vld [vmem:[#allocation25 + $0x18] sm:$0xff]   ;;  %v12900_v3 = vld [vmem:[#allocation25 + $0x60] sm:$0xff]  }
 0x999   :  { %v15332_v5 = vpack.c.bf16 %v7508_v40, %v7504_v29  ;;  %v11818_v27 = vadd.f32 %v7369_v17, %v15315_v10  ;;  %v11787_v2 = vadd.f32 %v6919_v54, %v15318_v58  ;;  %v7371_v12 = vpop.f32.mrb[165].mxu0  ;;  %v6921_v34 = vpop.f32.mrb[134].mxu1  ;;  %v7567_v24 = vpack.c.bf16 %v7507_v11, %v7503_v43  ;;  %v12850_v44 = vld [vmem:[#allocation22 + $0x120] ss:$8 sps:$4 sm:$0xff]   ;;  %v12855_v54 = vld [vmem:[#allocation22 + $0x134] ss:$8 sps:$4 sm:$0xff]   ;;  %11440 = vmatpush3.bf16.msra.mxu0 %v12899_v20 }
 0x99a   :  { %v7446_v30 = vmul.f32 0.01, %v11786_v37  ;;  %v11819_v48 = vadd.f32 %v7371_v12, %v15321_v38  ;;  %v11788_v53 = vadd.f32 %v6921_v34, %v15312_v6  ;;  %v7373_v26 = vpop.f32.mrb[166].mxu0  ;;  %v6923_v46 = vpop.f32.mrb[135].mxu1  ;;  %v15338_v14 = vpack.c.bf16 %v7509_v33, %v7505_v22  ;;  %11441 = vmatprep.subr.bf16.mxu0 %v12900_v3 }
 0x99b   :  { %v7448_v57 = vmul.f32 0.01, %v11818_v27  ;;  %v7447_v28 = vmul.f32 0.01, %v11787_v2  ;;  %v11820_v25 = vadd.f32 %v7373_v26, %v15315_v10  ;;  %v11789_v50 = vadd.f32 %v6923_v46, %v15318_v58  ;;  %v7375_v19 = vpop.f32.mrb[167].mxu0  ;;  %8026 = vmatprep.mubr.bf16.mxu1 %v7567_v24  ;;  %v12902_v26 = vld [vmem:[#allocation25 + $0x68] sm:$0xff]  }
 0x99c   :  { %v7449_v23 = vmul.f32 0.01, %v11819_v48  ;;  %v7450_v39 = vmul.f32 0.01, %v11788_v53  ;;  %v11821_v59 = vadd.f32 %v7375_v19, %v15321_v38  ;;  %8027 = vmatmul.mubr.bf16.vlgmr.msra.gmra.mrb[160].mxu1 %v7566_v60  ;;  %v7510_v51 = vmax.f32 %v11786_v37, %v7446_v30  ;;  %v12858_v19 = vld [vmem:[#allocation22 + $0x144] ss:$8 sps:$4 sm:$0xff]  }
 0x99d   :  { %v7452_v32 = vmul.f32 0.01, %v11820_v25  ;;  %v7451_v7 = vmul.f32 0.01, %v11789_v50  ;;  %8108 = vmatpush1.bf16.msra.mxu1 %v12844_v47  ;;  %v7512_v49 = vmax.f32 %v11818_v27, %v7448_v57  ;;  %v7511_v4 = vmax.f32 %v11787_v2, %v7447_v28  ;;  %v12901_v47 = vld [vmem:[#allocation25 + $0x20] sm:$0xff]  }
 0x99e   :  { %v7514_v56 = vmax.f32 %v11788_v53, %v7450_v39  ;;  %v7453_v0 = vmul.f32 0.01, %v11821_v59  ;;  %8109 = vmatprep.subr.bf16.mxu1 %v12849_v36  ;;  %v7513_v52 = vmax.f32 %v11819_v48, %v7449_v23  ;;  %v12853_v57 = vld [vmem:[#allocation22 + $0x130] ss:$8 sps:$4 sm:$0xff]   ;;  %11442 = vmatpush3.bf16.msra.mxu0 %v12901_v47  ;;  %v12864_v47 = vld [vmem:[#allocation22 + $0x164] ss:$8 sps:$4 sm:$0xff]  }
 0x99f   :  { %v7516_v63 = vmax.f32 %v11820_v25, %v7452_v32  ;;  %v7515_v45 = vmax.f32 %v11789_v50, %v7451_v7  ;;  %v6927_v61 = vpop.f32.mrb[136].mxu1  ;;  %v12903_v32 = vld [vmem:[#allocation25 + $0x28] sm:$0xff]   ;;  %11443 = vmatprep.subr.bf16.mxu0 %v12902_v26 }
 0x9a0   :  { %v7517_v9 = vmax.f32 %v11821_v59, %v7453_v0  ;;  %v11790_v42 = vadd.f32 %v6927_v61, %v15312_v6  ;;  %v7379_v21 = vpop.f32.mrb[168].mxu0  ;;  %v6929_v13 = vpop.f32.mrb[137].mxu1  ;;  %v7570_v55 = vpack.c.bf16 %v7514_v56, %v7510_v51 }
 0x9a1   :  { %v11822_v1 = vadd.f32 %v7379_v21, %v15315_v10  ;;  %v11791_v29 = vadd.f32 %v6929_v13, %v15318_v58  ;;  %v7381_v43 = vpop.f32.mrb[169].mxu0  ;;  %v6931_v40 = vpop.f32.mrb[138].mxu1  ;;  %8110 = vmatpush1.bf16.msra.mxu1 %v12847_v18  ;;  %v7571_v11 = vpack.c.bf16 %v7515_v45, %v7511_v4  ;;  %v15346_v41 = vpack.c.bf16 %v7516_v63, %v7512_v49  ;;  %v12904_v49 = vld [vmem:[#allocation25 + $0x70] sm:$0xff]  }
 0x9a2   :  { %v7454_v22 = vmul.f32 0.01, %v11790_v42  ;;  %v11823_v60 = vadd.f32 %v7381_v43, %v15321_v38  ;;  %v11792_v33 = vadd.f32 %v6931_v40, %v15312_v6  ;;  %v7383_v37 = vpop.f32.mrb[170].mxu0  ;;  %v6933_v17 = vpop.f32.mrb[139].mxu1  ;;  %8111 = vmatprep.subr.bf16.mxu1 %v12852_v15  ;;  %v15350_v16 = vpack.c.bf16 %v7517_v9, %v7513_v52  ;;  %v12856_v52 = vld [vmem:[#allocation22 + $0x140] ss:$8 sps:$4 sm:$0xff]   ;;  %11444 = vmatpush3.bf16.msra.mxu0 %v12903_v32 }
 0x9a3   :  { %v7456_v27 = vmul.f32 0.01, %v11822_v1  ;;  %v7455_v2 = vmul.f32 0.01, %v11791_v29  ;;  %v11824_v12 = vadd.f32 %v7383_v37, %v15315_v10  ;;  %v11793_v34 = vadd.f32 %v6933_v17, %v15318_v58  ;;  %v7385_v24 = vpop.f32.mrb[171].mxu0  ;;  %8036 = vmatprep.mubr.bf16.mxu1 %v7571_v11  ;;  %11445 = vmatprep.subr.bf16.mxu0 %v12904_v49 }
 0x9a4   :  { %v7457_v30 = vmul.f32 0.01, %v11823_v60  ;;  %v7458_v48 = vmul.f32 0.01, %v11792_v33  ;;  %v11825_v53 = vadd.f32 %v7385_v24, %v15321_v38  ;;  %8037 = vmatmul.mubr.bf16.gmra.mrb[164].mxu1 %v7570_v55  ;;  %v7518_v28 = vmax.f32 %v11790_v42, %v7454_v22  ;;  %v12862_v32 = vld [vmem:[#allocation22 + $0x160] ss:$8 sps:$4 sm:$0xff]  }
 0x9a5   :  { %v7460_v46 = vmul.f32 0.01, %v11824_v12  ;;  %v7459_v36 = vmul.f32 0.01, %v11793_v34  ;;  %8112 = vmatpush1.bf16.msra.mxu1 %v12850_v44  ;;  %v7520_v31 = vmax.f32 %v11822_v1, %v7456_v27  ;;  %v7519_v23 = vmax.f32 %v11791_v29, %v7455_v2  ;;  %v12861_v1 = vld [vmem:[#allocation22 + $0x154] ss:$8 sps:$4 sm:$0xff]  }
 0x9a6   :  { %v7522_v25 = vmax.f32 %v11792_v33, %v7458_v48  ;;  %v7461_v50 = vmul.f32 0.01, %v11825_v53  ;;  %8113 = vmatprep.subr.bf16.mxu1 %v12855_v54  ;;  %v7521_v7 = vmax.f32 %v11823_v60, %v7457_v30  ;;  %v12905_v60 = vld [vmem:[#allocation25 + $0x30] sm:$0xff]  }
 0x9a7   :  { %v7524_v39 = vmax.f32 %v11824_v12, %v7460_v46  ;;  %v7523_v59 = vmax.f32 %v11793_v34, %v7459_v36  ;;  %v6937_v8 = vpop.f32.mrb[140].mxu1  ;;  %v12859_v2 = vld [vmem:[#allocation22 + $0x150] ss:$8 sps:$4 sm:$0xff]   ;;  %11446 = vmatpush3.bf16.msra.mxu0 %v12905_v60  ;;  %v12867_v49 = vld [vmem:[#allocation22 + $0x174] ss:$8 sps:$4 sm:$0xff]  }
 0x9a8   :  { %v7525_v18 = vmax.f32 %v11825_v53, %v7461_v50  ;;  %v11794_v51 = vadd.f32 %v6937_v8, %v15312_v6  ;;  %v7389_v56 = vpop.f32.mrb[172].mxu0  ;;  %v6939_v0 = vpop.f32.mrb[141].mxu1  ;;  %v7574_v15 = vpack.c.bf16 %v7522_v25, %v7518_v28 }
 0x9a9   :  { %v11826_v4 = vadd.f32 %v7389_v56, %v15315_v10  ;;  %v11795_v63 = vadd.f32 %v6939_v0, %v15318_v58  ;;  %v7391_v45 = vpop.f32.mrb[173].mxu0  ;;  %v6941_v61 = vpop.f32.mrb[142].mxu1  ;;  %8114 = vmatpush1.bf16.msra.mxu1 %v12853_v57  ;;  %v7575_v20 = vpack.c.bf16 %v7523_v59, %v7519_v23  ;;  %v15358_v9 = vpack.c.bf16 %v7524_v39, %v7520_v31 }
 0x9aa   :  { %v7462_v42 = vmul.f32 0.01, %v11794_v51  ;;  %v11827_v21 = vadd.f32 %v7391_v45, %v15321_v38  ;;  %v11796_v13 = vadd.f32 %v6941_v61, %v15312_v6  ;;  %v7393_v55 = vpop.f32.mrb[174].mxu0  ;;  %v6943_v3 = vpop.f32.mrb[143].mxu1  ;;  %8115 = vmatprep.subr.bf16.mxu1 %v12858_v19  ;;  %v15362_v29 = vpack.c.bf16 %v7525_v18, %v7521_v7 }
 0x9ab   :  { %v7464_v43 = vmul.f32 0.01, %v11826_v4  ;;  %v7463_v40 = vmul.f32 0.01, %v11795_v63  ;;  %v11828_v11 = vadd.f32 %v7393_v55, %v15315_v10  ;;  %v11797_v44 = vadd.f32 %v6943_v3, %v15318_v58  ;;  %v7395_v22 = vpop.f32.mrb[175].mxu0  ;;  %8046 = vmatprep.mubr.bf16.mxu1 %v7575_v20 }
 0x9ac   :  { %v7465_v33 = vmul.f32 0.01, %v11827_v21  ;;  %v7466_v37 = vmul.f32 0.01, %v11796_v13  ;;  %v11829_v17 = vadd.f32 %v7395_v22, %v15321_v38  ;;  %8047 = vmatmul.mubr.bf16.gmra.mrb[168].mxu1 %v7574_v15  ;;  %v7526_v12 = vmax.f32 %v11794_v51, %v7462_v42 }
 0x9ad   :  { %v7468_v54 = vmul.f32 0.01, %v11828_v11  ;;  %v7467_v27 = vmul.f32 0.01, %v11797_v44  ;;  %8116 = vmatpush1.bf16.msra.mxu1 %v12856_v52  ;;  %v7528_v30 = vmax.f32 %v11826_v4, %v7464_v43  ;;  %v7527_v48 = vmax.f32 %v11795_v63, %v7463_v40 }
 0x9ae   :  { %v7530_v34 = vmax.f32 %v11796_v13, %v7466_v37  ;;  %v7469_v24 = vmul.f32 0.01, %v11829_v17  ;;  %8117 = vmatprep.subr.bf16.mxu1 %v12861_v1  ;;  %v7529_v36 = vmax.f32 %v11827_v21, %v7465_v33  ;;  %v12865_v1 = vld [vmem:[#allocation22 + $0x170] ss:$8 sps:$4 sm:$0xff]  }
 0x9af   :  { %v7532_v53 = vmax.f32 %v11828_v11, %v7468_v54  ;;  %v7531_v26 = vmax.f32 %v11797_v44, %v7467_v27  ;;  %v6947_v46 = vpop.f32.mrb[144].mxu1  ;;  %v12870_v44 = vld [vmem:[#allocation22 + $0x184] ss:$8 sps:$4 sm:$0xff]  }
 0x9b0   :  { %v7533_v57 = vmax.f32 %v11829_v17, %v7469_v24  ;;  %v11798_v28 = vadd.f32 %v6947_v46, %v15312_v6  ;;  %v7399_v25 = vpop.f32.mrb[176].mxu0  ;;  %v6949_v50 = vpop.f32.mrb[145].mxu1  ;;  %v7578_v19 = vpack.c.bf16 %v7530_v34, %v7526_v12  ;;  %v12868_v46 = vld [vmem:[#allocation22 + $0x180] ss:$8 sps:$4 sm:$0xff]  }
 0x9b1   :  { %v11830_v31 = vadd.f32 %v7399_v25, %v15315_v10  ;;  %v11799_v23 = vadd.f32 %v6949_v50, %v15318_v58  ;;  %v7401_v39 = vpop.f32.mrb[177].mxu0  ;;  %v6951_v59 = vpop.f32.mrb[146].mxu1  ;;  %8118 = vmatpush1.bf16.msra.mxu1 %v12859_v2  ;;  %v7579_v8 = vpack.c.bf16 %v7531_v26, %v7527_v48  ;;  %v15370_v7 = vpack.c.bf16 %v7532_v53, %v7528_v30 }
 0x9b2   :  { %v7470_v18 = vmul.f32 0.01, %v11798_v28  ;;  %v11831_v51 = vadd.f32 %v7401_v39, %v15321_v38  ;;  %v11800_v56 = vadd.f32 %v6951_v59, %v15312_v6  ;;  %v7403_v0 = vpop.f32.mrb[178].mxu0  ;;  %v6953_v15 = vpop.f32.mrb[147].mxu1  ;;  %8119 = vmatprep.subr.bf16.mxu1 %v12864_v47  ;;  %v15374_v4 = vpack.c.bf16 %v7533_v57, %v7529_v36 }
 0x9b3   :  { %v7472_v63 = vmul.f32 0.01, %v11830_v31  ;;  %v7471_v45 = vmul.f32 0.01, %v11799_v23  ;;  %v11832_v61 = vadd.f32 %v7403_v0, %v15315_v10  ;;  %v11801_v20 = vadd.f32 %v6953_v15, %v15318_v58  ;;  %v7405_v52 = vpop.f32.mrb[179].mxu0  ;;  %8056 = vmatprep.mubr.bf16.mxu1 %v7579_v8 }
 0x9b4   :  { %v7473_v42 = vmul.f32 0.01, %v11831_v51  ;;  %v7474_v21 = vmul.f32 0.01, %v11800_v56  ;;  %v11833_v13 = vadd.f32 %v7405_v52, %v15321_v38  ;;  %8057 = vmatmul.mubr.bf16.gmra.mrb[172].mxu1 %v7578_v19  ;;  %v7534_v43 = vmax.f32 %v11798_v28, %v7470_v18  ;;  %v12876_v52 = vld [vmem:[#allocation22 + $0x1a4] ss:$8 sps:$4 sm:$0xff]  }
 0x9b5   :  { %v7476_v55 = vmul.f32 0.01, %v11832_v61  ;;  %v7475_v3 = vmul.f32 0.01, %v11801_v20  ;;  %8120 = vmatpush1.bf16.msra.mxu1 %v12862_v32  ;;  %v7536_v22 = vmax.f32 %v11830_v31, %v7472_v63  ;;  %v7535_v60 = vmax.f32 %v11799_v23, %v7471_v45  ;;  %v12873_v31 = vld [vmem:[#allocation22 + $0x194] ss:$8 sps:$4 sm:$0xff]  }
 0x9b6   :  { %v7538_v40 = vmax.f32 %v11800_v56, %v7474_v21  ;;  %v7477_v11 = vmul.f32 0.01, %v11833_v13  ;;  %8121 = vmatprep.subr.bf16.mxu1 %v12867_v49  ;;  %v7537_v54 = vmax.f32 %v11831_v51, %v7473_v42  ;;  %v12871_v63 = vld [vmem:[#allocation22 + $0x190] ss:$8 sps:$4 sm:$0xff]  }
 0x9b7   :  { %v7540_v33 = vmax.f32 %v11832_v61, %v7476_v55  ;;  %v7539_v37 = vmax.f32 %v11801_v20, %v7475_v3  ;;  %v6957_v17 = vpop.f32.mrb[148].mxu1 }
 0x9b8   :  { %v7541_v27 = vmax.f32 %v11833_v13, %v7477_v11  ;;  %v11802_v2 = vadd.f32 %v6957_v17, %v15312_v6  ;;  %v7409_v12 = vpop.f32.mrb[180].mxu0  ;;  %v6959_v34 = vpop.f32.mrb[149].mxu1  ;;  %v7582_v24 = vpack.c.bf16 %v7538_v40, %v7534_v43 }
 0x9b9   :  { %v11834_v47 = vadd.f32 %v7409_v12, %v15315_v10  ;;  %v11803_v30 = vadd.f32 %v6959_v34, %v15318_v58  ;;  %v7411_v48 = vpop.f32.mrb[181].mxu0  ;;  %v6961_v53 = vpop.f32.mrb[150].mxu1  ;;  %8122 = vmatpush1.bf16.msra.mxu1 %v12865_v1  ;;  %v7583_v26 = vpack.c.bf16 %v7539_v37, %v7535_v60  ;;  %v15382_v36 = vpack.c.bf16 %v7540_v33, %v7536_v22 }
 0x9ba   :  { %v7478_v57 = vmul.f32 0.01, %v11802_v2  ;;  %v11835_v28 = vadd.f32 %v7411_v48, %v15321_v38  ;;  %v11804_v25 = vadd.f32 %v6961_v53, %v15312_v6  ;;  %v7413_v50 = vpop.f32.mrb[182].mxu0  ;;  %v6963_v19 = vpop.f32.mrb[151].mxu1  ;;  %8123 = vmatprep.subr.bf16.mxu1 %v12870_v44  ;;  %v15386_v23 = vpack.c.bf16 %v7541_v27, %v7537_v54  ;;  %v12874_v27 = vld [vmem:[#allocation22 + $0x1a0] ss:$8 sps:$4 sm:$0xff]  }
 0x9bb   :  { %v7480_v39 = vmul.f32 0.01, %v11834_v47  ;;  %v7479_v59 = vmul.f32 0.01, %v11803_v30  ;;  %v11836_v8 = vadd.f32 %v7413_v50, %v15315_v10  ;;  %v11805_v32 = vadd.f32 %v6963_v19, %v15318_v58  ;;  %v7415_v18 = vpop.f32.mrb[183].mxu0  ;;  %8066 = vmatprep.mubr.bf16.mxu1 %v7583_v26 }
 0x9bc   :  { %v7481_v51 = vmul.f32 0.01, %v11835_v28  ;;  %v7482_v56 = vmul.f32 0.01, %v11804_v25  ;;  %v11837_v0 = vadd.f32 %v7415_v18, %v15321_v38  ;;  %8067 = vmatmul.mubr.bf16.gmra.mrb[176].mxu1 %v7582_v24  ;;  %v7542_v45 = vmax.f32 %v11802_v2, %v7478_v57  ;;  %v12879_v48 = vld [vmem:[#allocation22 + $0x1b4] ss:$8 sps:$4 sm:$0xff]  }
 0x9bd   :  { %v7484_v15 = vmul.f32 0.01, %v11836_v8  ;;  %v7483_v49 = vmul.f32 0.01, %v11805_v32  ;;  %8124 = vmatpush1.bf16.msra.mxu1 %v12868_v46  ;;  %v7544_v42 = vmax.f32 %v11834_v47, %v7480_v39  ;;  %v7543_v21 = vmax.f32 %v11803_v30, %v7479_v59 }
 0x9be   :  { %v7546_v61 = vmax.f32 %v11804_v25, %v7482_v56  ;;  %v7485_v20 = vmul.f32 0.01, %v11837_v0  ;;  %8125 = vmatprep.subr.bf16.mxu1 %v12873_v31  ;;  %v7545_v1 = vmax.f32 %v11835_v28, %v7481_v51  ;;  %v12882_v56 = vld [vmem:[#allocation22 + $0x1c4] ss:$8 sps:$4 sm:$0xff]  }
 0x9bf   :  { %v7548_v13 = vmax.f32 %v11836_v8, %v7484_v15  ;;  %v7547_v55 = vmax.f32 %v11805_v32, %v7483_v49  ;;  %v6967_v3 = vpop.f32.mrb[152].mxu1  ;;  %v12877_v8 = vld [vmem:[#allocation22 + $0x1b0] ss:$8 sps:$4 sm:$0xff]  }
 0x9c0   :  { %v7549_v43 = vmax.f32 %v11837_v0, %v7485_v20  ;;  %v11806_v40 = vadd.f32 %v6967_v3, %v15312_v6  ;;  %v7419_v11 = vpop.f32.mrb[184].mxu0  ;;  %v6969_v44 = vpop.f32.mrb[153].mxu1  ;;  %v7586_v22 = vpack.c.bf16 %v7546_v61, %v7542_v45 }
 0x9c1   :  { %v11838_v60 = vadd.f32 %v7419_v11, %v15315_v10  ;;  %v11807_v33 = vadd.f32 %v6969_v44, %v15318_v58  ;;  %v7421_v37 = vpop.f32.mrb[185].mxu0  ;;  %v6971_v17 = vpop.f32.mrb[154].mxu1  ;;  %8126 = vmatpush1.bf16.msra.mxu1 %v12871_v63  ;;  %v7587_v54 = vpack.c.bf16 %v7547_v55, %v7543_v21  ;;  %v15394_v2 = vpack.c.bf16 %v7548_v13, %v7544_v42  ;;  %v12880_v11 = vld [vmem:[#allocation22 + $0x1c0] ss:$8 sps:$4 sm:$0xff]  }
 0x9c2   :  { %v7486_v12 = vmul.f32 0.01, %v11806_v40  ;;  %v11839_v34 = vadd.f32 %v7421_v37, %v15321_v38  ;;  %v11808_v24 = vadd.f32 %v6971_v17, %v15312_v6  ;;  %v7423_v47 = vpop.f32.mrb[186].mxu0  ;;  %v6973_v30 = vpop.f32.mrb[155].mxu1  ;;  %8127 = vmatprep.subr.bf16.mxu1 %v12876_v52  ;;  %v15398_v53 = vpack.c.bf16 %v7549_v43, %v7545_v1 }
 0x9c3   :  { %v7488_v26 = vmul.f32 0.01, %v11838_v60  ;;  %v7487_v46 = vmul.f32 0.01, %v11807_v33  ;;  %v11840_v57 = vadd.f32 %v7423_v47, %v15315_v10  ;;  %v11809_v28 = vadd.f32 %v6973_v30, %v15318_v58  ;;  %v7425_v25 = vpop.f32.mrb[187].mxu0  ;;  %8076 = vmatprep.mubr.bf16.mxu1 %v7587_v54 }
 0x9c4   :  { %v7489_v50 = vmul.f32 0.01, %v11839_v34  ;;  %v7490_v19 = vmul.f32 0.01, %v11808_v24  ;;  %v11841_v31 = vadd.f32 %v7425_v25, %v15321_v38  ;;  %8077 = vmatmul.mubr.bf16.gmra.mrb[180].mxu1 %v7586_v22  ;;  %v7550_v32 = vmax.f32 %v11806_v40, %v7486_v12  ;;  %v12885_v54 = vld [vmem:[#allocation22 + $0x1d4] ss:$8 sps:$4 sm:$0xff]  }
 0x9c5   :  { %v7492_v39 = vmul.f32 0.01, %v11840_v57  ;;  %v7491_v59 = vmul.f32 0.01, %v11809_v28  ;;  %8128 = vmatpush1.bf16.msra.mxu1 %v12874_v27  ;;  %v7552_v0 = vmax.f32 %v11838_v60, %v7488_v26  ;;  %v7551_v15 = vmax.f32 %v11807_v33, %v7487_v46 }
 0x9c6   :  { %v7554_v18 = vmax.f32 %v11808_v24, %v7490_v19  ;;  %v7493_v51 = vmul.f32 0.01, %v11841_v31  ;;  %8129 = vmatprep.subr.bf16.mxu1 %v12879_v48  ;;  %v7553_v61 = vmax.f32 %v11839_v34, %v7489_v50 }
 0x9c7   :  { %v7556_v49 = vmax.f32 %v11840_v57, %v7492_v39  ;;  %v7555_v63 = vmax.f32 %v11809_v28, %v7491_v59  ;;  %v6977_v45 = vpop.f32.mrb[156].mxu1  ;;  %v12883_v28 = vld [vmem:[#allocation22 + $0x1d0] ss:$8 sps:$4 sm:$0xff]  }
 0x9c8   :  { %v7557_v20 = vmax.f32 %v11841_v31, %v7493_v51  ;;  %v11810_v52 = vadd.f32 %v6977_v45, %v15312_v6  ;;  %v7429_v42 = vpop.f32.mrb[188].mxu0  ;;  %v6979_v21 = vpop.f32.mrb[157].mxu1  ;;  %v7590_v13 = vpack.c.bf16 %v7554_v18, %v7550_v32  ;;  %v12888_v31 = vld [vmem:[#allocation22 + $0x1e4] ss:$8 sps:$4 sm:$0xff]  }
 0x9c9   :  { %v11842_v55 = vadd.f32 %v7429_v42, %v15315_v10  ;;  %v11811_v3 = vadd.f32 %v6979_v21, %v15318_v58  ;;  %v7431_v1 = vpop.f32.mrb[189].mxu0  ;;  %v6981_v43 = vpop.f32.mrb[158].mxu1  ;;  %8130 = vmatpush1.bf16.msra.mxu1 %v12877_v8  ;;  %v7591_v40 = vpack.c.bf16 %v7555_v63, %v7551_v15  ;;  %v7592_v44 = vpack.c.bf16 %v7556_v49, %v7552_v0  ;;  %v12891_v0 = vld [vmem:[#allocation22 + $0x1f4] ss:$8 sps:$4 sm:$0xff]   ;;  %v12889_v49 = vld [vmem:[#allocation22 + $0x1f0] ss:$8 sps:$4 sm:$0xff]  }
 0x9ca   :  { %v7494_v22 = vmul.f32 0.01, %v11810_v52  ;;  %v11843_v60 = vadd.f32 %v7431_v1, %v15321_v38  ;;  %v11812_v33 = vadd.f32 %v6981_v43, %v15312_v6  ;;  %v7433_v37 = vpop.f32.mrb[190].mxu0  ;;  %v6983_v17 = vpop.f32.mrb[159].mxu1  ;;  %8131 = vmatprep.subr.bf16.mxu1 %v12882_v56  ;;  %v7593_v27 = vpack.c.bf16 %v7557_v20, %v7553_v61 }
 0x9cb   :  { %v7496_v12 = vmul.f32 0.01, %v11842_v55  ;;  %v7495_v34 = vmul.f32 0.01, %v11811_v3  ;;  %v11844_v24 = vadd.f32 %v7433_v37, %v15315_v10  ;;  %v11813_v47 = vadd.f32 %v6983_v17, %v15318_v58  ;;  %v7435_v30 = vpop.f32.mrb[191].mxu0  ;;  %8086 = vmatprep.mubr.bf16.mxu1 %v7591_v40  ;;  %v12909_v37 = vld [vmem:[%s16846_s21 + $0x8] sm:$0xff]  }
 0x9cc   :  { %v7497_v48 = vmul.f32 0.01, %v11843_v60  ;;  %v7498_v26 = vmul.f32 0.01, %v11812_v33  ;;  %v11845_v46 = vadd.f32 %v7435_v30, %v15321_v38  ;;  %8087 = vmatmul.mubr.bf16.gmra.mrb[184].mxu1 %v7590_v13  ;;  %v7558_v25 = vmax.f32 %v11810_v52, %v7494_v22  ;;  %v12886_v38 = vld [vmem:[#allocation22 + $0x1e0] ss:$8 sps:$4 sm:$0xff]  }
 0x9cd   :  { %v7500_v57 = vmul.f32 0.01, %v11844_v24  ;;  %v7499_v6 = vmul.f32 0.01, %v11813_v47  ;;  %8132 = vmatpush1.bf16.msra.mxu1 %v12880_v11  ;;  %v7560_v39 = vmax.f32 %v11842_v55, %v7496_v12  ;;  %v7559_v10 = vmax.f32 %v11811_v3, %v7495_v34 }
 0x9ce   :  { %v7562_v50 = vmax.f32 %v11812_v33, %v7498_v26  ;;  %v7501_v19 = vmul.f32 0.01, %v11845_v46  ;;  %8133 = vmatprep.subr.bf16.mxu1 %v12885_v54  ;;  %v7561_v8 = vmax.f32 %v11843_v60, %v7497_v48 }
 0x9cf   :  { %v7564_v59 = vmax.f32 %v11844_v24, %v7500_v57  ;;  %v7563_v58 = vmax.f32 %v11813_v47, %v7499_v6  ;;  %v12910_v47 = vld [vmem:[%s16846_s21 + $0x10] sm:$0xff]  }
 0x9d0   :  { %v7565_v32 = vmax.f32 %v11845_v46, %v7501_v19  ;;  %v7594_v18 = vpack.c.bf16 %v7562_v50, %v7558_v25 }
 0x9d1   :  { %8134 = vmatpush1.bf16.msra.mxu1 %v12883_v28  ;;  %v7595_v51 = vpack.c.bf16 %v7563_v58, %v7559_v10  ;;  %v7596_v56 = vpack.c.bf16 %v7564_v59, %v7560_v39  ;;  %v12911_v10 = vld [vmem:[%s16846_s21 + $0x18] sm:$0xff]  }
 0x9d2   :  { %8135 = vmatprep.subr.bf16.mxu1 %v12888_v31  ;;  %v7597_v15 = vpack.c.bf16 %v7565_v32, %v7561_v8 }
 0x9d3   :  { %8096 = vmatprep.mubr.bf16.mxu1 %v7595_v51 }
 0x9d4   :  { %8097 = vmatmul.mubr.bf16.gmra.mrb[188].mxu1 %v7594_v18 }
 0x9d5   :  { %8136 = vmatpush1.bf16.msra.mxu1 %v12886_v38  ;;  %8139 = vmatprep.mubr.bf16.mxu1 %v15338_v14  ;;  %v12907_v14 = vld [vmem:[#allocation25 + $0x38] sm:$0xff]  }
 0x9d6   :  { %8137 = vmatprep.subr.bf16.mxu1 %v12891_v0  ;;  %v12912_v38 = vld [vmem:[%s16846_s21 + $0x20] sm:$0xff]  }
 0x9d9   :  { %8138 = vmatpush1.bf16.msra.mxu1 %v12889_v49 }
 0x9dc   :  { %8140 = vmatmul.mubr.bf16.vlgmr.msra.gmra.mrb[160].mxu1 %v15332_v5  ;;  %v12906_v5 = vld [vmem:[#allocation25 + $0x78] sm:$0xff]  }
 0x9dd   :  { %8149 = vmatprep.mubr.bf16.mxu1 %v15350_v16  ;;  %11447 = vmatprep.subr.bf16.mxu0 %v12906_v5  ;;  %v7662_v16 = vld [vmem:[#allocation23] sm:$0x3] }
 0x9de   :  { %11448 = vmatpush3.bf16.msra.mxu0 %v12907_v14 }
 0x9e4   :  { %8150 = vmatmul.mubr.bf16.gmra.mrb[164].mxu1 %v15346_v41  ;;  %v12908_v41 = vld [vmem:[%s16846_s21] sm:$0xff]  }
 0x9e5   :  { %8159 = vmatprep.mubr.bf16.mxu1 %v15362_v29  ;;  %11602 = vmatprep.subr.bf16.mxu0 %v12908_v41  ;;  %v15430_v29 = vrot.slane %v7662_v16, %v17092_v62 }
 0x9ec   :  { %8160 = vmatmul.mubr.bf16.gmra.mrb[168].mxu1 %v15358_v9  ;;  %v15427_v9 = vrot.slane %v7662_v16, %v17090_v35 }
 0x9ed   :  { %8169 = vmatprep.mubr.bf16.mxu1 %v15374_v4 }
 0x9f4   :  { %8170 = vmatmul.mubr.bf16.gmra.mrb[172].mxu1 %v15370_v7 }
 0x9f5   :  { %8179 = vmatprep.mubr.bf16.mxu1 %v15386_v23 }
 0x9fc   :  { %8180 = vmatmul.mubr.bf16.gmra.mrb[176].mxu1 %v15382_v36 }
 0x9fd   :  { %8189 = vmatprep.mubr.bf16.mxu1 %v15398_v53 }
 0xa04   :  { %8190 = vmatmul.mubr.bf16.gmra.mrb[180].mxu1 %v15394_v2 }
 0xa05   :  { %8199 = vmatprep.mubr.bf16.mxu1 %v7593_v27 }
 0xa0c   :  { %8200 = vmatmul.mubr.bf16.gmra.mrb[184].mxu1 %v7592_v44 }
 0xa0d   :  { %8209 = vmatprep.mubr.bf16.mxu1 %v7597_v15 }
 0xa14   :  { %8210 = vmatmul.mubr.bf16.gmra.mrb[188].mxu1 %v7596_v56 }
 0xaaf   :  { %v8141_v7 = vpop.f32.mrb[160].mxu1 }
 0xab0   :  { %v11846_v4 = vadd.f32 %v8141_v7, %v15427_v9  ;;  %v8143_v36 = vpop.f32.mrb[161].mxu1 }
 0xab1   :  { %v11847_v23 = vadd.f32 %v8143_v36, %v15430_v29  ;;  %v8145_v2 = vpop.f32.mrb[162].mxu1 }
 0xab2   :  { %v8220_v53 = vmul.f32 0.01, %v11846_v4  ;;  %v11848_v63 = vadd.f32 %v8145_v2, %v15427_v9  ;;  %v8147_v45 = vpop.f32.mrb[163].mxu1  ;;  %v12913_v2 = vld [vmem:[%s16846_s21 + $0x28] sm:$0xff]  }
 0xab3   :  { %v8221_v61 = vmul.f32 0.01, %v11847_v23  ;;  %v11849_v20 = vadd.f32 %v8147_v45, %v15430_v29 }
 0xab4   :  { %v8222_v52 = vmul.f32 0.01, %v11848_v63  ;;  %v8252_v42 = vmax.f32 %v11846_v4, %v8220_v53 }
 0xab5   :  { %v8223_v35 = vmul.f32 0.01, %v11849_v20  ;;  %v8253_v62 = vmax.f32 %v11847_v23, %v8221_v61 }
 0xab6   :  { %v8254_v21 = vmax.f32 %v11848_v63, %v8222_v52 }
 0xab7   :  { %v8255_v13 = vmax.f32 %v11849_v20, %v8223_v35  ;;  %v8151_v55 = vpop.f32.mrb[164].mxu1 }
 0xab8   :  { %v8284_v3 = vpack.c.bf16 %v8254_v21, %v8252_v42  ;;  %v11850_v1 = vadd.f32 %v8151_v55, %v15427_v9  ;;  %v8153_v43 = vpop.f32.mrb[165].mxu1 }
 0xab9   :  { %v11851_v40 = vadd.f32 %v8153_v43, %v15430_v29  ;;  %v8155_v11 = vpop.f32.mrb[166].mxu1  ;;  %v8285_v44 = vpack.c.bf16 %v8255_v13, %v8253_v62 }
 0xaba   :  { %v8224_v22 = vmul.f32 0.01, %v11850_v1  ;;  %v11852_v60 = vadd.f32 %v8155_v11, %v15427_v9  ;;  %v8157_v33 = vpop.f32.mrb[167].mxu1 }
 0xabb   :  { %v8225_v17 = vmul.f32 0.01, %v11851_v40  ;;  %v11853_v54 = vadd.f32 %v8157_v33, %v15430_v29  ;;  %8467 = vmatprep.mubr.bf16.mxu0 %v8285_v44 }
 0xabc   :  { %v8226_v27 = vmul.f32 0.01, %v11852_v60  ;;  %8468 = vmatmul.mubr.bf16.vlgmr.msra.gmra.mrb[192].mxu0 %v8284_v3  ;;  %v8256_v34 = vmax.f32 %v11850_v1, %v8224_v22 }
 0xabd   :  { %v8227_v12 = vmul.f32 0.01, %v11853_v54  ;;  %11603 = vmatpush3.bf16.msra.mxu0 %v12908_v41  ;;  %v8257_v30 = vmax.f32 %v11851_v40, %v8225_v17 }
 0xabe   :  { %v8258_v24 = vmax.f32 %v11852_v60, %v8226_v27  ;;  %11604 = vmatprep.subr.bf16.mxu0 %v12909_v37 }
 0xabf   :  { %v8259_v48 = vmax.f32 %v11853_v54, %v8227_v12  ;;  %v8161_v26 = vpop.f32.mrb[168].mxu1 }
 0xac0   :  { %v11854_v46 = vadd.f32 %v8161_v26, %v15427_v9  ;;  %v8163_v57 = vpop.f32.mrb[169].mxu1  ;;  %v8286_v6 = vpack.c.bf16 %v8258_v24, %v8256_v34 }
 0xac1   :  { %v11855_v28 = vadd.f32 %v8163_v57, %v15430_v29  ;;  %v8165_v25 = vpop.f32.mrb[170].mxu1  ;;  %v8287_v50 = vpack.c.bf16 %v8259_v48, %v8257_v30  ;;  %11605 = vmatpush3.bf16.msra.mxu0 %v12909_v37 }
 0xac2   :  { %v8228_v19 = vmul.f32 0.01, %v11854_v46  ;;  %v11856_v31 = vadd.f32 %v8165_v25, %v15427_v9  ;;  %v8167_v39 = vpop.f32.mrb[171].mxu1  ;;  %11606 = vmatprep.subr.bf16.mxu0 %v12910_v47 }
 0xac3   :  { %v8229_v59 = vmul.f32 0.01, %v11855_v28  ;;  %v11857_v58 = vadd.f32 %v8167_v39, %v15430_v29  ;;  %8475 = vmatprep.mubr.bf16.mxu0 %v8287_v50 }
 0xac4   :  { %v8230_v8 = vmul.f32 0.01, %v11856_v31  ;;  %8476 = vmatmul.mubr.bf16.gmra.mrb[196].mxu0 %v8286_v6  ;;  %v8260_v18 = vmax.f32 %v11854_v46, %v8228_v19 }
 0xac5   :  { %v8231_v32 = vmul.f32 0.01, %v11857_v58  ;;  %11607 = vmatpush3.bf16.msra.mxu0 %v12910_v47  ;;  %v8261_v56 = vmax.f32 %v11855_v28, %v8229_v59 }
 0xac6   :  { %v8262_v51 = vmax.f32 %v11856_v31, %v8230_v8  ;;  %11608 = vmatprep.subr.bf16.mxu0 %v12911_v10 }
 0xac7   :  { %v8263_v0 = vmax.f32 %v11857_v58, %v8231_v32  ;;  %v8171_v15 = vpop.f32.mrb[172].mxu1 }
 0xac8   :  { %v11858_v49 = vadd.f32 %v8171_v15, %v15427_v9  ;;  %v8173_v5 = vpop.f32.mrb[173].mxu1  ;;  %v8288_v14 = vpack.c.bf16 %v8262_v51, %v8260_v18 }
 0xac9   :  { %v11859_v41 = vadd.f32 %v8173_v5, %v15430_v29  ;;  %v8175_v16 = vpop.f32.mrb[174].mxu1  ;;  %v8289_v7 = vpack.c.bf16 %v8263_v0, %v8261_v56  ;;  %11609 = vmatpush3.bf16.msra.mxu0 %v12911_v10 }
 0xaca   :  { %v8232_v4 = vmul.f32 0.01, %v11858_v49  ;;  %v11860_v36 = vadd.f32 %v8175_v16, %v15427_v9  ;;  %v8177_v23 = vpop.f32.mrb[175].mxu1  ;;  %11610 = vmatprep.subr.bf16.mxu0 %v12912_v38 }
 0xacb   :  { %v8233_v53 = vmul.f32 0.01, %v11859_v41  ;;  %v11861_v63 = vadd.f32 %v8177_v23, %v15430_v29  ;;  %8483 = vmatprep.mubr.bf16.mxu0 %v8289_v7 }
 0xacc   :  { %v8234_v45 = vmul.f32 0.01, %v11860_v36  ;;  %8484 = vmatmul.mubr.bf16.gmra.mrb[200].mxu0 %v8288_v14  ;;  %v8264_v20 = vmax.f32 %v11858_v49, %v8232_v4 }
 0xacd   :  { %v8235_v61 = vmul.f32 0.01, %v11861_v63  ;;  %11611 = vmatpush3.bf16.msra.mxu0 %v12912_v38  ;;  %v8265_v35 = vmax.f32 %v11859_v41, %v8233_v53 }
 0xace   :  { %v8266_v52 = vmax.f32 %v11860_v36, %v8234_v45  ;;  %11612 = vmatprep.subr.bf16.mxu0 %v12913_v2 }
 0xacf   :  { %v8267_v42 = vmax.f32 %v11861_v63, %v8235_v61  ;;  %v8181_v21 = vpop.f32.mrb[176].mxu1 }
 0xad0   :  { %v11862_v62 = vadd.f32 %v8181_v21, %v15427_v9  ;;  %v8183_v13 = vpop.f32.mrb[177].mxu1  ;;  %v8290_v55 = vpack.c.bf16 %v8266_v52, %v8264_v20 }
 0xad1   :  { %v11863_v3 = vadd.f32 %v8183_v13, %v15430_v29  ;;  %v8185_v1 = vpop.f32.mrb[178].mxu1  ;;  %v8291_v43 = vpack.c.bf16 %v8267_v42, %v8265_v35  ;;  %11613 = vmatpush3.bf16.msra.mxu0 %v12913_v2 }
 0xad2   :  { %v8236_v40 = vmul.f32 0.01, %v11862_v62  ;;  %v11864_v11 = vadd.f32 %v8185_v1, %v15427_v9  ;;  %v8187_v44 = vpop.f32.mrb[179].mxu1 }
 0xad3   :  { %v8237_v22 = vmul.f32 0.01, %v11863_v3  ;;  %v11865_v60 = vadd.f32 %v8187_v44, %v15430_v29  ;;  %8491 = vmatprep.mubr.bf16.mxu0 %v8291_v43 }
 0xad4   :  { %v8238_v33 = vmul.f32 0.01, %v11864_v11  ;;  %8492 = vmatmul.mubr.bf16.gmra.mrb[204].mxu0 %v8290_v55  ;;  %v8268_v17 = vmax.f32 %v11862_v62, %v8236_v40 }
 0xad5   :  { %v8239_v37 = vmul.f32 0.01, %v11865_v60  ;;  %v8269_v27 = vmax.f32 %v11863_v3, %v8237_v22 }
 0xad6   :  { %v8270_v54 = vmax.f32 %v11864_v11, %v8238_v33 }
 0xad7   :  { %v8271_v12 = vmax.f32 %v11865_v60, %v8239_v37  ;;  %v8191_v34 = vpop.f32.mrb[180].mxu1  ;;  %v15485_v37 = vld [vmem:[#allocation26] ss:$0 sm:$0xff] }
 0xad8   :  { %v11866_v24 = vadd.f32 %v8191_v34, %v15427_v9  ;;  %v8193_v47 = vpop.f32.mrb[181].mxu1  ;;  %v8292_v30 = vpack.c.bf16 %v8270_v54, %v8268_v17 }
 0xad9   :  { %v11867_v48 = vadd.f32 %v8193_v47, %v15430_v29  ;;  %v8195_v26 = vpop.f32.mrb[182].mxu1  ;;  %v8293_v46 = vpack.c.bf16 %v8271_v12, %v8269_v27 }
 0xada   :  { %v8240_v57 = vmul.f32 0.01, %v11866_v24  ;;  %v11868_v6 = vadd.f32 %v8195_v26, %v15427_v9  ;;  %v8197_v28 = vpop.f32.mrb[183].mxu1 }
 0xadb   :  { %v8241_v25 = vmul.f32 0.01, %v11867_v48  ;;  %v11869_v50 = vadd.f32 %v8197_v28, %v15430_v29  ;;  %8499 = vmatprep.mubr.bf16.mxu0 %v8293_v46 }
 0xadc   :  { %v8242_v19 = vmul.f32 0.01, %v11868_v6  ;;  %8500 = vmatmul.mubr.bf16.gmra.mrb[208].mxu0 %v8292_v30  ;;  %v8272_v39 = vmax.f32 %v11866_v24, %v8240_v57 }
 0xadd   :  { %v8243_v31 = vmul.f32 0.01, %v11869_v50  ;;  %v8273_v59 = vmax.f32 %v11867_v48, %v8241_v25 }
 0xade   :  { %v8274_v10 = vmax.f32 %v11868_v6, %v8242_v19 }
 0xadf   :  { %v8275_v58 = vmax.f32 %v11869_v50, %v8243_v31  ;;  %v8201_v8 = vpop.f32.mrb[184].mxu1 }
 0xae0   :  { %v11870_v32 = vadd.f32 %v8201_v8, %v15427_v9  ;;  %v8203_v18 = vpop.f32.mrb[185].mxu1  ;;  %v8294_v51 = vpack.c.bf16 %v8274_v10, %v8272_v39 }
 0xae1   :  { %v11871_v38 = vadd.f32 %v8203_v18, %v15430_v29  ;;  %v8205_v56 = vpop.f32.mrb[186].mxu1  ;;  %v8295_v0 = vpack.c.bf16 %v8275_v58, %v8273_v59 }
 0xae2   :  { %v8244_v15 = vmul.f32 0.01, %v11870_v32  ;;  %v11872_v49 = vadd.f32 %v8205_v56, %v15427_v9  ;;  %v8207_v5 = vpop.f32.mrb[187].mxu1 }
 0xae3   :  { %v8245_v14 = vmul.f32 0.01, %v11871_v38  ;;  %v11873_v41 = vadd.f32 %v8207_v5, %v15430_v29  ;;  %8507 = vmatprep.mubr.bf16.mxu0 %v8295_v0 }
 0xae4   :  { %v8246_v16 = vmul.f32 0.01, %v11872_v49  ;;  %8508 = vmatmul.mubr.bf16.gmra.mrb[212].mxu0 %v8294_v51  ;;  %v8276_v4 = vmax.f32 %v11870_v32, %v8244_v15 }
 0xae5   :  { %v8247_v7 = vmul.f32 0.01, %v11873_v41  ;;  %v8277_v23 = vmax.f32 %v11871_v38, %v8245_v14 }
 0xae6   :  { %v8278_v36 = vmax.f32 %v11872_v49, %v8246_v16 }
 0xae7   :  { %v8279_v2 = vmax.f32 %v11873_v41, %v8247_v7  ;;  %v8211_v53 = vpop.f32.mrb[188].mxu1 }
 0xae8   :  { %v11874_v63 = vadd.f32 %v8211_v53, %v15427_v9  ;;  %v8213_v45 = vpop.f32.mrb[189].mxu1  ;;  %v8296_v61 = vpack.c.bf16 %v8278_v36, %v8276_v4 }
 0xae9   :  { %v11875_v20 = vadd.f32 %v8213_v45, %v15430_v29  ;;  %v8215_v52 = vpop.f32.mrb[190].mxu1  ;;  %v8297_v35 = vpack.c.bf16 %v8279_v2, %v8277_v23 }
 0xaea   :  { %v8248_v42 = vmul.f32 0.01, %v11874_v63  ;;  %v11876_v21 = vadd.f32 %v8215_v52, %v15427_v9  ;;  %v8217_v62 = vpop.f32.mrb[191].mxu1  ;;  %v12914_v9 = vld [vmem:[%s16846_s21 + $0x30] sm:$0xff]  }
 0xaeb   :  { %v8249_v13 = vmul.f32 0.01, %v11875_v20  ;;  %v11877_v55 = vadd.f32 %v8217_v62, %v15430_v29  ;;  %8515 = vmatprep.mubr.bf16.mxu0 %v8297_v35  ;;  %11614 = vmatprep.subr.bf16.mxu0 %v12914_v9  ;;  %v12915_v29 = vld [vmem:[%s16846_s21 + $0x38] sm:$0xff]   ;;  %s16379_s21 = sld [smem:[#allocation29 + $0xf]] }
 0xaec   :  { %v8250_v3 = vmul.f32 0.01, %v11876_v21  ;;  %8516 = vmatmul.mubr.bf16.gmra.mrb[216].mxu0 %v8296_v61  ;;  %v8280_v43 = vmax.f32 %v11874_v63, %v8248_v42 }
 0xaed   :  { %v8251_v1 = vmul.f32 0.01, %v11877_v55  ;;  %v8281_v11 = vmax.f32 %v11875_v20, %v8249_v13  ;;  %11615 = vmatpush3.bf16.msra.mxu0 %v12914_v9 }
 0xaee   :  { %v8282_v40 = vmax.f32 %v11876_v21, %v8250_v3  ;;  %11616 = vmatprep.subr.bf16.mxu0 %v12915_v29 }
 0xaef   :  { %v8283_v44 = vmax.f32 %v11877_v55, %v8251_v1 }
 0xaf0   :  { %v8298_v22 = vpack.c.bf16 %v8282_v40, %v8280_v43 }
 0xaf1   :  { %v8299_v60 = vpack.c.bf16 %v8283_v44, %v8281_v11  ;;  %11617 = vmatpush3.bf16.msra.mxu0 %v12915_v29 }
 0xaf3   :  { %8523 = vmatprep.mubr.bf16.mxu0 %v8299_v60 }
 0xaf4   :  { %8524 = vmatmul.mubr.bf16.gmra.mrb[220].mxu0 %v8298_v22 }
 0xb8f   :  { %v11449_v33 = vpop.f32.mrb[192].mxu0 }
 0xb90   :  { %v11450_v17 = vpop.f32.mrb[193].mxu0 }
 0xb91   :  { %v11451_v54 = vadd.f32 %v11450_v17, %v11449_v33  ;;  %v11452_v27 = vpop.f32.mrb[194].mxu0 }
 0xb92   :  { %v11453_v12 = vpop.f32.mrb[195].mxu0 }
 0xb93   :  { %v8470_v34 = vadd.f32 %v11451_v54, %v15485_v37  ;;  %v11454_v24 = vadd.f32 %v11453_v12, %v11452_v27 }
 0xb95   :  { %v8532_v47 = vmul.f32 0.01, %v8470_v34  ;;  %v8473_v30 = vadd.f32 %v11454_v24, %v15485_v37 }
 0xb97   :  { %v8533_v48 = vmul.f32 0.01, %v8473_v30  ;;  %v11455_v26 = vpop.f32.mrb[196].mxu0  ;;  %v8548_v57 = vmax.f32 %v8470_v34, %v8532_v47 }
 0xb98   :  { %v11456_v46 = vpop.f32.mrb[197].mxu0 }
 0xb99   :  { %v8549_v6 = vmax.f32 %v8473_v30, %v8533_v48  ;;  %v11457_v28 = vadd.f32 %v11456_v46, %v11455_v26  ;;  %v11458_v25 = vpop.f32.mrb[198].mxu0 }
 0xb9a   :  { %v11459_v50 = vpop.f32.mrb[199].mxu0 }
 0xb9b   :  { %v8478_v19 = vadd.f32 %v11457_v28, %v15485_v37  ;;  %v11460_v31 = vadd.f32 %v11459_v50, %v11458_v25  ;;  %v8564_v39 = vpack.c.bf16 %v8549_v6, %v8548_v57 }
 0xb9d   :  { %v8534_v10 = vmul.f32 0.01, %v8478_v19  ;;  %v8481_v59 = vadd.f32 %v11460_v31, %v15485_v37  ;;  %11618 = vmatprep.mubr.bf16.mxu0 %v8564_v39 }
 0xb9f   :  { %v8535_v58 = vmul.f32 0.01, %v8481_v59  ;;  %v11461_v8 = vpop.f32.mrb[200].mxu0  ;;  %v8550_v18 = vmax.f32 %v8478_v19, %v8534_v10 }
 0xba0   :  { %v11462_v32 = vpop.f32.mrb[201].mxu0 }
 0xba1   :  { %v8551_v51 = vmax.f32 %v8481_v59, %v8535_v58  ;;  %v11463_v38 = vadd.f32 %v11462_v32, %v11461_v8  ;;  %v11464_v56 = vpop.f32.mrb[202].mxu0 }
 0xba2   :  { %v11465_v0 = vpop.f32.mrb[203].mxu0 }
 0xba3   :  { %v8565_v15 = vpack.c.bf16 %v8551_v51, %v8550_v18  ;;  %v8486_v49 = vadd.f32 %v11463_v38, %v15485_v37  ;;  %v11466_v5 = vadd.f32 %v11465_v0, %v11464_v56 }
 0xba5   :  { %v8536_v14 = vmul.f32 0.01, %v8486_v49  ;;  %v8489_v41 = vadd.f32 %v11466_v5, %v15485_v37  ;;  %11619 = vmatmul.mubr.bf16.vlgmr.msra.gmra.mrb[224].mxu0 %v8565_v15 }
 0xba7   :  { %v8537_v16 = vmul.f32 0.01, %v8489_v41  ;;  %v11467_v7 = vpop.f32.mrb[204].mxu0  ;;  %v8552_v36 = vmax.f32 %v8486_v49, %v8536_v14 }
 0xba8   :  { %v11468_v4 = vpop.f32.mrb[205].mxu0 }
 0xba9   :  { %v8553_v23 = vmax.f32 %v8489_v41, %v8537_v16  ;;  %v11469_v2 = vadd.f32 %v11468_v4, %v11467_v7  ;;  %v11470_v53 = vpop.f32.mrb[206].mxu0 }
 0xbaa   :  { %v11471_v63 = vpop.f32.mrb[207].mxu0 }
 0xbab   :  { %v8494_v45 = vadd.f32 %v11469_v2, %v15485_v37  ;;  %v11472_v61 = vadd.f32 %v11471_v63, %v11470_v53  ;;  %v8566_v20 = vpack.c.bf16 %v8553_v23, %v8552_v36  ;;  %v13397_v53 = vmov 0.0   ;;  %v15520_v63 = vld [vmem:[#allocation28] ss:$0 sm:$0xff] }
 0xbac   :  { %11634 = vmatprep.subr.bf16.mxu1 %v13397_v53  ;;  %11389 = vst [vmem:[%s16852_s27 + $0xc] sm:$0x1] %v13397_v53  ;;  %11390 = vst [vmem:[%s16852_s27 + $0xd] sm:$0x1] %v13397_v53  ;;  %11650 = vmatprep.mubr.msk.bf16.mxu1 %vm13398_vm5, %v13397_v53 }
 0xbad   :  { %v8538_v52 = vmul.f32 0.01, %v8494_v45  ;;  %v8497_v35 = vadd.f32 %v11472_v61, %v15485_v37  ;;  %11622 = vmatprep.mubr.bf16.mxu0 %v8566_v20  ;;  %11391 = vst [vmem:[%s16852_s27 + $0xe] sm:$0x1] %v13397_v53 }
 0xbaf   :  { %v8539_v42 = vmul.f32 0.01, %v8497_v35  ;;  %v11473_v21 = vpop.f32.mrb[208].mxu0  ;;  %v8554_v13 = vmax.f32 %v8494_v45, %v8538_v52 }
 0xbb0   :  { %v11474_v62 = vpop.f32.mrb[209].mxu0 }
 0xbb1   :  { %v8555_v55 = vmax.f32 %v8497_v35, %v8539_v42  ;;  %v11475_v3 = vadd.f32 %v11474_v62, %v11473_v21  ;;  %v11476_v1 = vpop.f32.mrb[210].mxu0 }
 0xbb2   :  { %v11477_v43 = vpop.f32.mrb[211].mxu0 }
 0xbb3   :  { %v8502_v40 = vadd.f32 %v11475_v3, %v15485_v37  ;;  %v11478_v11 = vadd.f32 %v11477_v43, %v11476_v1  ;;  %v8567_v44 = vpack.c.bf16 %v8555_v55, %v8554_v13 }
 0xbb5   :  { %v8540_v22 = vmul.f32 0.01, %v8502_v40  ;;  %v8505_v60 = vadd.f32 %v11478_v11, %v15485_v37  ;;  %11623 = vmatmul.mubr.bf16.gmra.mrb[228].mxu0 %v8567_v44 }
 0xbb7   :  { %v8541_v9 = vmul.f32 0.01, %v8505_v60  ;;  %v11479_v29 = vpop.f32.mrb[212].mxu0  ;;  %v8556_v17 = vmax.f32 %v8502_v40, %v8540_v22 }
 0xbb8   :  { %v11480_v33 = vpop.f32.mrb[213].mxu0 }
 0xbb9   :  { %v8557_v54 = vmax.f32 %v8505_v60, %v8541_v9  ;;  %v11481_v27 = vadd.f32 %v11480_v33, %v11479_v29  ;;  %v11482_v12 = vpop.f32.mrb[214].mxu0 }
 0xbba   :  { %v11483_v34 = vpop.f32.mrb[215].mxu0 }
 0xbbb   :  { %v8510_v24 = vadd.f32 %v11481_v27, %v15485_v37  ;;  %v11484_v47 = vadd.f32 %v11483_v34, %v11482_v12  ;;  %v8568_v30 = vpack.c.bf16 %v8557_v54, %v8556_v17 }
 0xbbd   :  { %v8542_v48 = vmul.f32 0.01, %v8510_v24  ;;  %v8513_v26 = vadd.f32 %v11484_v47, %v15485_v37  ;;  %11626 = vmatprep.mubr.bf16.mxu0 %v8568_v30 }
 0xbbf   :  { %v8543_v46 = vmul.f32 0.01, %v8513_v26  ;;  %v11485_v57 = vpop.f32.mrb[216].mxu0  ;;  %v8558_v28 = vmax.f32 %v8510_v24, %v8542_v48 }
 0xbc0   :  { %v11486_v6 = vpop.f32.mrb[217].mxu0 }
 0xbc1   :  { %v8559_v25 = vmax.f32 %v8513_v26, %v8543_v46  ;;  %v11487_v50 = vadd.f32 %v11486_v6, %v11485_v57  ;;  %v11488_v19 = vpop.f32.mrb[218].mxu0 }
 0xbc2   :  { %v11489_v31 = vpop.f32.mrb[219].mxu0 }
 0xbc3   :  { %v8518_v39 = vadd.f32 %v11487_v50, %v15485_v37  ;;  %v11490_v10 = vadd.f32 %v11489_v31, %v11488_v19  ;;  %v8569_v59 = vpack.c.bf16 %v8559_v25, %v8558_v28 }
 0xbc5   :  { %v8544_v58 = vmul.f32 0.01, %v8518_v39  ;;  %v8521_v8 = vadd.f32 %v11490_v10, %v15485_v37  ;;  %11627 = vmatmul.mubr.bf16.gmra.mrb[232].mxu0 %v8569_v59 }
 0xbc7   :  { %v8545_v32 = vmul.f32 0.01, %v8521_v8  ;;  %v11491_v18 = vpop.f32.mrb[220].mxu0  ;;  %v8560_v38 = vmax.f32 %v8518_v39, %v8544_v58 }
 0xbc8   :  { %v11492_v51 = vpop.f32.mrb[221].mxu0 }
 0xbc9   :  { %v8561_v56 = vmax.f32 %v8521_v8, %v8545_v32  ;;  %v11493_v0 = vadd.f32 %v11492_v51, %v11491_v18  ;;  %v11494_v15 = vpop.f32.mrb[222].mxu0 }
 0xbca   :  { %v11495_v49 = vpop.f32.mrb[223].mxu0 }
 0xbcb   :  { %v8526_v5 = vadd.f32 %v11493_v0, %v15485_v37  ;;  %v11496_v14 = vadd.f32 %v11495_v49, %v11494_v15  ;;  %v8570_v41 = vpack.c.bf16 %v8561_v56, %v8560_v38 }
 0xbcd   :  { %v8546_v16 = vmul.f32 0.01, %v8526_v5  ;;  %v8529_v7 = vadd.f32 %v11496_v14, %v15485_v37  ;;  %11630 = vmatprep.mubr.bf16.mxu0 %v8570_v41  ;;  %v8781_v37 = vld [vmem:[%s17095_s6] sm:$0xff]  ;;  %s16544_s6 = sld [smem:[#allocation30]] }
 0xbce   :  { %8784 = vperm.xlu0 %12284, %v8781_v37  }
 0xbcf   :  { %v8547_v4 = vmul.f32 0.01, %v8529_v7  ;;  %v8562_v36 = vmax.f32 %v8526_v5, %v8546_v16 }
 0xbd1   :  { %v8563_v23 = vmax.f32 %v8529_v7, %v8547_v4 }
 0xbd3   :  { %v8571_v2 = vpack.c.bf16 %v8563_v23, %v8562_v36 }
 0xbd5   :  { %11631 = vmatmul.mubr.bf16.gmra.mrb[236].mxu0 %v8571_v2 }
 0xc78   :  { %v11620_v45 = vpop.f32.mrb[224].mxu0 }
 0xc79   :  { %v8686_v61 = vadd.f32 %v11620_v45, %v15520_v63  ;;  %v8677_v20 = vpop.f32.mrb[225].mxu0 }
 0xc7a   :  { %v8678_v52 = vadd.f32 %v15520_v63, %v8677_v20  ;;  %v11621_v35 = vpop.f32.mrb[226].mxu0 }
 0xc7b   :  { %v8742_v42 = vmul.f32 0.01, %v8686_v61  ;;  %v8689_v21 = vadd.f32 %v11621_v35, %v15520_v63  ;;  %v8680_v62 = vpop.f32.mrb[227].mxu0 }
 0xc7c   :  { %v8740_v13 = vmul.f32 0.01, %v8678_v52  ;;  %v8681_v55 = vadd.f32 %v15520_v63, %v8680_v62 }
 0xc7d   :  { %v8743_v3 = vmul.f32 0.01, %v8689_v21  ;;  %v8758_v43 = vmax.f32 %v8686_v61, %v8742_v42 }
 0xc7e   :  { %v8741_v1 = vmul.f32 0.01, %v8681_v55  ;;  %v8756_v11 = vmax.f32 %v8678_v52, %v8740_v13 }
 0xc7f   :  { %v8759_v40 = vmax.f32 %v8689_v21, %v8743_v3 }
 0xc80   :  { %v8757_v44 = vmax.f32 %v8681_v55, %v8741_v1 }
 0xc81   :  { %v8774_v22 = vpack.c.bf16 %v8759_v40, %v8758_v43 }
 0xc82   :  { %v8773_v60 = vpack.c.bf16 %v8757_v44, %v8756_v11 }
 0xc83   :  { %v8794_v48 = vsel %vm919_vm4, %v8774_v22, 0 }
 0xc84   :  { %v8791_v9 = vsel %vm919_vm4, %v8773_v60, 0  ;;  %v8772_v60 = vld [vmem:[%s17096_s17] sm:$0xf]  ;;  %s16557_s17 = sld [smem:[#allocation30 + $0x4]] }
 0xc85   :  { %11635 = vmatpush3.bf16.xpose.msra.mxu1 %v8791_v9  ;;  %v8785_v9 = vpop.permute.xlu0 %8784 }
 0xc86   :  { %11636 = vmatprep.subr.bf16.mxu1 %v13397_v53 }
 0xc88   :  { %v11624_v29 = vpop.f32.mrb[228].mxu0 }
 0xc89   :  { %v8702_v33 = vadd.f32 %v11624_v29, %v15520_v63  ;;  %v8693_v17 = vpop.f32.mrb[229].mxu0 }
 0xc8a   :  { %v8694_v54 = vadd.f32 %v15520_v63, %v8693_v17  ;;  %v11625_v27 = vpop.f32.mrb[230].mxu0 }
 0xc8b   :  { %v8746_v12 = vmul.f32 0.01, %v8702_v33  ;;  %v8705_v34 = vadd.f32 %v11625_v27, %v15520_v63  ;;  %v8696_v24 = vpop.f32.mrb[231].mxu0 }
 0xc8c   :  { %v8744_v47 = vmul.f32 0.01, %v8694_v54  ;;  %v8697_v30 = vadd.f32 %v15520_v63, %v8696_v24  ;;  %v8866_v24 = vstv %s11313_s16  ;;  %s16566_s16 = sld [smem:[#allocation30 + $0x8]] }
 0xc8d   :  { %v8747_v26 = vmul.f32 0.01, %v8705_v34  ;;  %11637 = vmatpush3.bf16.xpose.msra.mxu1 %v8794_v48  ;;  %v8762_v57 = vmax.f32 %v8702_v33, %v8746_v12  ;;  %v8862_v12 = vstv %s8856_s5  ;;  %v9189_v48 = vstv %s11326_s7  ;;  %s16559_s5 = sld [smem:[#allocation30 + $0x5]]  ;;  %s16570_s7 = sld [smem:[#allocation30 + $0xa]] }
 0xc8e   :  { %v8745_v46 = vmul.f32 0.01, %v8697_v30  ;;  %11638 = vmatprep.subr.bf16.mxu1 %v13397_v53  ;;  %v8760_v28 = vmax.f32 %v8694_v54, %v8744_v47 }
 0xc8f   :  { %v8763_v6 = vmax.f32 %v8705_v34, %v8747_v26  ;;  %v8864_v34 = vstv %s11312_s20  ;;  %s16564_s20 = sld [smem:[#allocation30 + $0x6]] }
 0xc90   :  { %v8761_v25 = vmax.f32 %v8697_v30, %v8745_v46  ;;  %v9187_v30 = vstv %s11325_s18  ;;  %s16568_s18 = sld [smem:[#allocation30 + $0x9]] }
 0xc91   :  { %v8776_v50 = vpack.c.bf16 %v8763_v6, %v8762_v57 }
 0xc92   :  { %v8775_v19 = vpack.c.bf16 %v8761_v25, %v8760_v28  ;;  %v9191_v25 = vstv %s11327_s1  ;;  %s16572_s1 = sld [smem:[#allocation30 + $0x3]] }
 0xc93   :  { %v8800_v0 = vsel %vm919_vm4, %v8776_v50, 0 }
 0xc94   :  { %v8797_v31 = vsel %vm919_vm4, %v8775_v19, 0 }
 0xc95   :  { %11639 = vmatpush3.bf16.xpose.msra.mxu1 %v8797_v31 }
 0xc96   :  { %11640 = vmatprep.subr.bf16.mxu1 %v13397_v53 }
 0xc98   :  { %v11628_v39 = vpop.f32.mrb[232].mxu0 }
 0xc99   :  { %v8718_v10 = vadd.f32 %v11628_v39, %v15520_v63  ;;  %v8709_v59 = vpop.f32.mrb[233].mxu0 }
 0xc9a   :  { %v8710_v58 = vadd.f32 %v15520_v63, %v8709_v59  ;;  %v11629_v8 = vpop.f32.mrb[234].mxu0 }
 0xc9b   :  { %v8750_v32 = vmul.f32 0.01, %v8718_v10  ;;  %v8721_v18 = vadd.f32 %v11629_v8, %v15520_v63  ;;  %v8712_v51 = vpop.f32.mrb[235].mxu0  ;;  %v9611_v8 = vstv %s11339_s30  ;;  %s16578_s30 = sld [smem:[#allocation30 + $0x7]] }
 0xc9c   :  { %v8748_v38 = vmul.f32 0.01, %v8710_v58  ;;  %v8713_v56 = vadd.f32 %v15520_v63, %v8712_v51  ;;  %v9613_v51 = vstv %s11340_s11  ;;  %s16711_s11 = sld [smem:[#allocation30 + $0xb]] }
 0xc9d   :  { %v8751_v15 = vmul.f32 0.01, %v8721_v18  ;;  %11641 = vmatpush3.bf16.xpose.msra.mxu1 %v8800_v0  ;;  %v8766_v5 = vmax.f32 %v8718_v10, %v8750_v32 }
 0xc9e   :  { %v8749_v49 = vmul.f32 0.01, %v8713_v56  ;;  %11642 = vmatprep.subr.bf16.mxu1 %v13397_v53  ;;  %v8764_v41 = vmax.f32 %v8710_v58, %v8748_v38 }
 0xc9f   :  { %v8767_v14 = vmax.f32 %v8721_v18, %v8751_v15  ;;  %v9615_v15 = vstv %s11341_s28 }
 0xca0   :  { %v8765_v16 = vmax.f32 %v8713_v56, %v8749_v49 }
 0xca1   :  { %v8778_v7 = vpack.c.bf16 %v8767_v14, %v8766_v5 }
 0xca2   :  { %v8777_v4 = vpack.c.bf16 %v8765_v16, %v8764_v41 }
 0xca3   :  { %v8806_v62 = vsel %vm919_vm4, %v8778_v7, 0 }
 0xca4   :  { %v8803_v36 = vsel %vm919_vm4, %v8777_v4, 0 }
 0xca5   :  { %11643 = vmatpush3.bf16.xpose.msra.mxu1 %v8803_v36 }
 0xca6   :  { %11644 = vmatprep.subr.bf16.mxu1 %v13397_v53 }
 0xca8   :  { %v11632_v23 = vpop.f32.mrb[236].mxu0 }
 0xca9   :  { %v8734_v2 = vadd.f32 %v11632_v23, %v15520_v63  ;;  %v8725_v37 = vpop.f32.mrb[237].mxu0 }
 0xcaa   :  { %v8726_v45 = vadd.f32 %v15520_v63, %v8725_v37  ;;  %v11633_v61 = vpop.f32.mrb[238].mxu0 }
 0xcab   :  { %v8754_v20 = vmul.f32 0.01, %v8734_v2  ;;  %v8737_v52 = vadd.f32 %v11633_v61, %v15520_v63  ;;  %v8728_v35 = vpop.f32.mrb[239].mxu0 }
 0xcac   :  { %v8752_v42 = vmul.f32 0.01, %v8726_v45  ;;  %v8729_v21 = vadd.f32 %v15520_v63, %v8728_v35 }
 0xcad   :  { %v8755_v13 = vmul.f32 0.01, %v8737_v52  ;;  %11645 = vmatpush3.bf16.xpose.msra.mxu1 %v8806_v62  ;;  %v8770_v3 = vmax.f32 %v8734_v2, %v8754_v20 }
 0xcae   :  { %v8753_v55 = vmul.f32 0.01, %v8729_v21  ;;  %11646 = vmatprep.subr.bf16.mxu1 %v13397_v53  ;;  %v8768_v43 = vmax.f32 %v8726_v45, %v8752_v42 }
 0xcaf   :  { %v8771_v1 = vmax.f32 %v8737_v52, %v8755_v13 }
 0xcb0   :  { %v8769_v40 = vmax.f32 %v8729_v21, %v8753_v55 }
 0xcb1   :  { %v8780_v11 = vpack.c.bf16 %v8771_v1, %v8770_v3 }
 0xcb2   :  { %v8779_v44 = vpack.c.bf16 %v8769_v40, %v8768_v43  ;;  %v10035_v43 = vstv %s15626_s8  ;;  %v10037_v40 = vstv %s15628_s10 }
 0xcb3   :  { %v8812_v63 = vsel %vm919_vm4, %v8780_v11, 0 }
 0xcb4   :  { %v8809_v22 = vsel %vm919_vm4, %v8779_v44, 0 }
 0xcb5   :  { %11647 = vmatpush3.bf16.xpose.msra.mxu1 %v8809_v22 }
 0xcb6   :  { %11648 = vmatprep.subr.bf16.mxu1 %v13397_v53 }
 0xcbd   :  { %11649 = vmatpush3.bf16.xpose.msra.mxu1 %v8812_v63 }
 0xcc4   :  { %11651 = vmatmul.mubr.msk.bf16.vlgmr.msra.gmra.mrb[192].mxu1 %vm919_vm4, %v8772_v60 }
 0xd97   :  { %v8848_v29 = vpop.f32.mrb[192].mxu1 }
 0xd98   :  { %v8849_v33 = vadd.f32 %v8848_v29, %v8785_v9  ;;  %v11652_v17 = vpop.f32.mrb[193].mxu1 }
 0xd99   :  { %v8851_v53 = vpop.f32.mrb[194].mxu1 }
 0xd9a   :  { %v8854_v54 = vmul.f32 0.01, %v8849_v33  ;;  %v11653_v27 = vpop.f32.mrb[195].mxu1 }
 0xd9c   :  { %v15557_v47 = vmax.f32 %v8849_v33, %v8854_v54 }
 0xd9e   :  { %17097 = vst [vmem:[#allocation51_spill] sm:$0xff] %v15557_v47  ;;  %v15560_v26 = vmul.f32 %v8862_v12, %v15557_v47  ;;  %v15563_v46 = vmul.f32 %v8864_v34, %v15557_v47  ;;  %v15566_v57 = vmul.f32 %v8866_v24, %v15557_v47  ;;  %v15569_v6 = vmul.f32 %v9187_v30, %v15557_v47 }
 0xd9f   :  { %v15572_v28 = vmul.f32 %v9189_v48, %v15557_v47  ;;  %v15581_v10 = vmul.f32 %v9191_v25, %v15557_v47  ;;  %v15593_v56 = vmul.f32 %v9611_v8, %v15557_v47  ;;  %v15607_v41 = vmul.f32 %v9613_v51, %v15557_v47 }
 0xda0   :  { %17098 = vst [vmem:[#allocation52_spill] sm:$0xff] %v15569_v6  ;;  %v8874_v50 = vmul.f32 %v15560_v26, %v15560_v26  ;;  %v8875_v19 = vmul.f32 %v15563_v46, %v15563_v46  ;;  %v8876_v31 = vmul.f32 %v15566_v57, %v15566_v57  ;;  %v9199_v59 = vmul.f32 %v15569_v6, %v15569_v6 }
 0xda1   :  { %17099 = vst [vmem:[#allocation53_spill] sm:$0xff] %v15581_v10  ;;  %v9200_v58 = vmul.f32 %v15572_v28, %v15572_v28  ;;  %v9201_v38 = vmul.f32 %v15581_v10, %v15581_v10  ;;  %17100 = vst [vmem:[#allocation54_spill] sm:$0xff] %v15593_v56  ;;  %v15611_v16 = vmul.f32 %v9615_v15, %v15557_v47  ;;  %v10039_v24 = vstv %s15646_s19 }
 0xda2   :  { %v8880_v39 = vadd.f32 %v8875_v19, %v8874_v50  ;;  %17101 = vst [vmem:[#allocation55_spill] sm:$0xff] %v15607_v41  ;;  %v9623_v7 = vmul.f32 %v15593_v56, %v15593_v56  ;;  %v9624_v2 = vmul.f32 %v15607_v41, %v15607_v41  ;;  %v15682_v9 = vmul.f32 %v10035_v43, %v15557_v47 }
 0xda3   :  { %v9205_v18 = vadd.f32 %v9200_v58, %v9199_v59  ;;  %17102 = vst [vmem:[#allocation57_spill] sm:$0xff] %v15611_v16  ;;  %v9625_v37 = vmul.f32 %v15611_v16, %v15611_v16  ;;  %v15685_v29 = vmul.f32 %v10037_v40, %v15557_v47  ;;  %v15719_v51 = vmul.f32 %v10039_v24, %v15557_v47 }
 0xda4   :  { %v15587_v32 = vadd.f32 %v8880_v39, %v8876_v31  ;;  %v9629_v45 = vadd.f32 %v9624_v2, %v9623_v7  ;;  %17109 = vst [vmem:[#allocation44_spill] sm:$0xff] %v15682_v9  ;;  %v15885_v56 = vmul.f32 %v15581_v10, %v15569_v6 }
 0xda5   :  { %v15604_v14 = vadd.f32 %v9205_v18, %v9201_v38  ;;  %17110 = vst [vmem:[#allocation46_spill] sm:$0xff] %v15685_v29  ;;  %17113 = vst [vmem:[#allocation43_spill] sm:$0xff] %v15719_v51 }
 0xda6   :  { %12916 = vrsqrt.f32 %v15587_v32  ;;  %v15596_v0 = vsub.f32 %v8874_v50, %v15587_v32  ;;  %v15599_v49 = vsub.f32 %v8875_v19, %v15587_v32  ;;  %v15602_v5 = vsub.f32 %v8876_v31, %v15587_v32 }
 0xda7   :  { %12918 = vrsqrt.f32 %v15604_v14  ;;  %v15616_v4 = vsub.f32 %v9199_v59, %v15604_v14  ;;  %v15619_v36 = vsub.f32 %v9200_v58, %v15604_v14  ;;  %v15622_v23 = vsub.f32 %v9201_v38, %v15604_v14 }
 0xda8   :  { %v15632_v20 = vadd.f32 %v9629_v45, %v9625_v37  ;;  %vm8884_vm6 = vcmp.eq.f32.partialorder %v15587_v32, inf  ;;  %v8887_v35 = vand.u32 2147483648, %v15587_v32  ;;  %vm8886_vm7 = vcmp.eq.f32.partialorder %v15587_v32, 0.0 }
 0xda9   :  { %17103 = vst [vmem:[#allocation56_spill] sm:$0xff] %v15619_v36  ;;  %17104 = vst [vmem:[#allocation59_spill] sm:$0xff] %v15622_v23  ;;  %vm9209_vm9 = vcmp.eq.f32.partialorder %v15604_v14, inf  ;;  %v9212_v44 = vand.u32 2147483648, %v15604_v14  ;;  %vm9211_vm10 = vcmp.eq.f32.partialorder %v15604_v14, 0.0  ;;  %v15706_v50 = vmul.f32 %v15682_v9, %v15682_v9 }
 0xdaa   :  { %17105 = vst [vmem:[#allocation58_spill] sm:$0xff] %v15632_v20  ;;  %12920 = vrsqrt.f32 %v15632_v20  ;;  %v15651_v13 = vsub.f32 %v9623_v7, %v15632_v20  ;;  %v15654_v55 = vsub.f32 %v9624_v2, %v15632_v20  ;;  %v15657_v3 = vsub.f32 %v9625_v37, %v15632_v20 }
 0xdab   :  { %17111 = vst [vmem:[#allocation45_spill] sm:$0xff] %v15706_v50  ;;  %v15710_v19 = vmul.f32 %v15685_v29, %v15685_v29  ;;  %vm9633_vm12 = vcmp.eq.f32.partialorder %v15632_v20, inf  ;;  %v9636_v7 = vand.u32 2147483648, %v15632_v20  ;;  %vm9635_vm13 = vcmp.eq.f32.partialorder %v15632_v20, 0.0 }
 0xdac   :  { %17106 = vst [vmem:[#allocation49_spill] sm:$0xff] %v15651_v13  ;;  %17107 = vst [vmem:[#allocation48_spill] sm:$0xff] %v15654_v55 }
 0xdad   :  { %17108 = vst [vmem:[#allocation50_spill] sm:$0xff] %v15657_v3  ;;  %17112 = vst [vmem:[#allocation47_spill] sm:$0xff] %v15710_v19  ;;  %v10053_v45 = vadd.f32 %v15710_v19, %v15706_v50 }
 0xdb0   :  { %v12917_v61 = vpop.eup %12916 }
 0xdb1   :  { %v8883_v52 = vmul.f32 %v12917_v61, %v15587_v32  ;;  %v12919_v21 = vpop.eup %12918 }
 0xdb2   :  { %v9208_v1 = vmul.f32 %v12919_v21, %v15604_v14  ;;  %v15732_v21 = vmul.f32 %v15719_v51, %v15719_v51 }
 0xdb3   :  { %v8885_v42 = vsel %vm8884_vm6, %v15587_v32, %v8883_v52 }
 0xdb4   :  { %v15648_v62 = vsel %vm8886_vm7, %v8887_v35, %v8885_v42  ;;  %v9210_v63 = vsel %vm9209_vm9, %v15604_v14, %v9208_v1  ;;  %v12921_v30 = vpop.eup %12920  ;;  %17115 = vst [vmem:[#allocation61_spill] sm:$0xff] %v15732_v21 }
 0xdb5   :  { %vm8889_vm8 = vcmp.lt.f32.partialorder %v15648_v62, 0.01  ;;  %v15679_v60 = vsel %vm9211_vm10, %v9212_v44, %v9210_v63  ;;  %v9632_v58 = vmul.f32 %v12921_v30, %v15632_v20  ;;  %v15738_v44 = vadd.f32 %v10053_v45, %v15732_v21 }
 0xdb6   :  { %v15670_v11 = vsel %vm8889_vm8, 1.0, %v15648_v62  ;;  %vm9214_vm11 = vcmp.lt.f32.partialorder %v15679_v60, 0.01 }
 0xdb7   :  { %v15675_v22 = vmul.f32 0.5, %v15670_v11  ;;  %v15696_v34 = vsel %vm9214_vm11, 1.0, %v15679_v60  ;;  %v9634_v15 = vsel %vm9633_vm12, %v15632_v20, %v9632_v58  ;;  %17116 = vst [vmem:[#allocation62_spill] sm:$0xff] %v15738_v44  ;;  %v16905_v58 = vmov 2131351028  }
 0xdb8   :  { %v15702_v25 = vmul.f32 0.5, %v15696_v34  ;;  %v15728_v52 = vsel %vm9635_vm13, %v9636_v7, %v9634_v15  ;;  %v16913_v7 = vmov 920167782   ;;  %12922 = vrsqrt.f32 %v15738_v44 }
 0xdb9   :  { %v16904_v33 = vand.u32 2147483647, %v15675_v22  ;;  %v8895_v17 = vand.u32 2139095040, %v15675_v22  ;;  %17114 = vst [vmem:[#allocation60_spill] sm:$0xff] %v15728_v52  ;;  %vm9638_vm15 = vcmp.lt.f32.partialorder %v15728_v52, 0.01 }
 0xdba   :  { %v16903_v8 = vand.u32 2147483647, %v15702_v25  ;;  %v9220_v18 = vand.u32 2139095040, %v15702_v25  ;;  %vm10057_vm13 = vcmp.eq.f32.partialorder %v15738_v44, inf }
 0xdbb   :  { %v8896_v12 = vshrl.u32 %v8895_v17, 23  ;;  %v8899_v48 = vand.u32 8388607, %v16904_v33  ;;  %v16911_v17 = vmov 683565275  }
 0xdbc   :  { %v9221_v37 = vshrl.u32 %v9220_v18, 23  ;;  %v9224_v61 = vand.u32 8388607, %v16903_v8  ;;  %v16929_v8 = vmov 1326507024  }
 0xdbd   :  { %v11317_v31 = vadd.s32 4294967169, %v8896_v12  ;;  %v8900_v2 = vor.u32 8388608, %v8899_v48  ;;  %v16909_v48 = vmov 2475754826  }
 0xdbe   :  { %v11331_v42 = vadd.s32 4294967169, %v9221_v37  ;;  %v9225_v24 = vor.u32 8388608, %v9224_v61 }
 0xdbf   :  { %v8902_v38 = vadd.s32 1, %v11317_v31  ;;  %v15734_v40 = vshll.u32 %v8900_v2, 8 }
 0xdc0   :  { %v9227_v30 = vadd.s32 1, %v11331_v42 }
 0xdc1   :  { %vm8903_vm14 = vcmp.gt.s32.totalorder %v8902_v38, 0 }
 0xdc2   :  { %v8904_v35 = vsel %vm8903_vm14, %v8902_v38, 0  ;;  %v16907_v38 = vmov 2102212464   ;;  %vm9228_vm2 = vcmp.gt.s32.totalorder %v9227_v30, 0 }
 0xdc3   :  { %v8905_v1 = vshrl.u32 %v8904_v35, 5  ;;  %v8906_v43 = vand.u32 31, %v8904_v35  ;;  %v9229_v53 = vsel %vm9228_vm2, %v9227_v30, 0 }
 0xdc5   :  { %v8907_v63 = vsub.s32 32, %v8906_v43  ;;  %v8909_v12 = vshll.u32 %v16911_v17, %v8906_v43  ;;  %v8912_v31 = vshll.u32 %v16909_v48, %v8906_v43  ;;  %v8915_v18 = vshll.u32 %v16905_v58, %v8906_v43 }
 0xdc6   :  { %v8918_v15 = vshll.u32 %v16907_v38, %v8906_v43  ;;  %v8921_v2 = vshll.u32 %v16913_v7, %v8906_v43  ;;  %vm8924_vm0 = vcmp.lt.s32.totalorder %v8905_v1, 1  ;;  %vm8926_vm1 = vcmp.lt.s32.totalorder %v8905_v1, 3 }
 0xdc7   :  { %v8910_v37 = vshrl.u32 %v16909_v48, %v8907_v63  ;;  %v8913_v45 = vshrl.u32 %v16905_v58, %v8907_v63  ;;  %v8916_v35 = vshrl.u32 %v16907_v38, %v8907_v63  ;;  %v8908_v61 = vshrl.u32 %v16911_v17, %v8907_v63 }
 0xdc8   :  { %v8919_v42 = vshrl.u32 %v16913_v7, %v8907_v63  ;;  %v8922_v33 = vshrl.u32 %v16929_v8, %v8907_v63  ;;  %vm8927_vm3 = vcmp.lt.s32.totalorder %v8905_v1, 4  ;;  %vm8925_vm4 = vcmp.lt.s32.totalorder %v8905_v1, 2 }
 0xdc9   :  { %v8911_v59 = vor.u32 %v8910_v37, %v8909_v12  ;;  %v8914_v39 = vor.u32 %v8913_v45, %v8912_v31  ;;  %v8917_v27 = vor.u32 %v8916_v35, %v8915_v18  ;;  %v15758_v12 = vsel %vm9638_vm15, 1.0, %v15728_v52 }
 0xdca   :  { %v8920_v43 = vor.u32 %v8919_v42, %v8918_v15  ;;  %v8923_v54 = vor.u32 %v8922_v33, %v8921_v2  ;;  %17117 = vst [vmem:[#allocation63_spill] sm:$0xff] %v15758_v12  ;;  %v9231_v31 = vand.u32 31, %v9229_v53  ;;  %v9230_v37 = vshrl.u32 %v9229_v53, 5 }
 0xdcb   :  { %v8928_v58 = vsel %vm8924_vm0, %v8908_v61, %v8911_v59  ;;  %v8929_v38 = vsel %vm8927_vm3, %v8917_v27, 2102212464  ;;  %v8932_v48 = vsel %vm8924_vm0, %v8911_v59, %v8914_v39  ;;  %v8936_v17 = vsel %vm8924_vm0, %v8914_v39, %v8917_v27 }
 0xdcc   :  { %v8930_v7 = vsel %vm8926_vm1, %v8914_v39, %v8929_v38  ;;  %v8933_v21 = vsel %vm8927_vm3, %v8920_v43, 920167782  ;;  %v8937_v63 = vsel %vm8927_vm3, %v8923_v54, 1326507024  ;;  %v9232_v45 = vsub.s32 32, %v9231_v31 }
 0xdcd   :  { %v8934_v33 = vsel %vm8926_vm1, %v8917_v27, %v8933_v21  ;;  %v8938_v30 = vsel %vm8926_vm1, %v8920_v43, %v8937_v63  ;;  %v8931_v18 = vsel %vm8925_vm4, %v8928_v58, %v8930_v7  ;;  %v15772_v27 = vshll.u32 %v9225_v24, 8 }
 0xdce   :  { %v8935_v15 = vsel %vm8925_vm4, %v8932_v48, %v8934_v33  ;;  %v8939_v59 = vsel %vm8925_vm4, %v8936_v17, %v8938_v30  ;;  %v15775_v21 = vmul.f32 0.5, %v15758_v12  ;;  %v8947_v1 = vmul.u32 %v15734_v40, %v8931_v18 }
 0xdcf   :  { %v15764_v39 = vmul.u32.u64.low %v15734_v40, %v8939_v59  ;;  %v15765_v38 = vmul.u32.u64.high %v15734_v40, %v8939_v59, %v15764_v39  ;;  %v15768_v54 = vmul.u32.u64.low %v15734_v40, %v8935_v15  ;;  %v15769_v2 = vmul.u32.u64.high %v15734_v40, %v8935_v15, %v15768_v54 }
 0xdd0   :  { %17118 = vst [vmem:[#allocation64_spill] sm:$0xff] %v15775_v21  ;;  %v17119_v17 = vmov 683565275   ;;  %v17120_v58 = vmov 2475754826   ;;  %v9247_v19 = vshrl.u32 %v16929_v8, %v9232_v45  ;;  %vm9249_vm6 = vcmp.lt.s32.totalorder %v9230_v37, 1 }
 0xdd1   :  { %v9234_v48 = vshll.u32 %v17119_v17, %v9231_v31  ;;  %v9237_v7 = vshll.u32 %v17120_v58, %v9231_v31  ;;  %v17121_v35 = vmov 2131351028   ;;  %v9235_v42 = vshrl.u32 %v17120_v58, %v9232_v45 }
 0xdd2   :  { %v9240_v61 = vshll.u32 %v17121_v35, %v9231_v31  ;;  %v9238_v43 = vshrl.u32 %v17121_v35, %v9232_v45  ;;  %v17122_v63 = vmov 2102212464   ;;  %vm8949_vm5 = vc.u32 %v15765_v38, %v15768_v54 }
 0xdd3   :  { %v9241_v53 = vshrl.u32 %v17122_v63, %v9232_v45  ;;  %v9243_v24 = vshll.u32 %v17122_v63, %v9231_v31  ;;  %v8950_v33 = vadd.s32 1, %v15769_v2  ;;  %v17123_v40 = vmov 920167782  }
 0xdd4   :  { %v9244_v30 = vshrl.u32 %v17123_v40, %v9232_v45  ;;  %v9246_v18 = vshll.u32 %v17123_v40, %v9231_v31  ;;  %v9236_v15 = vor.u32 %v9235_v42, %v9234_v48  ;;  %v9239_v59 = vor.u32 %v9238_v43, %v9237_v7  ;;  %v12923_v48 = vpop.eup %12922 }
 0xdd5   :  { %v9242_v39 = vor.u32 %v9241_v53, %v9240_v61  ;;  %v8951_v50 = vsel %vm8949_vm5, %v8950_v33, %v15769_v2  ;;  %vm9252_vm7 = vcmp.lt.s32.totalorder %v9230_v37, 4  ;;  %vm9251_vm9 = vcmp.lt.s32.totalorder %v9230_v37, 3 }
 0xdd6   :  { %v9245_v51 = vor.u32 %v9244_v30, %v9243_v24  ;;  %v8952_v29 = vadd.s32 %v8951_v50, %v8947_v1  ;;  %v9248_v9 = vor.u32 %v9247_v19, %v9246_v18  ;;  %v9233_v55 = vshrl.u32 %v17119_v17, %v9232_v45 }
 0xdd7   :  { %v9254_v3 = vsel %vm9252_vm7, %v9242_v39, 2102212464  ;;  %v9257_v13 = vsel %vm9249_vm6, %v9236_v15, %v9239_v59  ;;  %v9261_v31 = vsel %vm9249_vm6, %v9239_v59, %v9242_v39  ;;  %vm9250_vm10 = vcmp.lt.s32.totalorder %v9230_v37, 2 }
 0xdd8   :  { %v9258_v52 = vsel %vm9252_vm7, %v9245_v51, 920167782  ;;  %v8953_v7 = vadd.s32 536870912, %v8952_v29  ;;  %v9262_v2 = vsel %vm9252_vm7, %v9248_v9, 1326507024  ;;  %v9253_v42 = vsel %vm9249_vm6, %v9233_v55, %v9236_v15 }
 0xdd9   :  { %v9259_v61 = vsel %vm9251_vm9, %v9242_v39, %v9258_v52  ;;  %v9255_v43 = vsel %vm9251_vm9, %v9239_v59, %v9254_v3  ;;  %v9263_v19 = vsel %vm9251_vm9, %v9245_v51, %v9262_v2  ;;  %v9197_v33 = vstv %s15788_s12 }
 0xdda   :  { %v9260_v50 = vsel %vm9250_vm10, %v9257_v13, %v9259_v61  ;;  %v8954_v1 = vshrl.u32 %v8953_v7, 30  ;;  %v9264_v45 = vsel %vm9250_vm10, %v9261_v31, %v9263_v19  ;;  %v9644_v55 = vand.u32 2139095040, %v15775_v21 }
 0xddb   :  { %v15798_v53 = vmul.u32.u64.low %v15772_v27, %v9260_v50  ;;  %v15799_v24 = vmul.u32.u64.high %v15772_v27, %v9260_v50, %v15798_v53  ;;  %v15804_v30 = vmul.u32.u64.low %v15772_v27, %v9264_v45  ;;  %v15805_v52 = vmul.u32.u64.high %v15772_v27, %v9264_v45, %v15804_v30 }
 0xddc   :  { %v17124_v3 = vstv %s15635_s15  ;;  %v17125_v9 = vstv %s15637_s4  ;;  %v8955_v18 = vshll.u32 %v8954_v1, 30  ;;  %v9256_v15 = vsel %vm9250_vm10, %v9253_v42, %v9255_v43 }
 0xddd   :  { %v15811_v13 = vmul.f32 %v17124_v3, %v15557_v47  ;;  %v15816_v51 = vmul.f32 %v17125_v9, %v15557_v47  ;;  %v17126_v59 = vstv %s15642_s2  ;;  %v15826_v31 = vmul.f32 %v15563_v46, %v15560_v26 }
 0xdde   :  { %v15822_v39 = vmul.f32 %v17126_v59, %v15557_v47  ;;  %v15830_v7 = vmul.f32 %v15566_v57, %v15560_v26  ;;  %v9645_v61 = vshrl.u32 %v9644_v55, 23  ;;  %v15834_v2 = vmul.f32 %v15566_v57, %v15563_v46 }
 0xddf   :  { %v15836_v50 = vsub.s32 %v8952_v29, %v8955_v18  ;;  %v9275_v37 = vadd.s32 1, %v15799_v24  ;;  %v10056_v42 = vmul.f32 %v12923_v48, %v15738_v44  ;;  %v17127_v43 = vstv %s15660_s25 }
 0xde0   :  { %v15843_v19 = vmul.f32 %v17127_v43, %v15557_v47  ;;  %v9272_v45 = vmul.u32 %v15772_v27, %v9256_v15  ;;  %vm9274_vm12 = vc.u32 %v15805_v52, %v15798_v53  ;;  %v11345_v30 = vadd.s32 4294967169, %v9645_v61 }
 0xde1   :  { %v8958_v55 = vsub.s32 0, %v15836_v50  ;;  %v17129_v3 = vstv %s15662_s0  ;;  %v15855_v9 = vmul.f32 %v9197_v33, %v15557_v47  ;;  %v9276_v48 = vsel %vm9274_vm12, %v9275_v37, %v15799_v24 }
 0xde2   :  { %17128 = vst [vmem:[#allocation65_spill] sm:$0xff] %v15843_v19  ;;  %v15852_v29 = vmul.f32 %v17129_v3, %v15557_v47  ;;  %v9277_v18 = vadd.s32 %v9276_v48, %v9272_v45  ;;  %v16939_v59 = vand.u32 2147483647, %v15775_v21  ;;  %v9651_v43 = vadd.s32 1, %v11345_v30 }
 0xde3   :  { %17131 = vst [vmem:[#allocation67_spill] sm:$0xff] %v15855_v9  ;;  %v11318_v27 = vmin.u32 %v8958_v55, %v15836_v50  ;;  %v15862_v15 = vmul.f32 0.16666667, %v15587_v32  ;;  %v15866_v61 = vmul.f32 %v15572_v28, %v15569_v6  ;;  %v10058_v33 = vsel %vm10057_vm13, %v15738_v44, %v10056_v42 }
 0xde4   :  { %17130 = vst [vmem:[#allocation66_spill] sm:$0xff] %v15852_v29  ;;  %v15870_v3 = vmul.f32 0.041666668, %v15587_v32  ;;  %v9278_v24 = vadd.s32 536870912, %v9277_v18  ;;  %vm9652_vm14 = vcmp.gt.s32.totalorder %v9651_v43, 0  ;;  %v10060_v37 = vand.u32 2147483648, %v15738_v44 }
 0xde5   :  { %v8960_v45 = vclz %v11318_v27  ;;  %v8978_v30 = vsub.s32 4, %v8954_v1  ;;  %v15874_v55 = vmul.f32 0.008333334, %v15587_v32  ;;  %vm10059_vm0 = vcmp.eq.f32.partialorder %v15738_v44, 0.0 }
 0xde6   :  { %v15877_v48 = vshrl.u32 %v9278_v24, 30  ;;  %v9648_v8 = vand.u32 8388607, %v16939_v59  ;;  %v9653_v42 = vsel %vm9652_vm14, %v9651_v43, 0  ;;  %v15881_v16 = vsel %vm10059_vm0, %v10060_v37, %v10058_v33 }
 0xde7   :  { %17132 = vst [vmem:[#allocation68_spill] sm:$0xff] %v15881_v16  ;;  %v11319_v41 = vadd.s32 4294967294, %v8960_v45  ;;  %v15889_v27 = vmul.f32 %v15581_v10, %v15572_v28  ;;  %v9655_v32 = vand.u32 31, %v9653_v42  ;;  %vm8894_vm1 = vcmp.lt.s32.totalorder %v15675_v22, 0 }
 0xde8   :  { %v9280_v43 = vshll.u32 %v15877_v48, 30  ;;  %v8979_v33 = vsel %vm8894_vm1, %v8978_v30, %v8954_v1  ;;  %vm10062_vm3 = vcmp.lt.f32.partialorder %v15881_v16, 0.01  ;;  %v9649_v20 = vor.u32 8388608, %v9648_v8 }
 0xde9   :  { %17133 = vst [vmem:[#allocation69_spill] sm:$0xff] %v15889_v27  ;;  %vm11320_vm2 = vcmp.lt.s32.totalorder %v11319_v41, 0  ;;  %v9656_v37 = vsub.s32 32, %v9655_v32  ;;  %v17134_v12 = vand.u32 2147483647, %v15675_v22  ;;  %v8948_v44 = vadd.s32 %v15768_v54, %v15765_v38 }
 0xdea   :  { %v8963_v45 = vsel %vm11320_vm2, 0, %v11319_v41  ;;  %v15899_v47 = vsub.s32 %v9277_v18, %v9280_v43  ;;  %v9273_v41 = vadd.s32 %v15798_v53, %v15805_v52  ;;  %v15927_v53 = vshll.u32 %v9649_v20, 8 }
 0xdeb   :  { %vm15903_vm4 = vcmp.le.f32.partialorder %v17134_v12, 0.7853982  ;;  %v8964_v21 = vsub.s32 32, %v8963_v45  ;;  %v8968_v1 = vsub.s32 4294967266, %v8963_v45  ;;  %v15919_v12 = vsel %vm10062_vm3, 1.0, %v15881_v16 }
 0xdec   :  { %v15911_v30 = vsel %vm15903_vm4, 0, %v8979_v33  ;;  %v9283_v8 = vsub.s32 0, %v15899_v47  ;;  %17137 = vst [vmem:[#allocation70_spill] sm:$0xff] %v15919_v12  ;;  %v8965_v18 = vshll.u32 %v15836_v50, %v8963_v45  ;;  %v9659_v54 = vshrl.u32 %v17120_v58, %v9656_v37 }
 0xded   :  { %v8966_v43 = vshrl.u32 %v8948_v44, %v8964_v21  ;;  %v8969_v38 = vadd.s32 127, %v8968_v1  ;;  %v15924_v33 = vshrl.u32 %v9653_v42, 5  ;;  %v9662_v9 = vshrl.u32 %v17121_v35, %v9656_v37 }
 0xdee   :  { %v11332_v59 = vmin.u32 %v9283_v8, %v15899_v47  ;;  %v9658_v19 = vshll.u32 %v17119_v17, %v9655_v32  ;;  %v15931_v16 = vmul.f32 0.5, %v15919_v12  ;;  %v9657_v44 = vshrl.u32 %v17119_v17, %v9656_v37 }
 0xdef   :  { %v8967_v52 = vor.u32 %v8966_v43, %v8965_v18  ;;  %v8970_v29 = vshll.u32 %v8969_v38, 23  ;;  %v9661_v21 = vshll.u32 %v17120_v58, %v9655_v32  ;;  %v9664_v45 = vshll.u32 %v17121_v35, %v9655_v32 }
 0xdf0   :  { %17138 = vst [vmem:[#allocation71_spill] sm:$0xff] %v15931_v16  ;;  %v9285_v50 = vclz %v11332_v59  ;;  %v9660_v8 = vor.u32 %v9659_v54, %v9658_v19  ;;  %v9665_v20 = vshrl.u32 %v17122_v63, %v9656_v37  ;;  %v9667_v43 = vshll.u32 %v17122_v63, %v9655_v32 }
 0xdf1   :  { %v8971_v42 = vor.u32 4788187, %v8970_v29  ;;  %v8974_v1 = vcvt.s32.f32 %v8967_v52  ;;  %v9663_v18 = vor.u32 %v9662_v9, %v9661_v21  ;;  %v9668_v38 = vshrl.u32 %v17123_v40, %v9656_v37 }
 0xdf2   :  { %v11333_v23 = vadd.s32 4294967294, %v9285_v50  ;;  %v9666_v27 = vor.u32 %v9665_v20, %v9664_v45  ;;  %v9670_v59 = vshll.u32 %v17123_v40, %v9655_v32  ;;  %v17139_v6 = vmov 1326507024  }
 0xdf3   :  { %v8972_v12 = vand.u32 2147483647, %v8971_v42  ;;  %v9671_v36 = vshrl.u32 %v17139_v6, %v9656_v37  ;;  %v9669_v10 = vor.u32 %v9668_v38, %v9667_v43  ;;  %vm9673_vm6 = vcmp.lt.s32.totalorder %v15924_v33, 1 }
 0xdf4   :  { %vm11334_vm5 = vcmp.lt.s32.totalorder %v11333_v23, 0  ;;  %vm9674_vm7 = vcmp.lt.s32.totalorder %v15924_v33, 2  ;;  %vm9675_vm9 = vcmp.lt.s32.totalorder %v15924_v33, 3  ;;  %vm9676_vm10 = vcmp.lt.s32.totalorder %v15924_v33, 4 }
 0xdf5   :  { %v8975_v19 = vmul.f32 %v8974_v1, %v8972_v12  ;;  %v9288_v29 = vsel %vm11334_vm5, 0, %v11333_v23  ;;  %v9672_v54 = vor.u32 %v9671_v36, %v9670_v59  ;;  %v9678_v37 = vsel %vm9676_vm10, %v9666_v27, 2102212464 }
 0xdf6   :  { %v9289_v9 = vsub.s32 32, %v9288_v29  ;;  %v9290_v52 = vshll.u32 %v15899_v47, %v9288_v29  ;;  %v9293_v50 = vsub.s32 4294967266, %v9288_v29  ;;  %v9681_v21 = vsel %vm9673_vm6, %v9660_v8, %v9663_v18 }
 0xdf7   :  { %v8976_v32 = vxor.u32 2147483648, %v8975_v19  ;;  %v9682_v12 = vsel %vm9676_vm10, %v9669_v10, 920167782  ;;  %v9677_v45 = vsel %vm9673_vm6, %v9657_v44, %v9660_v8  ;;  %v9679_v1 = vsel %vm9675_vm9, %v9663_v18, %v9678_v37 }
 0xdf8   :  { %v9291_v23 = vshrl.u32 %v9273_v41, %v9289_v9  ;;  %v9294_v36 = vadd.s32 127, %v9293_v50  ;;  %v9683_v47 = vsel %vm9675_vm9, %v9666_v27, %v9682_v12  ;;  %v9685_v43 = vsel %vm9673_vm6, %v9663_v18, %v9666_v27 }
 0xdf9   :  { %v8977_v42 = vsel %vm8894_vm1, %v8976_v32, %v8975_v19  ;;  %v9684_v20 = vsel %vm9674_vm7, %v9681_v21, %v9683_v47  ;;  %v9686_v38 = vsel %vm9676_vm10, %v9672_v54, 1326507024  ;;  %v15977_v18 = vmul.f32 0.16666667, %v15604_v14 }
 0xdfa   :  { %v8980_v41 = vsel %vm15903_vm4, %v15675_v22, %v8977_v42  ;;  %v9292_v44 = vor.u32 %v9291_v23, %v9290_v52  ;;  %v9295_v8 = vshll.u32 %v9294_v36, 23  ;;  %v9687_v59 = vsel %vm9675_vm9, %v9669_v10, %v9686_v38 }
 0xdfb   :  { %12924 = vcosq.f32 %v8980_v41  ;;  %v15972_v19 = vmul.u32.u64.low %v15927_v53, %v9684_v20  ;;  %v15973_v29 = vmul.u32.u64.high %v15927_v53, %v9684_v20, %v15972_v19  ;;  %v9688_v24 = vsel %vm9674_vm7, %v9685_v43, %v9687_v59 }
 0xdfc   :  { %12926 = vsinq.f32 %v8980_v41  ;;  %v9296_v27 = vor.u32 4788187, %v9295_v8  ;;  %v8985_v9 = vadd.s32 3, %v15911_v30  ;;  %v15983_v54 = vmul.f32 0.041666668, %v15604_v14 }
 0xdfd   :  { %v15986_v10 = vmul.u32.u64.low %v15927_v53, %v9688_v24  ;;  %v15987_v52 = vmul.u32.u64.high %v15927_v53, %v9688_v24, %v15986_v10  ;;  %v9299_v32 = vcvt.s32.f32 %v9292_v44  ;;  %v9680_v37 = vsel %vm9674_vm7, %v9677_v45, %v9679_v1 }
 0xdfe   :  { %v9297_v50 = vand.u32 2147483647, %v9296_v27  ;;  %v10068_v21 = vand.u32 2139095040, %v15931_v16  ;;  %12928 = vrcp.f32 %v15670_v11  ;;  %v9303_v12 = vsub.s32 4, %v15877_v48 }
 0xdff   :  { %v15995_v23 = vmul.f32 0.008333334, %v15604_v14  ;;  %v9699_v36 = vadd.s32 1, %v15973_v29  ;;  %v9089_v47 = vand.u32 3, %v15911_v30  ;;  %12930 = vrcp.f32 %v15696_v34 }
 0xe00   :  { %v9300_v42 = vmul.f32 %v9299_v32, %v9297_v50  ;;  %v10069_v20 = vshrl.u32 %v10068_v21, 23  ;;  %v8986_v43 = vand.u32 3, %v8985_v9  ;;  %v9696_v45 = vmul.u32 %v15927_v53, %v9680_v37 }
 0xe01   :  { %vm9698_vm12 = vc.u32 %v15987_v52, %v15972_v19  ;;  %vm9219_vm13 = vcmp.lt.s32.totalorder %v15702_v25, 0  ;;  %v17140_v30 = vand.u32 2147483647, %v15702_v25  ;;  %v16962_v53 = vand.u32 2147483647, %v15931_v16 }
 0xe02   :  { %v9301_v14 = vxor.u32 2147483648, %v9300_v42  ;;  %v9700_v1 = vsel %vm9698_vm12, %v9699_v36, %v15973_v29  ;;  %v11359_v41 = vadd.s32 4294967169, %v10069_v20  ;;  %v9304_v8 = vsel %vm9219_vm13, %v9303_v12, %v15877_v48 }
 0xe03   :  { %vm16008_vm14 = vcmp.le.f32.partialorder %v17140_v30, 0.7853982  ;;  %v9701_v38 = vadd.s32 %v9700_v1, %v9696_v45  ;;  %vm9090_vm0 = vcmp.lt.s32.totalorder %v9089_v47, 2  ;;  %vm9091_vm1 = vcmp.eq.s32.totalorder %v9089_v47, 0 }
 0xe04   :  { %v9302_v59 = vsel %vm9219_vm13, %v9301_v14, %v9300_v42  ;;  %v10075_v27 = vadd.s32 1, %v11359_v41  ;;  %vm8988_vm2 = vcmp.eq.s32.totalorder %v8986_v43, 0  ;;  %vm9094_vm4 = vcmp.eq.s32.totalorder %v9089_v47, 2 }
 0xe05   :  { %v12925_v24 = vpop.eup %12924  ;;  %v9305_v29 = vsel %vm16008_vm14, %v15702_v25, %v9302_v59  ;;  %v9702_v9 = vadd.s32 536870912, %v9701_v38  ;;  %vm8991_vm5 = vcmp.eq.s32.totalorder %v8986_v43, 2  ;;  %v9306_v48 = vsel %vm16008_vm14, 0, %v9304_v8 }
 0xe06   :  { %v12927_v10 = vpop.eup %12926  ;;  %v8992_v50 = vxor.u32 2147483648, %v12925_v24  ;;  %vm10076_vm6 = vcmp.gt.s32.totalorder %v10075_v27, 0  ;;  %v10072_v21 = vand.u32 8388607, %v16962_v53  ;;  %12932 = vcosq.f32 %v9305_v29 }
 0xe07   :  { %v8989_v32 = vxor.u32 2147483648, %v12927_v10  ;;  %v16019_v37 = vshrl.u32 %v9702_v9, 30  ;;  %v10077_v12 = vsel %vm10076_vm6, %v10075_v27, 0  ;;  %vm8987_vm7 = vcmp.lt.s32.totalorder %v8986_v43, 2 }
 0xe08   :  { %v8993_v36 = vsel %vm8991_vm5, %v8992_v50, %v12927_v10  ;;  %v9096_v42 = vsel %vm9094_vm4, %v8992_v50, %v12927_v10  ;;  %v16023_v20 = vand.u32 31, %v10077_v12  ;;  %v12929_v45 = vpop.eup %12928  ;;  %vm8984_vm9 = vweird.f32 %v15675_v22 }
 0xe09   :  { %17143 = vst [vmem:[#allocation72_spill] sm:$0xff] %v16019_v37  ;;  %v8990_v14 = vsel %vm8988_vm2, %v12925_v24, %v8989_v32  ;;  %v9093_v1 = vsel %vm9091_vm1, %v12925_v24, %v8989_v32  ;;  %v9704_v41 = vshll.u32 %v16019_v37, 30  ;;  %v16028_v30 = vpop.eup %12930  ;;  %v9310_v9 = vadd.s32 3, %v9306_v48 }
 0xe0a   :  { %v8994_v44 = vsel %vm8987_vm7, %v8990_v14, %v8993_v36  ;;  %v9097_v8 = vsel %vm9090_vm0, %v9093_v1, %v9096_v42  ;;  %v16033_v59 = vsub.s32 32, %v16023_v20  ;;  %v10073_v43 = vor.u32 8388608, %v10072_v21 }
 0xe0b   :  { %v8995_v27 = vsel %vm8984_vm9, nan, %v8994_v44  ;;  %v16035_v10 = vsub.s32 %v9701_v38, %v9704_v41  ;;  %v9104_v53 = vmul.f32 %v12929_v45, %v12929_v45  ;;  %v9098_v33 = vsel %vm8984_vm9, nan, %v9097_v8 }
 0xe0c   :  { %v9099_v50 = vmul.f32 2.0, %v8995_v27  ;;  %12934 = vsinq.f32 %v9305_v29  ;;  %v16041_v22 = vmul.f32 %v16028_v30, %v16028_v30  ;;  %v10083_v47 = vshrl.u32 %v17120_v58, %v16033_v59 }
 0xe0d   :  { %v16045_v38 = vand.u32 3, %v9306_v48  ;;  %v9707_v21 = vsub.s32 0, %v16035_v10  ;;  %v16048_v14 = vand.u32 3, %v9310_v9  ;;  %v16052_v1 = vadd.s32 %v15972_v19, %v15987_v52 }
 0xe0e   :  { %v9100_v36 = vmul.f32 %v9099_v50, %v9098_v33  ;;  %v9101_v42 = vmul.f32 %v9099_v50, %v8995_v27  ;;  %v10082_v29 = vshll.u32 %v17119_v17, %v16023_v20  ;;  %v16056_v41 = vshll.u32 %v10073_v43, 8 }
 0xe0f   :  { %v16059_v27 = vshrl.u32 %v10077_v12, 5  ;;  %v16066_v9 = vshll.u32 %v17120_v58, %v16023_v20  ;;  %v16070_v19 = vshrl.u32 %v17121_v35, %v16033_v59  ;;  %v17147_v43 = vsub.f32 1.0, %v15862_v15 }
 0xe10   :  { %17144 = vst [vmem:[#allocation73_spill] sm:$0xff] %v16056_v41  ;;  %v9107_v44 = vmul.f32 %v12929_v45, %v9100_v36  ;;  %v9111_v8 = vmul.f32 %v9104_v53, %v9101_v42  ;;  %v9115_v33 = vsub.f32 %v15670_v11, %v9100_v36  ;;  %v16062_v50 = vor.u32 %v10083_v47, %v10082_v29  ;;  %v16072_v52 = vpop.eup %12932 }
 0xe11   :  { %17145 = vst [vmem:[#allocation74_spill] sm:$0xff] %v16059_v27  ;;  %v17148_v12 = vsub.f32 0.5, %v15870_v3  ;;  %v16083_v58 = vmin.u32 %v9707_v21, %v16035_v10  ;;  %vm9313_vm10 = vcmp.eq.s32.totalorder %v16048_v14, 0  ;;  %vm9416_vm12 = vcmp.eq.s32.totalorder %v16045_v38, 0 }
 0xe12   :  { %17146 = vst [vmem:[#allocation75_spill] sm:$0xff] %v16062_v50  ;;  %v9108_v11 = vsel %vm8889_vm8, %v17147_v43, %v9107_v44  ;;  %v9116_v36 = vmul.f32 %v9115_v33, %v9104_v53  ;;  %v9317_v33 = vxor.u32 2147483648, %v16072_v52  ;;  %vm9312_vm13 = vcmp.lt.s32.totalorder %v16048_v14, 2 }
 0xe13   :  { %v9112_v47 = vsel %vm8889_vm8, %v17148_v12, %v9111_v8  ;;  %v9124_v29 = vsub.f32 0.0, %v9108_v11  ;;  %v9128_v15 = vmul.f32 %v9108_v11, %v15563_v46  ;;  %v9131_v3 = vmul.f32 %v9108_v11, %v15566_v57 }
 0xe14   :  { %v16086_v42 = vmul.f32 %v15596_v0, %v9112_v47  ;;  %v9126_v48 = vmul.f32 %v9112_v47, %v15826_v31  ;;  %v9117_v32 = vmul.f32 %v12929_v45, %v9116_v36  ;;  %v9129_v44 = vmul.f32 %v9112_v47, %v15830_v7 }
 0xe15   :  { %v16093_v43 = vmul.f32 %v15599_v49, %v9112_v47  ;;  %v9125_v53 = vmul.f32 %v9124_v29, %v15566_v57  ;;  %v9135_v21 = vmul.f32 %v9124_v29, %v15560_v26  ;;  %v9136_v8 = vmul.f32 %v9112_v47, %v15834_v2 }
 0xe16   :  { %v17149_v12 = vsub.f32 0.16666667, %v15874_v55  ;;  %v16103_v36 = vadd.f32 %v9129_v44, %v9128_v15  ;;  %v16105_v24 = vadd.f32 %v9131_v3, %v9126_v48  ;;  %v9709_v16 = vclz %v16083_v58  ;;  %v12935_v37 = vpop.eup %12934 }
 0xe17   :  { %v16108_v41 = vadd.f32 %v9126_v48, %v9125_v53  ;;  %v16110_v50 = vadd.f32 %v9136_v8, %v9135_v21  ;;  %v9138_v27 = vmul.f32 %v9124_v29, %v15563_v46  ;;  %v9140_v17 = vmul.f32 %v9108_v11, %v15560_v26 }
 0xe18   :  { %v9118_v45 = vsel %vm8889_vm8, %v17149_v12, %v9117_v32  ;;  %17150 = vst [vmem:[#allocation76_spill] sm:$0xff] %v16103_v36  ;;  %17151 = vst [vmem:[#allocation77_spill] sm:$0xff] %v16105_v24  ;;  %v9142_v62 = vmul.f32 %v15602_v5, %v9112_v47  ;;  %v9146_v32 = vsub.f32 0.0, %v9112_v47  ;;  %vm9316_vm8 = vcmp.eq.s32.totalorder %v16048_v14, 2 }
 0xe19   :  { %17152 = vst [vmem:[#allocation78_spill] sm:$0xff] %v16108_v41  ;;  %17153 = vst [vmem:[#allocation79_spill] sm:$0xff] %v16110_v50  ;;  %v9144_v55 = vmul.f32 %v15596_v0, %v9118_v45  ;;  %v9148_v15 = vmul.f32 %v9118_v45, %v15826_v31  ;;  %v16120_v48 = vadd.f32 %v9138_v27, %v9129_v44  ;;  %vm9419_vm14 = vcmp.eq.s32.totalorder %v16045_v38, 2 }
 0xe1a   :  { %v16122_v58 = vadd.f32 %v9140_v17, %v9136_v8  ;;  %v9150_v29 = vmul.f32 %v9112_v47, %v15563_v46  ;;  %v9151_v11 = vmul.f32 %v9118_v45, %v15830_v7  ;;  %v9147_v3 = vmul.f32 %v9146_v32, %v15566_v57 }
 0xe1b   :  { %17154 = vst [vmem:[#allocation80_spill] sm:$0xff] %v16120_v48  ;;  %v9145_v0 = vadd.f32 1.0, %v9144_v55  ;;  %v9153_v31 = vmul.f32 %v9112_v47, %v15566_v57  ;;  %vm9309_vm0 = vweird.f32 %v15702_v25  ;;  %v9314_v53 = vxor.u32 2147483648, %v12935_v37 }
 0xe1c   :  { %17155 = vst [vmem:[#allocation81_spill] sm:$0xff] %v16122_v58  ;;  %vm9415_vm1 = vcmp.lt.s32.totalorder %v16045_v38, 2  ;;  %v9152_v17 = vadd.f32 %v9151_v11, %v9150_v29  ;;  %v9155_v27 = vmul.f32 %v15599_v49, %v9118_v45  ;;  %v9157_v44 = vmul.f32 %v9146_v32, %v15560_v26 }
 0xe1d   :  { %v9158_v7 = vmul.f32 %v9118_v45, %v15834_v2  ;;  %v9149_v21 = vadd.f32 %v9148_v15, %v9147_v3  ;;  %v9154_v8 = vadd.f32 %v9153_v31, %v9148_v15  ;;  %v9160_v12 = vmul.f32 %v9146_v32, %v15563_v46 }
 0xe1e   :  { %v9162_v55 = vmul.f32 %v9112_v47, %v15560_v26  ;;  %v9156_v58 = vadd.f32 1.0, %v9155_v27  ;;  %v9164_v48 = vmul.f32 %v15602_v5, %v9118_v45  ;;  %v9166_v50 = vmul.f32 %v9145_v0, %v15811_v13 }
 0xe1f   :  { %v9159_v57 = vadd.f32 %v9158_v7, %v9157_v44  ;;  %v9161_v24 = vadd.f32 %v9160_v12, %v9151_v11  ;;  %v9167_v49 = vmul.f32 %v9149_v21, %v15816_v51  ;;  %v9169_v36 = vmul.f32 %v9152_v17, %v15822_v39 }
 0xe20   :  { %v9163_v29 = vadd.f32 %v9162_v55, %v9158_v7  ;;  %v9165_v41 = vadd.f32 1.0, %v9164_v48  ;;  %v9171_v2 = vmul.f32 %v9154_v8, %v15811_v13  ;;  %v9172_v15 = vmul.f32 %v9156_v58, %v15816_v51 }
 0xe21   :  { %v9174_v46 = vmul.f32 %v9159_v57, %v15822_v39  ;;  %v9168_v26 = vadd.f32 %v9167_v49, %v9166_v50  ;;  %v9176_v47 = vmul.f32 %v9161_v24, %v15811_v13  ;;  %v9315_v45 = vsel %vm9313_vm10, %v16072_v52, %v9314_v53 }
 0xe22   :  { %v9177_v5 = vmul.f32 %v9163_v29, %v15816_v51  ;;  %v9173_v32 = vadd.f32 %v9172_v15, %v9171_v2  ;;  %v9179_v11 = vmul.f32 %v9165_v41, %v15822_v39  ;;  %v9318_v48 = vsel %vm9316_vm8, %v9317_v33, %v12935_v37  ;;  %v17158_v15 = vld [vmem:[#allocation53_spill] sm:$0xff] }
 0xe23   :  { %v9418_v58 = vsel %vm9416_vm12, %v16072_v52, %v9314_v53  ;;  %v16155_v0 = vadd.f32 %v9169_v36, %v9168_v26  ;;  %v9319_v13 = vsel %vm9312_vm13, %v9315_v45, %v9318_v48  ;;  %v9421_v51 = vsel %vm9419_vm14, %v9317_v33, %v12935_v37  ;;  %v17159_v26 = vld [vmem:[#allocation56_spill] sm:$0xff] }
 0xe24   :  { %v9178_v50 = vadd.f32 %v9177_v5, %v9176_v47  ;;  %v16161_v24 = vadd.f32 %v9174_v46, %v9173_v32  ;;  %v9320_v39 = vsel %vm9309_vm0, nan, %v9319_v13  ;;  %v9422_v41 = vsel %vm9415_vm1, %v9418_v58, %v9421_v51  ;;  %v17161_v32 = vld [vmem:[#allocation69_spill] sm:$0xff] }
 0xe25   :  { %v11347_v3 = vadd.s32 4294967294, %v9709_v16  ;;  %v16168_v52 = vadd.f32 1.0, %v16086_v42  ;;  %v16171_v36 = vadd.f32 1.0, %v16093_v43  ;;  %v9424_v31 = vmul.f32 2.0, %v9320_v39 }
 0xe26   :  { %v16173_v14 = vadd.f32 %v9179_v11, %v9178_v50  ;;  %v16175_v53 = vadd.f32 1.0, %v9142_v62  ;;  %v9423_v37 = vsel %vm9309_vm0, nan, %v9422_v41  ;;  %v16181_v38 = vor.u32 %v16070_v19, %v16066_v9 }
 0xe27   :  { %vm11348_vm2 = vcmp.lt.s32.totalorder %v11347_v3, 0  ;;  %v9425_v16 = vmul.f32 %v9424_v31, %v9423_v37  ;;  %v9426_v33 = vmul.f32 %v9424_v31, %v9320_v39  ;;  %v16187_v43 = vshll.u32 %v17121_v35, %v16023_v20  ;;  %v17163_v31 = vld [vmem:[#allocation59_spill] sm:$0xff] }
 0xe28   :  { %v16183_v42 = vsel %vm11348_vm2, 0, %v11347_v3  ;;  %v16193_v25 = vshrl.u32 %v17122_v63, %v16033_v59  ;;  %v16197_v9 = vshll.u32 %v17122_v63, %v16023_v20  ;;  %v16211_v8 = vshrl.u32 %v17123_v40, %v16033_v59 }
 0xe29   :  { %v9713_v17 = vsub.s32 32, %v16183_v42  ;;  %v9717_v62 = vsub.s32 4294967266, %v16183_v42  ;;  %v9432_v19 = vmul.f32 %v16028_v30, %v9425_v16  ;;  %v9436_v27 = vmul.f32 %v16041_v22, %v9426_v33 }
 0xe2a   :  { %v9440_v44 = vsub.f32 %v15696_v34, %v9425_v16  ;;  %v9714_v35 = vshll.u32 %v16035_v10, %v16183_v42  ;;  %v16215_v63 = vshll.u32 %v17123_v40, %v16023_v20  ;;  %v17156_v12 = vsub.f32 1.0, %v15977_v18 }
 0xe2b   :  { %v16205_v7 = vshrl.u32 %v16052_v1, %v9713_v17  ;;  %v16207_v21 = vadd.s32 127, %v9717_v62  ;;  %v17157_v55 = vsub.f32 0.5, %v15983_v54  ;;  %v16228_v29 = vshrl.u32 %v17139_v6, %v16033_v59  ;;  %v17160_v6 = vld [vmem:[#allocation52_spill] sm:$0xff] }
 0xe2c   :  { %v9433_v34 = vsel %vm9214_vm11, %v17156_v12, %v9432_v19  ;;  %v9441_v57 = vmul.f32 %v9440_v44, %v16041_v22  ;;  %v17162_v48 = vsub.f32 0.16666667, %v15995_v23 }
 0xe2d   :  { %v9437_v1 = vsel %vm9214_vm11, %v17157_v55, %v9436_v27  ;;  %v9449_v40 = vsub.f32 0.0, %v9433_v34  ;;  %v9453_v18 = vmul.f32 %v9433_v34, %v15572_v28  ;;  %v9456_v46 = vmul.f32 %v9433_v34, %v17158_v15 }
 0xe2e   :  { %v9447_v49 = vmul.f32 %v15616_v4, %v9437_v1  ;;  %v9451_v20 = vmul.f32 %v9437_v1, %v15866_v61  ;;  %v9442_v2 = vmul.f32 %v16028_v30, %v9441_v57  ;;  %v9454_v54 = vmul.f32 %v9437_v1, %v15885_v56 }
 0xe2f   :  { %v9458_v47 = vmul.f32 %v17159_v26, %v9437_v1  ;;  %v9450_v5 = vmul.f32 %v9449_v40, %v17158_v15  ;;  %v9460_v45 = vmul.f32 %v9449_v40, %v17160_v6  ;;  %v9461_v11 = vmul.f32 %v9437_v1, %v17161_v32 }
 0xe30   :  { %v9448_v22 = vadd.f32 1.0, %v9447_v49  ;;  %v9443_v58 = vsel %vm9214_vm11, %v17162_v48, %v9442_v2  ;;  %v9455_v50 = vadd.f32 %v9454_v54, %v9453_v18  ;;  %v9457_v30 = vadd.f32 %v9456_v46, %v9451_v20  ;;  %v17164_v46 = vld [vmem:[#allocation65_spill] sm:$0xff] }
 0xe31   :  { %v9459_v13 = vadd.f32 1.0, %v9458_v47  ;;  %v9452_v51 = vadd.f32 %v9451_v20, %v9450_v5  ;;  %v9462_v39 = vadd.f32 %v9461_v11, %v9460_v45  ;;  %v9463_v41 = vmul.f32 %v9449_v40, %v15572_v28  ;;  %v17165_v45 = vld [vmem:[#allocation66_spill] sm:$0xff] }
 0xe32   :  { %v9465_v3 = vmul.f32 %v9433_v34, %v17160_v6  ;;  %v9467_v37 = vmul.f32 %v17163_v31, %v9437_v1  ;;  %v9469_v16 = vmul.f32 %v15616_v4, %v9443_v58  ;;  %v9471_v33 = vsub.f32 0.0, %v9437_v1 }
 0xe33   :  { %v9473_v17 = vmul.f32 %v9443_v58, %v15866_v61  ;;  %v9464_v23 = vadd.f32 %v9463_v41, %v9454_v54  ;;  %v9475_v60 = vmul.f32 %v9437_v1, %v15572_v28  ;;  %v9476_v19 = vmul.f32 %v9443_v58, %v15885_v56 }
 0xe34   :  { %v9466_v62 = vadd.f32 %v9465_v3, %v9461_v11  ;;  %v9468_v27 = vadd.f32 1.0, %v9467_v37  ;;  %v9470_v44 = vadd.f32 1.0, %v9469_v16  ;;  %v9472_v12 = vmul.f32 %v9471_v33, %v17158_v15  ;;  %v17166_v11 = vld [vmem:[#allocation67_spill] sm:$0xff] }
 0xe35   :  { %v9478_v55 = vmul.f32 %v9437_v1, %v17158_v15  ;;  %v9477_v34 = vadd.f32 %v9476_v19, %v9475_v60  ;;  %v9480_v57 = vmul.f32 %v17159_v26, %v9443_v58  ;;  %v9482_v4 = vmul.f32 %v9471_v33, %v17160_v6 }
 0xe36   :  { %v9483_v49 = vmul.f32 %v9443_v58, %v17161_v32  ;;  %v9474_v61 = vadd.f32 %v9473_v17, %v9472_v12  ;;  %v9485_v20 = vmul.f32 %v9471_v33, %v15572_v28  ;;  %v9487_v18 = vmul.f32 %v9437_v1, %v17160_v6 }
 0xe37   :  { %v9479_v40 = vadd.f32 %v9478_v55, %v9473_v17  ;;  %v9481_v56 = vadd.f32 1.0, %v9480_v57  ;;  %v9489_v54 = vmul.f32 %v17163_v31, %v9443_v58  ;;  %v9491_v47 = vmul.f32 %v9470_v44, %v17164_v46 }
 0xe38   :  { %v9484_v2 = vadd.f32 %v9483_v49, %v9482_v4  ;;  %v9486_v15 = vadd.f32 %v9485_v20, %v9476_v19  ;;  %v9488_v5 = vadd.f32 %v9487_v18, %v9483_v49  ;;  %v9492_v26 = vmul.f32 %v9474_v61, %v17165_v45  ;;  %v17168_v4 = vld [vmem:[#allocation76_spill] sm:$0xff] }
 0xe39   :  { %v9494_v48 = vmul.f32 %v9477_v34, %v17166_v11  ;;  %v9490_v41 = vadd.f32 1.0, %v9489_v54  ;;  %v9496_v32 = vmul.f32 %v9479_v40, %v17164_v46  ;;  %v9497_v3 = vmul.f32 %v9481_v56, %v17165_v45  ;;  %v17167_v34 = vld [vmem:[#allocation78_spill] sm:$0xff] }
 0xe3a   :  { %v9499_v28 = vmul.f32 %v9484_v2, %v17166_v11  ;;  %v9493_v1 = vadd.f32 %v9492_v26, %v9491_v47  ;;  %v9501_v6 = vmul.f32 %v9486_v15, %v17164_v46  ;;  %v9502_v58 = vmul.f32 %v9488_v5, %v17165_v45  ;;  %v17169_v46 = vld [vmem:[#allocation77_spill] sm:$0xff]  ;;  %v17170_v26 = vld [vmem:[#allocation79_spill] sm:$0xff] }
 0xe3b   :  { %v9507_v31 = vrot.slane %v9448_v22, 1  ;;  %v9498_v37 = vadd.f32 %v9497_v3, %v9496_v32  ;;  %v9504_v16 = vmul.f32 %v9490_v41, %v17166_v11  ;;  %v9511_v33 = vrot.slane %v9457_v30, 1 }
 0xe3c   :  { %v9516_v17 = vrot.slane %v9464_v23, 1  ;;  %v9495_v60 = vadd.f32 %v9494_v48, %v9493_v1  ;;  %v9503_v19 = vadd.f32 %v9502_v58, %v9501_v6  ;;  %v9521_v12 = vrot.slane %v9452_v51, 1 }
 0xe3d   :  { %v9509_v44 = vmul.f32 %v9507_v31, %v16168_v52  ;;  %v9500_v55 = vadd.f32 %v9499_v28, %v9498_v37  ;;  %v9513_v57 = vmul.f32 %v9511_v33, %v17167_v34  ;;  %v9525_v61 = vrot.slane %v9459_v13, 1 }
 0xe3e   :  { %v9518_v49 = vmul.f32 %v9516_v17, %v17168_v4  ;;  %v9505_v40 = vadd.f32 %v9504_v16, %v9503_v19  ;;  %v9523_v20 = vmul.f32 %v9521_v12, %v16168_v52  ;;  %v9530_v22 = vrot.slane %v9466_v62, 1  ;;  %v17171_v16 = vld [vmem:[#allocation80_spill] sm:$0xff] }
 0xe3f   :  { %v9535_v18 = vrot.slane %v9455_v50, 1  ;;  %v9514_v56 = vadd.f32 %v9513_v57, %v9509_v44  ;;  %v9527_v30 = vmul.f32 %v9525_v61, %v17167_v34  ;;  %v9539_v23 = vrot.slane %v9462_v39, 1  ;;  %v17172_v44 = vld [vmem:[#allocation81_spill] sm:$0xff] }
 0xe40   :  { %v9544_v2 = vrot.slane %v9468_v27, 1  ;;  %v9532_v54 = vmul.f32 %v9530_v22, %v17168_v4  ;;  %v9548_v47 = vmul.f32 %v9507_v31, %v17169_v46  ;;  %v9549_v15 = vmul.f32 %v9511_v33, %v16171_v36 }
 0xe41   :  { %v9537_v51 = vmul.f32 %v9535_v18, %v16168_v52  ;;  %v16277_v5 = vadd.f32 %v9518_v49, %v9514_v56  ;;  %v9528_v13 = vadd.f32 %v9527_v30, %v9523_v20  ;;  %v9541_v45 = vmul.f32 %v9539_v23, %v17167_v34 }
 0xe42   :  { %v9546_v50 = vmul.f32 %v9544_v2, %v17168_v4  ;;  %v9550_v62 = vadd.f32 %v9549_v15, %v9548_v47  ;;  %v9551_v11 = vmul.f32 %v9516_v17, %v17170_v26  ;;  %v9553_v39 = vmul.f32 %v9521_v12, %v17169_v46 }
 0xe43   :  { %v9554_v27 = vmul.f32 %v9525_v61, %v16171_v36  ;;  %v16284_v48 = vadd.f32 %v9532_v54, %v9528_v13  ;;  %v9542_v41 = vadd.f32 %v9541_v45, %v9537_v51  ;;  %v9556_v32 = vmul.f32 %v9530_v22, %v17170_v26 }
 0xe44   :  { %v9558_v3 = vmul.f32 %v9535_v18, %v17169_v46  ;;  %v16288_v28 = vadd.f32 %v9551_v11, %v9550_v62  ;;  %v9559_v6 = vmul.f32 %v9539_v23, %v16171_v36  ;;  %v9561_v58 = vmul.f32 %v9544_v2, %v17170_v26 }
 0xe45   :  { %v9555_v1 = vadd.f32 %v9554_v27, %v9553_v39  ;;  %v16292_v37 = vadd.f32 %v9546_v50, %v9542_v41  ;;  %v9563_v19 = vmul.f32 %v9507_v31, %v17171_v16  ;;  %v9564_v57 = vmul.f32 %v9511_v33, %v17172_v44 }
 0xe46   :  { %v9566_v49 = vmul.f32 %v9516_v17, %v16175_v53  ;;  %v9560_v56 = vadd.f32 %v9559_v6, %v9558_v3  ;;  %v9568_v30 = vmul.f32 %v9521_v12, %v17171_v16  ;;  %v9569_v54 = vmul.f32 %v9525_v61, %v17172_v44 }
 0xe47   :  { %v16297_v20 = vadd.f32 %v9556_v32, %v9555_v1  ;;  %v9565_v51 = vadd.f32 %v9564_v57, %v9563_v19  ;;  %v9571_v47 = vmul.f32 %v9530_v22, %v16175_v53  ;;  %v9573_v15 = vmul.f32 %v9535_v18, %v17171_v16 }
 0xe48   :  { %v9574_v13 = vmul.f32 %v9539_v23, %v17172_v44  ;;  %v16304_v45 = vadd.f32 %v9561_v58, %v9560_v56  ;;  %v9570_v31 = vadd.f32 %v9569_v54, %v9568_v30  ;;  %v9576_v33 = vmul.f32 %v9544_v2, %v16175_v53  ;;  %v17176_v54 = vld [vmem:[#allocation73_spill] sm:$0xff] }
 0xe49   :  { %v9579_v17 = vrot.slane %v9495_v60, 1  ;;  %v16307_v50 = vadd.f32 %v9566_v49, %v9565_v51  ;;  %v9583_v11 = vrot.slane %v9500_v55, 1  ;;  %v9588_v12 = vrot.slane %v9505_v40, 1 }
 0xe4a   :  { %v9575_v62 = vadd.f32 %v9574_v13, %v9573_v15  ;;  %v16309_v39 = vadd.f32 %v9571_v47, %v9570_v31  ;;  %v9719_v3 = vshll.u32 %v16207_v21, 23  ;;  %v10093_v1 = vor.u32 %v16211_v8, %v16197_v9  ;;  %v17177_v15 = vld [vmem:[#allocation64_spill] sm:$0xff] }
 0xe4b   :  { %v9581_v61 = vmul.f32 %v9579_v17, %v16168_v52  ;;  %v9593_v22 = vmul.f32 %v9579_v17, %v17169_v46  ;;  %v9599_v18 = vmul.f32 %v9579_v17, %v17171_v16  ;;  %v9585_v27 = vmul.f32 %v9583_v11, %v17167_v34 }
 0xe4c   :  { %v16314_v23 = vadd.f32 %v9576_v33, %v9575_v62  ;;  %v9590_v2 = vmul.f32 %v9588_v12, %v17168_v4  ;;  %v9594_v60 = vmul.f32 %v9583_v11, %v16171_v36  ;;  %v9596_v41 = vmul.f32 %v9588_v12, %v17170_v26 }
 0xe4d   :  { %v9600_v55 = vmul.f32 %v9583_v11, %v17172_v44  ;;  %v9602_v40 = vmul.f32 %v9588_v12, %v16175_v53  ;;  %v9716_v52 = vor.u32 %v16205_v7, %v9714_v35  ;;  %v9586_v46 = vadd.f32 %v9585_v27, %v9581_v61  ;;  %v17174_v7 = vld [vmem:[#allocation74_spill] sm:$0xff] }
 0xe4e   :  { %v9595_v32 = vadd.f32 %v9594_v60, %v9593_v22  ;;  %v10090_v34 = vor.u32 %v16193_v25, %v16187_v43  ;;  %v17173_v36 = vmov 683565275   ;;  %v10096_v53 = vor.u32 %v16228_v29, %v16215_v63  ;;  %v17175_v43 = vld [vmem:[#allocation75_spill] sm:$0xff] }
 0xe4f   :  { %v9601_v4 = vadd.f32 %v9600_v55, %v9599_v18  ;;  %v10081_v26 = vshrl.u32 %v17173_v36, %v16033_v59  ;;  %v9591_v10 = vadd.f32 %v9590_v2, %v9586_v46  ;;  %v9720_v35 = vor.u32 4788187, %v9719_v3 }
 0xe50   :  { %v9597_v42 = vadd.f32 %v9596_v41, %v9595_v32  ;;  %vm10097_vm11 = vcmp.lt.s32.totalorder %v17174_v7, 1  ;;  %v9723_v21 = vcvt.s32.f32 %v9716_v52  ;;  %vm10100_vm4 = vcmp.lt.s32.totalorder %v17174_v7, 4 }
 0xe51   :  { %v9603_v6 = vadd.f32 %v9602_v40, %v9601_v4  ;;  %v10105_v59 = vsel %vm10097_vm11, %v17175_v43, %v16181_v38  ;;  %v16342_v25 = vadd.f32 %v9591_v10, %v16155_v0  ;;  %v9721_v8 = vand.u32 2147483647, %v9720_v35  ;;  %v17181_v40 = vld [vmem:[#allocation63_spill] sm:$0xff] }
 0xe52   :  { %v16345_v9 = vadd.f32 %v9597_v42, %v16161_v24  ;;  %v10102_v63 = vsel %vm10100_vm4, %v10090_v34, 2102212464  ;;  %vm10099_vm5 = vcmp.lt.s32.totalorder %v17174_v7, 3  ;;  %v10106_v58 = vsel %vm10100_vm4, %v10093_v1, 920167782 }
 0xe53   :  { %v16348_v29 = vadd.f32 %v9603_v6, %v16173_v14  ;;  %v10109_v16 = vsel %vm10097_vm11, %v16181_v38, %v10090_v34  ;;  %v9724_v19 = vmul.f32 %v9723_v21, %v9721_v8  ;;  %vm10098_vm6 = vcmp.lt.s32.totalorder %v17174_v7, 2 }
 0xe54   :  { %v10107_v0 = vsel %vm10099_vm5, %v10090_v34, %v10106_v58  ;;  %v10110_v44 = vsel %vm10100_vm4, %v10096_v53, 1326507024  ;;  %v10101_v24 = vsel %vm10097_vm11, %v10081_v26, %v17175_v43  ;;  %v10103_v57 = vsel %vm10099_vm5, %v16181_v38, %v10102_v63  ;;  %v17179_v38 = vld [vmem:[#allocation72_spill] sm:$0xff] }
 0xe55   :  { %v10108_v14 = vsel %vm10098_vm6, %v10105_v59, %v10107_v0  ;;  %v10111_v49 = vsel %vm10099_vm5, %v10093_v1, %v10110_v44  ;;  %v9725_v56 = vxor.u32 2147483648, %v9724_v19  ;;  %vm9643_vm7 = vcmp.lt.s32.totalorder %v17177_v15, 0 }
 0xe56   :  { %v10112_v30 = vsel %vm10098_vm6, %v10109_v16, %v10111_v49  ;;  %v16360_v51 = vmul.u32.u64.low %v17176_v54, %v10108_v14  ;;  %v16361_v47 = vmul.u32.u64.high %v17176_v54, %v10108_v14, %v16360_v51  ;;  %v17178_v33 = vand.u32 2147483647, %v17177_v15 }
 0xe57   :  { %v16366_v13 = vmul.u32.u64.low %v17176_v54, %v10112_v30  ;;  %v16367_v31 = vmul.u32.u64.high %v17176_v54, %v10112_v30, %v16366_v13  ;;  %v9726_v17 = vsel %vm9643_vm7, %v9725_v56, %v9724_v19  ;;  %v17180_v62 = vsub.s32 4, %v17179_v38  ;;  %v17182_v19 = vld [vmem:[#allocation58_spill] sm:$0xff] }
 0xe58   :  { %vm9642_vm9 = vcmp.le.f32.partialorder %v17178_v33, 0.7853982  ;;  %v10104_v12 = vsel %vm10098_vm6, %v10101_v24, %v10103_v57  ;;  %v10123_v22 = vadd.s32 1, %v16361_v47  ;;  %v9617_v4 = vstv %s16379_s21  ;;  %v17183_v24 = vld [vmem:[#allocation51_spill] sm:$0xff] }
 0xe59   :  { %v9728_v11 = vsel %vm9643_vm7, %v17180_v62, %v17179_v38  ;;  %v9729_v61 = vsel %vm9642_vm9, %v17177_v15, %v9726_v17  ;;  %v10120_v27 = vmul.u32 %v17176_v54, %v10104_v12  ;;  %vm10122_vm10 = vc.u32 %v16367_v31, %v16360_v51  ;;  %v17184_v54 = vld [vmem:[#allocation54_spill] sm:$0xff]  ;;  %v17186_v12 = vld [vmem:[#allocation57_spill] sm:$0xff] }
 0xe5a   :  { %12936 = vcosq.f32 %v9729_v61  ;;  %v9730_v18 = vsel %vm9642_vm9, 0, %v9728_v11  ;;  %v10124_v2 = vsel %vm10122_vm10, %v10123_v22, %v16361_v47  ;;  %v9619_v26 = vstv %s16382_s9  ;;  %v17185_v47 = vld [vmem:[#allocation55_spill] sm:$0xff] }
 0xe5b   :  { %12938 = vsinq.f32 %v9729_v61  ;;  %v10125_v60 = vadd.s32 %v10124_v2, %v10120_v27  ;;  %v9734_v41 = vadd.s32 3, %v9730_v18  ;;  %v9838_v32 = vand.u32 3, %v9730_v18 }
 0xe5c   :  { %12940 = vrcp.f32 %v17181_v40  ;;  %v9621_v1 = vstv %s16384_s24  ;;  %vm9733_vm2 = vweird.f32 %v17177_v15  ;;  %v9854_v0 = vmul.f32 0.16666667, %v17182_v19 }
 0xe5d   :  { %v10126_v55 = vadd.s32 536870912, %v10125_v60  ;;  %v9735_v46 = vand.u32 3, %v9734_v41  ;;  %vm9840_vm12 = vcmp.eq.s32.totalorder %v9838_v32, 0  ;;  %vm9843_vm13 = vcmp.eq.s32.totalorder %v9838_v32, 2 }
 0xe5e   :  { %vm9839_vm1 = vcmp.lt.s32.totalorder %v9838_v32, 2  ;;  %v9858_v44 = vmul.f32 0.041666668, %v17182_v19  ;;  %v16401_v57 = vmul.f32 %v9617_v4, %v17183_v24  ;;  %v16404_v14 = vmul.f32 %v9619_v26, %v17183_v24 }
 0xe5f   :  { %v16387_v52 = vshrl.u32 %v10126_v55, 30  ;;  %vm9740_vm8 = vcmp.eq.s32.totalorder %v9735_v46, 2  ;;  %vm9737_vm14 = vcmp.eq.s32.totalorder %v9735_v46, 0  ;;  %vm9736_vm0 = vcmp.lt.s32.totalorder %v9735_v46, 2 }
 0xe60   :  { %v16407_v30 = vmul.f32 %v9621_v1, %v17183_v24  ;;  %v9626_v15 = vmul.f32 %v17185_v47, %v17184_v54  ;;  %v9862_v33 = vmul.f32 0.008333334, %v17182_v19  ;;  %v9627_v61 = vmul.f32 %v17186_v12, %v17184_v54 }
 0xe61   :  { %v10128_v3 = vshll.u32 %v16387_v52, 30  ;;  %v9628_v22 = vmul.f32 %v17186_v12, %v17185_v47  ;;  %v9855_v18 = vsub.f32 1.0, %v9854_v0  ;;  %v9859_v27 = vsub.f32 0.5, %v9858_v44 }
 0xe62   :  { %v9863_v55 = vsub.f32 0.16666667, %v9862_v33  ;;  %v16419_v46 = vadd.s32 %v16360_v51, %v16367_v31  ;;  %v13405_v1 = vmov 1.0  }
 0xe63   :  { %v16393_v10 = vsub.s32 %v10125_v60, %v10128_v3  ;;  %11392 = vst [vmem:[%s16852_s27 + $0xf] sm:$0x1] %v13405_v1 }
 0xe64   :  { %v12937_v34 = vpop.eup %12936 }
 0xe65   :  { %v12939_v36 = vpop.eup %12938  ;;  %v9741_v53 = vxor.u32 2147483648, %v12937_v34  ;;  %v10131_v6 = vsub.s32 0, %v16393_v10 }
 0xe66   :  { %v9738_v42 = vxor.u32 2147483648, %v12939_v36  ;;  %v12941_v58 = vpop.eup %12940 }
 0xe67   :  { %v9742_v35 = vsel %vm9740_vm8, %v9741_v53, %v12939_v36  ;;  %v9845_v7 = vsel %vm9843_vm13, %v9741_v53, %v12939_v36  ;;  %v11360_v63 = vmin.u32 %v10131_v6, %v16393_v10  ;;  %v9853_v62 = vmul.f32 %v12941_v58, %v12941_v58 }
 0xe68   :  { %v9739_v21 = vsel %vm9737_vm14, %v12937_v34, %v9738_v42  ;;  %v9842_v43 = vsel %vm9840_vm12, %v12937_v34, %v9738_v42 }
 0xe69   :  { %v9743_v59 = vsel %vm9736_vm0, %v9739_v21, %v9742_v35  ;;  %v9846_v8 = vsel %vm9839_vm1, %v9842_v43, %v9845_v7  ;;  %v10133_v56 = vclz %v11360_v63  ;;  %v17189_v21 = vld [vmem:[#allocation48_spill] sm:$0xff] }
 0xe6a   :  { %v9744_v16 = vsel %vm9733_vm2, nan, %v9743_v59  ;;  %v9847_v13 = vsel %vm9733_vm2, nan, %v9846_v8 }
 0xe6b   :  { %v9848_v49 = vmul.f32 2.0, %v9744_v16  ;;  %v11361_v11 = vadd.s32 4294967294, %v10133_v56 }
 0xe6d   :  { %v9849_v17 = vmul.f32 %v9848_v49, %v9847_v13  ;;  %v9850_v38 = vmul.f32 %v9848_v49, %v9744_v16  ;;  %vm11362_vm11 = vcmp.lt.s32.totalorder %v11361_v11, 0 }
 0xe6e   :  { %v16421_v32 = vsel %vm11362_vm11, 0, %v11361_v11 }
 0xe6f   :  { %v9856_v2 = vmul.f32 %v12941_v58, %v9849_v17  ;;  %v9860_v60 = vmul.f32 %v9853_v62, %v9850_v38  ;;  %v9864_v41 = vsub.f32 %v17181_v40, %v9849_v17  ;;  %v10137_v26 = vsub.s32 32, %v16421_v32  ;;  %v17188_v40 = vld [vmem:[#allocation49_spill] sm:$0xff]  ;;  %v17190_v17 = vld [vmem:[#allocation50_spill] sm:$0xff] }
 0xe71   :  { %v9857_v34 = vsel %vm9638_vm15, %v9855_v18, %v9856_v2  ;;  %v9861_v4 = vsel %vm9638_vm15, %v9859_v27, %v9860_v60  ;;  %v9865_v36 = vmul.f32 %v9864_v41, %v9853_v62 }
 0xe72   :  { %v9871_v53 = vmul.f32 %v17188_v40, %v9861_v4  ;;  %v9873_v51 = vsub.f32 0.0, %v9857_v34  ;;  %v9875_v31 = vmul.f32 %v9861_v4, %v9626_v15  ;;  %v9877_v42 = vmul.f32 %v9857_v34, %v17185_v47 }
 0xe73   :  { %v9866_v35 = vmul.f32 %v12941_v58, %v9865_v36  ;;  %v9878_v7 = vmul.f32 %v9861_v4, %v9627_v61  ;;  %v9880_v6 = vmul.f32 %v9857_v34, %v17186_v12  ;;  %v9882_v43 = vmul.f32 %v17189_v21, %v9861_v4 }
 0xe74   :  { %v9872_v59 = vadd.f32 1.0, %v9871_v53  ;;  %v9874_v8 = vmul.f32 %v9873_v51, %v17186_v12  ;;  %v9884_v63 = vmul.f32 %v9873_v51, %v17184_v54  ;;  %v9885_v16 = vmul.f32 %v9861_v4, %v9628_v22 }
 0xe75   :  { %v9867_v19 = vsel %vm9638_vm15, %v9863_v55, %v9866_v35  ;;  %v9879_v0 = vadd.f32 %v9878_v7, %v9877_v42  ;;  %v9881_v44 = vadd.f32 %v9880_v6, %v9875_v31  ;;  %v9883_v49 = vadd.f32 1.0, %v9882_v43 }
 0xe76   :  { %v9876_v56 = vadd.f32 %v9875_v31, %v9874_v8  ;;  %v9886_v13 = vadd.f32 %v9885_v16, %v9884_v63  ;;  %v9887_v58 = vmul.f32 %v9873_v51, %v17185_v47  ;;  %v9889_v33 = vmul.f32 %v9857_v34, %v17184_v54 }
 0xe77   :  { %v9891_v38 = vmul.f32 %v17190_v17, %v9861_v4  ;;  %v9893_v62 = vmul.f32 %v17188_v40, %v9867_v19  ;;  %v9895_v11 = vsub.f32 0.0, %v9861_v4  ;;  %v9897_v18 = vmul.f32 %v9867_v19, %v9626_v15 }
 0xe78   :  { %v9888_v27 = vadd.f32 %v9887_v58, %v9878_v7  ;;  %v9890_v2 = vadd.f32 %v9889_v33, %v9885_v16  ;;  %v9899_v60 = vmul.f32 %v9861_v4, %v17185_v47  ;;  %v9900_v41 = vmul.f32 %v9867_v19, %v9627_v61 }
 0xe79   :  { %v9892_v55 = vadd.f32 1.0, %v9891_v38  ;;  %v9894_v3 = vadd.f32 1.0, %v9893_v62  ;;  %v9896_v36 = vmul.f32 %v9895_v11, %v17186_v12  ;;  %v9902_v1 = vmul.f32 %v9861_v4, %v17186_v12 }
 0xe7a   :  { %v9901_v53 = vadd.f32 %v9900_v41, %v9899_v60  ;;  %v9904_v34 = vmul.f32 %v17189_v21, %v9867_v19  ;;  %v9906_v51 = vmul.f32 %v9895_v11, %v17184_v54  ;;  %v9907_v31 = vmul.f32 %v9867_v19, %v9628_v22 }
 0xe7b   :  { %v9898_v40 = vadd.f32 %v9897_v18, %v9896_v36  ;;  %v9903_v42 = vadd.f32 %v9902_v1, %v9897_v18  ;;  %v9909_v15 = vmul.f32 %v9895_v11, %v17185_v47  ;;  %v9911_v35 = vmul.f32 %v9861_v4, %v17184_v54 }
 0xe7c   :  { %v9905_v7 = vadd.f32 1.0, %v9904_v34  ;;  %v9908_v61 = vadd.f32 %v9907_v31, %v9906_v51  ;;  %v9913_v6 = vmul.f32 %v17190_v17, %v9867_v19  ;;  %v9915_v43 = vmul.f32 %v9894_v3, %v16401_v57 }
 0xe7d   :  { %v9910_v8 = vadd.f32 %v9909_v15, %v9900_v41  ;;  %v9912_v12 = vadd.f32 %v9911_v35, %v9907_v31  ;;  %v9916_v63 = vmul.f32 %v9898_v40, %v16404_v14  ;;  %v9918_v21 = vmul.f32 %v9901_v53, %v16407_v30 }
 0xe7e   :  { %v9914_v16 = vadd.f32 1.0, %v9913_v6  ;;  %v9920_v22 = vmul.f32 %v9903_v42, %v16401_v57  ;;  %v9921_v58 = vmul.f32 %v9905_v7, %v16404_v14  ;;  %v9923_v47 = vmul.f32 %v9908_v61, %v16407_v30 }
 0xe7f   :  { %v9917_v54 = vadd.f32 %v9916_v63, %v9915_v43  ;;  %v9925_v4 = vmul.f32 %v9910_v8, %v16401_v57  ;;  %v9926_v19 = vmul.f32 %v9912_v12, %v16404_v14  ;;  %v9931_v33 = vrot.slane %v9872_v59, 2 }
 0xe80   :  { %v9922_v17 = vadd.f32 %v9921_v58, %v9920_v22  ;;  %v9928_v38 = vmul.f32 %v9914_v16, %v16407_v30  ;;  %v9935_v62 = vrot.slane %v9881_v44, 2  ;;  %v9940_v11 = vrot.slane %v9888_v27, 2 }
 0xe81   :  { %v9919_v18 = vadd.f32 %v9918_v21, %v9917_v54  ;;  %v9927_v60 = vadd.f32 %v9926_v19, %v9925_v4  ;;  %v9933_v41 = vmul.f32 %v9931_v33, %v16277_v5  ;;  %v9945_v3 = vrot.slane %v9876_v56, 2 }
 0xe82   :  { %v9924_v36 = vadd.f32 %v9923_v47, %v9922_v17  ;;  %v9937_v1 = vmul.f32 %v9935_v62, %v16284_v48  ;;  %v9942_v53 = vmul.f32 %v9940_v11, %v16292_v37  ;;  %v9949_v34 = vrot.slane %v9883_v49, 2 }
 0xe83   :  { %v9929_v57 = vadd.f32 %v9928_v38, %v9927_v60  ;;  %v9947_v14 = vmul.f32 %v9945_v3, %v16277_v5  ;;  %v9954_v59 = vrot.slane %v9890_v2, 2  ;;  %v9959_v51 = vrot.slane %v9879_v0, 2 }
 0xe84   :  { %v9938_v31 = vadd.f32 %v9937_v1, %v9933_v41  ;;  %v9951_v30 = vmul.f32 %v9949_v34, %v16284_v48  ;;  %v9963_v44 = vrot.slane %v9886_v13, 2  ;;  %v9968_v27 = vrot.slane %v9892_v55, 2 }
 0xe85   :  { %v9956_v40 = vmul.f32 %v9954_v59, %v16292_v37  ;;  %v9961_v56 = vmul.f32 %v9959_v51, %v16277_v5  ;;  %v9972_v42 = vmul.f32 %v9931_v33, %v16288_v28  ;;  %v9973_v15 = vmul.f32 %v9935_v62, %v16297_v20 }
 0xe86   :  { %v16469_v35 = vadd.f32 %v9942_v53, %v9938_v31  ;;  %v9952_v49 = vadd.f32 %v9951_v30, %v9947_v14  ;;  %v9965_v7 = vmul.f32 %v9963_v44, %v16284_v48  ;;  %v9970_v0 = vmul.f32 %v9968_v27, %v16292_v37 }
 0xe87   :  { %v9974_v2 = vadd.f32 %v9973_v15, %v9972_v42  ;;  %v9975_v61 = vmul.f32 %v9940_v11, %v16304_v45  ;;  %v9977_v13 = vmul.f32 %v9945_v3, %v16288_v28  ;;  %v9978_v55 = vmul.f32 %v9949_v34, %v16297_v20 }
 0xe88   :  { %v16476_v6 = vadd.f32 %v9956_v40, %v9952_v49  ;;  %v9966_v43 = vadd.f32 %v9965_v7, %v9961_v56  ;;  %v9980_v8 = vmul.f32 %v9954_v59, %v16304_v45  ;;  %v9982_v12 = vmul.f32 %v9959_v51, %v16288_v28 }
 0xe89   :  { %v16480_v63 = vadd.f32 %v9975_v61, %v9974_v2  ;;  %v9979_v21 = vadd.f32 %v9978_v55, %v9977_v13  ;;  %v9983_v16 = vmul.f32 %v9963_v44, %v16297_v20  ;;  %v9985_v22 = vmul.f32 %v9968_v27, %v16304_v45 }
 0xe8a   :  { %v16484_v58 = vadd.f32 %v9970_v0, %v9966_v43  ;;  %v9987_v47 = vmul.f32 %v9931_v33, %v16307_v50  ;;  %v9988_v54 = vmul.f32 %v9935_v62, %v16309_v39  ;;  %v9990_v4 = vmul.f32 %v9940_v11, %v16314_v23 }
 0xe8b   :  { %v16489_v19 = vadd.f32 %v9980_v8, %v9979_v21  ;;  %v9984_v17 = vadd.f32 %v9983_v16, %v9982_v12  ;;  %v9992_v38 = vmul.f32 %v9945_v3, %v16307_v50  ;;  %v9993_v60 = vmul.f32 %v9949_v34, %v16309_v39 }
 0xe8c   :  { %v9989_v41 = vadd.f32 %v9988_v54, %v9987_v47  ;;  %v9995_v1 = vmul.f32 %v9954_v59, %v16314_v23  ;;  %v9997_v53 = vmul.f32 %v9959_v51, %v16307_v50  ;;  %v9998_v14 = vmul.f32 %v9963_v44, %v16309_v39  ;;  %v17193_v47 = vld [vmem:[#allocation70_spill] sm:$0xff] }
 0xe8d   :  { %v16496_v31 = vadd.f32 %v9985_v22, %v9984_v17  ;;  %v9994_v33 = vadd.f32 %v9993_v60, %v9992_v38  ;;  %v10000_v62 = vmul.f32 %v9968_v27, %v16314_v23  ;;  %v10003_v11 = vrot.slane %v9919_v18, 2  ;;  %v17194_v60 = vld [vmem:[#allocation62_spill] sm:$0xff] }
 0xe8e   :  { %v16499_v30 = vadd.f32 %v9990_v4, %v9989_v41  ;;  %v9999_v40 = vadd.f32 %v9998_v14, %v9997_v53  ;;  %v10007_v56 = vrot.slane %v9924_v36, 2  ;;  %v10012_v3 = vrot.slane %v9929_v57, 2 }
 0xe8f   :  { %v16501_v42 = vadd.f32 %v9995_v1, %v9994_v33  ;;  %v10005_v34 = vmul.f32 %v10003_v11, %v16277_v5  ;;  %v10017_v59 = vmul.f32 %v10003_v11, %v16288_v28  ;;  %v10023_v51 = vmul.f32 %v10003_v11, %v16307_v50 }
 0xe90   :  { %v16506_v44 = vadd.f32 %v10000_v62, %v9999_v40  ;;  %v10009_v15 = vmul.f32 %v10007_v56, %v16284_v48  ;;  %v10014_v27 = vmul.f32 %v10012_v3, %v16292_v37  ;;  %v10018_v18 = vmul.f32 %v10007_v56, %v16297_v20 }
 0xe91   :  { %v10020_v49 = vmul.f32 %v10012_v3, %v16304_v45  ;;  %v10024_v36 = vmul.f32 %v10007_v56, %v16309_v39  ;;  %v10026_v57 = vmul.f32 %v10012_v3, %v16314_v23  ;;  %v10139_v28 = vshrl.u32 %v16419_v46, %v10137_v26 }
 0xe92   :  { %v10010_v7 = vadd.f32 %v10009_v15, %v10005_v34  ;;  %v10019_v5 = vadd.f32 %v10018_v18, %v10017_v59  ;;  %v10141_v50 = vsub.s32 4294967266, %v16421_v32  ;;  %v10138_v37 = vshll.u32 %v16393_v10, %v16421_v32  ;;  %v17191_v32 = vld [vmem:[#allocation71_spill] sm:$0xff] }
 0xe93   :  { %v10025_v0 = vadd.f32 %v10024_v36, %v10023_v51  ;;  %v10151_v12 = vsub.s32 4, %v16387_v52  ;;  %vm10067_vm15 = vcmp.lt.s32.totalorder %v17191_v32, 0  ;;  %v10041_v54 = vstv %s11356_s14  ;;  %v17195_v36 = vld [vmem:[#allocation44_spill] sm:$0xff] }
 0xe94   :  { %v10015_v48 = vadd.f32 %v10014_v27, %v10010_v7  ;;  %v10021_v2 = vadd.f32 %v10020_v49, %v10019_v5  ;;  %v10142_v20 = vadd.s32 127, %v10141_v50  ;;  %v10140_v61 = vor.u32 %v10139_v28, %v10138_v37  ;;  %v17197_v5 = vld [vmem:[#allocation43_spill] sm:$0xff]  ;;  %v17198_v37 = vld [vmem:[#allocation45_spill] sm:$0xff] }
 0xe95   :  { %v10027_v45 = vadd.f32 %v10026_v57, %v10025_v0  ;;  %v10043_v38 = vstv %s11357_s22  ;;  %v16539_v41 = vmul.f32 0.16666667, %v17194_v60  ;;  %v16547_v53 = vmul.f32 0.008333334, %v17194_v60  ;;  %v17196_v57 = vld [vmem:[#allocation46_spill] sm:$0xff] }
 0xe96   :  { %v16521_v39 = vadd.f32 %v10015_v48, %v16342_v25  ;;  %v16524_v23 = vadd.f32 %v10021_v2, %v16345_v9  ;;  %v10143_v13 = vshll.u32 %v10142_v20, 23  ;;  %v10147_v43 = vcvt.s32.f32 %v10140_v61 }
 0xe97   :  { %v16527_v46 = vadd.f32 %v10027_v45, %v16348_v29  ;;  %v17192_v25 = vand.u32 2147483647, %v17191_v32  ;;  %v10152_v9 = vsel %vm10067_vm15, %v10151_v12, %v16387_v52  ;;  %v16542_v52 = vmul.f32 0.041666668, %v17194_v60  ;;  %v17200_v12 = vld [vmem:[#allocation61_spill] sm:$0xff] }
 0xe98   :  { %v10144_v26 = vor.u32 4788187, %v10143_v13  ;;  %v16554_v33 = vmul.f32 %v10041_v54, %v17183_v24  ;;  %v10045_v62 = vstv %s16535_s26  ;;  %v16562_v40 = vmul.f32 %v10043_v38, %v17183_v24 }
 0xe99   :  { %vm10066_vm4 = vcmp.le.f32.partialorder %v17192_v25, 0.7853982  ;;  %v16575_v27 = vmul.f32 %v10045_v62, %v17183_v24  ;;  %vm10157_vm12 = vweird.f32 %v17191_v32  ;;  %v10050_v7 = vmul.f32 %v17196_v57, %v17195_v36 }
 0xe9a   :  { %v10145_v55 = vand.u32 2147483647, %v10144_v26  ;;  %v10154_v29 = vsel %vm10066_vm4, 0, %v10152_v9  ;;  %v10051_v28 = vmul.f32 %v17197_v5, %v17195_v36  ;;  %v16586_v50 = vmul.f32 %v17197_v5, %v17196_v57  ;;  %v17199_v26 = vld [vmem:[#allocation47_spill] sm:$0xff] }
 0xe9b   :  { %v10158_v22 = vadd.s32 3, %v10154_v29  ;;  %v10262_v17 = vand.u32 3, %v10154_v29  ;;  %v10279_v2 = vsub.f32 1.0, %v16539_v41  ;;  %v10292_v20 = vsub.f32 %v17198_v37, %v17194_v60 }
 0xe9c   :  { %v10148_v8 = vmul.f32 %v10147_v43, %v10145_v55  ;;  %v10283_v61 = vsub.f32 0.5, %v16542_v52  ;;  %v10287_v13 = vsub.f32 0.16666667, %v16547_v53  ;;  %v10293_v55 = vsub.f32 %v17199_v26, %v17194_v60 }
 0xe9d   :  { %v10159_v4 = vand.u32 3, %v10158_v22  ;;  %vm10267_vm6 = vcmp.eq.s32.totalorder %v10262_v17, 2  ;;  %vm10264_vm9 = vcmp.eq.s32.totalorder %v10262_v17, 0  ;;  %vm10263_vm8 = vcmp.lt.s32.totalorder %v10262_v17, 2 }
 0xe9e   :  { %v10149_v10 = vxor.u32 2147483648, %v10148_v8  ;;  %v16601_v25 = vstv %s16557_s17  ;;  %v16607_v9 = vstv %s16559_s5  ;;  %v16617_v17 = vstv %s16566_s16 }
 0xe9f   :  { %vm10164_vm5 = vcmp.eq.s32.totalorder %v10159_v4, 2  ;;  %vm10161_vm7 = vcmp.eq.s32.totalorder %v10159_v4, 0  ;;  %vm10160_vm10 = vcmp.lt.s32.totalorder %v10159_v4, 2  ;;  %v16614_v4 = vstv %s16564_s20 }
 0xea0   :  { %v10150_v21 = vsel %vm10067_vm15, %v10149_v10, %v10148_v8  ;;  %v10294_v10 = vsub.f32 %v17200_v12, %v17194_v60  ;;  %v16620_v38 = vstv %s16568_s18  ;;  %v16623_v60 = vstv %s16570_s7 }
 0xea1   :  { %v10153_v16 = vsel %vm10066_vm4, %v17191_v32, %v10150_v21  ;;  %v16598_v32 = vstv %s16544_s6  ;;  %v16604_v21 = vstv %s16549_s23  ;;  %v16626_v41 = vstv %s16572_s1 }
 0xea2   :  { %12942 = vcosq.f32 %v10153_v16  ;;  %17201 = vst [vmem:[#allocation53_spill] sm:$0xff] %v16626_v41  ;;  %v16633_v62 = vstv %s16578_s30 }
 0xea3   :  { %12944 = vsinq.f32 %v10153_v16  ;;  %v16610_v16 = vstv %s16551_s29  ;;  %17203 = vst [vmem:[#allocation56_spill] sm:$0xff] %v16633_v62 }
 0xea4   :  { %12946 = vrcp.f32 %v17193_v47 }
 0xeac   :  { %v12943_v1 = vpop.eup %12942 }
 0xead   :  { %v12945_v14 = vpop.eup %12944  ;;  %v10165_v11 = vxor.u32 2147483648, %v12943_v1 }
 0xeae   :  { %v10162_v56 = vxor.u32 2147483648, %v12945_v14  ;;  %v12947_v59 = vpop.eup %12946 }
 0xeaf   :  { %v10166_v3 = vsel %vm10164_vm5, %v10165_v11, %v12945_v14  ;;  %v10269_v34 = vsel %vm10267_vm6, %v10165_v11, %v12945_v14  ;;  %v10277_v48 = vmul.f32 %v12947_v59, %v12947_v59 }
 0xeb0   :  { %v10163_v51 = vsel %vm10161_vm7, %v12943_v1, %v10162_v56  ;;  %v10266_v15 = vsel %vm10264_vm9, %v12943_v1, %v10162_v56 }
 0xeb1   :  { %v10167_v18 = vsel %vm10160_vm10, %v10163_v51, %v10166_v3  ;;  %v10270_v49 = vsel %vm10263_vm8, %v10266_v15, %v10269_v34 }
 0xeb2   :  { %v10168_v24 = vsel %vm10157_vm12, nan, %v10167_v18  ;;  %v10271_v45 = vsel %vm10157_vm12, nan, %v10270_v49 }
 0xeb3   :  { %v10272_v0 = vmul.f32 2.0, %v10168_v24 }
 0xeb5   :  { %v10273_v43 = vmul.f32 %v10272_v0, %v10271_v45  ;;  %v10274_v8 = vmul.f32 %v10272_v0, %v10168_v24 }
 0xeb7   :  { %v10280_v29 = vmul.f32 %v12947_v59, %v10273_v43  ;;  %v10284_v22 = vmul.f32 %v10277_v48, %v10274_v8  ;;  %v10288_v54 = vsub.f32 %v17193_v47, %v10273_v43 }
 0xeb9   :  { %v10281_v1 = vsel %vm10062_vm3, %v10279_v2, %v10280_v29  ;;  %v10285_v53 = vsel %vm10062_vm3, %v10283_v61, %v10284_v22  ;;  %v10289_v14 = vmul.f32 %v10288_v54, %v10277_v48 }
 0xeba   :  { %v10295_v47 = vmul.f32 %v10292_v20, %v10285_v53  ;;  %v10297_v11 = vsub.f32 0.0, %v10281_v1  ;;  %v10299_v56 = vmul.f32 %v10285_v53, %v10050_v7  ;;  %v10301_v3 = vmul.f32 %v10281_v1, %v17196_v57 }
 0xebb   :  { %v10290_v34 = vmul.f32 %v12947_v59, %v10289_v14  ;;  %v10302_v51 = vmul.f32 %v10285_v53, %v10051_v28  ;;  %v10304_v15 = vmul.f32 %v10281_v1, %v17197_v5  ;;  %v10306_v18 = vmul.f32 %v10293_v55, %v10285_v53 }
 0xebc   :  { %v10296_v49 = vadd.f32 1.0, %v10295_v47  ;;  %v10298_v24 = vmul.f32 %v10297_v11, %v17197_v5  ;;  %v10308_v0 = vmul.f32 %v10297_v11, %v17195_v36  ;;  %v10309_v2 = vmul.f32 %v10285_v53, %v16586_v50 }
 0xebd   :  { %v10291_v48 = vsel %vm10062_vm3, %v10287_v13, %v10290_v34  ;;  %v10303_v37 = vadd.f32 %v10302_v51, %v10301_v3  ;;  %v10305_v45 = vadd.f32 %v10304_v15, %v10299_v56  ;;  %v10307_v61 = vadd.f32 1.0, %v10306_v18 }
 0xebe   :  { %v10300_v26 = vadd.f32 %v10299_v56, %v10298_v24  ;;  %v10310_v43 = vadd.f32 %v10309_v2, %v10308_v0  ;;  %v10311_v59 = vmul.f32 %v10297_v11, %v17196_v57  ;;  %v10313_v8 = vmul.f32 %v10281_v1, %v17195_v36 }
 0xebf   :  { %v10315_v12 = vmul.f32 %v10294_v10, %v10285_v53  ;;  %v10317_v29 = vmul.f32 %v10292_v20, %v10291_v48  ;;  %v10319_v22 = vsub.f32 0.0, %v10285_v53  ;;  %v10321_v54 = vmul.f32 %v10291_v48, %v10050_v7 }
 0xec0   :  { %v10312_v14 = vadd.f32 %v10311_v59, %v10302_v51  ;;  %v10314_v47 = vadd.f32 %v10313_v8, %v10309_v2  ;;  %v10323_v62 = vmul.f32 %v10285_v53, %v17196_v57  ;;  %v10324_v41 = vmul.f32 %v10291_v48, %v10051_v28 }
 0xec1   :  { %v10316_v52 = vadd.f32 1.0, %v10315_v12  ;;  %v10318_v13 = vadd.f32 1.0, %v10317_v29  ;;  %v10320_v3 = vmul.f32 %v10319_v22, %v17197_v5  ;;  %v10326_v56 = vmul.f32 %v10285_v53, %v17197_v5 }
 0xec2   :  { %v10325_v34 = vadd.f32 %v10324_v41, %v10323_v62  ;;  %v10328_v15 = vmul.f32 %v10293_v55, %v10291_v48  ;;  %v10330_v11 = vmul.f32 %v10319_v22, %v17195_v36  ;;  %v10331_v1 = vmul.f32 %v10291_v48, %v16586_v50 }
 0xec3   :  { %v10322_v20 = vadd.f32 %v10321_v54, %v10320_v3  ;;  %v10327_v18 = vadd.f32 %v10326_v56, %v10321_v54  ;;  %v10333_v7 = vmul.f32 %v10319_v22, %v17196_v57  ;;  %v10335_v51 = vmul.f32 %v10285_v53, %v17195_v36 }
 0xec4   :  { %v10329_v24 = vadd.f32 1.0, %v10328_v15  ;;  %v10332_v28 = vadd.f32 %v10331_v1, %v10330_v11  ;;  %v10337_v0 = vmul.f32 %v10294_v10, %v10291_v48  ;;  %v10339_v2 = vmul.f32 %v10318_v13, %v16554_v33 }
 0xec5   :  { %v10334_v59 = vadd.f32 %v10333_v7, %v10324_v41  ;;  %v10336_v8 = vadd.f32 %v10335_v51, %v10331_v1  ;;  %v10340_v5 = vmul.f32 %v10322_v20, %v16562_v40  ;;  %v10342_v55 = vmul.f32 %v10325_v34, %v16575_v27 }
 0xec6   :  { %v10338_v62 = vadd.f32 1.0, %v10337_v0  ;;  %v10344_v50 = vmul.f32 %v10327_v18, %v16554_v33  ;;  %v10345_v12 = vmul.f32 %v10329_v24, %v16562_v40  ;;  %v10347_v57 = vmul.f32 %v10332_v28, %v16575_v27 }
 0xec7   :  { %v10341_v29 = vadd.f32 %v10340_v5, %v10339_v2  ;;  %v10349_v36 = vmul.f32 %v10334_v59, %v16554_v33  ;;  %v10350_v10 = vmul.f32 %v10336_v8, %v16562_v40  ;;  %v10355_v53 = vrot.slane %v10296_v49, 3 }
 0xec8   :  { %v10346_v48 = vadd.f32 %v10345_v12, %v10344_v50  ;;  %v10352_v41 = vmul.f32 %v10338_v62, %v16575_v27  ;;  %v10359_v22 = vrot.slane %v10305_v45, 3  ;;  %v10364_v54 = vrot.slane %v10312_v14, 3 }
 0xec9   :  { %v10343_v13 = vadd.f32 %v10342_v55, %v10341_v29  ;;  %v10351_v3 = vadd.f32 %v10350_v10, %v10349_v36  ;;  %v10357_v56 = vmul.f32 %v10355_v53, %v16469_v35  ;;  %v10369_v34 = vrot.slane %v10300_v26, 3 }
 0xeca   :  { %v10348_v15 = vadd.f32 %v10347_v57, %v10346_v48  ;;  %v10361_v11 = vmul.f32 %v10359_v22, %v16476_v6  ;;  %v10366_v1 = vmul.f32 %v10364_v54, %v16484_v58  ;;  %v10373_v20 = vrot.slane %v10307_v61, 3 }
 0xecb   :  { %v10353_v33 = vadd.f32 %v10352_v41, %v10351_v3  ;;  %v10371_v40 = vmul.f32 %v10369_v34, %v16469_v35  ;;  %v10378_v49 = vrot.slane %v10314_v47, 3  ;;  %v10383_v18 = vrot.slane %v10303_v37, 3 }
 0xecc   :  { %v10362_v7 = vadd.f32 %v10361_v11, %v10357_v56  ;;  %v10375_v27 = vmul.f32 %v10373_v20, %v16476_v6  ;;  %v10387_v45 = vrot.slane %v10310_v43, 3  ;;  %v10392_v14 = vrot.slane %v10316_v52, 3 }
 0xecd   :  { %v10380_v51 = vmul.f32 %v10378_v49, %v16484_v58  ;;  %v10385_v26 = vmul.f32 %v10383_v18, %v16469_v35  ;;  %v10396_v24 = vmul.f32 %v10355_v53, %v16480_v63  ;;  %v10397_v28 = vmul.f32 %v10359_v22, %v16489_v19 }
 0xece   :  { %v16669_v0 = vadd.f32 %v10366_v1, %v10362_v7  ;;  %v10376_v61 = vadd.f32 %v10375_v27, %v10371_v40  ;;  %v10389_v2 = vmul.f32 %v10387_v45, %v16476_v6  ;;  %v10394_v37 = vmul.f32 %v10392_v14, %v16484_v58 }
 0xecf   :  { %v10398_v47 = vadd.f32 %v10397_v28, %v10396_v24  ;;  %v10399_v59 = vmul.f32 %v10364_v54, %v16496_v31  ;;  %v10401_v43 = vmul.f32 %v10369_v34, %v16480_v63  ;;  %v10402_v52 = vmul.f32 %v10373_v20, %v16489_v19 }
 0xed0   :  { %v16676_v8 = vadd.f32 %v10380_v51, %v10376_v61  ;;  %v10390_v5 = vadd.f32 %v10389_v2, %v10385_v26  ;;  %v10404_v55 = vmul.f32 %v10378_v49, %v16496_v31  ;;  %v10406_v62 = vmul.f32 %v10383_v18, %v16480_v63 }
 0xed1   :  { %v16680_v50 = vadd.f32 %v10399_v59, %v10398_v47  ;;  %v10403_v12 = vadd.f32 %v10402_v52, %v10401_v43  ;;  %v10407_v57 = vmul.f32 %v10387_v45, %v16489_v19  ;;  %v10409_v29 = vmul.f32 %v10392_v14, %v16496_v31 }
 0xed2   :  { %v16684_v36 = vadd.f32 %v10394_v37, %v10390_v5  ;;  %v10411_v10 = vmul.f32 %v10355_v53, %v16499_v30  ;;  %v10412_v48 = vmul.f32 %v10359_v22, %v16501_v42  ;;  %v10414_v41 = vmul.f32 %v10364_v54, %v16506_v44 }
 0xed3   :  { %v16689_v3 = vadd.f32 %v10404_v55, %v10403_v12  ;;  %v10408_v56 = vadd.f32 %v10407_v57, %v10406_v62  ;;  %v10416_v11 = vmul.f32 %v10369_v34, %v16499_v30  ;;  %v10417_v1 = vmul.f32 %v10373_v20, %v16501_v42 }
 0xed4   :  { %v10413_v40 = vadd.f32 %v10412_v48, %v10411_v10  ;;  %v10419_v7 = vmul.f32 %v10378_v49, %v16506_v44  ;;  %v10421_v27 = vmul.f32 %v10383_v18, %v16499_v30  ;;  %v10422_v51 = vmul.f32 %v10387_v45, %v16501_v42 }
 0xed5   :  { %v16696_v26 = vadd.f32 %v10409_v29, %v10408_v56  ;;  %v10418_v53 = vadd.f32 %v10417_v1, %v10416_v11  ;;  %v10424_v22 = vmul.f32 %v10392_v14, %v16506_v44  ;;  %v10427_v54 = vrot.slane %v10343_v13, 3 }
 0xed6   :  { %v16699_v24 = vadd.f32 %v10414_v41, %v10413_v40  ;;  %v10423_v28 = vadd.f32 %v10422_v51, %v10421_v27  ;;  %v10431_v61 = vrot.slane %v10348_v15, 3  ;;  %v10436_v34 = vrot.slane %v10353_v33, 3 }
 0xed7   :  { %v16701_v2 = vadd.f32 %v10419_v7, %v10418_v53  ;;  %v10429_v20 = vmul.f32 %v10427_v54, %v16469_v35  ;;  %v10441_v49 = vmul.f32 %v10427_v54, %v16480_v63  ;;  %v10447_v18 = vmul.f32 %v10427_v54, %v16499_v30 }
 0xed8   :  { %v16706_v45 = vadd.f32 %v10424_v22, %v10423_v28  ;;  %v10433_v37 = vmul.f32 %v10431_v61, %v16476_v6  ;;  %v10438_v14 = vmul.f32 %v10436_v34, %v16484_v58  ;;  %v10442_v13 = vmul.f32 %v10431_v61, %v16489_v19 }
 0xed9   :  { %v10444_v15 = vmul.f32 %v10436_v34, %v16496_v31  ;;  %v10448_v33 = vmul.f32 %v10431_v61, %v16501_v42  ;;  %v10450_v35 = vmul.f32 %v10436_v34, %v16506_v44  ;;  %v10466_v63 = vmul.f32 %v16598_v32, %v16669_v0 }
 0xeda   :  { %v10434_v30 = vadd.f32 %v10433_v37, %v10429_v20  ;;  %v10443_v47 = vadd.f32 %v10442_v13, %v10441_v49  ;;  %v10468_v6 = vmul.f32 %v16601_v25, %v16676_v8  ;;  %v10471_v58 = vmul.f32 %v16617_v17, %v16684_v36 }
 0xedb   :  { %v10449_v19 = vadd.f32 %v10448_v33, %v10447_v18  ;;  %v10474_v59 = vmul.f32 %v16604_v21, %v16669_v0  ;;  %v10476_v31 = vmul.f32 %v16607_v9, %v16676_v8  ;;  %v10479_v42 = vmul.f32 %v16620_v38, %v16684_v36 }
 0xedc   :  { %v10439_v44 = vadd.f32 %v10438_v14, %v10434_v30  ;;  %v10445_v43 = vadd.f32 %v10444_v15, %v10443_v47  ;;  %v10469_v52 = vadd.f32 %v10468_v6, %v10466_v63  ;;  %v10482_v5 = vmul.f32 %v16610_v16, %v16669_v0 }
 0xedd   :  { %v10451_v55 = vadd.f32 %v10450_v35, %v10449_v19  ;;  %v10477_v62 = vadd.f32 %v10476_v31, %v10474_v59  ;;  %v10484_v12 = vmul.f32 %v16614_v4, %v16676_v8  ;;  %v10487_v57 = vmul.f32 %v16623_v60, %v16684_v36 }
 0xede   :  { %v10440_v29 = vadd.f32 %v10439_v44, %v16521_v39  ;;  %v10446_v10 = vadd.f32 %v10445_v43, %v16524_v23  ;;  %v10472_v48 = vadd.f32 %v10471_v58, %v10469_v52  ;;  %v10489_v41 = vmul.f32 %v16598_v32, %v16680_v50 }
 0xedf   :  { %v10452_v56 = vadd.f32 %v10451_v55, %v16527_v46  ;;  %v10480_v11 = vadd.f32 %v10479_v42, %v10477_v62  ;;  %v10485_v1 = vadd.f32 %v10484_v12, %v10482_v5  ;;  %v10490_v40 = vmul.f32 %v16601_v25, %v16689_v3 }
 0xee0   :  { %v10492_v7 = vmul.f32 %v16617_v17, %v16696_v26  ;;  %v10494_v27 = vmul.f32 %v16604_v21, %v16680_v50  ;;  %v10495_v39 = vmul.f32 %v16607_v9, %v16689_v3  ;;  %v10524_v23 = vstv %s16711_s11  ;;  %10540 = vst [vmem:[%s16852_s27] sm:$0x1] %v10472_v48 }
 0xee1   :  { %v10488_v46 = vadd.f32 %v10487_v57, %v10485_v1  ;;  %v10491_v51 = vadd.f32 %v10490_v40, %v10489_v41  ;;  %v10499_v53 = vmul.f32 %v16610_v16, %v16680_v50  ;;  %v10500_v22 = vmul.f32 %v16614_v4, %v16689_v3  ;;  %11378 = vst [vmem:[%s16852_s27 + $0x1] sm:$0x1] %v10480_v11 }
 0xee2   :  { %v10496_v54 = vadd.f32 %v10495_v39, %v10494_v27  ;;  %v10497_v28 = vmul.f32 %v16620_v38, %v16696_v26  ;;  %v10504_v61 = vmul.f32 %v16598_v32, %v16699_v24  ;;  %v10505_v34 = vmul.f32 %v16601_v25, %v16701_v2 }
 0xee3   :  { %v10493_v20 = vadd.f32 %v10492_v7, %v10491_v51  ;;  %v10501_v49 = vadd.f32 %v10500_v22, %v10499_v53  ;;  %v10502_v18 = vmul.f32 %v16623_v60, %v16696_v26  ;;  %v10509_v37 = vmul.f32 %v16604_v21, %v16699_v24  ;;  %11379 = vst [vmem:[%s16852_s27 + $0x2] sm:$0x1] %v10488_v46 }
 0xee4   :  { %v10498_v14 = vadd.f32 %v10497_v28, %v10496_v54  ;;  %v10506_v13 = vadd.f32 %v10505_v34, %v10504_v61  ;;  %v10507_v32 = vmul.f32 %v16617_v17, %v16706_v45  ;;  %v10510_v25 = vmul.f32 %v16607_v9, %v16701_v2  ;;  %v17204_v17 = vld [vmem:[#allocation53_spill] sm:$0xff]  ;;  %v17205_v9 = vld [vmem:[#allocation56_spill] sm:$0xff] }
 0xee5   :  { %v10503_v15 = vadd.f32 %v10502_v18, %v10501_v49  ;;  %v10512_v33 = vmul.f32 %v16620_v38, %v16706_v45  ;;  %v10514_v35 = vmul.f32 %v16610_v16, %v16699_v24  ;;  %v10515_v21 = vmul.f32 %v16614_v4, %v16701_v2  ;;  %11381 = vst [vmem:[%s16852_s27 + $0x4] sm:$0x1] %v10493_v20 }
 0xee6   :  { %v10508_v63 = vadd.f32 %v10507_v32, %v10506_v13  ;;  %v10511_v30 = vadd.f32 %v10510_v25, %v10509_v37  ;;  %v10520_v47 = vmul.f32 %v17204_v17, %v16669_v0  ;;  %v10522_v6 = vmul.f32 %v17205_v9, %v16676_v8  ;;  %11382 = vst [vmem:[%s16852_s27 + $0x5] sm:$0x1] %v10498_v14 }
 0xee7   :  { %v10516_v16 = vadd.f32 %v10515_v21, %v10514_v35  ;;  %v10517_v4 = vmul.f32 %v16623_v60, %v16706_v45  ;;  %v10528_v38 = vmul.f32 %v17204_v17, %v16680_v50  ;;  %v10529_v58 = vmul.f32 %v17205_v9, %v16689_v3  ;;  %11383 = vst [vmem:[%s16852_s27 + $0x6] sm:$0x1] %v10503_v15 }
 0xee8   :  { %v10513_v0 = vadd.f32 %v10512_v33, %v10511_v30  ;;  %v10523_v8 = vadd.f32 %v10522_v6, %v10520_v47  ;;  %v10525_v19 = vmul.f32 %v10524_v23, %v16684_v36  ;;  %v10534_v59 = vmul.f32 %v17204_v17, %v16699_v24  ;;  %11385 = vst [vmem:[%s16852_s27 + $0x8] sm:$0x1] %v10508_v63 }
 0xee9   :  { %v10518_v60 = vadd.f32 %v10517_v4, %v10516_v16  ;;  %v10530_v50 = vadd.f32 %v10529_v58, %v10528_v38  ;;  %v10531_v31 = vmul.f32 %v10524_v23, %v16696_v26  ;;  %v10535_v3 = vmul.f32 %v17205_v9, %v16701_v2 }
 0xeea   :  { %v10526_v42 = vadd.f32 %v10525_v19, %v10523_v8  ;;  %11386 = vst [vmem:[%s16852_s27 + $0x9] sm:$0x1] %v10513_v0  ;;  %v10537_v24 = vmul.f32 %v10524_v23, %v16706_v45 }
 0xeeb   :  { %v10532_v36 = vadd.f32 %v10531_v31, %v10530_v50  ;;  %v10536_v44 = vadd.f32 %v10535_v3, %v10534_v59  ;;  %11387 = vst [vmem:[%s16852_s27 + $0xa] sm:$0x1] %v10518_v60 }
 0xeec   :  { %v10527_v43 = vadd.f32 %v10526_v42, %v10440_v29 }
 0xeed   :  { %v10533_v52 = vadd.f32 %v10532_v36, %v10446_v10  ;;  %v10538_v5 = vadd.f32 %v10537_v24, %v10536_v44 }
 0xeee   :  { %11380 = vst [vmem:[%s16852_s27 + $0x3] sm:$0x1] %v10527_v43 }
 0xeef   :  { %v10539_v26 = vadd.f32 %v10538_v5, %v10452_v56  ;;  %11384 = vst [vmem:[%s16852_s27 + $0x7] sm:$0x1] %v10533_v52 }
 0xef1   :  { %11388 = vst [vmem:[%s16852_s27 + $0xb] sm:$0x1] %v10539_v26 }
 0xef2   :  { %10575 = vsyncpa [#allocation3], 1 }
 0xef3   :  { %10576 = vsyncpa [#allocation6], 1 }
 0xef4   :  { %10577 = vsyncpa [#allocation9], 1 }
 0xef5   :  { %10578 = vsyncpa [#allocation12], 1 }
 0xef6   :  { %10579 = vsyncpa [#allocation15], 1 }
 0xef7   :  { %10580 = vsyncpa [#allocation18], 1 }
 0xef8   :  { %10581 = vsyncpa [#allocation21], 1 }
 0xef9   :  { %10582 = vsyncpa [#allocation24], 1 }
 0xefa   :  { %10583 = vsyncpa [#allocation27], 1 }
 0xefb   :  { %10584 = vsyncpa [#allocation4], 1 }
 0xefc   :  { %10585 = vsyncpa [#allocation31], 1 }

</bundles_post_ra>
